<compile_context>
chip_gen: v7x
topology: tpu7x:2x2x1
jax: 0.10.0
libtpu: 0.0.40
codegen_flags: <defaults>
</compile_context>

<pallas_src>
import functools
import math

import jax
import jax.numpy as jnp
from jax import lax
from jax.experimental import pallas as pl
from jax.experimental.pallas import tpu as pltpu

# ----------------------------------------------------------------------------
# Model hyper-parameters (small, consistent with the module's forward).
# ----------------------------------------------------------------------------
BATCH = 2
N_C = 8            # subcarriers
M_COM = 16         # antennas
N_RF_COM = 4       # RF chains
K = 4              # must equal N_RF_COM for F_RF @ F_BB to be well defined
Q_BSC, Q_EHC = 2, 2
Q = Q_BSC + Q_EHC
B_FB = 16          # feedback bits per K-slot
FEEDBACK_BITS = 2
D_MODEL = 64       # BB backbone width
D_SMALL = D_MODEL // K   # Theta backbone width (16)
NHEAD = 8
NUM_LAYERS = 6
LN_EPS = 1e-5
NEG_BIG = -1e30


# ----------------------------------------------------------------------------
# Fused transformer-encoder-stack Pallas kernel
# ----------------------------------------------------------------------------
def _gelu_tanh(x):
    c = math.sqrt(2.0 / math.pi)
    return 0.5 * x * (1.0 + jnp.tanh(c * (x + 0.044715 * x * x * x)))


def _layer_norm(x, g, b, eps):
    mean = jnp.mean(x, axis=-1, keepdims=True)
    xc = x - mean
    var = jnp.mean(xc * xc, axis=-1, keepdims=True)
    return xc * lax.rsqrt(var + eps) * g + b


def _encoder_stack_kernel(z_ref, bias_ref,
                          wq_ref, bq_ref, wk_ref, bk_ref, wv_ref, bv_ref,
                          wo_ref, bo_ref, g1_ref, b1_ref,
                          wf1_ref, bf1_ref, wf2_ref, bf2_ref,
                          g2_ref, b2_ref,
                          o_ref, *, nhead, eps):
    """One grid step == one post-norm encoder layer.

    The (N*S, E) activation is resident in the output VMEM block across the
    whole layer grid (constant out index_map), so intermediates never touch
    HBM.  Per-layer weights arrive via per-layer BlockSpec index maps.
    """
    # Load the initial activation (embeddings + positional encoding) once.
    @pl.when(pl.program_id(0) == 0)
    def _():
        o_ref[...] = z_ref[...]

    ns, e = o_ref.shape
    dh = e // nhead
    scale = 1.0 / math.sqrt(dh)

    x = o_ref[...]                       # (NS, E)  f32, VMEM-resident
    attn_bias = bias_ref[...]            # (NS, NS) block-diag batch mask

    # ---------------- multi-head self-attention (all 2-D matmuls) ----------
    q = (jnp.dot(x, wq_ref[0], preferred_element_type=jnp.float32)
         + bq_ref[0]) * scale            # fold 1/sqrt(dh) into q
    k = jnp.dot(x, wk_ref[0], preferred_element_type=jnp.float32) + bk_ref[0]
    v = jnp.dot(x, wv_ref[0], preferred_element_type=jnp.float32) + bv_ref[0]

    col = lax.broadcasted_iota(jnp.int32, (1, e), 1)
    attn_ctx = jnp.zeros((ns, e), jnp.float32)
    for h in range(nhead):               # static unroll; heads picked by masks
        hmask = jnp.logical_and(col >= h * dh,
                                col < (h + 1) * dh).astype(jnp.float32)
        qh = q * hmask                   # zero non-head columns -> per-head
        vh = v * hmask                   # scores from a full-E contraction
        s = jnp.einsum("se,te->st", qh, k,
                       preferred_element_type=jnp.float32)       # (NS, NS)
        s = s + attn_bias                # block cross-sample attention
        s = s - jnp.max(s, axis=-1, keepdims=True)
        p = jnp.exp(s)
        p = p / jnp.sum(p, axis=-1, keepdims=True)
        attn_ctx = attn_ctx + jnp.dot(p, vh,
                                      preferred_element_type=jnp.float32)

    attn = jnp.dot(attn_ctx, wo_ref[0],
                   preferred_element_type=jnp.float32) + bo_ref[0]

    # ---------------- add & LN1, FFN (GELU), add & LN2 ---------------------
    x = _layer_norm(x + attn, g1_ref[0], b1_ref[0], eps)

    hdn = jnp.dot(x, wf1_ref[0], preferred_element_type=jnp.float32) + bf1_ref[0]
    hdn = _gelu_tanh(hdn)
    hdn = jnp.dot(hdn, wf2_ref[0], preferred_element_type=jnp.float32) + bf2_ref[0]

    x = _layer_norm(x + hdn, g2_ref[0], b2_ref[0], eps)
    o_ref[...] = x


_LAYER_PARAM_ORDER = ("wq", "bq", "wk", "bk", "wv", "bv", "wo", "bo",
                      "g1", "b1", "wf1", "bf1", "wf2", "bf2", "g2", "b2")


def encoder_backbone(z, layers, pe):
    """Transpose(0,1)+PE -> 6x TransformerEncoderLayer -> Transpose(0,1).

    z: (N, S, E) f32; layers: dict of (L, ...) stacked params; pe: (S, 1, E).
    Implemented as a single pallas_call with grid=(L,) over layers.
    """
    n, s, e = z.shape
    ns = n * s
    x0 = (z + jnp.swapaxes(pe[:s], 0, 1)).reshape(ns, e).astype(jnp.float32)

    # Additive attention bias: 0 within a batch sample, -1e30 across samples
    # (keeps the flattened (N*S) rows batch-independent, as in PyTorch).
    sid = jnp.repeat(jnp.arange(n, dtype=jnp.int32), s)
    attn_bias = jnp.where(sid[:, None] == sid[None, :], 0.0,
                          NEG_BIG).astype(jnp.float32)

    num_layers = layers["wq"].shape[0]
    const2 = lambda l: (0, 0)
    per_layer = lambda l: (l, 0, 0)

    in_specs = [pl.BlockSpec((ns, e), const2),
                pl.BlockSpec((ns, ns), const2)]
    operands = [x0, attn_bias]
    for name in _LAYER_PARAM_ORDER:
        arr = layers[name]
        in_specs.append(pl.BlockSpec((1,) + arr.shape[1:], per_layer))
        operands.append(arr)

    out = pl.pallas_call(
        functools.partial(_encoder_stack_kernel, nhead=NHEAD, eps=LN_EPS),
        out_shape=jax.ShapeDtypeStruct((ns, e), jnp.float32),
        grid=(num_layers,),
        in_specs=in_specs,
        out_specs=pl.BlockSpec((ns, e), const2),
        compiler_params=pltpu.CompilerParams(
            dimension_semantics=("arbitrary",)),
    )(*operands)
    return out.reshape(n, s, e)


# ----------------------------------------------------------------------------
# Plain-JAX glue (tiny embeddings / heads / complex math; XLA fuses these)
# ----------------------------------------------------------------------------
def dense(x, p):
    return x @ p["w"] + p["b"]


def dequantize(bits, nbits):
    """Bit2Num + (x+0.5)/2^B  (matches Dequantization.forward)."""
    x = bits.astype(jnp.float32).reshape(bits.shape[0], -1, nbits)
    weights = 2.0 ** jnp.arange(nbits - 1, -1, -1, dtype=jnp.float32)
    num = jnp.sum(x * weights, axis=-1)
    return (num + 0.5) / (2 ** nbits)


def make_positional_encoding(max_len, d_model):
    position = jnp.arange(max_len, dtype=jnp.float32)[:, None]
    div_term = jnp.exp(jnp.arange(0, d_model, 2, dtype=jnp.float32)
                       * (-math.log(10000.0) / d_model))
    pe = jnp.zeros((max_len, 1, d_model), dtype=jnp.float32)
    pe = pe.at[:, 0, 0::2].set(jnp.sin(position * div_term))
    pe = pe.at[:, 0, 1::2].set(jnp.cos(position * div_term))
    return pe


def complex2real_last(x):
    return jnp.concatenate((x.real, x.imag), axis=-1)


def norm_f_bb(f_rf, f_bb):
    n_c, n_rf = f_bb.shape[-3], f_bb.shape[-2]
    f = jnp.matmul(f_rf, f_bb)
    power = jnp.sum(jnp.abs(f) ** 2, axis=(-3, -2, -1), keepdims=True)
    return f_bb / jnp.sqrt(power) * math.sqrt(n_c * n_rf)


# ----------------------------------------------------------------------------
# Forward pass
# ----------------------------------------------------------------------------
def semantic_decoder_forward(params, pilot, echo, feedback):
    b = pilot.shape[0]

    # ------------------ Theta branch ------------------
    # embed_pilot_Theta
    x = complex2real_last(pilot)                          # (b, N_C, M, 2Q)
    x = jnp.swapaxes(x, 1, 2).reshape(b, M_COM, N_C * 2 * Q)
    z_pilot_t = dense(x, params["pilot_theta"])           # (b, M, d_small)

    # embed_echo_Theta
    e = jnp.swapaxes(echo, 1, 3)                          # (b, Q, 1, N_C)
    e = complex2real_last(e).reshape(b, Q, 2 * N_C)
    e = dense(e, params["echo_theta_lin"])                # (b, Q, d_small)
    # Conv1d(Q -> M_com, kernel_size=1) == channel-mixing matmul
    z_echo_t = (jnp.einsum("bql,qm->bml", e, params["echo_theta_conv"]["w"])
                + params["echo_theta_conv"]["b"][None, :, None])

    # embed_feedback_Theta
    f = dequantize(feedback.reshape(-1, B_FB), FEEDBACK_BITS)       # (b*K, 8)
    z_fb_t = dense(f, params["feedback_theta"]).reshape(b * K, M_COM, D_SMALL)

    z_t = jnp.tile((z_pilot_t + z_echo_t)[:, None], (1, K, 1, 1))
    z_t = z_t.reshape(b * K, M_COM, D_SMALL) + z_fb_t
    z_t = encoder_backbone(z_t, params["backbone_theta"], params["pe_theta"])

    # F_Theta_head
    h = dense(z_t[:, 0:M_COM].reshape(b * K * M_COM, D_SMALL),
              params["theta_head"])
    theta = jnp.swapaxes(h.reshape(b, K, M_COM, 1), 1, 3)  # (b, 1, M, K)
    f_rf = jnp.exp(1j * theta)                             # complex64

    # ------------------ BB branch ------------------
    p2 = complex2real_last(pilot).reshape(b, N_C, M_COM * 2 * Q)
    z_pilot_bb = dense(p2, params["pilot_bb"])             # (b, N_C, d_model)

    e2 = complex2real_last(echo).reshape(b, N_C, 2 * Q)
    z_echo_bb = dense(e2, params["echo_bb"])               # (b, N_C, d_model)

    f2 = dequantize(feedback.reshape(-1, B_FB), FEEDBACK_BITS)
    f2 = f2.reshape(b, K * B_FB // FEEDBACK_BITS)
    z_fb_bb = dense(f2, params["feedback_bb"]).reshape(b, N_C, D_MODEL)

    fr = complex2real_last(f_rf).reshape(b, 1, M_COM * 2 * N_RF_COM)
    z_frf = dense(fr, params["f_rf_embed"])                # (b, 1, d_model)

    z_bb = jnp.concatenate((z_pilot_bb + z_echo_bb + z_fb_bb, z_frf), axis=1)
    z_bb = encoder_backbone(z_bb, params["backbone_bb"], params["pe_bb"])

    # F_BB_head + Real2complex
    h = dense(z_bb[:, 0:N_C].reshape(b * N_C, D_MODEL), params["bb_head"])
    h = h.reshape(b, N_C, N_RF_COM, K, 2)
    f_bb = h[..., 0] + 1j * h[..., 1]                      # (b, N_C, N_RF, K)

    f_bb = norm_f_bb(f_rf, f_bb)
    return jnp.matmul(f_rf, f_bb)                          # (b, N_C, M_com, K)


# ----------------------------------------------------------------------------
# Parameter initialization (deterministic, random weights)
# ----------------------------------------------------------------------------
def _init_linear(key, fan_in, fan_out):
    w = jax.random.normal(key, (fan_in, fan_out), jnp.float32) / math.sqrt(fan_in)
    return {"w": w, "b": jnp.zeros((fan_out,), jnp.float32)}


def _init_encoder_stack(key, d, dff, num_layers):
    """Stacked (L, ...) encoder-layer params, laid out for per-layer BlockSpecs."""
    def one(k):
        kq, kk, kv, ko, k1, k2 = jax.random.split(k, 6)

        def lin(kw, fi, fo):
            w = jax.random.normal(kw, (fi, fo), jnp.float32) / math.sqrt(fi)
            return w, jnp.zeros((1, fo), jnp.float32)

        wq, bq = lin(kq, d, d)
        wk, bk = lin(kk, d, d)
        wv, bv = lin(kv, d, d)
        wo, bo = lin(ko, d, d)
        wf1, bf1 = lin(k1, d, dff)
        wf2, bf2 = lin(k2, dff, d)
        return {
            "wq": wq, "bq": bq, "wk": wk, "bk": bk, "wv": wv, "bv": bv,
            "wo": wo, "bo": bo,
            "g1": jnp.ones((1, d), jnp.float32), "b1": jnp.zeros((1, d), jnp.float32),
            "wf1": wf1, "bf1": bf1, "wf2": wf2, "bf2": bf2,
            "g2": jnp.ones((1, d), jnp.float32), "b2": jnp.zeros((1, d), jnp.float32),
        }

    layers = [one(k) for k in jax.random.split(key, num_layers)]
    return jax.tree_util.tree_map(lambda *xs: jnp.stack(xs, axis=0), *layers)


def init_params(key):
    keys = jax.random.split(key, 12)
    return {
        "pilot_theta": _init_linear(keys[0], N_C * 2 * Q, D_SMALL),
        "echo_theta_lin": _init_linear(keys[1], 2 * N_C, D_SMALL),
        "echo_theta_conv": _init_linear(keys[2], Q, M_COM),
        "feedback_theta": _init_linear(keys[3], B_FB // FEEDBACK_BITS,
                                       M_COM * D_SMALL),
        "theta_head": _init_linear(keys[4], D_SMALL, 1),
        "pilot_bb": _init_linear(keys[5], M_COM * 2 * Q, D_MODEL),
        "echo_bb": _init_linear(keys[6], 2 * Q, D_MODEL),
        "feedback_bb": _init_linear(keys[7], K * B_FB // FEEDBACK_BITS,
                                    N_C * D_MODEL),
        "f_rf_embed": _init_linear(keys[8], M_COM * 2 * N_RF_COM, D_MODEL),
        "bb_head": _init_linear(keys[9], D_MODEL, N_RF_COM * K * 2),
        "pe_theta": make_positional_encoding(M_COM, D_SMALL),
        "pe_bb": make_positional_encoding(N_C + 1, D_MODEL),
        "backbone_theta": _init_encoder_stack(keys[10], D_SMALL, 4 * D_SMALL,
                                              NUM_LAYERS),
        "backbone_bb": _init_encoder_stack(keys[11], D_MODEL, 4 * D_MODEL,
                                           NUM_LAYERS),
    }


# ----------------------------------------------------------------------------
# Main
# ----------------------------------------------------------------------------
if __name__ == "__main__":
    key = jax.random.PRNGKey(0)
    k_par, k_pr, k_pi, k_er, k_ei, k_fb = jax.random.split(key, 6)

    params = init_params(k_par)

    pilot = (jax.random.normal(k_pr, (BATCH, N_C, M_COM, Q), jnp.float32)
             + 1j * jax.random.normal(k_pi, (BATCH, N_C, M_COM, Q), jnp.float32))
    echo = (jax.random.normal(k_er, (BATCH, N_C, 1, Q), jnp.float32)
            + 1j * jax.random.normal(k_ei, (BATCH, N_C, 1, Q), jnp.float32))
    feedback = jax.random.bernoulli(k_fb, 0.5,
                                    (BATCH, K * B_FB)).astype(jnp.float32)

    fwd = jax.jit(semantic_decoder_forward)
    F = fwd(params, pilot, echo, feedback)
    F = jax.block_until_ready(F)

    assert F.shape == (BATCH, N_C, M_COM, K), F.shape
    assert jnp.iscomplexobj(F)
    assert bool(jnp.all(jnp.isfinite(F.real))) and bool(jnp.all(jnp.isfinite(F.imag)))

    print("KERNEL_OK")
</pallas_src>

<mosaic_0001>
module attributes {stable_mosaic.version = 11 : i64} {
  func.func @_encoder_stack_kernel(%arg0: i32, %arg1: memref<128x16xf32, #tpu.memory_space<vmem>>, %arg2: memref<128x128xf32, #tpu.memory_space<vmem>>, %arg3: memref<1x16x16xf32, #tpu.memory_space<vmem>>, %arg4: memref<1x1x16xf32, #tpu.memory_space<vmem>>, %arg5: memref<1x16x16xf32, #tpu.memory_space<vmem>>, %arg6: memref<1x1x16xf32, #tpu.memory_space<vmem>>, %arg7: memref<1x16x16xf32, #tpu.memory_space<vmem>>, %arg8: memref<1x1x16xf32, #tpu.memory_space<vmem>>, %arg9: memref<1x16x16xf32, #tpu.memory_space<vmem>>, %arg10: memref<1x1x16xf32, #tpu.memory_space<vmem>>, %arg11: memref<1x1x16xf32, #tpu.memory_space<vmem>>, %arg12: memref<1x1x16xf32, #tpu.memory_space<vmem>>, %arg13: memref<1x16x64xf32, #tpu.memory_space<vmem>>, %arg14: memref<1x1x64xf32, #tpu.memory_space<vmem>>, %arg15: memref<1x64x16xf32, #tpu.memory_space<vmem>>, %arg16: memref<1x1x16xf32, #tpu.memory_space<vmem>>, %arg17: memref<1x1x16xf32, #tpu.memory_space<vmem>>, %arg18: memref<1x1x16xf32, #tpu.memory_space<vmem>>, %arg19: memref<128x16xf32, #tpu.memory_space<vmem>>) attributes {dimension_semantics = [#tpu.dimension_semantics<arbitrary>], iteration_bounds = array<i64: 6>, scalar_prefetch = 0 : i64, scratch_operands = 0 : i64, tpu.core_type = #tpu.core_type<tc>, window_params = [{pipeline_mode = #tpu.pipeline_mode<synchronous>, transform_indices = @transform_0, window_bounds = array<i64: 128, 16>}, {pipeline_mode = #tpu.pipeline_mode<synchronous>, transform_indices = @transform_1, window_bounds = array<i64: 128, 128>}, {transform_indices = @transform_2, window_bounds = array<i64: 1, 16, 16>}, {transform_indices = @transform_3, window_bounds = array<i64: 1, 1, 16>}, {transform_indices = @transform_4, window_bounds = array<i64: 1, 16, 16>}, {transform_indices = @transform_5, window_bounds = array<i64: 1, 1, 16>}, {transform_indices = @transform_6, window_bounds = array<i64: 1, 16, 16>}, {transform_indices = @transform_7, window_bounds = array<i64: 1, 1, 16>}, {transform_indices = @transform_8, window_bounds = array<i64: 1, 16, 16>}, {transform_indices = @transform_9, window_bounds = array<i64: 1, 1, 16>}, {transform_indices = @transform_10, window_bounds = array<i64: 1, 1, 16>}, {transform_indices = @transform_11, window_bounds = array<i64: 1, 1, 16>}, {transform_indices = @transform_12, window_bounds = array<i64: 1, 16, 64>}, {transform_indices = @transform_13, window_bounds = array<i64: 1, 1, 64>}, {transform_indices = @transform_14, window_bounds = array<i64: 1, 64, 16>}, {transform_indices = @transform_15, window_bounds = array<i64: 1, 1, 16>}, {transform_indices = @transform_16, window_bounds = array<i64: 1, 1, 16>}, {transform_indices = @transform_17, window_bounds = array<i64: 1, 1, 16>}, {pipeline_mode = #tpu.pipeline_mode<synchronous>, transform_indices = @transform_18, window_bounds = array<i64: 128, 16>}]} {
    %c0_i32 = arith.constant 0 : i32
    %0 = arith.cmpi eq, %arg0, %c0_i32 : i32
    %1 = arith.extui %0 : i1 to i32
    %c0_i32_0 = arith.constant 0 : i32
    %2 = arith.cmpi ne, %1, %c0_i32_0 : i32
    scf.if %2 {
      %c0_115 = arith.constant 0 : index
      %c0_116 = arith.constant 0 : index
      %307 = vector.load %arg1[%c0_115, %c0_116] : memref<128x16xf32, #tpu.memory_space<vmem>>, vector<128x16xf32>
      %c0_117 = arith.constant 0 : index
      %c0_118 = arith.constant 0 : index
      %308 = vector.load %arg19[%c0_117, %c0_118] : memref<128x16xf32, #tpu.memory_space<vmem>>, vector<128x16xf32>
      tpu.vector_store %arg19[%c0_117, %c0_118], %307 {strides = array<i32>} : memref<128x16xf32, #tpu.memory_space<vmem>>, vector<128x16xf32>,
    } else {
    }
    %c0 = arith.constant 0 : index
    %c0_1 = arith.constant 0 : index
    %3 = vector.load %arg19[%c0, %c0_1] : memref<128x16xf32, #tpu.memory_space<vmem>>, vector<128x16xf32>
    %c0_2 = arith.constant 0 : index
    %c0_3 = arith.constant 0 : index
    %4 = vector.load %arg2[%c0_2, %c0_3] : memref<128x128xf32, #tpu.memory_space<vmem>>, vector<128x128xf32>
    %c0_4 = arith.constant 0 : index
    %c0_5 = arith.constant 0 : index
    %c0_6 = arith.constant 0 : index
    %5 = vector.load %arg3[%c0_4, %c0_5, %c0_6] : memref<1x16x16xf32, #tpu.memory_space<vmem>>, vector<1x16x16xf32>
    %6 = vector.shape_cast %5 : vector<1x16x16xf32> to vector<16x16xf32>
    %cst = arith.constant dense<0.000000e+00> : vector<128x16xf32>
    %7 = tpu.matmul %3, %6, %cst {dimension_numbers = #tpu.dot_dimension_numbers<[1], [0], [0], [1], [0, 0, 1, 1], [], []>} : vector<128x16xf32>, vector<16x16xf32>, vector<128x16xf32> -> vector<128x16xf32>
    %c0_7 = arith.constant 0 : index
    %c0_8 = arith.constant 0 : index
    %c0_9 = arith.constant 0 : index
    %8 = vector.load %arg4[%c0_7, %c0_8, %c0_9] : memref<1x1x16xf32, #tpu.memory_space<vmem>>, vector<1x1x16xf32>
    %9 = vector.shape_cast %8 : vector<1x1x16xf32> to vector<1x16xf32>
    %10 = vector.broadcast %9 : vector<1x16xf32> to vector<128x16xf32>
    %11 = arith.addf %7, %10 : vector<128x16xf32>
    %cst_10 = arith.constant 0.707106769 : f32
    %12 = vector.broadcast %cst_10 : f32 to vector<128x16xf32>
    %13 = arith.mulf %11, %12 : vector<128x16xf32>
    %c0_11 = arith.constant 0 : index
    %c0_12 = arith.constant 0 : index
    %c0_13 = arith.constant 0 : index
    %14 = vector.load %arg5[%c0_11, %c0_12, %c0_13] : memref<1x16x16xf32, #tpu.memory_space<vmem>>, vector<1x16x16xf32>
    %15 = vector.shape_cast %14 : vector<1x16x16xf32> to vector<16x16xf32>
    %cst_14 = arith.constant dense<0.000000e+00> : vector<128x16xf32>
    %16 = tpu.matmul %3, %15, %cst_14 {dimension_numbers = #tpu.dot_dimension_numbers<[1], [0], [0], [1], [0, 0, 1, 1], [], []>} : vector<128x16xf32>, vector<16x16xf32>, vector<128x16xf32> -> vector<128x16xf32>
    %c0_15 = arith.constant 0 : index
    %c0_16 = arith.constant 0 : index
    %c0_17 = arith.constant 0 : index
    %17 = vector.load %arg6[%c0_15, %c0_16, %c0_17] : memref<1x1x16xf32, #tpu.memory_space<vmem>>, vector<1x1x16xf32>
    %18 = vector.shape_cast %17 : vector<1x1x16xf32> to vector<1x16xf32>
    %19 = vector.broadcast %18 : vector<1x16xf32> to vector<128x16xf32>
    %20 = arith.addf %16, %19 : vector<128x16xf32>
    %c0_18 = arith.constant 0 : index
    %c0_19 = arith.constant 0 : index
    %c0_20 = arith.constant 0 : index
    %21 = vector.load %arg7[%c0_18, %c0_19, %c0_20] : memref<1x16x16xf32, #tpu.memory_space<vmem>>, vector<1x16x16xf32>
    %22 = vector.shape_cast %21 : vector<1x16x16xf32> to vector<16x16xf32>
    %cst_21 = arith.constant dense<0.000000e+00> : vector<128x16xf32>
    %23 = tpu.matmul %3, %22, %cst_21 {dimension_numbers = #tpu.dot_dimension_numbers<[1], [0], [0], [1], [0, 0, 1, 1], [], []>} : vector<128x16xf32>, vector<16x16xf32>, vector<128x16xf32> -> vector<128x16xf32>
    %c0_22 = arith.constant 0 : index
    %c0_23 = arith.constant 0 : index
    %c0_24 = arith.constant 0 : index
    %24 = vector.load %arg8[%c0_22, %c0_23, %c0_24] : memref<1x1x16xf32, #tpu.memory_space<vmem>>, vector<1x1x16xf32>
    %25 = vector.shape_cast %24 : vector<1x1x16xf32> to vector<1x16xf32>
    %26 = vector.broadcast %25 : vector<1x16xf32> to vector<128x16xf32>
    %27 = arith.addf %23, %26 : vector<128x16xf32>
    %28 = tpu.iota {dimensions = array<i32: 1>} : vector<1x16xi32>
    %cst_25 = arith.constant 0.000000e+00 : f32
    %29 = vector.broadcast %cst_25 : f32 to vector<128x16xf32>
    %c0_i32_26 = arith.constant 0 : i32
    %30 = vector.broadcast %c0_i32_26 : i32 to vector<1x16xi32>
    %31 = arith.cmpi sge, %28, %30 : vector<1x16xi32>
    %c2_i32 = arith.constant 2 : i32
    %32 = vector.broadcast %c2_i32 : i32 to vector<1x16xi32>
    %33 = arith.cmpi slt, %28, %32 : vector<1x16xi32>
    %34 = arith.andi %31, %33 : vector<1x16xi1>
    %35 = arith.extui %34 : vector<1x16xi1> to vector<1x16xi32>
    %36 = arith.sitofp %35 : vector<1x16xi32> to vector<1x16xf32>
    %37 = vector.broadcast %36 : vector<1x16xf32> to vector<128x16xf32>
    %38 = arith.mulf %13, %37 : vector<128x16xf32>
    %39 = vector.broadcast %36 : vector<1x16xf32> to vector<128x16xf32>
    %40 = arith.mulf %27, %39 : vector<128x16xf32>
    "tpu.trace_start"() <{level = 10 : i32, message = "se,te->st"}> : () -> ()
    %cst_27 = arith.constant dense<0.000000e+00> : vector<128x128xf32>
    %41 = tpu.matmul %38, %20, %cst_27 {dimension_numbers = #tpu.dot_dimension_numbers<[1], [1], [0], [0], [0, 0, 1, 0], [], []>} : vector<128x16xf32>, vector<128x16xf32>, vector<128x128xf32> -> vector<128x128xf32>
    "tpu.trace_stop"() : () -> ()
    %42 = arith.addf %41, %4 : vector<128x128xf32>
    %cst_28 = arith.constant dense<0xFF800000> : vector<128xf32>
    %43 = vector.multi_reduction <maximumf>, %42, %cst_28 [1] : vector<128x128xf32> to vector<128xf32>
    %44 = vector.shape_cast %43 : vector<128xf32> to vector<128x1xf32>
    %45 = vector.broadcast %44 : vector<128x1xf32> to vector<128x128xf32>
    %46 = arith.subf %42, %45 : vector<128x128xf32>
    %47 = math.exp %46 : vector<128x128xf32>
    %cst_29 = arith.constant dense<0.000000e+00> : vector<128xf32>
    %48 = vector.multi_reduction <add>, %47, %cst_29 [1] : vector<128x128xf32> to vector<128xf32>
    %49 = vector.shape_cast %48 : vector<128xf32> to vector<128x1xf32>
    %50 = vector.broadcast %49 : vector<128x1xf32> to vector<128x128xf32>
    %51 = arith.divf %47, %50 : vector<128x128xf32>
    %cst_30 = arith.constant dense<0.000000e+00> : vector<128x16xf32>
    %52 = tpu.matmul %51, %40, %cst_30 {dimension_numbers = #tpu.dot_dimension_numbers<[1], [0], [0], [1], [0, 0, 1, 1], [], []>} : vector<128x128xf32>, vector<128x16xf32>, vector<128x16xf32> -> vector<128x16xf32>
    %53 = arith.addf %29, %52 : vector<128x16xf32>
    %c2_i32_31 = arith.constant 2 : i32
    %54 = vector.broadcast %c2_i32_31 : i32 to vector<1x16xi32>
    %55 = arith.cmpi sge, %28, %54 : vector<1x16xi32>
    %c4_i32 = arith.constant 4 : i32
    %56 = vector.broadcast %c4_i32 : i32 to vector<1x16xi32>
    %57 = arith.cmpi slt, %28, %56 : vector<1x16xi32>
    %58 = arith.andi %55, %57 : vector<1x16xi1>
    %59 = arith.extui %58 : vector<1x16xi1> to vector<1x16xi32>
    %60 = arith.sitofp %59 : vector<1x16xi32> to vector<1x16xf32>
    %61 = vector.broadcast %60 : vector<1x16xf32> to vector<128x16xf32>
    %62 = arith.mulf %13, %61 : vector<128x16xf32>
    %63 = vector.broadcast %60 : vector<1x16xf32> to vector<128x16xf32>
    %64 = arith.mulf %27, %63 : vector<128x16xf32>
    "tpu.trace_start"() <{level = 10 : i32, message = "se,te->st"}> : () -> ()
    %cst_32 = arith.constant dense<0.000000e+00> : vector<128x128xf32>
    %65 = tpu.matmul %62, %20, %cst_32 {dimension_numbers = #tpu.dot_dimension_numbers<[1], [1], [0], [0], [0, 0, 1, 0], [], []>} : vector<128x16xf32>, vector<128x16xf32>, vector<128x128xf32> -> vector<128x128xf32>
    "tpu.trace_stop"() : () -> ()
    %66 = arith.addf %65, %4 : vector<128x128xf32>
    %cst_33 = arith.constant dense<0xFF800000> : vector<128xf32>
    %67 = vector.multi_reduction <maximumf>, %66, %cst_33 [1] : vector<128x128xf32> to vector<128xf32>
    %68 = vector.shape_cast %67 : vector<128xf32> to vector<128x1xf32>
    %69 = vector.broadcast %68 : vector<128x1xf32> to vector<128x128xf32>
    %70 = arith.subf %66, %69 : vector<128x128xf32>
    %71 = math.exp %70 : vector<128x128xf32>
    %cst_34 = arith.constant dense<0.000000e+00> : vector<128xf32>
    %72 = vector.multi_reduction <add>, %71, %cst_34 [1] : vector<128x128xf32> to vector<128xf32>
    %73 = vector.shape_cast %72 : vector<128xf32> to vector<128x1xf32>
    %74 = vector.broadcast %73 : vector<128x1xf32> to vector<128x128xf32>
    %75 = arith.divf %71, %74 : vector<128x128xf32>
    %cst_35 = arith.constant dense<0.000000e+00> : vector<128x16xf32>
    %76 = tpu.matmul %75, %64, %cst_35 {dimension_numbers = #tpu.dot_dimension_numbers<[1], [0], [0], [1], [0, 0, 1, 1], [], []>} : vector<128x128xf32>, vector<128x16xf32>, vector<128x16xf32> -> vector<128x16xf32>
    %77 = arith.addf %53, %76 : vector<128x16xf32>
    %c4_i32_36 = arith.constant 4 : i32
    %78 = vector.broadcast %c4_i32_36 : i32 to vector<1x16xi32>
    %79 = arith.cmpi sge, %28, %78 : vector<1x16xi32>
    %c6_i32 = arith.constant 6 : i32
    %80 = vector.broadcast %c6_i32 : i32 to vector<1x16xi32>
    %81 = arith.cmpi slt, %28, %80 : vector<1x16xi32>
    %82 = arith.andi %79, %81 : vector<1x16xi1>
    %83 = arith.extui %82 : vector<1x16xi1> to vector<1x16xi32>
    %84 = arith.sitofp %83 : vector<1x16xi32> to vector<1x16xf32>
    %85 = vector.broadcast %84 : vector<1x16xf32> to vector<128x16xf32>
    %86 = arith.mulf %13, %85 : vector<128x16xf32>
    %87 = vector.broadcast %84 : vector<1x16xf32> to vector<128x16xf32>
    %88 = arith.mulf %27, %87 : vector<128x16xf32>
    "tpu.trace_start"() <{level = 10 : i32, message = "se,te->st"}> : () -> ()
    %cst_37 = arith.constant dense<0.000000e+00> : vector<128x128xf32>
    %89 = tpu.matmul %86, %20, %cst_37 {dimension_numbers = #tpu.dot_dimension_numbers<[1], [1], [0], [0], [0, 0, 1, 0], [], []>} : vector<128x16xf32>, vector<128x16xf32>, vector<128x128xf32> -> vector<128x128xf32>
    "tpu.trace_stop"() : () -> ()
    %90 = arith.addf %89, %4 : vector<128x128xf32>
    %cst_38 = arith.constant dense<0xFF800000> : vector<128xf32>
    %91 = vector.multi_reduction <maximumf>, %90, %cst_38 [1] : vector<128x128xf32> to vector<128xf32>
    %92 = vector.shape_cast %91 : vector<128xf32> to vector<128x1xf32>
    %93 = vector.broadcast %92 : vector<128x1xf32> to vector<128x128xf32>
    %94 = arith.subf %90, %93 : vector<128x128xf32>
    %95 = math.exp %94 : vector<128x128xf32>
    %cst_39 = arith.constant dense<0.000000e+00> : vector<128xf32>
    %96 = vector.multi_reduction <add>, %95, %cst_39 [1] : vector<128x128xf32> to vector<128xf32>
    %97 = vector.shape_cast %96 : vector<128xf32> to vector<128x1xf32>
    %98 = vector.broadcast %97 : vector<128x1xf32> to vector<128x128xf32>
    %99 = arith.divf %95, %98 : vector<128x128xf32>
    %cst_40 = arith.constant dense<0.000000e+00> : vector<128x16xf32>
    %100 = tpu.matmul %99, %88, %cst_40 {dimension_numbers = #tpu.dot_dimension_numbers<[1], [0], [0], [1], [0, 0, 1, 1], [], []>} : vector<128x128xf32>, vector<128x16xf32>, vector<128x16xf32> -> vector<128x16xf32>
    %101 = arith.addf %77, %100 : vector<128x16xf32>
    %c6_i32_41 = arith.constant 6 : i32
    %102 = vector.broadcast %c6_i32_41 : i32 to vector<1x16xi32>
    %103 = arith.cmpi sge, %28, %102 : vector<1x16xi32>
    %c8_i32 = arith.constant 8 : i32
    %104 = vector.broadcast %c8_i32 : i32 to vector<1x16xi32>
    %105 = arith.cmpi slt, %28, %104 : vector<1x16xi32>
    %106 = arith.andi %103, %105 : vector<1x16xi1>
    %107 = arith.extui %106 : vector<1x16xi1> to vector<1x16xi32>
    %108 = arith.sitofp %107 : vector<1x16xi32> to vector<1x16xf32>
    %109 = vector.broadcast %108 : vector<1x16xf32> to vector<128x16xf32>
    %110 = arith.mulf %13, %109 : vector<128x16xf32>
    %111 = vector.broadcast %108 : vector<1x16xf32> to vector<128x16xf32>
    %112 = arith.mulf %27, %111 : vector<128x16xf32>
    "tpu.trace_start"() <{level = 10 : i32, message = "se,te->st"}> : () -> ()
    %cst_42 = arith.constant dense<0.000000e+00> : vector<128x128xf32>
    %113 = tpu.matmul %110, %20, %cst_42 {dimension_numbers = #tpu.dot_dimension_numbers<[1], [1], [0], [0], [0, 0, 1, 0], [], []>} : vector<128x16xf32>, vector<128x16xf32>, vector<128x128xf32> -> vector<128x128xf32>
    "tpu.trace_stop"() : () -> ()
    %114 = arith.addf %113, %4 : vector<128x128xf32>
    %cst_43 = arith.constant dense<0xFF800000> : vector<128xf32>
    %115 = vector.multi_reduction <maximumf>, %114, %cst_43 [1] : vector<128x128xf32> to vector<128xf32>
    %116 = vector.shape_cast %115 : vector<128xf32> to vector<128x1xf32>
    %117 = vector.broadcast %116 : vector<128x1xf32> to vector<128x128xf32>
    %118 = arith.subf %114, %117 : vector<128x128xf32>
    %119 = math.exp %118 : vector<128x128xf32>
    %cst_44 = arith.constant dense<0.000000e+00> : vector<128xf32>
    %120 = vector.multi_reduction <add>, %119, %cst_44 [1] : vector<128x128xf32> to vector<128xf32>
    %121 = vector.shape_cast %120 : vector<128xf32> to vector<128x1xf32>
    %122 = vector.broadcast %121 : vector<128x1xf32> to vector<128x128xf32>
    %123 = arith.divf %119, %122 : vector<128x128xf32>
    %cst_45 = arith.constant dense<0.000000e+00> : vector<128x16xf32>
    %124 = tpu.matmul %123, %112, %cst_45 {dimension_numbers = #tpu.dot_dimension_numbers<[1], [0], [0], [1], [0, 0, 1, 1], [], []>} : vector<128x128xf32>, vector<128x16xf32>, vector<128x16xf32> -> vector<128x16xf32>
    %125 = arith.addf %101, %124 : vector<128x16xf32>
    %c8_i32_46 = arith.constant 8 : i32
    %126 = vector.broadcast %c8_i32_46 : i32 to vector<1x16xi32>
    %127 = arith.cmpi sge, %28, %126 : vector<1x16xi32>
    %c10_i32 = arith.constant 10 : i32
    %128 = vector.broadcast %c10_i32 : i32 to vector<1x16xi32>
    %129 = arith.cmpi slt, %28, %128 : vector<1x16xi32>
    %130 = arith.andi %127, %129 : vector<1x16xi1>
    %131 = arith.extui %130 : vector<1x16xi1> to vector<1x16xi32>
    %132 = arith.sitofp %131 : vector<1x16xi32> to vector<1x16xf32>
    %133 = vector.broadcast %132 : vector<1x16xf32> to vector<128x16xf32>
    %134 = arith.mulf %13, %133 : vector<128x16xf32>
    %135 = vector.broadcast %132 : vector<1x16xf32> to vector<128x16xf32>
    %136 = arith.mulf %27, %135 : vector<128x16xf32>
    "tpu.trace_start"() <{level = 10 : i32, message = "se,te->st"}> : () -> ()
    %cst_47 = arith.constant dense<0.000000e+00> : vector<128x128xf32>
    %137 = tpu.matmul %134, %20, %cst_47 {dimension_numbers = #tpu.dot_dimension_numbers<[1], [1], [0], [0], [0, 0, 1, 0], [], []>} : vector<128x16xf32>, vector<128x16xf32>, vector<128x128xf32> -> vector<128x128xf32>
    "tpu.trace_stop"() : () -> ()
    %138 = arith.addf %137, %4 : vector<128x128xf32>
    %cst_48 = arith.constant dense<0xFF800000> : vector<128xf32>
    %139 = vector.multi_reduction <maximumf>, %138, %cst_48 [1] : vector<128x128xf32> to vector<128xf32>
    %140 = vector.shape_cast %139 : vector<128xf32> to vector<128x1xf32>
    %141 = vector.broadcast %140 : vector<128x1xf32> to vector<128x128xf32>
    %142 = arith.subf %138, %141 : vector<128x128xf32>
    %143 = math.exp %142 : vector<128x128xf32>
    %cst_49 = arith.constant dense<0.000000e+00> : vector<128xf32>
    %144 = vector.multi_reduction <add>, %143, %cst_49 [1] : vector<128x128xf32> to vector<128xf32>
    %145 = vector.shape_cast %144 : vector<128xf32> to vector<128x1xf32>
    %146 = vector.broadcast %145 : vector<128x1xf32> to vector<128x128xf32>
    %147 = arith.divf %143, %146 : vector<128x128xf32>
    %cst_50 = arith.constant dense<0.000000e+00> : vector<128x16xf32>
    %148 = tpu.matmul %147, %136, %cst_50 {dimension_numbers = #tpu.dot_dimension_numbers<[1], [0], [0], [1], [0, 0, 1, 1], [], []>} : vector<128x128xf32>, vector<128x16xf32>, vector<128x16xf32> -> vector<128x16xf32>
    %149 = arith.addf %125, %148 : vector<128x16xf32>
    %c10_i32_51 = arith.constant 10 : i32
    %150 = vector.broadcast %c10_i32_51 : i32 to vector<1x16xi32>
    %151 = arith.cmpi sge, %28, %150 : vector<1x16xi32>
    %c12_i32 = arith.constant 12 : i32
    %152 = vector.broadcast %c12_i32 : i32 to vector<1x16xi32>
    %153 = arith.cmpi slt, %28, %152 : vector<1x16xi32>
    %154 = arith.andi %151, %153 : vector<1x16xi1>
    %155 = arith.extui %154 : vector<1x16xi1> to vector<1x16xi32>
    %156 = arith.sitofp %155 : vector<1x16xi32> to vector<1x16xf32>
    %157 = vector.broadcast %156 : vector<1x16xf32> to vector<128x16xf32>
    %158 = arith.mulf %13, %157 : vector<128x16xf32>
    %159 = vector.broadcast %156 : vector<1x16xf32> to vector<128x16xf32>
    %160 = arith.mulf %27, %159 : vector<128x16xf32>
    "tpu.trace_start"() <{level = 10 : i32, message = "se,te->st"}> : () -> ()
    %cst_52 = arith.constant dense<0.000000e+00> : vector<128x128xf32>
    %161 = tpu.matmul %158, %20, %cst_52 {dimension_numbers = #tpu.dot_dimension_numbers<[1], [1], [0], [0], [0, 0, 1, 0], [], []>} : vector<128x16xf32>, vector<128x16xf32>, vector<128x128xf32> -> vector<128x128xf32>
    "tpu.trace_stop"() : () -> ()
    %162 = arith.addf %161, %4 : vector<128x128xf32>
    %cst_53 = arith.constant dense<0xFF800000> : vector<128xf32>
    %163 = vector.multi_reduction <maximumf>, %162, %cst_53 [1] : vector<128x128xf32> to vector<128xf32>
    %164 = vector.shape_cast %163 : vector<128xf32> to vector<128x1xf32>
    %165 = vector.broadcast %164 : vector<128x1xf32> to vector<128x128xf32>
    %166 = arith.subf %162, %165 : vector<128x128xf32>
    %167 = math.exp %166 : vector<128x128xf32>
    %cst_54 = arith.constant dense<0.000000e+00> : vector<128xf32>
    %168 = vector.multi_reduction <add>, %167, %cst_54 [1] : vector<128x128xf32> to vector<128xf32>
    %169 = vector.shape_cast %168 : vector<128xf32> to vector<128x1xf32>
    %170 = vector.broadcast %169 : vector<128x1xf32> to vector<128x128xf32>
    %171 = arith.divf %167, %170 : vector<128x128xf32>
    %cst_55 = arith.constant dense<0.000000e+00> : vector<128x16xf32>
    %172 = tpu.matmul %171, %160, %cst_55 {dimension_numbers = #tpu.dot_dimension_numbers<[1], [0], [0], [1], [0, 0, 1, 1], [], []>} : vector<128x128xf32>, vector<128x16xf32>, vector<128x16xf32> -> vector<128x16xf32>
    %173 = arith.addf %149, %172 : vector<128x16xf32>
    %c12_i32_56 = arith.constant 12 : i32
    %174 = vector.broadcast %c12_i32_56 : i32 to vector<1x16xi32>
    %175 = arith.cmpi sge, %28, %174 : vector<1x16xi32>
    %c14_i32 = arith.constant 14 : i32
    %176 = vector.broadcast %c14_i32 : i32 to vector<1x16xi32>
    %177 = arith.cmpi slt, %28, %176 : vector<1x16xi32>
    %178 = arith.andi %175, %177 : vector<1x16xi1>
    %179 = arith.extui %178 : vector<1x16xi1> to vector<1x16xi32>
    %180 = arith.sitofp %179 : vector<1x16xi32> to vector<1x16xf32>
    %181 = vector.broadcast %180 : vector<1x16xf32> to vector<128x16xf32>
    %182 = arith.mulf %13, %181 : vector<128x16xf32>
    %183 = vector.broadcast %180 : vector<1x16xf32> to vector<128x16xf32>
    %184 = arith.mulf %27, %183 : vector<128x16xf32>
    "tpu.trace_start"() <{level = 10 : i32, message = "se,te->st"}> : () -> ()
    %cst_57 = arith.constant dense<0.000000e+00> : vector<128x128xf32>
    %185 = tpu.matmul %182, %20, %cst_57 {dimension_numbers = #tpu.dot_dimension_numbers<[1], [1], [0], [0], [0, 0, 1, 0], [], []>} : vector<128x16xf32>, vector<128x16xf32>, vector<128x128xf32> -> vector<128x128xf32>
    "tpu.trace_stop"() : () -> ()
    %186 = arith.addf %185, %4 : vector<128x128xf32>
    %cst_58 = arith.constant dense<0xFF800000> : vector<128xf32>
    %187 = vector.multi_reduction <maximumf>, %186, %cst_58 [1] : vector<128x128xf32> to vector<128xf32>
    %188 = vector.shape_cast %187 : vector<128xf32> to vector<128x1xf32>
    %189 = vector.broadcast %188 : vector<128x1xf32> to vector<128x128xf32>
    %190 = arith.subf %186, %189 : vector<128x128xf32>
    %191 = math.exp %190 : vector<128x128xf32>
    %cst_59 = arith.constant dense<0.000000e+00> : vector<128xf32>
    %192 = vector.multi_reduction <add>, %191, %cst_59 [1] : vector<128x128xf32> to vector<128xf32>
    %193 = vector.shape_cast %192 : vector<128xf32> to vector<128x1xf32>
    %194 = vector.broadcast %193 : vector<128x1xf32> to vector<128x128xf32>
    %195 = arith.divf %191, %194 : vector<128x128xf32>
    %cst_60 = arith.constant dense<0.000000e+00> : vector<128x16xf32>
    %196 = tpu.matmul %195, %184, %cst_60 {dimension_numbers = #tpu.dot_dimension_numbers<[1], [0], [0], [1], [0, 0, 1, 1], [], []>} : vector<128x128xf32>, vector<128x16xf32>, vector<128x16xf32> -> vector<128x16xf32>
    %197 = arith.addf %173, %196 : vector<128x16xf32>
    %c14_i32_61 = arith.constant 14 : i32
    %198 = vector.broadcast %c14_i32_61 : i32 to vector<1x16xi32>
    %199 = arith.cmpi sge, %28, %198 : vector<1x16xi32>
    %c16_i32 = arith.constant 16 : i32
    %200 = vector.broadcast %c16_i32 : i32 to vector<1x16xi32>
    %201 = arith.cmpi slt, %28, %200 : vector<1x16xi32>
    %202 = arith.andi %199, %201 : vector<1x16xi1>
    %203 = arith.extui %202 : vector<1x16xi1> to vector<1x16xi32>
    %204 = arith.sitofp %203 : vector<1x16xi32> to vector<1x16xf32>
    %205 = vector.broadcast %204 : vector<1x16xf32> to vector<128x16xf32>
    %206 = arith.mulf %13, %205 : vector<128x16xf32>
    %207 = vector.broadcast %204 : vector<1x16xf32> to vector<128x16xf32>
    %208 = arith.mulf %27, %207 : vector<128x16xf32>
    "tpu.trace_start"() <{level = 10 : i32, message = "se,te->st"}> : () -> ()
    %cst_62 = arith.constant dense<0.000000e+00> : vector<128x128xf32>
    %209 = tpu.matmul %206, %20, %cst_62 {dimension_numbers = #tpu.dot_dimension_numbers<[1], [1], [0], [0], [0, 0, 1, 0], [], []>} : vector<128x16xf32>, vector<128x16xf32>, vector<128x128xf32> -> vector<128x128xf32>
    "tpu.trace_stop"() : () -> ()
    %210 = arith.addf %209, %4 : vector<128x128xf32>
    %cst_63 = arith.constant dense<0xFF800000> : vector<128xf32>
    %211 = vector.multi_reduction <maximumf>, %210, %cst_63 [1] : vector<128x128xf32> to vector<128xf32>
    %212 = vector.shape_cast %211 : vector<128xf32> to vector<128x1xf32>
    %213 = vector.broadcast %212 : vector<128x1xf32> to vector<128x128xf32>
    %214 = arith.subf %210, %213 : vector<128x128xf32>
    %215 = math.exp %214 : vector<128x128xf32>
    %cst_64 = arith.constant dense<0.000000e+00> : vector<128xf32>
    %216 = vector.multi_reduction <add>, %215, %cst_64 [1] : vector<128x128xf32> to vector<128xf32>
    %217 = vector.shape_cast %216 : vector<128xf32> to vector<128x1xf32>
    %218 = vector.broadcast %217 : vector<128x1xf32> to vector<128x128xf32>
    %219 = arith.divf %215, %218 : vector<128x128xf32>
    %cst_65 = arith.constant dense<0.000000e+00> : vector<128x16xf32>
    %220 = tpu.matmul %219, %208, %cst_65 {dimension_numbers = #tpu.dot_dimension_numbers<[1], [0], [0], [1], [0, 0, 1, 1], [], []>} : vector<128x128xf32>, vector<128x16xf32>, vector<128x16xf32> -> vector<128x16xf32>
    %221 = arith.addf %197, %220 : vector<128x16xf32>
    %c0_66 = arith.constant 0 : index
    %c0_67 = arith.constant 0 : index
    %c0_68 = arith.constant 0 : index
    %222 = vector.load %arg9[%c0_66, %c0_67, %c0_68] : memref<1x16x16xf32, #tpu.memory_space<vmem>>, vector<1x16x16xf32>
    %223 = vector.shape_cast %222 : vector<1x16x16xf32> to vector<16x16xf32>
    %cst_69 = arith.constant dense<0.000000e+00> : vector<128x16xf32>
    %224 = tpu.matmul %221, %223, %cst_69 {dimension_numbers = #tpu.dot_dimension_numbers<[1], [0], [0], [1], [0, 0, 1, 1], [], []>} : vector<128x16xf32>, vector<16x16xf32>, vector<128x16xf32> -> vector<128x16xf32>
    %c0_70 = arith.constant 0 : index
    %c0_71 = arith.constant 0 : index
    %c0_72 = arith.constant 0 : index
    %225 = vector.load %arg10[%c0_70, %c0_71, %c0_72] : memref<1x1x16xf32, #tpu.memory_space<vmem>>, vector<1x1x16xf32>
    %226 = vector.shape_cast %225 : vector<1x1x16xf32> to vector<1x16xf32>
    %227 = vector.broadcast %226 : vector<1x16xf32> to vector<128x16xf32>
    %228 = arith.addf %224, %227 : vector<128x16xf32>
    %229 = arith.addf %3, %228 : vector<128x16xf32>
    %c0_73 = arith.constant 0 : index
    %c0_74 = arith.constant 0 : index
    %c0_75 = arith.constant 0 : index
    %230 = vector.load %arg11[%c0_73, %c0_74, %c0_75] : memref<1x1x16xf32, #tpu.memory_space<vmem>>, vector<1x1x16xf32>
    %231 = vector.shape_cast %230 : vector<1x1x16xf32> to vector<1x16xf32>
    %c0_76 = arith.constant 0 : index
    %c0_77 = arith.constant 0 : index
    %c0_78 = arith.constant 0 : index
    %232 = vector.load %arg12[%c0_76, %c0_77, %c0_78] : memref<1x1x16xf32, #tpu.memory_space<vmem>>, vector<1x1x16xf32>
    %233 = vector.shape_cast %232 : vector<1x1x16xf32> to vector<1x16xf32>
    %cst_79 = arith.constant dense<0.000000e+00> : vector<128xf32>
    %234 = vector.multi_reduction <add>, %229, %cst_79 [1] : vector<128x16xf32> to vector<128xf32>
    %235 = vector.shape_cast %234 : vector<128xf32> to vector<128x1xf32>
    %cst_80 = arith.constant 1.600000e+01 : f32
    %236 = vector.broadcast %cst_80 : f32 to vector<128x1xf32>
    %237 = arith.divf %235, %236 : vector<128x1xf32>
    %238 = vector.broadcast %237 : vector<128x1xf32> to vector<128x16xf32>
    %239 = arith.subf %229, %238 : vector<128x16xf32>
    %240 = arith.mulf %239, %239 : vector<128x16xf32>
    %cst_81 = arith.constant dense<0.000000e+00> : vector<128xf32>
    %241 = vector.multi_reduction <add>, %240, %cst_81 [1] : vector<128x16xf32> to vector<128xf32>
    %242 = vector.shape_cast %241 : vector<128xf32> to vector<128x1xf32>
    %cst_82 = arith.constant 1.600000e+01 : f32
    %243 = vector.broadcast %cst_82 : f32 to vector<128x1xf32>
    %244 = arith.divf %242, %243 : vector<128x1xf32>
    %cst_83 = arith.constant 9.99999974E-6 : f32
    %245 = vector.broadcast %cst_83 : f32 to vector<128x1xf32>
    %246 = arith.addf %244, %245 : vector<128x1xf32>
    %247 = math.rsqrt %246 : vector<128x1xf32>
    %248 = vector.broadcast %247 : vector<128x1xf32> to vector<128x16xf32>
    %249 = arith.mulf %239, %248 : vector<128x16xf32>
    %250 = vector.broadcast %231 : vector<1x16xf32> to vector<128x16xf32>
    %251 = arith.mulf %249, %250 : vector<128x16xf32>
    %252 = vector.broadcast %233 : vector<1x16xf32> to vector<128x16xf32>
    %253 = arith.addf %251, %252 : vector<128x16xf32>
    %c0_84 = arith.constant 0 : index
    %c0_85 = arith.constant 0 : index
    %c0_86 = arith.constant 0 : index
    %254 = vector.load %arg13[%c0_84, %c0_85, %c0_86] : memref<1x16x64xf32, #tpu.memory_space<vmem>>, vector<1x16x64xf32>
    %255 = vector.shape_cast %254 : vector<1x16x64xf32> to vector<16x64xf32>
    %cst_87 = arith.constant dense<0.000000e+00> : vector<128x64xf32>
    %256 = tpu.matmul %253, %255, %cst_87 {dimension_numbers = #tpu.dot_dimension_numbers<[1], [0], [0], [1], [0, 0, 1, 1], [], []>} : vector<128x16xf32>, vector<16x64xf32>, vector<128x64xf32> -> vector<128x64xf32>
    %c0_88 = arith.constant 0 : index
    %c0_89 = arith.constant 0 : index
    %c0_90 = arith.constant 0 : index
    %257 = vector.load %arg14[%c0_88, %c0_89, %c0_90] : memref<1x1x64xf32, #tpu.memory_space<vmem>>, vector<1x1x64xf32>
    %258 = vector.shape_cast %257 : vector<1x1x64xf32> to vector<1x64xf32>
    %259 = vector.broadcast %258 : vector<1x64xf32> to vector<128x64xf32>
    %260 = arith.addf %256, %259 : vector<128x64xf32>
    %cst_91 = arith.constant 5.000000e-01 : f32
    %261 = vector.broadcast %cst_91 : f32 to vector<128x64xf32>
    %262 = arith.mulf %261, %260 : vector<128x64xf32>
    %cst_92 = arith.constant 4.471500e-02 : f32
    %263 = vector.broadcast %cst_92 : f32 to vector<128x64xf32>
    %264 = arith.mulf %263, %260 : vector<128x64xf32>
    %265 = arith.mulf %264, %260 : vector<128x64xf32>
    %266 = arith.mulf %265, %260 : vector<128x64xf32>
    %267 = arith.addf %260, %266 : vector<128x64xf32>
    %cst_93 = arith.constant 0.797884583 : f32
    %268 = vector.broadcast %cst_93 : f32 to vector<128x64xf32>
    %269 = arith.mulf %268, %267 : vector<128x64xf32>
    %270 = math.tanh %269 : vector<128x64xf32>
    %cst_94 = arith.constant 1.000000e+00 : f32
    %271 = vector.broadcast %cst_94 : f32 to vector<128x64xf32>
    %272 = arith.addf %271, %270 : vector<128x64xf32>
    %273 = arith.mulf %262, %272 : vector<128x64xf32>
    %c0_95 = arith.constant 0 : index
    %c0_96 = arith.constant 0 : index
    %c0_97 = arith.constant 0 : index
    %274 = vector.load %arg15[%c0_95, %c0_96, %c0_97] : memref<1x64x16xf32, #tpu.memory_space<vmem>>, vector<1x64x16xf32>
    %275 = vector.shape_cast %274 : vector<1x64x16xf32> to vector<64x16xf32>
    %cst_98 = arith.constant dense<0.000000e+00> : vector<128x16xf32>
    %276 = tpu.matmul %273, %275, %cst_98 {dimension_numbers = #tpu.dot_dimension_numbers<[1], [0], [0], [1], [0, 0, 1, 1], [], []>} : vector<128x64xf32>, vector<64x16xf32>, vector<128x16xf32> -> vector<128x16xf32>
    %c0_99 = arith.constant 0 : index
    %c0_100 = arith.constant 0 : index
    %c0_101 = arith.constant 0 : index
    %277 = vector.load %arg16[%c0_99, %c0_100, %c0_101] : memref<1x1x16xf32, #tpu.memory_space<vmem>>, vector<1x1x16xf32>
    %278 = vector.shape_cast %277 : vector<1x1x16xf32> to vector<1x16xf32>
    %279 = vector.broadcast %278 : vector<1x16xf32> to vector<128x16xf32>
    %280 = arith.addf %276, %279 : vector<128x16xf32>
    %281 = arith.addf %253, %280 : vector<128x16xf32>
    %c0_102 = arith.constant 0 : index
    %c0_103 = arith.constant 0 : index
    %c0_104 = arith.constant 0 : index
    %282 = vector.load %arg17[%c0_102, %c0_103, %c0_104] : memref<1x1x16xf32, #tpu.memory_space<vmem>>, vector<1x1x16xf32>
    %283 = vector.shape_cast %282 : vector<1x1x16xf32> to vector<1x16xf32>
    %c0_105 = arith.constant 0 : index
    %c0_106 = arith.constant 0 : index
    %c0_107 = arith.constant 0 : index
    %284 = vector.load %arg18[%c0_105, %c0_106, %c0_107] : memref<1x1x16xf32, #tpu.memory_space<vmem>>, vector<1x1x16xf32>
    %285 = vector.shape_cast %284 : vector<1x1x16xf32> to vector<1x16xf32>
    %cst_108 = arith.constant dense<0.000000e+00> : vector<128xf32>
    %286 = vector.multi_reduction <add>, %281, %cst_108 [1] : vector<128x16xf32> to vector<128xf32>
    %287 = vector.shape_cast %286 : vector<128xf32> to vector<128x1xf32>
    %cst_109 = arith.constant 1.600000e+01 : f32
    %288 = vector.broadcast %cst_109 : f32 to vector<128x1xf32>
    %289 = arith.divf %287, %288 : vector<128x1xf32>
    %290 = vector.broadcast %289 : vector<128x1xf32> to vector<128x16xf32>
    %291 = arith.subf %281, %290 : vector<128x16xf32>
    %292 = arith.mulf %291, %291 : vector<128x16xf32>
    %cst_110 = arith.constant dense<0.000000e+00> : vector<128xf32>
    %293 = vector.multi_reduction <add>, %292, %cst_110 [1] : vector<128x16xf32> to vector<128xf32>
    %294 = vector.shape_cast %293 : vector<128xf32> to vector<128x1xf32>
    %cst_111 = arith.constant 1.600000e+01 : f32
    %295 = vector.broadcast %cst_111 : f32 to vector<128x1xf32>
    %296 = arith.divf %294, %295 : vector<128x1xf32>
    %cst_112 = arith.constant 9.99999974E-6 : f32
    %297 = vector.broadcast %cst_112 : f32 to vector<128x1xf32>
    %298 = arith.addf %296, %297 : vector<128x1xf32>
    %299 = math.rsqrt %298 : vector<128x1xf32>
    %300 = vector.broadcast %299 : vector<128x1xf32> to vector<128x16xf32>
    %301 = arith.mulf %291, %300 : vector<128x16xf32>
    %302 = vector.broadcast %283 : vector<1x16xf32> to vector<128x16xf32>
    %303 = arith.mulf %301, %302 : vector<128x16xf32>
    %304 = vector.broadcast %285 : vector<1x16xf32> to vector<128x16xf32>
    %305 = arith.addf %303, %304 : vector<128x16xf32>
    %c0_113 = arith.constant 0 : index
    %c0_114 = arith.constant 0 : index
    %306 = vector.load %arg19[%c0_113, %c0_114] : memref<128x16xf32, #tpu.memory_space<vmem>>, vector<128x16xf32>
    tpu.vector_store %arg19[%c0_113, %c0_114], %305 {strides = array<i32>} : memref<128x16xf32, #tpu.memory_space<vmem>>, vector<128x16xf32>,
    return
  }
  func.func @transform_0(%arg0: i32) -> (i32, i32) {
    %c0_i32 = arith.constant 0 : i32
    %c0_i32_0 = arith.constant 0 : i32
    %c0_i32_1 = arith.constant 0 : i32
    return %c0_i32, %c0_i32_0 : i32, i32
  }
  func.func @transform_1(%arg0: i32) -> (i32, i32) {
    %c0_i32 = arith.constant 0 : i32
    %c0_i32_0 = arith.constant 0 : i32
    %c0_i32_1 = arith.constant 0 : i32
    return %c0_i32, %c0_i32_0 : i32, i32
  }
  func.func @transform_2(%arg0: i32) -> (i32, i32, i32) {
    %c0_i32 = arith.constant 0 : i32
    %c0_i32_0 = arith.constant 0 : i32
    %c0_i32_1 = arith.constant 0 : i32
    return %arg0, %c0_i32, %c0_i32_0 : i32, i32, i32
  }
  func.func @transform_3(%arg0: i32) -> (i32, i32, i32) {
    %c0_i32 = arith.constant 0 : i32
    %c0_i32_0 = arith.constant 0 : i32
    %c0_i32_1 = arith.constant 0 : i32
    return %arg0, %c0_i32, %c0_i32_0 : i32, i32, i32
  }
  func.func @transform_4(%arg0: i32) -> (i32, i32, i32) {
    %c0_i32 = arith.constant 0 : i32
    %c0_i32_0 = arith.constant 0 : i32
    %c0_i32_1 = arith.constant 0 : i32
    return %arg0, %c0_i32, %c0_i32_0 : i32, i32, i32
  }
  func.func @transform_5(%arg0: i32) -> (i32, i32, i32) {
    %c0_i32 = arith.constant 0 : i32
    %c0_i32_0 = arith.constant 0 : i32
    %c0_i32_1 = arith.constant 0 : i32
    return %arg0, %c0_i32, %c0_i32_0 : i32, i32, i32
  }
  func.func @transform_6(%arg0: i32) -> (i32, i32, i32) {
    %c0_i32 = arith.constant 0 : i32
    %c0_i32_0 = arith.constant 0 : i32
    %c0_i32_1 = arith.constant 0 : i32
    return %arg0, %c0_i32, %c0_i32_0 : i32, i32, i32
  }
  func.func @transform_7(%arg0: i32) -> (i32, i32, i32) {
    %c0_i32 = arith.constant 0 : i32
    %c0_i32_0 = arith.constant 0 : i32
    %c0_i32_1 = arith.constant 0 : i32
    return %arg0, %c0_i32, %c0_i32_0 : i32, i32, i32
  }
  func.func @transform_8(%arg0: i32) -> (i32, i32, i32) {
    %c0_i32 = arith.constant 0 : i32
    %c0_i32_0 = arith.constant 0 : i32
    %c0_i32_1 = arith.constant 0 : i32
    return %arg0, %c0_i32, %c0_i32_0 : i32, i32, i32
  }
  func.func @transform_9(%arg0: i32) -> (i32, i32, i32) {
    %c0_i32 = arith.constant 0 : i32
    %c0_i32_0 = arith.constant 0 : i32
    %c0_i32_1 = arith.constant 0 : i32
    return %arg0, %c0_i32, %c0_i32_0 : i32, i32, i32
  }
  func.func @transform_10(%arg0: i32) -> (i32, i32, i32) {
    %c0_i32 = arith.constant 0 : i32
    %c0_i32_0 = arith.constant 0 : i32
    %c0_i32_1 = arith.constant 0 : i32
    return %arg0, %c0_i32, %c0_i32_0 : i32, i32, i32
  }
  func.func @transform_11(%arg0: i32) -> (i32, i32, i32) {
    %c0_i32 = arith.constant 0 : i32
    %c0_i32_0 = arith.constant 0 : i32
    %c0_i32_1 = arith.constant 0 : i32
    return %arg0, %c0_i32, %c0_i32_0 : i32, i32, i32
  }
  func.func @transform_12(%arg0: i32) -> (i32, i32, i32) {
    %c0_i32 = arith.constant 0 : i32
    %c0_i32_0 = arith.constant 0 : i32
    %c0_i32_1 = arith.constant 0 : i32
    return %arg0, %c0_i32, %c0_i32_0 : i32, i32, i32
  }
  func.func @transform_13(%arg0: i32) -> (i32, i32, i32) {
    %c0_i32 = arith.constant 0 : i32
    %c0_i32_0 = arith.constant 0 : i32
    %c0_i32_1 = arith.constant 0 : i32
    return %arg0, %c0_i32, %c0_i32_0 : i32, i32, i32
  }
  func.func @transform_14(%arg0: i32) -> (i32, i32, i32) {
    %c0_i32 = arith.constant 0 : i32
    %c0_i32_0 = arith.constant 0 : i32
    %c0_i32_1 = arith.constant 0 : i32
    return %arg0, %c0_i32, %c0_i32_0 : i32, i32, i32
  }
  func.func @transform_15(%arg0: i32) -> (i32, i32, i32) {
    %c0_i32 = arith.constant 0 : i32
    %c0_i32_0 = arith.constant 0 : i32
    %c0_i32_1 = arith.constant 0 : i32
    return %arg0, %c0_i32, %c0_i32_0 : i32, i32, i32
  }
  func.func @transform_16(%arg0: i32) -> (i32, i32, i32) {
    %c0_i32 = arith.constant 0 : i32
    %c0_i32_0 = arith.constant 0 : i32
    %c0_i32_1 = arith.constant 0 : i32
    return %arg0, %c0_i32, %c0_i32_0 : i32, i32, i32
  }
  func.func @transform_17(%arg0: i32) -> (i32, i32, i32) {
    %c0_i32 = arith.constant 0 : i32
    %c0_i32_0 = arith.constant 0 : i32
    %c0_i32_1 = arith.constant 0 : i32
    return %arg0, %c0_i32, %c0_i32_0 : i32, i32, i32
  }
  func.func @transform_18(%arg0: i32) -> (i32, i32) {
    %c0_i32 = arith.constant 0 : i32
    %c0_i32_0 = arith.constant 0 : i32
    %c0_i32_1 = arith.constant 0 : i32
    return %c0_i32, %c0_i32_0 : i32, i32
  }
}

module attributes {stable_mosaic.version = 11 : i64} {
  func.func @_encoder_stack_kernel(%arg0: i32, %arg1: memref<18x64xf32, #tpu.memory_space<vmem>>, %arg2: memref<18x18xf32, #tpu.memory_space<vmem>>, %arg3: memref<1x64x64xf32, #tpu.memory_space<vmem>>, %arg4: memref<1x1x64xf32, #tpu.memory_space<vmem>>, %arg5: memref<1x64x64xf32, #tpu.memory_space<vmem>>, %arg6: memref<1x1x64xf32, #tpu.memory_space<vmem>>, %arg7: memref<1x64x64xf32, #tpu.memory_space<vmem>>, %arg8: memref<1x1x64xf32, #tpu.memory_space<vmem>>, %arg9: memref<1x64x64xf32, #tpu.memory_space<vmem>>, %arg10: memref<1x1x64xf32, #tpu.memory_space<vmem>>, %arg11: memref<1x1x64xf32, #tpu.memory_space<vmem>>, %arg12: memref<1x1x64xf32, #tpu.memory_space<vmem>>, %arg13: memref<1x64x256xf32, #tpu.memory_space<vmem>>, %arg14: memref<1x1x256xf32, #tpu.memory_space<vmem>>, %arg15: memref<1x256x64xf32, #tpu.memory_space<vmem>>, %arg16: memref<1x1x64xf32, #tpu.memory_space<vmem>>, %arg17: memref<1x1x64xf32, #tpu.memory_space<vmem>>, %arg18: memref<1x1x64xf32, #tpu.memory_space<vmem>>, %arg19: memref<18x64xf32, #tpu.memory_space<vmem>>) attributes {dimension_semantics = [#tpu.dimension_semantics<arbitrary>], iteration_bounds = array<i64: 6>, scalar_prefetch = 0 : i64, scratch_operands = 0 : i64, tpu.core_type = #tpu.core_type<tc>, window_params = [{pipeline_mode = #tpu.pipeline_mode<synchronous>, transform_indices = @transform_0, window_bounds = array<i64: 18, 64>}, {pipeline_mode = #tpu.pipeline_mode<synchronous>, transform_indices = @transform_1, window_bounds = array<i64: 18, 18>}, {transform_indices = @transform_2, window_bounds = array<i64: 1, 64, 64>}, {transform_indices = @transform_3, window_bounds = array<i64: 1, 1, 64>}, {transform_indices = @transform_4, window_bounds = array<i64: 1, 64, 64>}, {transform_indices = @transform_5, window_bounds = array<i64: 1, 1, 64>}, {transform_indices = @transform_6, window_bounds = array<i64: 1, 64, 64>}, {transform_indices = @transform_7, window_bounds = array<i64: 1, 1, 64>}, {transform_indices = @transform_8, window_bounds = array<i64: 1, 64, 64>}, {transform_indices = @transform_9, window_bounds = array<i64: 1, 1, 64>}, {transform_indices = @transform_10, window_bounds = array<i64: 1, 1, 64>}, {transform_indices = @transform_11, window_bounds = array<i64: 1, 1, 64>}, {transform_indices = @transform_12, window_bounds = array<i64: 1, 64, 256>}, {transform_indices = @transform_13, window_bounds = array<i64: 1, 1, 256>}, {transform_indices = @transform_14, window_bounds = array<i64: 1, 256, 64>}, {transform_indices = @transform_15, window_bounds = array<i64: 1, 1, 64>}, {transform_indices = @transform_16, window_bounds = array<i64: 1, 1, 64>}, {transform_indices = @transform_17, window_bounds = array<i64: 1, 1, 64>}, {pipeline_mode = #tpu.pipeline_mode<synchronous>, transform_indices = @transform_18, window_bounds = array<i64: 18, 64>}]} {
    %c0_i32 = arith.constant 0 : i32
    %0 = arith.cmpi eq, %arg0, %c0_i32 : i32
    %1 = arith.extui %0 : i1 to i32
    %c0_i32_0 = arith.constant 0 : i32
    %2 = arith.cmpi ne, %1, %c0_i32_0 : i32
    scf.if %2 {
      %c0_115 = arith.constant 0 : index
      %c0_116 = arith.constant 0 : index
      %307 = vector.load %arg1[%c0_115, %c0_116] : memref<18x64xf32, #tpu.memory_space<vmem>>, vector<18x64xf32>
      %c0_117 = arith.constant 0 : index
      %c0_118 = arith.constant 0 : index
      %308 = vector.load %arg19[%c0_117, %c0_118] : memref<18x64xf32, #tpu.memory_space<vmem>>, vector<18x64xf32>
      tpu.vector_store %arg19[%c0_117, %c0_118], %307 {strides = array<i32>} : memref<18x64xf32, #tpu.memory_space<vmem>>, vector<18x64xf32>,
    } else {
    }
    %c0 = arith.constant 0 : index
    %c0_1 = arith.constant 0 : index
    %3 = vector.load %arg19[%c0, %c0_1] : memref<18x64xf32, #tpu.memory_space<vmem>>, vector<18x64xf32>
    %c0_2 = arith.constant 0 : index
    %c0_3 = arith.constant 0 : index
    %4 = vector.load %arg2[%c0_2, %c0_3] : memref<18x18xf32, #tpu.memory_space<vmem>>, vector<18x18xf32>
    %c0_4 = arith.constant 0 : index
    %c0_5 = arith.constant 0 : index
    %c0_6 = arith.constant 0 : index
    %5 = vector.load %arg3[%c0_4, %c0_5, %c0_6] : memref<1x64x64xf32, #tpu.memory_space<vmem>>, vector<1x64x64xf32>
    %6 = vector.shape_cast %5 : vector<1x64x64xf32> to vector<64x64xf32>
    %cst = arith.constant dense<0.000000e+00> : vector<18x64xf32>
    %7 = tpu.matmul %3, %6, %cst {dimension_numbers = #tpu.dot_dimension_numbers<[1], [0], [0], [1], [0, 0, 1, 1], [], []>} : vector<18x64xf32>, vector<64x64xf32>, vector<18x64xf32> -> vector<18x64xf32>
    %c0_7 = arith.constant 0 : index
    %c0_8 = arith.constant 0 : index
    %c0_9 = arith.constant 0 : index
    %8 = vector.load %arg4[%c0_7, %c0_8, %c0_9] : memref<1x1x64xf32, #tpu.memory_space<vmem>>, vector<1x1x64xf32>
    %9 = vector.shape_cast %8 : vector<1x1x64xf32> to vector<1x64xf32>
    %10 = vector.broadcast %9 : vector<1x64xf32> to vector<18x64xf32>
    %11 = arith.addf %7, %10 : vector<18x64xf32>
    %cst_10 = arith.constant 0.353553385 : f32
    %12 = vector.broadcast %cst_10 : f32 to vector<18x64xf32>
    %13 = arith.mulf %11, %12 : vector<18x64xf32>
    %c0_11 = arith.constant 0 : index
    %c0_12 = arith.constant 0 : index
    %c0_13 = arith.constant 0 : index
    %14 = vector.load %arg5[%c0_11, %c0_12, %c0_13] : memref<1x64x64xf32, #tpu.memory_space<vmem>>, vector<1x64x64xf32>
    %15 = vector.shape_cast %14 : vector<1x64x64xf32> to vector<64x64xf32>
    %cst_14 = arith.constant dense<0.000000e+00> : vector<18x64xf32>
    %16 = tpu.matmul %3, %15, %cst_14 {dimension_numbers = #tpu.dot_dimension_numbers<[1], [0], [0], [1], [0, 0, 1, 1], [], []>} : vector<18x64xf32>, vector<64x64xf32>, vector<18x64xf32> -> vector<18x64xf32>
    %c0_15 = arith.constant 0 : index
    %c0_16 = arith.constant 0 : index
    %c0_17 = arith.constant 0 : index
    %17 = vector.load %arg6[%c0_15, %c0_16, %c0_17] : memref<1x1x64xf32, #tpu.memory_space<vmem>>, vector<1x1x64xf32>
    %18 = vector.shape_cast %17 : vector<1x1x64xf32> to vector<1x64xf32>
    %19 = vector.broadcast %18 : vector<1x64xf32> to vector<18x64xf32>
    %20 = arith.addf %16, %19 : vector<18x64xf32>
    %c0_18 = arith.constant 0 : index
    %c0_19 = arith.constant 0 : index
    %c0_20 = arith.constant 0 : index
    %21 = vector.load %arg7[%c0_18, %c0_19, %c0_20] : memref<1x64x64xf32, #tpu.memory_space<vmem>>, vector<1x64x64xf32>
    %22 = vector.shape_cast %21 : vector<1x64x64xf32> to vector<64x64xf32>
    %cst_21 = arith.constant dense<0.000000e+00> : vector<18x64xf32>
    %23 = tpu.matmul %3, %22, %cst_21 {dimension_numbers = #tpu.dot_dimension_numbers<[1], [0], [0], [1], [0, 0, 1, 1], [], []>} : vector<18x64xf32>, vector<64x64xf32>, vector<18x64xf32> -> vector<18x64xf32>
    %c0_22 = arith.constant 0 : index
    %c0_23 = arith.constant 0 : index
    %c0_24 = arith.constant 0 : index
    %24 = vector.load %arg8[%c0_22, %c0_23, %c0_24] : memref<1x1x64xf32, #tpu.memory_space<vmem>>, vector<1x1x64xf32>
    %25 = vector.shape_cast %24 : vector<1x1x64xf32> to vector<1x64xf32>
    %26 = vector.broadcast %25 : vector<1x64xf32> to vector<18x64xf32>
    %27 = arith.addf %23, %26 : vector<18x64xf32>
    %28 = tpu.iota {dimensions = array<i32: 1>} : vector<1x64xi32>
    %cst_25 = arith.constant 0.000000e+00 : f32
    %29 = vector.broadcast %cst_25 : f32 to vector<18x64xf32>
    %c0_i32_26 = arith.constant 0 : i32
    %30 = vector.broadcast %c0_i32_26 : i32 to vector<1x64xi32>
    %31 = arith.cmpi sge, %28, %30 : vector<1x64xi32>
    %c8_i32 = arith.constant 8 : i32
    %32 = vector.broadcast %c8_i32 : i32 to vector<1x64xi32>
    %33 = arith.cmpi slt, %28, %32 : vector<1x64xi32>
    %34 = arith.andi %31, %33 : vector<1x64xi1>
    %35 = arith.extui %34 : vector<1x64xi1> to vector<1x64xi32>
    %36 = arith.sitofp %35 : vector<1x64xi32> to vector<1x64xf32>
    %37 = vector.broadcast %36 : vector<1x64xf32> to vector<18x64xf32>
    %38 = arith.mulf %13, %37 : vector<18x64xf32>
    %39 = vector.broadcast %36 : vector<1x64xf32> to vector<18x64xf32>
    %40 = arith.mulf %27, %39 : vector<18x64xf32>
    "tpu.trace_start"() <{level = 10 : i32, message = "se,te->st"}> : () -> ()
    %cst_27 = arith.constant dense<0.000000e+00> : vector<18x18xf32>
    %41 = tpu.matmul %38, %20, %cst_27 {dimension_numbers = #tpu.dot_dimension_numbers<[1], [1], [0], [0], [0, 0, 1, 0], [], []>} : vector<18x64xf32>, vector<18x64xf32>, vector<18x18xf32> -> vector<18x18xf32>
    "tpu.trace_stop"() : () -> ()
    %42 = arith.addf %41, %4 : vector<18x18xf32>
    %cst_28 = arith.constant dense<0xFF800000> : vector<18xf32>
    %43 = vector.multi_reduction <maximumf>, %42, %cst_28 [1] : vector<18x18xf32> to vector<18xf32>
    %44 = vector.shape_cast %43 : vector<18xf32> to vector<18x1xf32>
    %45 = vector.broadcast %44 : vector<18x1xf32> to vector<18x18xf32>
    %46 = arith.subf %42, %45 : vector<18x18xf32>
    %47 = math.exp %46 : vector<18x18xf32>
    %cst_29 = arith.constant dense<0.000000e+00> : vector<18xf32>
    %48 = vector.multi_reduction <add>, %47, %cst_29 [1] : vector<18x18xf32> to vector<18xf32>
    %49 = vector.shape_cast %48 : vector<18xf32> to vector<18x1xf32>
    %50 = vector.broadcast %49 : vector<18x1xf32> to vector<18x18xf32>
    %51 = arith.divf %47, %50 : vector<18x18xf32>
    %cst_30 = arith.constant dense<0.000000e+00> : vector<18x64xf32>
    %52 = tpu.matmul %51, %40, %cst_30 {dimension_numbers = #tpu.dot_dimension_numbers<[1], [0], [0], [1], [0, 0, 1, 1], [], []>} : vector<18x18xf32>, vector<18x64xf32>, vector<18x64xf32> -> vector<18x64xf32>
    %53 = arith.addf %29, %52 : vector<18x64xf32>
    %c8_i32_31 = arith.constant 8 : i32
    %54 = vector.broadcast %c8_i32_31 : i32 to vector<1x64xi32>
    %55 = arith.cmpi sge, %28, %54 : vector<1x64xi32>
    %c16_i32 = arith.constant 16 : i32
    %56 = vector.broadcast %c16_i32 : i32 to vector<1x64xi32>
    %57 = arith.cmpi slt, %28, %56 : vector<1x64xi32>
    %58 = arith.andi %55, %57 : vector<1x64xi1>
    %59 = arith.extui %58 : vector<1x64xi1> to vector<1x64xi32>
    %60 = arith.sitofp %59 : vector<1x64xi32> to vector<1x64xf32>
    %61 = vector.broadcast %60 : vector<1x64xf32> to vector<18x64xf32>
    %62 = arith.mulf %13, %61 : vector<18x64xf32>
    %63 = vector.broadcast %60 : vector<1x64xf32> to vector<18x64xf32>
    %64 = arith.mulf %27, %63 : vector<18x64xf32>
    "tpu.trace_start"() <{level = 10 : i32, message = "se,te->st"}> : () -> ()
    %cst_32 = arith.constant dense<0.000000e+00> : vector<18x18xf32>
    %65 = tpu.matmul %62, %20, %cst_32 {dimension_numbers = #tpu.dot_dimension_numbers<[1], [1], [0], [0], [0, 0, 1, 0], [], []>} : vector<18x64xf32>, vector<18x64xf32>, vector<18x18xf32> -> vector<18x18xf32>
    "tpu.trace_stop"() : () -> ()
    %66 = arith.addf %65, %4 : vector<18x18xf32>
    %cst_33 = arith.constant dense<0xFF800000> : vector<18xf32>
    %67 = vector.multi_reduction <maximumf>, %66, %cst_33 [1] : vector<18x18xf32> to vector<18xf32>
    %68 = vector.shape_cast %67 : vector<18xf32> to vector<18x1xf32>
    %69 = vector.broadcast %68 : vector<18x1xf32> to vector<18x18xf32>
    %70 = arith.subf %66, %69 : vector<18x18xf32>
    %71 = math.exp %70 : vector<18x18xf32>
    %cst_34 = arith.constant dense<0.000000e+00> : vector<18xf32>
    %72 = vector.multi_reduction <add>, %71, %cst_34 [1] : vector<18x18xf32> to vector<18xf32>
    %73 = vector.shape_cast %72 : vector<18xf32> to vector<18x1xf32>
    %74 = vector.broadcast %73 : vector<18x1xf32> to vector<18x18xf32>
    %75 = arith.divf %71, %74 : vector<18x18xf32>
    %cst_35 = arith.constant dense<0.000000e+00> : vector<18x64xf32>
    %76 = tpu.matmul %75, %64, %cst_35 {dimension_numbers = #tpu.dot_dimension_numbers<[1], [0], [0], [1], [0, 0, 1, 1], [], []>} : vector<18x18xf32>, vector<18x64xf32>, vector<18x64xf32> -> vector<18x64xf32>
    %77 = arith.addf %53, %76 : vector<18x64xf32>
    %c16_i32_36 = arith.constant 16 : i32
    %78 = vector.broadcast %c16_i32_36 : i32 to vector<1x64xi32>
    %79 = arith.cmpi sge, %28, %78 : vector<1x64xi32>
    %c24_i32 = arith.constant 24 : i32
    %80 = vector.broadcast %c24_i32 : i32 to vector<1x64xi32>
    %81 = arith.cmpi slt, %28, %80 : vector<1x64xi32>
    %82 = arith.andi %79, %81 : vector<1x64xi1>
    %83 = arith.extui %82 : vector<1x64xi1> to vector<1x64xi32>
    %84 = arith.sitofp %83 : vector<1x64xi32> to vector<1x64xf32>
    %85 = vector.broadcast %84 : vector<1x64xf32> to vector<18x64xf32>
    %86 = arith.mulf %13, %85 : vector<18x64xf32>
    %87 = vector.broadcast %84 : vector<1x64xf32> to vector<18x64xf32>
    %88 = arith.mulf %27, %87 : vector<18x64xf32>
    "tpu.trace_start"() <{level = 10 : i32, message = "se,te->st"}> : () -> ()
    %cst_37 = arith.constant dense<0.000000e+00> : vector<18x18xf32>
    %89 = tpu.matmul %86, %20, %cst_37 {dimension_numbers = #tpu.dot_dimension_numbers<[1], [1], [0], [0], [0, 0, 1, 0], [], []>} : vector<18x64xf32>, vector<18x64xf32>, vector<18x18xf32> -> vector<18x18xf32>
    "tpu.trace_stop"() : () -> ()
    %90 = arith.addf %89, %4 : vector<18x18xf32>
    %cst_38 = arith.constant dense<0xFF800000> : vector<18xf32>
    %91 = vector.multi_reduction <maximumf>, %90, %cst_38 [1] : vector<18x18xf32> to vector<18xf32>
    %92 = vector.shape_cast %91 : vector<18xf32> to vector<18x1xf32>
    %93 = vector.broadcast %92 : vector<18x1xf32> to vector<18x18xf32>
    %94 = arith.subf %90, %93 : vector<18x18xf32>
    %95 = math.exp %94 : vector<18x18xf32>
    %cst_39 = arith.constant dense<0.000000e+00> : vector<18xf32>
    %96 = vector.multi_reduction <add>, %95, %cst_39 [1] : vector<18x18xf32> to vector<18xf32>
    %97 = vector.shape_cast %96 : vector<18xf32> to vector<18x1xf32>
    %98 = vector.broadcast %97 : vector<18x1xf32> to vector<18x18xf32>
    %99 = arith.divf %95, %98 : vector<18x18xf32>
    %cst_40 = arith.constant dense<0.000000e+00> : vector<18x64xf32>
    %100 = tpu.matmul %99, %88, %cst_40 {dimension_numbers = #tpu.dot_dimension_numbers<[1], [0], [0], [1], [0, 0, 1, 1], [], []>} : vector<18x18xf32>, vector<18x64xf32>, vector<18x64xf32> -> vector<18x64xf32>
    %101 = arith.addf %77, %100 : vector<18x64xf32>
    %c24_i32_41 = arith.constant 24 : i32
    %102 = vector.broadcast %c24_i32_41 : i32 to vector<1x64xi32>
    %103 = arith.cmpi sge, %28, %102 : vector<1x64xi32>
    %c32_i32 = arith.constant 32 : i32
    %104 = vector.broadcast %c32_i32 : i32 to vector<1x64xi32>
    %105 = arith.cmpi slt, %28, %104 : vector<1x64xi32>
    %106 = arith.andi %103, %105 : vector<1x64xi1>
    %107 = arith.extui %106 : vector<1x64xi1> to vector<1x64xi32>
    %108 = arith.sitofp %107 : vector<1x64xi32> to vector<1x64xf32>
    %109 = vector.broadcast %108 : vector<1x64xf32> to vector<18x64xf32>
    %110 = arith.mulf %13, %109 : vector<18x64xf32>
    %111 = vector.broadcast %108 : vector<1x64xf32> to vector<18x64xf32>
    %112 = arith.mulf %27, %111 : vector<18x64xf32>
    "tpu.trace_start"() <{level = 10 : i32, message = "se,te->st"}> : () -> ()
    %cst_42 = arith.constant dense<0.000000e+00> : vector<18x18xf32>
    %113 = tpu.matmul %110, %20, %cst_42 {dimension_numbers = #tpu.dot_dimension_numbers<[1], [1], [0], [0], [0, 0, 1, 0], [], []>} : vector<18x64xf32>, vector<18x64xf32>, vector<18x18xf32> -> vector<18x18xf32>
    "tpu.trace_stop"() : () -> ()
    %114 = arith.addf %113, %4 : vector<18x18xf32>
    %cst_43 = arith.constant dense<0xFF800000> : vector<18xf32>
    %115 = vector.multi_reduction <maximumf>, %114, %cst_43 [1] : vector<18x18xf32> to vector<18xf32>
    %116 = vector.shape_cast %115 : vector<18xf32> to vector<18x1xf32>
    %117 = vector.broadcast %116 : vector<18x1xf32> to vector<18x18xf32>
    %118 = arith.subf %114, %117 : vector<18x18xf32>
    %119 = math.exp %118 : vector<18x18xf32>
    %cst_44 = arith.constant dense<0.000000e+00> : vector<18xf32>
    %120 = vector.multi_reduction <add>, %119, %cst_44 [1] : vector<18x18xf32> to vector<18xf32>
    %121 = vector.shape_cast %120 : vector<18xf32> to vector<18x1xf32>
    %122 = vector.broadcast %121 : vector<18x1xf32> to vector<18x18xf32>
    %123 = arith.divf %119, %122 : vector<18x18xf32>
    %cst_45 = arith.constant dense<0.000000e+00> : vector<18x64xf32>
    %124 = tpu.matmul %123, %112, %cst_45 {dimension_numbers = #tpu.dot_dimension_numbers<[1], [0], [0], [1], [0, 0, 1, 1], [], []>} : vector<18x18xf32>, vector<18x64xf32>, vector<18x64xf32> -> vector<18x64xf32>
    %125 = arith.addf %101, %124 : vector<18x64xf32>
    %c32_i32_46 = arith.constant 32 : i32
    %126 = vector.broadcast %c32_i32_46 : i32 to vector<1x64xi32>
    %127 = arith.cmpi sge, %28, %126 : vector<1x64xi32>
    %c40_i32 = arith.constant 40 : i32
    %128 = vector.broadcast %c40_i32 : i32 to vector<1x64xi32>
    %129 = arith.cmpi slt, %28, %128 : vector<1x64xi32>
    %130 = arith.andi %127, %129 : vector<1x64xi1>
    %131 = arith.extui %130 : vector<1x64xi1> to vector<1x64xi32>
    %132 = arith.sitofp %131 : vector<1x64xi32> to vector<1x64xf32>
    %133 = vector.broadcast %132 : vector<1x64xf32> to vector<18x64xf32>
    %134 = arith.mulf %13, %133 : vector<18x64xf32>
    %135 = vector.broadcast %132 : vector<1x64xf32> to vector<18x64xf32>
    %136 = arith.mulf %27, %135 : vector<18x64xf32>
    "tpu.trace_start"() <{level = 10 : i32, message = "se,te->st"}> : () -> ()
    %cst_47 = arith.constant dense<0.000000e+00> : vector<18x18xf32>
    %137 = tpu.matmul %134, %20, %cst_47 {dimension_numbers = #tpu.dot_dimension_numbers<[1], [1], [0], [0], [0, 0, 1, 0], [], []>} : vector<18x64xf32>, vector<18x64xf32>, vector<18x18xf32> -> vector<18x18xf32>
    "tpu.trace_stop"() : () -> ()
    %138 = arith.addf %137, %4 : vector<18x18xf32>
    %cst_48 = arith.constant dense<0xFF800000> : vector<18xf32>
    %139 = vector.multi_reduction <maximumf>, %138, %cst_48 [1] : vector<18x18xf32> to vector<18xf32>
    %140 = vector.shape_cast %139 : vector<18xf32> to vector<18x1xf32>
    %141 = vector.broadcast %140 : vector<18x1xf32> to vector<18x18xf32>
    %142 = arith.subf %138, %141 : vector<18x18xf32>
    %143 = math.exp %142 : vector<18x18xf32>
    %cst_49 = arith.constant dense<0.000000e+00> : vector<18xf32>
    %144 = vector.multi_reduction <add>, %143, %cst_49 [1] : vector<18x18xf32> to vector<18xf32>
    %145 = vector.shape_cast %144 : vector<18xf32> to vector<18x1xf32>
    %146 = vector.broadcast %145 : vector<18x1xf32> to vector<18x18xf32>
    %147 = arith.divf %143, %146 : vector<18x18xf32>
    %cst_50 = arith.constant dense<0.000000e+00> : vector<18x64xf32>
    %148 = tpu.matmul %147, %136, %cst_50 {dimension_numbers = #tpu.dot_dimension_numbers<[1], [0], [0], [1], [0, 0, 1, 1], [], []>} : vector<18x18xf32>, vector<18x64xf32>, vector<18x64xf32> -> vector<18x64xf32>
    %149 = arith.addf %125, %148 : vector<18x64xf32>
    %c40_i32_51 = arith.constant 40 : i32
    %150 = vector.broadcast %c40_i32_51 : i32 to vector<1x64xi32>
    %151 = arith.cmpi sge, %28, %150 : vector<1x64xi32>
    %c48_i32 = arith.constant 48 : i32
    %152 = vector.broadcast %c48_i32 : i32 to vector<1x64xi32>
    %153 = arith.cmpi slt, %28, %152 : vector<1x64xi32>
    %154 = arith.andi %151, %153 : vector<1x64xi1>
    %155 = arith.extui %154 : vector<1x64xi1> to vector<1x64xi32>
    %156 = arith.sitofp %155 : vector<1x64xi32> to vector<1x64xf32>
    %157 = vector.broadcast %156 : vector<1x64xf32> to vector<18x64xf32>
    %158 = arith.mulf %13, %157 : vector<18x64xf32>
    %159 = vector.broadcast %156 : vector<1x64xf32> to vector<18x64xf32>
    %160 = arith.mulf %27, %159 : vector<18x64xf32>
    "tpu.trace_start"() <{level = 10 : i32, message = "se,te->st"}> : () -> ()
    %cst_52 = arith.constant dense<0.000000e+00> : vector<18x18xf32>
    %161 = tpu.matmul %158, %20, %cst_52 {dimension_numbers = #tpu.dot_dimension_numbers<[1], [1], [0], [0], [0, 0, 1, 0], [], []>} : vector<18x64xf32>, vector<18x64xf32>, vector<18x18xf32> -> vector<18x18xf32>
    "tpu.trace_stop"() : () -> ()
    %162 = arith.addf %161, %4 : vector<18x18xf32>
    %cst_53 = arith.constant dense<0xFF800000> : vector<18xf32>
    %163 = vector.multi_reduction <maximumf>, %162, %cst_53 [1] : vector<18x18xf32> to vector<18xf32>
    %164 = vector.shape_cast %163 : vector<18xf32> to vector<18x1xf32>
    %165 = vector.broadcast %164 : vector<18x1xf32> to vector<18x18xf32>
    %166 = arith.subf %162, %165 : vector<18x18xf32>
    %167 = math.exp %166 : vector<18x18xf32>
    %cst_54 = arith.constant dense<0.000000e+00> : vector<18xf32>
    %168 = vector.multi_reduction <add>, %167, %cst_54 [1] : vector<18x18xf32> to vector<18xf32>
    %169 = vector.shape_cast %168 : vector<18xf32> to vector<18x1xf32>
    %170 = vector.broadcast %169 : vector<18x1xf32> to vector<18x18xf32>
    %171 = arith.divf %167, %170 : vector<18x18xf32>
    %cst_55 = arith.constant dense<0.000000e+00> : vector<18x64xf32>
    %172 = tpu.matmul %171, %160, %cst_55 {dimension_numbers = #tpu.dot_dimension_numbers<[1], [0], [0], [1], [0, 0, 1, 1], [], []>} : vector<18x18xf32>, vector<18x64xf32>, vector<18x64xf32> -> vector<18x64xf32>
    %173 = arith.addf %149, %172 : vector<18x64xf32>
    %c48_i32_56 = arith.constant 48 : i32
    %174 = vector.broadcast %c48_i32_56 : i32 to vector<1x64xi32>
    %175 = arith.cmpi sge, %28, %174 : vector<1x64xi32>
    %c56_i32 = arith.constant 56 : i32
    %176 = vector.broadcast %c56_i32 : i32 to vector<1x64xi32>
    %177 = arith.cmpi slt, %28, %176 : vector<1x64xi32>
    %178 = arith.andi %175, %177 : vector<1x64xi1>
    %179 = arith.extui %178 : vector<1x64xi1> to vector<1x64xi32>
    %180 = arith.sitofp %179 : vector<1x64xi32> to vector<1x64xf32>
    %181 = vector.broadcast %180 : vector<1x64xf32> to vector<18x64xf32>
    %182 = arith.mulf %13, %181 : vector<18x64xf32>
    %183 = vector.broadcast %180 : vector<1x64xf32> to vector<18x64xf32>
    %184 = arith.mulf %27, %183 : vector<18x64xf32>
    "tpu.trace_start"() <{level = 10 : i32, message = "se,te->st"}> : () -> ()
    %cst_57 = arith.constant dense<0.000000e+00> : vector<18x18xf32>
    %185 = tpu.matmul %182, %20, %cst_57 {dimension_numbers = #tpu.dot_dimension_numbers<[1], [1], [0], [0], [0, 0, 1, 0], [], []>} : vector<18x64xf32>, vector<18x64xf32>, vector<18x18xf32> -> vector<18x18xf32>
    "tpu.trace_stop"() : () -> ()
    %186 = arith.addf %185, %4 : vector<18x18xf32>
    %cst_58 = arith.constant dense<0xFF800000> : vector<18xf32>
    %187 = vector.multi_reduction <maximumf>, %186, %cst_58 [1] : vector<18x18xf32> to vector<18xf32>
    %188 = vector.shape_cast %187 : vector<18xf32> to vector<18x1xf32>
    %189 = vector.broadcast %188 : vector<18x1xf32> to vector<18x18xf32>
    %190 = arith.subf %186, %189 : vector<18x18xf32>
    %191 = math.exp %190 : vector<18x18xf32>
    %cst_59 = arith.constant dense<0.000000e+00> : vector<18xf32>
    %192 = vector.multi_reduction <add>, %191, %cst_59 [1] : vector<18x18xf32> to vector<18xf32>
    %193 = vector.shape_cast %192 : vector<18xf32> to vector<18x1xf32>
    %194 = vector.broadcast %193 : vector<18x1xf32> to vector<18x18xf32>
    %195 = arith.divf %191, %194 : vector<18x18xf32>
    %cst_60 = arith.constant dense<0.000000e+00> : vector<18x64xf32>
    %196 = tpu.matmul %195, %184, %cst_60 {dimension_numbers = #tpu.dot_dimension_numbers<[1], [0], [0], [1], [0, 0, 1, 1], [], []>} : vector<18x18xf32>, vector<18x64xf32>, vector<18x64xf32> -> vector<18x64xf32>
    %197 = arith.addf %173, %196 : vector<18x64xf32>
    %c56_i32_61 = arith.constant 56 : i32
    %198 = vector.broadcast %c56_i32_61 : i32 to vector<1x64xi32>
    %199 = arith.cmpi sge, %28, %198 : vector<1x64xi32>
    %c64_i32 = arith.constant 64 : i32
    %200 = vector.broadcast %c64_i32 : i32 to vector<1x64xi32>
    %201 = arith.cmpi slt, %28, %200 : vector<1x64xi32>
    %202 = arith.andi %199, %201 : vector<1x64xi1>
    %203 = arith.extui %202 : vector<1x64xi1> to vector<1x64xi32>
    %204 = arith.sitofp %203 : vector<1x64xi32> to vector<1x64xf32>
    %205 = vector.broadcast %204 : vector<1x64xf32> to vector<18x64xf32>
    %206 = arith.mulf %13, %205 : vector<18x64xf32>
    %207 = vector.broadcast %204 : vector<1x64xf32> to vector<18x64xf32>
    %208 = arith.mulf %27, %207 : vector<18x64xf32>
    "tpu.trace_start"() <{level = 10 : i32, message = "se,te->st"}> : () -> ()
    %cst_62 = arith.constant dense<0.000000e+00> : vector<18x18xf32>
    %209 = tpu.matmul %206, %20, %cst_62 {dimension_numbers = #tpu.dot_dimension_numbers<[1], [1], [0], [0], [0, 0, 1, 0], [], []>} : vector<18x64xf32>, vector<18x64xf32>, vector<18x18xf32> -> vector<18x18xf32>
    "tpu.trace_stop"() : () -> ()
    %210 = arith.addf %209, %4 : vector<18x18xf32>
    %cst_63 = arith.constant dense<0xFF800000> : vector<18xf32>
    %211 = vector.multi_reduction <maximumf>, %210, %cst_63 [1] : vector<18x18xf32> to vector<18xf32>
    %212 = vector.shape_cast %211 : vector<18xf32> to vector<18x1xf32>
    %213 = vector.broadcast %212 : vector<18x1xf32> to vector<18x18xf32>
    %214 = arith.subf %210, %213 : vector<18x18xf32>
    %215 = math.exp %214 : vector<18x18xf32>
    %cst_64 = arith.constant dense<0.000000e+00> : vector<18xf32>
    %216 = vector.multi_reduction <add>, %215, %cst_64 [1] : vector<18x18xf32> to vector<18xf32>
    %217 = vector.shape_cast %216 : vector<18xf32> to vector<18x1xf32>
    %218 = vector.broadcast %217 : vector<18x1xf32> to vector<18x18xf32>
    %219 = arith.divf %215, %218 : vector<18x18xf32>
    %cst_65 = arith.constant dense<0.000000e+00> : vector<18x64xf32>
    %220 = tpu.matmul %219, %208, %cst_65 {dimension_numbers = #tpu.dot_dimension_numbers<[1], [0], [0], [1], [0, 0, 1, 1], [], []>} : vector<18x18xf32>, vector<18x64xf32>, vector<18x64xf32> -> vector<18x64xf32>
    %221 = arith.addf %197, %220 : vector<18x64xf32>
    %c0_66 = arith.constant 0 : index
    %c0_67 = arith.constant 0 : index
    %c0_68 = arith.constant 0 : index
    %222 = vector.load %arg9[%c0_66, %c0_67, %c0_68] : memref<1x64x64xf32, #tpu.memory_space<vmem>>, vector<1x64x64xf32>
    %223 = vector.shape_cast %222 : vector<1x64x64xf32> to vector<64x64xf32>
    %cst_69 = arith.constant dense<0.000000e+00> : vector<18x64xf32>
    %224 = tpu.matmul %221, %223, %cst_69 {dimension_numbers = #tpu.dot_dimension_numbers<[1], [0], [0], [1], [0, 0, 1, 1], [], []>} : vector<18x64xf32>, vector<64x64xf32>, vector<18x64xf32> -> vector<18x64xf32>
    %c0_70 = arith.constant 0 : index
    %c0_71 = arith.constant 0 : index
    %c0_72 = arith.constant 0 : index
    %225 = vector.load %arg10[%c0_70, %c0_71, %c0_72] : memref<1x1x64xf32, #tpu.memory_space<vmem>>, vector<1x1x64xf32>
    %226 = vector.shape_cast %225 : vector<1x1x64xf32> to vector<1x64xf32>
    %227 = vector.broadcast %226 : vector<1x64xf32> to vector<18x64xf32>
    %228 = arith.addf %224, %227 : vector<18x64xf32>
    %229 = arith.addf %3, %228 : vector<18x64xf32>
    %c0_73 = arith.constant 0 : index
    %c0_74 = arith.constant 0 : index
    %c0_75 = arith.constant 0 : index
    %230 = vector.load %arg11[%c0_73, %c0_74, %c0_75] : memref<1x1x64xf32, #tpu.memory_space<vmem>>, vector<1x1x64xf32>
    %231 = vector.shape_cast %230 : vector<1x1x64xf32> to vector<1x64xf32>
    %c0_76 = arith.constant 0 : index
    %c0_77 = arith.constant 0 : index
    %c0_78 = arith.constant 0 : index
    %232 = vector.load %arg12[%c0_76, %c0_77, %c0_78] : memref<1x1x64xf32, #tpu.memory_space<vmem>>, vector<1x1x64xf32>
    %233 = vector.shape_cast %232 : vector<1x1x64xf32> to vector<1x64xf32>
    %cst_79 = arith.constant dense<0.000000e+00> : vector<18xf32>
    %234 = vector.multi_reduction <add>, %229, %cst_79 [1] : vector<18x64xf32> to vector<18xf32>
    %235 = vector.shape_cast %234 : vector<18xf32> to vector<18x1xf32>
    %cst_80 = arith.constant 6.400000e+01 : f32
    %236 = vector.broadcast %cst_80 : f32 to vector<18x1xf32>
    %237 = arith.divf %235, %236 : vector<18x1xf32>
    %238 = vector.broadcast %237 : vector<18x1xf32> to vector<18x64xf32>
    %239 = arith.subf %229, %238 : vector<18x64xf32>
    %240 = arith.mulf %239, %239 : vector<18x64xf32>
    %cst_81 = arith.constant dense<0.000000e+00> : vector<18xf32>
    %241 = vector.multi_reduction <add>, %240, %cst_81 [1] : vector<18x64xf32> to vector<18xf32>
    %242 = vector.shape_cast %241 : vector<18xf32> to vector<18x1xf32>
    %cst_82 = arith.constant 6.400000e+01 : f32
    %243 = vector.broadcast %cst_82 : f32 to vector<18x1xf32>
    %244 = arith.divf %242, %243 : vector<18x1xf32>
    %cst_83 = arith.constant 9.99999974E-6 : f32
    %245 = vector.broadcast %cst_83 : f32 to vector<18x1xf32>
    %246 = arith.addf %244, %245 : vector<18x1xf32>
    %247 = math.rsqrt %246 : vector<18x1xf32>
    %248 = vector.broadcast %247 : vector<18x1xf32> to vector<18x64xf32>
    %249 = arith.mulf %239, %248 : vector<18x64xf32>
    %250 = vector.broadcast %231 : vector<1x64xf32> to vector<18x64xf32>
    %251 = arith.mulf %249, %250 : vector<18x64xf32>
    %252 = vector.broadcast %233 : vector<1x64xf32> to vector<18x64xf32>
    %253 = arith.addf %251, %252 : vector<18x64xf32>
    %c0_84 = arith.constant 0 : index
    %c0_85 = arith.constant 0 : index
    %c0_86 = arith.constant 0 : index
    %254 = vector.load %arg13[%c0_84, %c0_85, %c0_86] : memref<1x64x256xf32, #tpu.memory_space<vmem>>, vector<1x64x256xf32>
    %255 = vector.shape_cast %254 : vector<1x64x256xf32> to vector<64x256xf32>
    %cst_87 = arith.constant dense<0.000000e+00> : vector<18x256xf32>
    %256 = tpu.matmul %253, %255, %cst_87 {dimension_numbers = #tpu.dot_dimension_numbers<[1], [0], [0], [1], [0, 0, 1, 1], [], []>} : vector<18x64xf32>, vector<64x256xf32>, vector<18x256xf32> -> vector<18x256xf32>
    %c0_88 = arith.constant 0 : index
    %c0_89 = arith.constant 0 : index
    %c0_90 = arith.constant 0 : index
    %257 = vector.load %arg14[%c0_88, %c0_89, %c0_90] : memref<1x1x256xf32, #tpu.memory_space<vmem>>, vector<1x1x256xf32>
    %258 = vector.shape_cast %257 : vector<1x1x256xf32> to vector<1x256xf32>
    %259 = vector.broadcast %258 : vector<1x256xf32> to vector<18x256xf32>
    %260 = arith.addf %256, %259 : vector<18x256xf32>
    %cst_91 = arith.constant 5.000000e-01 : f32
    %261 = vector.broadcast %cst_91 : f32 to vector<18x256xf32>
    %262 = arith.mulf %261, %260 : vector<18x256xf32>
    %cst_92 = arith.constant 4.471500e-02 : f32
    %263 = vector.broadcast %cst_92 : f32 to vector<18x256xf32>
    %264 = arith.mulf %263, %260 : vector<18x256xf32>
    %265 = arith.mulf %264, %260 : vector<18x256xf32>
    %266 = arith.mulf %265, %260 : vector<18x256xf32>
    %267 = arith.addf %260, %266 : vector<18x256xf32>
    %cst_93 = arith.constant 0.797884583 : f32
    %268 = vector.broadcast %cst_93 : f32 to vector<18x256xf32>
    %269 = arith.mulf %268, %267 : vector<18x256xf32>
    %270 = math.tanh %269 : vector<18x256xf32>
    %cst_94 = arith.constant 1.000000e+00 : f32
    %271 = vector.broadcast %cst_94 : f32 to vector<18x256xf32>
    %272 = arith.addf %271, %270 : vector<18x256xf32>
    %273 = arith.mulf %262, %272 : vector<18x256xf32>
    %c0_95 = arith.constant 0 : index
    %c0_96 = arith.constant 0 : index
    %c0_97 = arith.constant 0 : index
    %274 = vector.load %arg15[%c0_95, %c0_96, %c0_97] : memref<1x256x64xf32, #tpu.memory_space<vmem>>, vector<1x256x64xf32>
    %275 = vector.shape_cast %274 : vector<1x256x64xf32> to vector<256x64xf32>
    %cst_98 = arith.constant dense<0.000000e+00> : vector<18x64xf32>
    %276 = tpu.matmul %273, %275, %cst_98 {dimension_numbers = #tpu.dot_dimension_numbers<[1], [0], [0], [1], [0, 0, 1, 1], [], []>} : vector<18x256xf32>, vector<256x64xf32>, vector<18x64xf32> -> vector<18x64xf32>
    %c0_99 = arith.constant 0 : index
    %c0_100 = arith.constant 0 : index
    %c0_101 = arith.constant 0 : index
    %277 = vector.load %arg16[%c0_99, %c0_100, %c0_101] : memref<1x1x64xf32, #tpu.memory_space<vmem>>, vector<1x1x64xf32>
    %278 = vector.shape_cast %277 : vector<1x1x64xf32> to vector<1x64xf32>
    %279 = vector.broadcast %278 : vector<1x64xf32> to vector<18x64xf32>
    %280 = arith.addf %276, %279 : vector<18x64xf32>
    %281 = arith.addf %253, %280 : vector<18x64xf32>
    %c0_102 = arith.constant 0 : index
    %c0_103 = arith.constant 0 : index
    %c0_104 = arith.constant 0 : index
    %282 = vector.load %arg17[%c0_102, %c0_103, %c0_104] : memref<1x1x64xf32, #tpu.memory_space<vmem>>, vector<1x1x64xf32>
    %283 = vector.shape_cast %282 : vector<1x1x64xf32> to vector<1x64xf32>
    %c0_105 = arith.constant 0 : index
    %c0_106 = arith.constant 0 : index
    %c0_107 = arith.constant 0 : index
    %284 = vector.load %arg18[%c0_105, %c0_106, %c0_107] : memref<1x1x64xf32, #tpu.memory_space<vmem>>, vector<1x1x64xf32>
    %285 = vector.shape_cast %284 : vector<1x1x64xf32> to vector<1x64xf32>
    %cst_108 = arith.constant dense<0.000000e+00> : vector<18xf32>
    %286 = vector.multi_reduction <add>, %281, %cst_108 [1] : vector<18x64xf32> to vector<18xf32>
    %287 = vector.shape_cast %286 : vector<18xf32> to vector<18x1xf32>
    %cst_109 = arith.constant 6.400000e+01 : f32
    %288 = vector.broadcast %cst_109 : f32 to vector<18x1xf32>
    %289 = arith.divf %287, %288 : vector<18x1xf32>
    %290 = vector.broadcast %289 : vector<18x1xf32> to vector<18x64xf32>
    %291 = arith.subf %281, %290 : vector<18x64xf32>
    %292 = arith.mulf %291, %291 : vector<18x64xf32>
    %cst_110 = arith.constant dense<0.000000e+00> : vector<18xf32>
    %293 = vector.multi_reduction <add>, %292, %cst_110 [1] : vector<18x64xf32> to vector<18xf32>
    %294 = vector.shape_cast %293 : vector<18xf32> to vector<18x1xf32>
    %cst_111 = arith.constant 6.400000e+01 : f32
    %295 = vector.broadcast %cst_111 : f32 to vector<18x1xf32>
    %296 = arith.divf %294, %295 : vector<18x1xf32>
    %cst_112 = arith.constant 9.99999974E-6 : f32
    %297 = vector.broadcast %cst_112 : f32 to vector<18x1xf32>
    %298 = arith.addf %296, %297 : vector<18x1xf32>
    %299 = math.rsqrt %298 : vector<18x1xf32>
    %300 = vector.broadcast %299 : vector<18x1xf32> to vector<18x64xf32>
    %301 = arith.mulf %291, %300 : vector<18x64xf32>
    %302 = vector.broadcast %283 : vector<1x64xf32> to vector<18x64xf32>
    %303 = arith.mulf %301, %302 : vector<18x64xf32>
    %304 = vector.broadcast %285 : vector<1x64xf32> to vector<18x64xf32>
    %305 = arith.addf %303, %304 : vector<18x64xf32>
    %c0_113 = arith.constant 0 : index
    %c0_114 = arith.constant 0 : index
    %306 = vector.load %arg19[%c0_113, %c0_114] : memref<18x64xf32, #tpu.memory_space<vmem>>, vector<18x64xf32>
    tpu.vector_store %arg19[%c0_113, %c0_114], %305 {strides = array<i32>} : memref<18x64xf32, #tpu.memory_space<vmem>>, vector<18x64xf32>,
    return
  }
  func.func @transform_0(%arg0: i32) -> (i32, i32) {
    %c0_i32 = arith.constant 0 : i32
    %c0_i32_0 = arith.constant 0 : i32
    %c0_i32_1 = arith.constant 0 : i32
    return %c0_i32, %c0_i32_0 : i32, i32
  }
  func.func @transform_1(%arg0: i32) -> (i32, i32) {
    %c0_i32 = arith.constant 0 : i32
    %c0_i32_0 = arith.constant 0 : i32
    %c0_i32_1 = arith.constant 0 : i32
    return %c0_i32, %c0_i32_0 : i32, i32
  }
  func.func @transform_2(%arg0: i32) -> (i32, i32, i32) {
    %c0_i32 = arith.constant 0 : i32
    %c0_i32_0 = arith.constant 0 : i32
    %c0_i32_1 = arith.constant 0 : i32
    return %arg0, %c0_i32, %c0_i32_0 : i32, i32, i32
  }
  func.func @transform_3(%arg0: i32) -> (i32, i32, i32) {
    %c0_i32 = arith.constant 0 : i32
    %c0_i32_0 = arith.constant 0 : i32
    %c0_i32_1 = arith.constant 0 : i32
    return %arg0, %c0_i32, %c0_i32_0 : i32, i32, i32
  }
  func.func @transform_4(%arg0: i32) -> (i32, i32, i32) {
    %c0_i32 = arith.constant 0 : i32
    %c0_i32_0 = arith.constant 0 : i32
    %c0_i32_1 = arith.constant 0 : i32
    return %arg0, %c0_i32, %c0_i32_0 : i32, i32, i32
  }
  func.func @transform_5(%arg0: i32) -> (i32, i32, i32) {
    %c0_i32 = arith.constant 0 : i32
    %c0_i32_0 = arith.constant 0 : i32
    %c0_i32_1 = arith.constant 0 : i32
    return %arg0, %c0_i32, %c0_i32_0 : i32, i32, i32
  }
  func.func @transform_6(%arg0: i32) -> (i32, i32, i32) {
    %c0_i32 = arith.constant 0 : i32
    %c0_i32_0 = arith.constant 0 : i32
    %c0_i32_1 = arith.constant 0 : i32
    return %arg0, %c0_i32, %c0_i32_0 : i32, i32, i32
  }
  func.func @transform_7(%arg0: i32) -> (i32, i32, i32) {
    %c0_i32 = arith.constant 0 : i32
    %c0_i32_0 = arith.constant 0 : i32
    %c0_i32_1 = arith.constant 0 : i32
    return %arg0, %c0_i32, %c0_i32_0 : i32, i32, i32
  }
  func.func @transform_8(%arg0: i32) -> (i32, i32, i32) {
    %c0_i32 = arith.constant 0 : i32
    %c0_i32_0 = arith.constant 0 : i32
    %c0_i32_1 = arith.constant 0 : i32
    return %arg0, %c0_i32, %c0_i32_0 : i32, i32, i32
  }
  func.func @transform_9(%arg0: i32) -> (i32, i32, i32) {
    %c0_i32 = arith.constant 0 : i32
    %c0_i32_0 = arith.constant 0 : i32
    %c0_i32_1 = arith.constant 0 : i32
    return %arg0, %c0_i32, %c0_i32_0 : i32, i32, i32
  }
  func.func @transform_10(%arg0: i32) -> (i32, i32, i32) {
    %c0_i32 = arith.constant 0 : i32
    %c0_i32_0 = arith.constant 0 : i32
    %c0_i32_1 = arith.constant 0 : i32
    return %arg0, %c0_i32, %c0_i32_0 : i32, i32, i32
  }
  func.func @transform_11(%arg0: i32) -> (i32, i32, i32) {
    %c0_i32 = arith.constant 0 : i32
    %c0_i32_0 = arith.constant 0 : i32
    %c0_i32_1 = arith.constant 0 : i32
    return %arg0, %c0_i32, %c0_i32_0 : i32, i32, i32
  }
  func.func @transform_12(%arg0: i32) -> (i32, i32, i32) {
    %c0_i32 = arith.constant 0 : i32
    %c0_i32_0 = arith.constant 0 : i32
    %c0_i32_1 = arith.constant 0 : i32
    return %arg0, %c0_i32, %c0_i32_0 : i32, i32, i32
  }
  func.func @transform_13(%arg0: i32) -> (i32, i32, i32) {
    %c0_i32 = arith.constant 0 : i32
    %c0_i32_0 = arith.constant 0 : i32
    %c0_i32_1 = arith.constant 0 : i32
    return %arg0, %c0_i32, %c0_i32_0 : i32, i32, i32
  }
  func.func @transform_14(%arg0: i32) -> (i32, i32, i32) {
    %c0_i32 = arith.constant 0 : i32
    %c0_i32_0 = arith.constant 0 : i32
    %c0_i32_1 = arith.constant 0 : i32
    return %arg0, %c0_i32, %c0_i32_0 : i32, i32, i32
  }
  func.func @transform_15(%arg0: i32) -> (i32, i32, i32) {
    %c0_i32 = arith.constant 0 : i32
    %c0_i32_0 = arith.constant 0 : i32
    %c0_i32_1 = arith.constant 0 : i32
    return %arg0, %c0_i32, %c0_i32_0 : i32, i32, i32
  }
  func.func @transform_16(%arg0: i32) -> (i32, i32, i32) {
    %c0_i32 = arith.constant 0 : i32
    %c0_i32_0 = arith.constant 0 : i32
    %c0_i32_1 = arith.constant 0 : i32
    return %arg0, %c0_i32, %c0_i32_0 : i32, i32, i32
  }
  func.func @transform_17(%arg0: i32) -> (i32, i32, i32) {
    %c0_i32 = arith.constant 0 : i32
    %c0_i32_0 = arith.constant 0 : i32
    %c0_i32_1 = arith.constant 0 : i32
    return %arg0, %c0_i32, %c0_i32_0 : i32, i32, i32
  }
  func.func @transform_18(%arg0: i32) -> (i32, i32) {
    %c0_i32 = arith.constant 0 : i32
    %c0_i32_0 = arith.constant 0 : i32
    %c0_i32_1 = arith.constant 0 : i32
    return %c0_i32, %c0_i32_0 : i32, i32
  }
}

</mosaic_0001>

<bundles_post_ra>
// kernel: eq.22
= control target key start
LH: loop header
LB: loop body
LE: loop exit
PB: predicated region body
PF: predicated region fallthrough
CT: control target
= control target key end

     0   :  { %vm7_vm0 = vcmask 72704   ;;  %vm13_vm1 = vcmask 146504   ;;  %s39_s0 = inlined_call_operand.vmem [shape: s32[2,9], index: 0, kind: input, shape index: {}]   ;;  %s40_s1 = inlined_call_operand.vmem [shape: s32[18], index: 1, kind: output, shape index: {}]  }
   0x1   :  { %v4_v0 = vld [vmem:[%s39_s0] sm:$0x3]  ;;  %s22_s0 = smov 9  }
   0x2   :  { %5 = vst [vmem:[#allocation1] sm:$0x3] %v4_v0 }
   0x9   :  { %v10_v1 = vld [vmem:[#allocation1 + $0x1] sm:$0x1]   ;;  %v6_v2 = vld [vmem:[#allocation1] sm:$0x1]  }
   0xa   :  { %11 = vrot.lane.b32.xlu0 %v10_v1, %s22_s0  ;;  %8 = vst.msk [vmem:[#allocation0] sm:$0x1] %vm7_vm0, %v6_v2  }
  0x7c   :  { %v12_v3 = vpop.permute.xlu0 %11  }
  0x7d   :  { %14 = vst.msk [vmem:[#allocation0] sm:$0x1] %vm13_vm1, %v12_v3  }
  0x84   :  { %v18_v4 = vld [vmem:[#allocation0] sm:$0x1] }
  0x85   :  { %20 = vst [vmem:[%s40_s1] sm:$0x1] %v18_v4 }

// kernel: eq.15
= control target key start
LH: loop header
LB: loop body
LE: loop exit
PB: predicated region body
PF: predicated region fallthrough
CT: control target
= control target key end

     0   :  { %s67_s10 = smov 112   ;;  %s68_s11 = smov 80   ;;  %vm3_vm0 = vcmask 130048   ;;  %vm9_vm1 = vcmask 1048448   ;;  %vm15_vm2 = vcmask 917248   ;;  %vm21_vm3 = vcmask 786048   ;;  %s111_s0 = inlined_call_operand.vmem [shape: s32[8,16], index: 0, kind: input, shape index: {}]   ;;  %s112_s1 = inlined_call_operand.vmem [shape: s32[128], index: 1, kind: output, shape index: {}]  }
   0x1   :  { %v53_v0 = vld [vmem:[%s111_s0 + $0x7] sm:$0x1]   ;;  %v55_v1 = vld [vmem:[%s111_s0 + $0x5] sm:$0x1]   ;;  %v54_v2 = vld [vmem:[%s111_s0 + $0x6] sm:$0x1]  }
   0x2   :  { %7 = vrot.lane.b32.xlu0 %v53_v0, %s67_s10  ;;  %19 = vrot.lane.b32.xlu1 %v55_v1, %s68_s11  ;;  %v56_v3 = vld [vmem:[%s111_s0 + $0x4] sm:$0x1]   ;;  %v2_v4 = vld [vmem:[%s111_s0] sm:$0x1]   ;;  %s69_s18 = smov 96   ;;  %s70_s19 = smov 64  }
   0x3   :  { %4 = vst.msk [vmem:[#allocation0] sm:$0x1] %vm3_vm0, %v2_v4   ;;  %v57_v5 = vld [vmem:[%s111_s0 + $0x3] sm:$0x1]   ;;  %v58_v6 = vld [vmem:[%s111_s0 + $0x2] sm:$0x1]  }
   0x4   :  { %s71_s24 = smov 48   ;;  %s72_s25 = smov 32   ;;  %v59_v7 = vld [vmem:[%s111_s0 + $0x1] sm:$0x1]   ;;  %vm27_vm4 = vcmask 654848   ;;  %vm33_vm5 = vcmask 523648  }
   0x5   :  { %s73_s0 = smov 16   ;;  %vm39_vm6 = vcmask 392448   ;;  %vm45_vm7 = vcmask 261248  }
   0x6   :  { %13 = vrot.lane.b32.xlu0 %v54_v2, %s69_s18  ;;  %25 = vrot.lane.b32.xlu1 %v56_v3, %s70_s19 }
   0xa   :  { %31 = vrot.lane.b32.xlu0 %v57_v5, %s71_s24  ;;  %37 = vrot.lane.b32.xlu1 %v58_v6, %s72_s25 }
   0xe   :  { %43 = vrot.lane.b32.xlu0 %v59_v7, %s73_s0 }
  0x74   :  { %v8_v8 = vpop.permute.xlu0 %7   ;;  %v20_v9 = vpop.permute.xlu1 %19  }
  0x75   :  { %10 = vst.msk [vmem:[#allocation0] sm:$0x1] %vm9_vm1, %v8_v8  }
  0x78   :  { %v14_v10 = vpop.permute.xlu0 %13   ;;  %v26_v11 = vpop.permute.xlu1 %25  }
  0x79   :  { %16 = vst.msk [vmem:[#allocation0] sm:$0x1] %vm15_vm2, %v14_v10  }
  0x7a   :  { %22 = vst.msk [vmem:[#allocation0] sm:$0x1] %vm21_vm3, %v20_v9  }
  0x7b   :  { %28 = vst.msk [vmem:[#allocation0] sm:$0x1] %vm27_vm4, %v26_v11  }
  0x7c   :  { %v32_v12 = vpop.permute.xlu0 %31   ;;  %v38_v13 = vpop.permute.xlu1 %37  }
  0x7d   :  { %34 = vst.msk [vmem:[#allocation0] sm:$0x1] %vm33_vm5, %v32_v12  }
  0x7e   :  { %40 = vst.msk [vmem:[#allocation0] sm:$0x1] %vm39_vm6, %v38_v13  }
  0x80   :  { %v44_v14 = vpop.permute.xlu0 %43  }
  0x81   :  { %46 = vst.msk [vmem:[#allocation0] sm:$0x1] %vm45_vm7, %v44_v14  }
  0x88   :  { %v50_v15 = vld [vmem:[#allocation0] sm:$0x1] }
  0x89   :  { %52 = vst [vmem:[%s112_s1] sm:$0x1] %v50_v15 }

// kernel: custom-call.3
= control target key start
LH: loop header
LB: loop body
LE: loop exit
PB: predicated region body
PF: predicated region fallthrough
CT: control target
= control target key end

     0   :  { %s35_s0 = inlined_call_operand.vmem [shape: c64[2,8,1,4], index: 0, kind: input, shape index: {}]   ;;  %s36_s1 = inlined_call_operand.vmem [shape: f32[2,8,1,4], index: 1, kind: output, shape index: {}]  }
   0x1   :  { %v10_v0 = vld [vmem:[%s35_s0 + $0x10] sm:$0xff]  ;;  %v11_v1 = vld [vmem:[%s35_s0 + $0x18] sm:$0xff] }
   0x2   :  { %4 = vst [vmem:[%s36_s1] sm:$0xff] %v10_v0  ;;  %12 = vst [vmem:[%s36_s1 + $0x8] sm:$0xff] %v11_v1 }

// kernel: custom-call.2
= control target key start
LH: loop header
LB: loop body
LE: loop exit
PB: predicated region body
PF: predicated region fallthrough
CT: control target
= control target key end

     0   :  { %s32_s0 = inlined_call_operand.vmem [shape: c64[2,8,1,4], index: 0, kind: input, shape index: {}]   ;;  %s33_s1 = inlined_call_operand.vmem [shape: f32[2,8,1,4], index: 1, kind: output, shape index: {}]  }
   0x1   :  { %v2_v0 = vld [vmem:[%s32_s0] sm:$0xff]  ;;  %v8_v1 = vld [vmem:[%s32_s0 + $0x8] sm:$0xff] }
   0x2   :  { %3 = vst [vmem:[%s33_s1] sm:$0xff] %v2_v0  ;;  %9 = vst [vmem:[%s33_s1 + $0x8] sm:$0xff] %v8_v1 }

// kernel: custom-call.1
= control target key start
LH: loop header
LB: loop body
LE: loop exit
PB: predicated region body
PF: predicated region fallthrough
CT: control target
= control target key end

     0   :  { %s59_s0 = inlined_call_operand.hbm [shape: c64[2,8,16,4], index: 0, kind: input, shape index: {}]   ;;  %s60_s1 = inlined_call_operand.vmem [shape: f32[2,8,16,4], index: 1, kind: output, shape index: {}]  }
   0x1   :  { %s2_s8 = scalar_lea.hbm %s59_s0, 1024 }
   0x2   :  { %3 = vsyncpa [#allocation0], 0  ;;  %s4_s11 = sshll.u32 %s60_s1, 4  ;;  %s34_s14 = scalar_lea.hbm %s59_s0, 2048  ;;  %s5_s11 = int_to_ptr.vmem [resolvable:$true] %s4_s11 }
   0x3   :  { %p11_p0 = scmp.ne.s32.totalorder %s2_s8, %s34_s14  ;;  %p13_p1 = scmp.lt.u32.totalorder %s2_s8, %s59_s0 }
   0x4   :  { %p14_p2 = scmp.lt.u32.totalorder %s34_s14, %s34_s14  ;;  %p16_p4 = scmp.lt.u32.totalorder %s34_s14, %s2_s8 }
   0x6   :  { %p15_p3 = por %p14_p2, %p13_p1 }
   0x8   :  { %p17_p5 = por %p16_p4, %p15_p3 }
   0xa   :  { %p18_p6 = pnand %p17_p5, %p11_p0 }
   0xc   :  { %21 = shalt.err (!%p18_p6)  }
   0xd   :  { %s22_s17 = scalar_lea.vmem %s5_s11, 1024  ;;  %p27_p8 = scmp.lt.s32.totalorder %s5_s11, %s5_s11 }
   0xe   :  { %p23_p7 = scmp.ne.s32.totalorder %s5_s11, %s22_s17  ;;  %p28_p9 = scmp.lt.s32.totalorder %s22_s17, %s22_s17 }
  0x10   :  { %p29_p10 = por %p28_p9, %p27_p8 }
  0x12   :  { %p30_p11 = pnand %p29_p10, %p23_p7 }
  0x14   :  { %33 = shalt.err (!%p30_p11)  }
  0x15   :  { %7 = dma.hbm_to_vmem [thread:$0]  %s2_s8, 1024, %s5_s11, [#allocation0] }
  0x16   :  { %35 = dma.done.wait [#allocation0], 1024  }
  0x17   :  { %36 = vsyncadd [#allocation0], 4294966272 }
  0x18   :  { %9 = vsyncpa [#allocation0], 1 }

// kernel: custom-call
= control target key start
LH: loop header
LB: loop body
LE: loop exit
PB: predicated region body
PF: predicated region fallthrough
CT: control target
= control target key end

     0   :  { %2 = vsyncpa [#allocation0], 0  ;;  %s61_s0 = inlined_call_operand.hbm [shape: c64[2,8,16,4], index: 0, kind: input, shape index: {}]   ;;  %s62_s1 = inlined_call_operand.vmem [shape: f32[2,8,16,4], index: 1, kind: output, shape index: {}]  }
   0x1   :  { %s3_s8 = sshll.u32 %s62_s1, 4  ;;  %s9_s11 = scalar_lea.hbm %s61_s0, 1024  ;;  %s4_s8 = int_to_ptr.vmem [resolvable:$true] %s3_s8 }
   0x2   :  { %p10_p0 = scmp.ne.s32.totalorder %s61_s0, %s9_s11  ;;  %s11_s16 = scalar_lea.hbm %s61_s0, 2048 }
   0x3   :  { %p12_p1 = scmp.lt.u32.totalorder %s11_s16, %s9_s11  ;;  %p13_p2 = scmp.lt.u32.totalorder %s9_s11, %s61_s0 }
   0x5   :  { %p14_p3 = por %p13_p2, %p12_p1 }
   0x7   :  { %p15_p4 = pnand %p14_p3, %p10_p0 }
   0x9   :  { %18 = shalt.err (!%p15_p4)  }
   0xa   :  { %s19_s1 = scalar_lea.vmem %s4_s8, 1024  ;;  %p24_p6 = scmp.lt.s32.totalorder %s4_s8, %s4_s8 }
   0xb   :  { %p20_p5 = scmp.ne.s32.totalorder %s4_s8, %s19_s1  ;;  %p25_p7 = scmp.lt.s32.totalorder %s19_s1, %s19_s1 }
   0xd   :  { %p26_p8 = por %p25_p7, %p24_p6 }
   0xf   :  { %p27_p9 = pnand %p26_p8, %p20_p5 }
  0x11   :  { %30 = shalt.err (!%p27_p9)  }
  0x12   :  { %6 = dma.hbm_to_vmem [thread:$0]  %s61_s0, 1024, %s4_s8, [#allocation0] }
  0x13   :  { %31 = dma.done.wait [#allocation0], 1024  }
  0x14   :  { %32 = vsyncadd [#allocation0], 4294966272 }
  0x15   :  { %8 = vsyncpa [#allocation0], 1 }

// kernel: custom-call.4
= control target key start
LH: loop header
LB: loop body
LE: loop exit
PB: predicated region body
PF: predicated region fallthrough
CT: control target
= control target key end

     0   :  { %s212_s0 = inlined_call_operand.vmem [shape: f32[2,8,16,4], index: 0, kind: input, shape index: {}]   ;;  %s213_s1 = inlined_call_operand.vmem [shape: f32[2,8,16,4], index: 1, kind: input, shape index: {}]   ;;  %s214_s2 = inlined_call_operand.vmem [shape: c64[2,8,16,4], index: 2, kind: output, shape index: {}]  }
   0x1   :  { %v5_v0 = vld [vmem:[%s212_s0] sm:$0xff]  ;;  %v72_v1 = vld [vmem:[%s212_s0 + $0x8] sm:$0xff]  ;;  %v74_v2 = vld [vmem:[%s212_s0 + $0x10] sm:$0xff] }
   0x2   :  { %6 = vst [vmem:[%s214_s2] sm:$0xff] %v5_v0  ;;  %73 = vst [vmem:[%s214_s2 + $0x8] sm:$0xff] %v72_v1  ;;  %v76_v3 = vld [vmem:[%s212_s0 + $0x18] sm:$0xff]  ;;  %v78_v4 = vld [vmem:[%s212_s0 + $0x20] sm:$0xff] }
   0x3   :  { %75 = vst [vmem:[%s214_s2 + $0x10] sm:$0xff] %v74_v2  ;;  %v80_v5 = vld [vmem:[%s212_s0 + $0x28] sm:$0xff]  ;;  %77 = vst [vmem:[%s214_s2 + $0x18] sm:$0xff] %v76_v3  ;;  %v82_v6 = vld [vmem:[%s212_s0 + $0x30] sm:$0xff] }
   0x4   :  { %79 = vst [vmem:[%s214_s2 + $0x20] sm:$0xff] %v78_v4  ;;  %81 = vst [vmem:[%s214_s2 + $0x28] sm:$0xff] %v80_v5  ;;  %v84_v7 = vld [vmem:[%s212_s0 + $0x38] sm:$0xff]  ;;  %v35_v8 = vld [vmem:[%s213_s1] sm:$0xff] }
   0x5   :  { %83 = vst [vmem:[%s214_s2 + $0x30] sm:$0xff] %v82_v6  ;;  %85 = vst [vmem:[%s214_s2 + $0x38] sm:$0xff] %v84_v7  ;;  %v87_v9 = vld [vmem:[%s213_s1 + $0x8] sm:$0xff]  ;;  %v89_v10 = vld [vmem:[%s213_s1 + $0x10] sm:$0xff] }
   0x6   :  { %86 = vst [vmem:[%s214_s2 + $0x40] sm:$0xff] %v35_v8  ;;  %v91_v11 = vld [vmem:[%s213_s1 + $0x18] sm:$0xff]  ;;  %88 = vst [vmem:[%s214_s2 + $0x48] sm:$0xff] %v87_v9  ;;  %v93_v12 = vld [vmem:[%s213_s1 + $0x20] sm:$0xff] }
   0x7   :  { %90 = vst [vmem:[%s214_s2 + $0x50] sm:$0xff] %v89_v10  ;;  %92 = vst [vmem:[%s214_s2 + $0x58] sm:$0xff] %v91_v11  ;;  %v95_v13 = vld [vmem:[%s213_s1 + $0x28] sm:$0xff]  ;;  %v97_v14 = vld [vmem:[%s213_s1 + $0x30] sm:$0xff] }
   0x8   :  { %94 = vst [vmem:[%s214_s2 + $0x60] sm:$0xff] %v93_v12  ;;  %96 = vst [vmem:[%s214_s2 + $0x68] sm:$0xff] %v95_v13  ;;  %v99_v15 = vld [vmem:[%s213_s1 + $0x38] sm:$0xff] }
   0x9   :  { %98 = vst [vmem:[%s214_s2 + $0x70] sm:$0xff] %v97_v14  ;;  %100 = vst [vmem:[%s214_s2 + $0x78] sm:$0xff] %v99_v15 }

// kernel: semantic_decoder_forward.3
= control target key start
LH: loop header
LB: loop body
LE: loop exit
PB: predicated region body
PF: predicated region fallthrough
CT: control target
= control target key end

     0   :  { %s4752_s27 = smov 0   ;;  %s5818_s0 = inlined_call_operand.vmem [shape: f32[18,64], index: 0, kind: input, shape index: {}]   ;;  %s5819_s1 = inlined_call_operand.vmem [shape: f32[18,18], index: 1, kind: input, shape index: {}]   ;;  %s5820_s2 = inlined_call_operand.vmem [shape: f32[6,64,64], index: 2, kind: input, shape index: {}]   ;;  %s5821_s3 = inlined_call_operand.vmem [shape: f32[6,1,64], index: 3, kind: input, shape index: {}]   ;;  %s5822_s4 = inlined_call_operand.vmem [shape: f32[6,64,64], index: 4, kind: input, shape index: {}]   ;;  %s5823_s5 = inlined_call_operand.vmem [shape: f32[6,1,64], index: 5, kind: input, shape index: {}]   ;;  %s5824_s6 = inlined_call_operand.vmem [shape: f32[6,64,64], index: 6, kind: input, shape index: {}]   ;;  %s5825_s7 = inlined_call_operand.vmem [shape: f32[6,1,64], index: 7, kind: input, shape index: {}]   ;;  %s5826_s8 = inlined_call_operand.vmem [shape: f32[6,64,64], index: 8, kind: input, shape index: {}]   ;;  %s5827_s9 = inlined_call_operand.vmem [shape: f32[6,1,64], index: 9, kind: input, shape index: {}]   ;;  %s5828_s10 = inlined_call_operand.vmem [shape: f32[6,1,64], index: 10, kind: input, shape index: {}]   ;;  %s5829_s11 = inlined_call_operand.vmem [shape: f32[6,1,64], index: 11, kind: input, shape index: {}]   ;;  %s5830_s12 = inlined_call_operand.vmem [shape: f32[6,64,256], index: 12, kind: input, shape index: {}]   ;;  %s5831_s13 = inlined_call_operand.vmem [shape: f32[6,1,256], index: 13, kind: input, shape index: {}]   ;;  %s5832_s14 = inlined_call_operand.vmem [shape: f32[6,256,64], index: 14, kind: input, shape index: {}]   ;;  %s5833_s15 = inlined_call_operand.vmem [shape: f32[6,1,64], index: 15, kind: input, shape index: {}]   ;;  %s5834_s16 = inlined_call_operand.vmem [shape: f32[6,1,64], index: 16, kind: input, shape index: {}]   ;;  %s5835_s17 = inlined_call_operand.vmem [shape: f32[6,1,64], index: 17, kind: input, shape index: {}]   ;;  %s5836_s18 = inlined_call_operand.vmem [shape: f32[18,64], index: 18, kind: output, shape index: {}]  }
   0x1   :  { %5844 = sst [smem:[#allocation4_spill]] %s5818_s0 }
   0x2   :  { %5845 = sst [smem:[#allocation5_spill]] %s5819_s1 }
   0x3   :  { %5846 = sst [smem:[#allocation6_spill]] %s5820_s2 }
   0x4   :  { %5847 = sst [smem:[#allocation7_spill]] %s5821_s3 }
   0x5   :  { %5848 = sst [smem:[#allocation8_spill]] %s5822_s4 }
   0x6   :  { %5849 = sst [smem:[#allocation9_spill]] %s5823_s5 }
   0x7   :  { %5850 = sst [smem:[#allocation10_spill]] %s5824_s6 }
   0x8   :  { %5851 = sst [smem:[#allocation11_spill]] %s5826_s8 }
   0x9   :  { %5852 = sst [smem:[#allocation12_spill]] %s5830_s12 }
   0xa   :  { %5853 = sst [smem:[#allocation13_spill]] %s5831_s13 }
   0xb   :  { %5854 = sst [smem:[#allocation14_spill]] %s5835_s17 }
   0xc   :  { %5855 = sst [smem:[#allocation15_spill]] %s5836_s18 }
   0xd LB: > { %5856 = sst [smem:[#allocation2_spill]] %s4652_s27  ;;  %s3659_s28 = sadd.s32 4294967295, %s4652_s27   ;;  %s4652_s27 = sphi %s4752_s27, %s28_s27  }
   0xe   : > { %p3662_p0 = scmp.ge.s32.totalorder %s4652_s27, 1  ;;  %p638_p1 = scmp.lt.s32.totalorder %s4652_s27, 7 }
  0x10   : > { %p639_p2 = pnand %p3662_p0, %p638_p1 }
  0x12   : > { %642 = sbr.rel (%p639_p2) target bundleno = 2431 (0x97f), region = 92 }
  0x19   : > { %p743_p3 = scmp.lt.s32.totalorder %s3659_s28, 5  ;;  %s5858_s22 = sld [smem:[#allocation6_spill]] }
  0x1a   : > { %s5859_s4 = sld [smem:[#allocation8_spill]]  ;;  %s5861_s6 = sld [smem:[#allocation10_spill]] }
  0x1b   : > { %s4760_s29 = scalar_select %p743_p3, %s3659_s28, 5 }
  0x1c   : > { %s5863_s8 = sld [smem:[#allocation11_spill]]  ;;  %s5864_s12 = sld [smem:[#allocation12_spill]] }
  0x1d   : > { %s3791_s30 = sshll.u32 %s4760_s29, 6  ;;  %s3673_s3 = sshll.u32 %s4760_s29, 1 }
  0x1e   : > { %s5865_s13 = sld [smem:[#allocation13_spill]]  ;;  %s3796_s24 = sshll.u32 %s4760_s29, 8 }
  0x1f   : > { %s4770_s2 = scalar_lea.vmem %s5858_s22, %s3791_s30  ;;  %s4823_s26 = scalar_lea.vmem %s5832_s14, %s3796_s24 }
  0x20   : > { %s4775_s25 = scalar_lea.vmem %s5859_s4, %s3791_s30  ;;  %s4784_s19 = scalar_lea.vmem %s5861_s6, %s3791_s30 }
  0x21   : > { %5862 = sst [smem:[#allocation3_spill]] %s4784_s19  ;;  %s3795_s19 = sshll.u32 %s4760_s29, 7 }
  0x22   : > { %s4793_s23 = scalar_lea.vmem %s5863_s8, %s3791_s30  ;;  %s4811_s22 = scalar_lea.vmem %s5864_s12, %s3795_s19 }
  0x23   : > { %s797_s6 = scalar_lea.vmem %s5833_s15, %s4760_s29  ;;  %s800_s19 = scalar_lea.vmem %s5834_s16, %s4760_s29 }
  0x24   : > { %s4817_s4 = scalar_lea.vmem %s5865_s13, %s3673_s3  ;;  %s5866_s12 = sld [smem:[#allocation14_spill]] }
  0x25   : > { %p3676_p4 = scmp.ne.s32.totalorder %s3659_s28, 0 }
  0x26   : > { %s5867_s13 = sld [smem:[#allocation4_spill]] (!%p3676_p4)  ;;  %vm811_vm0 = vcmask (!%p3676_p4), 523264   ;;  %vm814_vm1 = vcmask (!%p3676_p4), 517120   ;;  %s5868_s8 = sld [smem:[#allocation15_spill]] (!%p3676_p4) }
  0x27   : > { %807 = sbr.rel (%p3676_p4) target bundleno = 47 (0x2f), region = 96 }
  0x2a   : > { %s803_s30 = scalar_lea.vmem %s5866_s12, %s4760_s29 }
  0x2c   : > { %v808_v0 = vld [vmem:[%s5867_s13] sm:$0xff] (!%p3676_p4)  ;;  %v809_v1 = vld [vmem:[%s5867_s13 + $0x8] sm:$0xff] (!%p3676_p4)  ;;  %v810_v2 = vld [vmem:[%s5867_s13 + $0x10] sm:$0x3] (!%p3676_p4) }
  0x2d   : > { %812 = vst.msk [vmem:[%s5868_s8] sm:$0xff] (!%p3676_p4), %vm811_vm0, %v808_v0  ;;  %813 = vst.msk [vmem:[%s5868_s8 + $0x8] sm:$0xff] (!%p3676_p4), %vm811_vm0, %v809_v1 }
  0x2e   : > { %815 = vst.msk [vmem:[%s5868_s8 + $0x10] sm:$0x3] %vm814_vm1, %v810_v2 }
  0x2f PF: > { %v930_v3 = vld [vmem:[%s4775_s25] sm:$0xff]  ;;  %v931_v4 = vld [vmem:[%s4775_s25 + $0x8] sm:$0xff]  ;;  %v932_v5 = vld [vmem:[%s4775_s25 + $0x10] sm:$0xff]  ;;  %v4654_v6 = vmov 0.0|0.0   ;;  %vm4655_vm2 = vmmov 0   ;;  %v4656_v10 = vmov 0.0   ;;  %v5843_v44 = vlaneseq  ;;  %s5884_s20 = scalar_lea.vmem %s5827_s9, %s4760_s29  ;;  %s5885_s5 = scalar_lea.vmem %s5828_s10, %s4760_s29 }
  0x30   : > { %4330 = vmatprep.subr.bf16.mxu1 %v4654_v6  ;;  %v4331_v7 = vpack.c.bf16 %v931_v4, %v930_v3  ;;  %v933_v8 = vld [vmem:[%s4775_s25 + $0x18] sm:$0xff]  ;;  %4318 = vmatprep.subr.bf16.mxu0 %v4654_v6  ;;  %v822_v9 = vld [vmem:[%s4770_s2] sm:$0xff]  ;;  %v823_v12 = vld [vmem:[%s4770_s2 + $0x8] sm:$0xff]  ;;  %s5869_s3 = sld [smem:[#allocation3_spill]]  ;;  %s5870_s24 = sld [smem:[#allocation15_spill]]  ;;  %vm837_vm3 = vcmask 523264  }
  0x31   : > { %4019 = vmatprep.mubr.msk.f32.mxu1 %vm4655_vm2, %v4656_v10  ;;  %3994 = vmatprep.mubr.msk.f32.mxu0 %vm4655_vm2, %v4656_v10  ;;  %v4334_v11 = vpack.c.bf16 %v933_v8, %v932_v5  ;;  %v824_v13 = vld [vmem:[%s4770_s2 + $0x10] sm:$0xff]  ;;  %v934_v14 = vld [vmem:[%s4775_s25 + $0x20] sm:$0xff]  ;;  %v935_v15 = vld [vmem:[%s4775_s25 + $0x28] sm:$0xff]  ;;  %v4319_v16 = vpack.c.bf16 %v823_v12, %v822_v9  ;;  %s5871_s8 = sld [smem:[#allocation9_spill]]  ;;  %v4939_v49 = vand.u32 127, %v5843_v44  ;;  %s5873_s21 = sld [smem:[#allocation7_spill]] }
  0x32   : > { %4332 = vmatpush3.bf16.msra.mxu1 %v4331_v7  ;;  %v825_v17 = vld [vmem:[%s4770_s2 + $0x18] sm:$0xff]  ;;  %v4337_v19 = vpack.c.bf16 %v935_v15, %v934_v14  ;;  %v826_v20 = vld [vmem:[%s4770_s2 + $0x20] sm:$0xff]  ;;  %v827_v21 = vld [vmem:[%s4770_s2 + $0x28] sm:$0xff]  ;;  %s5878_s17 = sld [smem:[#allocation5_spill]] }
  0x33   : > { %4333 = vmatprep.subr.bf16.mxu1 %v4654_v6  ;;  %4320 = vmatpush3.bf16.msra.mxu0 %v4319_v16  ;;  %v4322_v18 = vpack.c.bf16 %v825_v17, %v824_v13  ;;  %v936_v22 = vld [vmem:[%s4775_s25 + $0x30] sm:$0xff]  ;;  %v937_v23 = vld [vmem:[%s4775_s25 + $0x38] sm:$0xff]  ;;  %v4325_v24 = vpack.c.bf16 %v827_v21, %v826_v20  ;;  %vm4948_vm4 = vmpackc.low %vm837_vm3, %vm837_vm3  ;;  %vm1266_vm5 = vcmp.ge.s32.totalorder %v4939_v49, 8  ;;  %vm1267_vm6 = vcmp.lt.s32.totalorder %v4939_v49, 16 }
  0x34   : > { %4321 = vmatprep.subr.bf16.mxu0 %v4654_v6  ;;  %v4340_v25 = vpack.c.bf16 %v937_v23, %v936_v22  ;;  %v828_v26 = vld [vmem:[%s4770_s2 + $0x30] sm:$0xff]  ;;  %v829_v27 = vld [vmem:[%s4770_s2 + $0x38] sm:$0xff]  ;;  %vm1268_vm7 = vmand %vm1266_vm5, %vm1267_vm6  ;;  %vm1123_vm8 = vcmp.lt.s32.totalorder %v4939_v49, 8  ;;  %vm1584_vm9 = vcmp.ge.s32.totalorder %v4939_v49, 16  ;;  %vm1585_vm10 = vcmp.lt.s32.totalorder %v4939_v49, 24  ;;  %s5877_s2 = scalar_lea.vmem %s5825_s7, %s4760_s29 }
  0x35   : > { %v4328_v28 = vpack.c.bf16 %v829_v27, %v828_v26  ;;  %v4970_v4 = vsel %vm1268_vm7, 1.0, %v4656_v10  ;;  %v4973_v5 = vsel %vm1123_vm8, 1.0, %v4656_v10  ;;  %vm1586_vm11 = vmand %vm1584_vm9, %vm1585_vm10  ;;  %vm1812_vm12 = vcmp.ge.s32.totalorder %v4939_v49, 24 }
  0x36   : > { %4335 = vmatpush3.bf16.msra.mxu1 %v4334_v11  ;;  %v816_v29 = vld [vmem:[%s5870_s24] sm:$0xff]  ;;  %v1026_v31 = vld [vmem:[%s5869_s3 + $0x8] sm:$0xff]  ;;  %v1027_v34 = vld [vmem:[%s5869_s3 + $0x10] sm:$0xff]  ;;  %v5016_v17 = vsel %vm1586_vm11, 1.0, %v4656_v10  ;;  %vm1813_vm13 = vcmp.lt.s32.totalorder %v4939_v49, 32  ;;  %vm2040_vm15 = vcmp.ge.s32.totalorder %v4939_v49, 32 }
  0x37   : > { %4336 = vmatprep.subr.bf16.mxu1 %v4654_v6  ;;  %4323 = vmatpush3.bf16.msra.mxu0 %v4322_v18  ;;  %v1025_v30 = vld [vmem:[%s5869_s3] sm:$0xff]  ;;  %v817_v32 = vld [vmem:[%s5870_s24 + $0x8] sm:$0xff]  ;;  %v1028_v35 = vld [vmem:[%s5869_s3 + $0x18] sm:$0xff]  ;;  %s5872_s12 = scalar_lea.vmem %s5871_s8, %s4760_s29  ;;  %vm2041_vm0 = vcmp.lt.s32.totalorder %v4939_v49, 40  ;;  %vm2268_vm5 = vcmp.ge.s32.totalorder %v4939_v49, 40  ;;  %vm2269_vm6 = vcmp.lt.s32.totalorder %v4939_v49, 48 }
  0x38   : > { %4324 = vmatprep.subr.bf16.mxu0 %v4654_v6  ;;  %v4343_v33 = vpack.c.bf16 %v1026_v31, %v1025_v30  ;;  %v818_v36 = vld [vmem:[%s5870_s24 + $0x10] sm:$0x3]  ;;  %v4346_v37 = vpack.c.bf16 %v1028_v35, %v1027_v34  ;;  %v1029_v38 = vld [vmem:[%s5869_s3 + $0x20] sm:$0xff]  ;;  %v1030_v39 = vld [vmem:[%s5869_s3 + $0x28] sm:$0xff]  ;;  %vm2496_vm8 = vcmp.ge.s32.totalorder %v4939_v49, 48  ;;  %vm2497_vm9 = vcmp.lt.s32.totalorder %v4939_v49, 56 }
  0x39   : > { %v4349_v40 = vpack.c.bf16 %v1030_v39, %v1029_v38  ;;  %v1031_v41 = vld [vmem:[%s5869_s3 + $0x30] sm:$0xff]  ;;  %v1032_v42 = vld [vmem:[%s5869_s3 + $0x38] sm:$0xff]  ;;  %v3681_v47 = vld [vmem:[%s5872_s12] ss:$0 sm:$0xff]  ;;  %s5874_s3 = scalar_lea.vmem %s5873_s21, %s4760_s29  ;;  %vm2724_vm11 = vcmp.ge.s32.totalorder %v4939_v49, 56  ;;  %s5886_s12 = scalar_lea.vmem %s5829_s11, %s4760_s29 }
  0x3a   : > { %4338 = vmatpush3.bf16.msra.mxu1 %v4337_v19  ;;  %v4352_v43 = vpack.c.bf16 %v1032_v42, %v1031_v41  ;;  %v3677_v55 = vld [vmem:[%s5874_s3] ss:$0 sm:$0xff]  ;;  %vm1814_vm14 = vmand %vm1812_vm12, %vm1813_vm13  ;;  %vm2725_vm12 = vcmp.lt.s32.totalorder %v4939_v49, 64 }
  0x3b   : > { %4339 = vmatprep.subr.bf16.mxu1 %v4654_v6  ;;  %4326 = vmatpush3.bf16.msra.mxu0 %v4325_v24  ;;  %v5046_v21 = vsel %vm1814_vm14, 1.0, %v4656_v10  ;;  %vm2042_vm1 = vmand %vm2040_vm15, %vm2041_vm0  ;;  %vm1231_vm14 = vcmask 146432   ;;  %vm1238_vm15 = vcmask 140288  }
  0x3c   : > { %4327 = vmatprep.subr.bf16.mxu0 %v4654_v6  ;;  %vm2270_vm7 = vmand %vm2268_vm5, %vm2269_vm6 }
  0x3d   : > { %vm2498_vm10 = vmand %vm2496_vm8, %vm2497_vm9 }
  0x3e   : > { %4341 = vmatpush3.bf16.msra.mxu1 %v4340_v25  ;;  %v5073_v25 = vsel %vm2042_vm1, 1.0, %v4656_v10  ;;  %vm2726_vm13 = vmand %vm2724_vm11, %vm2725_vm12 }
  0x3f   : > { %4358 = vmatprep.subr.bf16.mxu1 %v4654_v6  ;;  %4329 = vmatpush3.bf16.msra.mxu0 %v4328_v28  ;;  %v5154_v38 = vsel %vm2726_vm13, 1.0, %v4656_v10 }
  0x40   : > { %4342 = vmatprep.subr.bf16.mxu0 %v4654_v6 }
  0x41   : > { %4020 = vmatmul.mubr.msk.f32.vlgmr.msra.gmra.mrb[0].mxu1 %vm837_vm3, %v816_v29 }
  0x42   : > { %4022 = vmatprep.mubr.msk.f32.mxu1 %vm4655_vm2, %v4656_v10  ;;  %3995 = vmatmul.mubr.msk.f32.vlgmr.msra.gmra.mrb[0].mxu0 %vm837_vm3, %v816_v29 }
  0x43   : > { %3997 = vmatprep.mubr.msk.f32.mxu0 %vm4655_vm2, %v4656_v10  ;;  %4344 = vmatpush3.bf16.msra.mxu0 %v4343_v33  ;;  %v5127_v33 = vsel %vm2498_vm10, 1.0, %v4656_v10 }
  0x44   : > { %4345 = vmatprep.subr.bf16.mxu0 %v4654_v6 }
  0x45   : > { %4023 = vmatmul.mubr.msk.f32.gmra.mrb[2].mxu1 %vm837_vm3, %v817_v32 }
  0x46   : > { %4025 = vmatprep.mubr.msk.f32.mxu1 %vm4655_vm2, %v4656_v10  ;;  %3998 = vmatmul.mubr.msk.f32.gmra.mrb[2].mxu0 %vm837_vm3, %v817_v32 }
  0x47   : > { %4000 = vmatprep.mubr.msk.f32.mxu0 %vm4655_vm2, %v4656_v10  ;;  %4347 = vmatpush3.bf16.msra.mxu0 %v4346_v37 }
  0x48   : > { %4348 = vmatprep.subr.bf16.mxu0 %v4654_v6 }
  0x49   : > { %4026 = vmatmul.mubr.msk.f32.gmra.mrb[4].mxu1 %vm837_vm3, %v818_v36 }
  0x4a   : > { %4074 = vmatprep.mubr.msk.f32.mxu1 %vm4655_vm2, %v4656_v10  ;;  %4001 = vmatmul.mubr.msk.f32.gmra.mrb[4].mxu0 %vm837_vm3, %v818_v36 }
  0x4b   : > { %4044 = vmatprep.mubr.msk.f32.mxu0 %vm4655_vm2, %v4656_v10  ;;  %4350 = vmatpush3.bf16.msra.mxu0 %v4349_v40 }
  0x4c   : > { %4351 = vmatprep.subr.bf16.mxu0 %v4654_v6 }
  0x4f   : > { %4353 = vmatpush3.bf16.msra.mxu0 %v4352_v43 }
  0x50   : > { %4354 = vmatprep.subr.bf16.mxu0 %v4654_v6 }
  0x52   : > { %4045 = vmatmul.mubr.msk.f32.vlgmr.msra.gmra.mrb[6].mxu0 %vm837_vm3, %v816_v29  ;;  %v5100_v29 = vsel %vm2270_vm7, 1.0, %v4656_v10 }
  0x53   : > { %4047 = vmatprep.mubr.msk.f32.mxu0 %vm4655_vm2, %v4656_v10 }
  0x56   : > { %4048 = vmatmul.mubr.msk.f32.gmra.mrb[8].mxu0 %vm837_vm3, %v817_v32 }
  0x57   : > { %4050 = vmatprep.mubr.msk.f32.mxu0 %vm4655_vm2, %v4656_v10 }
  0x5a   : > { %4051 = vmatmul.mubr.msk.f32.gmra.mrb[10].mxu0 %vm837_vm3, %v818_v36 }
  0x5b   : > { %4059 = vmatprep.mubr.msk.f32.mxu0 %vm4655_vm2, %v4656_v10 }
 0x114   : > { %v1011_v45 = vpop.f32.mrb[0].mxu1 }
 0x115   : > { %v4021_v46 = vpop.f32.mrb[1].mxu1  ;;  %v913_v48 = vpop.f32.mrb[0].mxu0  ;;  %v1012_v52 = vadd.f32 %v3681_v47, %v1011_v45 }
 0x116   : > { %v3996_v51 = vpop.f32.mrb[1].mxu0  ;;  %v914_v59 = vadd.f32 %v3677_v55, %v913_v48  ;;  %v3685_v48 = vld [vmem:[%s5877_s2] ss:$0 sm:$0xff] }
 0x118   : > { %v1016_v50 = vpop.f32.mrb[2].mxu1  ;;  %v4965_v0 = vmul.f32 0.35355338, %v914_v59 }
 0x119   : > { %v1017_v53 = vadd.f32 %v3681_v47, %v1016_v50  ;;  %v4024_v54 = vpop.f32.mrb[3].mxu1  ;;  %v918_v58 = vpop.f32.mrb[2].mxu0 }
 0x11a   : > { %v3999_v61 = vpop.f32.mrb[3].mxu0  ;;  %v919_v1 = vadd.f32 %v3677_v55, %v918_v58  ;;  %v1271_v8 = vmul.f32 %v4970_v4, %v4965_v0  ;;  %v1127_v11 = vmul.f32 %v4973_v5, %v4965_v0  ;;  %v1589_v18 = vmul.f32 %v5016_v17, %v4965_v0 }
 0x11b   : > { %v4952_v57 = vpack.c.bf16 %v1017_v53, %v1012_v52  ;;  %v1817_v22 = vmul.f32 %v5046_v21, %v4965_v0  ;;  %v2045_v26 = vmul.f32 %v5073_v25, %v4965_v0  ;;  %v2273_v30 = vmul.f32 %v5100_v29, %v4965_v0 }
 0x11c   : > { %v1021_v60 = vpop.f32.mrb[4].mxu1  ;;  %v4975_v7 = vmul.f32 0.35355338, %v919_v1  ;;  %v2501_v34 = vmul.f32 %v5127_v33, %v4965_v0  ;;  %v2729_v40 = vmul.f32 %v5154_v38, %v4965_v0 }
 0x11d   : > { %4357 = vmatpush3.bf16.xpose.msk.msra.mxu0 %vm4948_vm4, %v4952_v57  ;;  %4361 = vmatpush3.bf16.xpose.msk.msra.mxu1 %vm4948_vm4, %v4952_v57  ;;  %v4027_v62 = vpop.f32.mrb[5].mxu1  ;;  %v923_v63 = vpop.f32.mrb[4].mxu0  ;;  %v4967_v3 = vadd.f32 %v3681_v47, %v1021_v60 }
 0x11e   : > { %4057 = vmatprep.subr.mxu0 %v4656_v10  ;;  %4072 = vmatprep.subr.mxu1 %v4656_v10  ;;  %v4002_v2 = vpop.f32.mrb[5].mxu0  ;;  %v924_v9 = vadd.f32 %v3677_v55, %v923_v63  ;;  %v1272_v13 = vmul.f32 %v4970_v4, %v4975_v7  ;;  %v1128_v14 = vmul.f32 %v4973_v5, %v4975_v7 }
 0x11f   : > { %v1590_v19 = vmul.f32 %v5016_v17, %v4975_v7  ;;  %v1818_v23 = vmul.f32 %v5046_v21, %v4975_v7  ;;  %v2046_v27 = vmul.f32 %v5073_v25, %v4975_v7  ;;  %v2274_v31 = vmul.f32 %v5100_v29, %v4975_v7 }
 0x120   : > { %v4988_v12 = vmul.f32 0.35355338, %v924_v9  ;;  %v2502_v35 = vmul.f32 %v5127_v33, %v4975_v7  ;;  %v2730_v43 = vmul.f32 %v5154_v38, %v4975_v7 }
 0x122   : > { %v1273_v15 = vmul.f32 %v4970_v4, %v4988_v12  ;;  %v1129_v16 = vmul.f32 %v4973_v5, %v4988_v12  ;;  %v1591_v20 = vmul.f32 %v5016_v17, %v4988_v12  ;;  %v1819_v24 = vmul.f32 %v5046_v21, %v4988_v12 }
 0x123   : > { %v2047_v28 = vmul.f32 %v5073_v25, %v4988_v12  ;;  %v2275_v32 = vmul.f32 %v5100_v29, %v4988_v12  ;;  %v2503_v36 = vmul.f32 %v5127_v33, %v4988_v12  ;;  %v2731_v47 = vmul.f32 %v5154_v38, %v4988_v12 }
 0x125   : > { %4058 = vmatpush3.xpose.msk.msra.mxu0 %vm837_vm3, %v4967_v3  ;;  %4073 = vmatpush3.xpose.msk.msra.mxu1 %vm837_vm3, %v4967_v3  ;;  %v1106_v37 = vpop.f32.mrb[6].mxu0 }
 0x126   : > { %4368 = vmatprep.subr.bf16.mxu1 %v4654_v6  ;;  %4362 = vmatprep.subr.bf16.mxu0 %v4654_v6  ;;  %v4046_v39 = vpop.f32.mrb[7].mxu0  ;;  %v1107_v49 = vadd.f32 %v3685_v48, %v1106_v37 }
 0x128   : > { %4075 = vmatmul.mubr.msk.f32.vlgmr.msra.gmra.mrb[6].mxu1 %vm837_vm3, %v1271_v8  ;;  %4060 = vmatmul.mubr.msk.f32.vlgmr.msra.gmra.mrb[12].mxu0 %vm837_vm3, %v1127_v11  ;;  %v1274_v52 = vmul.f32 %v4970_v4, %v1107_v49  ;;  %v5187_v54 = vmul.f32 %v4973_v5, %v1107_v49  ;;  %v5193_v56 = vmul.f32 %v5016_v17, %v1107_v49 }
 0x129   : > { %4371 = vmatpush3.bf16.xpose.msk.msra.mxu1 %vm4948_vm4, %v4952_v57  ;;  %4077 = vmatprep.mubr.msk.f32.mxu1 %vm4655_vm2, %v4656_v10  ;;  %v1111_v41 = vpop.f32.mrb[8].mxu0  ;;  %v5199_v59 = vmul.f32 %v5046_v21, %v1107_v49  ;;  %v5205_v61 = vmul.f32 %v5073_v25, %v1107_v49  ;;  %v5215_v1 = vmul.f32 %v5100_v29, %v1107_v49 }
 0x12a   : > { %4062 = vmatprep.mubr.msk.f32.mxu0 %vm4655_vm2, %v4656_v10  ;;  %4117 = vmatprep.subr.mxu1 %v4656_v10  ;;  %v4049_v42 = vpop.f32.mrb[9].mxu0  ;;  %v1112_v50 = vadd.f32 %v3685_v48, %v1111_v41  ;;  %v5223_v7 = vmul.f32 %v5127_v33, %v1107_v49  ;;  %v5232_v11 = vmul.f32 %v5154_v38, %v1107_v49 }
 0x12c   : > { %4078 = vmatmul.mubr.msk.f32.gmra.mrb[8].mxu1 %vm837_vm3, %v1272_v13  ;;  %4063 = vmatmul.mubr.msk.f32.gmra.mrb[14].mxu0 %vm837_vm3, %v1128_v14  ;;  %v1275_v53 = vmul.f32 %v4970_v4, %v1112_v50  ;;  %v5190_v55 = vmul.f32 %v4973_v5, %v1112_v50  ;;  %v5202_v60 = vmul.f32 %v5046_v21, %v1112_v50 }
 0x12d   : > { %4080 = vmatprep.mubr.msk.f32.mxu1 %vm4655_vm2, %v4656_v10  ;;  %4065 = vmatprep.mubr.msk.f32.mxu0 %vm4655_vm2, %v4656_v10  ;;  %v1116_v45 = vpop.f32.mrb[10].mxu0  ;;  %v5212_v0 = vmul.f32 %v5073_v25, %v1112_v50  ;;  %v5226_v8 = vmul.f32 %v5127_v33, %v1112_v50  ;;  %v5235_v12 = vmul.f32 %v5154_v38, %v1112_v50 }
 0x12e   : > { %v4052_v46 = vpop.f32.mrb[11].mxu0  ;;  %v5182_v51 = vadd.f32 %v3685_v48, %v1116_v45  ;;  %v4363_v58 = vpack.c.bf16 %v1275_v53, %v1274_v52  ;;  %v4366_v62 = vpack.c.bf16 %v5190_v55, %v5187_v54 }
 0x130   : > { %4081 = vmatmul.mubr.msk.f32.gmra.mrb[10].mxu1 %vm837_vm3, %v1273_v15  ;;  %4066 = vmatmul.mubr.msk.f32.gmra.mrb[16].mxu0 %vm837_vm3, %v1129_v16  ;;  %v1276_v16 = vmul.f32 %v4970_v4, %v5182_v51  ;;  %v5258_v4 = vld [vmem:[%s5878_s17 + $0x8] sm:$0xff] }
 0x131   : > { %4118 = vmatpush3.xpose.msk.msra.mxu1 %vm837_vm3, %v4967_v3  ;;  %4119 = vmatprep.mubr.msk.f32.mxu1 %vm4655_vm2, %v4656_v10 }
 0x132   : > { %4375 = vmatprep.subr.bf16.mxu1 %v4654_v6  ;;  %4089 = vmatprep.mubr.msk.f32.mxu0 %vm4655_vm2, %v4656_v10 }
 0x133   : > { %4364 = vmatpush3.bf16.msra.mxu0 %v4363_v58 }
 0x134   : > { %4120 = vmatmul.mubr.msk.f32.vlgmr.msra.gmra.mrb[12].mxu1 %vm837_vm3, %v1589_v18  ;;  %4087 = vmatprep.subr.mxu0 %v4656_v10  ;;  %v5250_v18 = vld [vmem:[%s5878_s17] sm:$0xff] }
 0x135   : > { %4378 = vmatpush3.bf16.xpose.msk.msra.mxu1 %vm4948_vm4, %v4952_v57  ;;  %4122 = vmatprep.mubr.msk.f32.mxu1 %vm4655_vm2, %v4656_v10 }
 0x136   : > { %4147 = vmatprep.subr.mxu1 %v4656_v10 }
 0x138   : > { %4123 = vmatmul.mubr.msk.f32.gmra.mrb[14].mxu1 %vm837_vm3, %v1590_v19 }
 0x139   : > { %4125 = vmatprep.mubr.msk.f32.mxu1 %vm4655_vm2, %v4656_v10 }
 0x13c   : > { %4126 = vmatmul.mubr.msk.f32.gmra.mrb[16].mxu1 %vm837_vm3, %v1591_v20 }
 0x13d   : > { %4148 = vmatpush3.xpose.msk.msra.mxu1 %vm837_vm3, %v4967_v3  ;;  %4149 = vmatprep.mubr.msk.f32.mxu1 %vm4655_vm2, %v4656_v10 }
 0x13e   : > { %4382 = vmatprep.subr.bf16.mxu1 %v4654_v6 }
 0x140   : > { %4150 = vmatmul.mubr.msk.f32.vlgmr.msra.gmra.mrb[18].mxu1 %vm837_vm3, %v1817_v22 }
 0x141   : > { %4385 = vmatpush3.bf16.xpose.msk.msra.mxu1 %vm4948_vm4, %v4952_v57  ;;  %4152 = vmatprep.mubr.msk.f32.mxu1 %vm4655_vm2, %v4656_v10 }
 0x142   : > { %4177 = vmatprep.subr.mxu1 %v4656_v10 }
 0x144   : > { %4153 = vmatmul.mubr.msk.f32.gmra.mrb[20].mxu1 %vm837_vm3, %v1818_v23 }
 0x145   : > { %4155 = vmatprep.mubr.msk.f32.mxu1 %vm4655_vm2, %v4656_v10 }
 0x148   : > { %4156 = vmatmul.mubr.msk.f32.gmra.mrb[22].mxu1 %vm837_vm3, %v1819_v24 }
 0x149   : > { %4178 = vmatpush3.xpose.msk.msra.mxu1 %vm837_vm3, %v4967_v3  ;;  %4179 = vmatprep.mubr.msk.f32.mxu1 %vm4655_vm2, %v4656_v10 }
 0x14a   : > { %4389 = vmatprep.subr.bf16.mxu1 %v4654_v6 }
 0x14c   : > { %4180 = vmatmul.mubr.msk.f32.vlgmr.msra.gmra.mrb[24].mxu1 %vm837_vm3, %v2045_v26 }
 0x14d   : > { %4392 = vmatpush3.bf16.xpose.msk.msra.mxu1 %vm4948_vm4, %v4952_v57  ;;  %4182 = vmatprep.mubr.msk.f32.mxu1 %vm4655_vm2, %v4656_v10 }
 0x14e   : > { %4207 = vmatprep.subr.mxu1 %v4656_v10 }
 0x150   : > { %4183 = vmatmul.mubr.msk.f32.gmra.mrb[26].mxu1 %vm837_vm3, %v2046_v27 }
 0x151   : > { %4185 = vmatprep.mubr.msk.f32.mxu1 %vm4655_vm2, %v4656_v10 }
 0x154   : > { %4186 = vmatmul.mubr.msk.f32.gmra.mrb[28].mxu1 %vm837_vm3, %v2047_v28 }
 0x155   : > { %4208 = vmatpush3.xpose.msk.msra.mxu1 %vm837_vm3, %v4967_v3  ;;  %4209 = vmatprep.mubr.msk.f32.mxu1 %vm4655_vm2, %v4656_v10 }
 0x156   : > { %4396 = vmatprep.subr.bf16.mxu1 %v4654_v6 }
 0x158   : > { %4210 = vmatmul.mubr.msk.f32.vlgmr.msra.gmra.mrb[30].mxu1 %vm837_vm3, %v2273_v30 }
 0x159   : > { %4399 = vmatpush3.bf16.xpose.msk.msra.mxu1 %vm4948_vm4, %v4952_v57  ;;  %4212 = vmatprep.mubr.msk.f32.mxu1 %vm4655_vm2, %v4656_v10 }
 0x15a   : > { %4237 = vmatprep.subr.mxu1 %v4656_v10 }
 0x15c   : > { %4213 = vmatmul.mubr.msk.f32.gmra.mrb[32].mxu1 %vm837_vm3, %v2274_v31 }
 0x15d   : > { %4215 = vmatprep.mubr.msk.f32.mxu1 %vm4655_vm2, %v4656_v10 }
 0x160   : > { %4216 = vmatmul.mubr.msk.f32.gmra.mrb[34].mxu1 %vm837_vm3, %v2275_v32 }
 0x161   : > { %4238 = vmatpush3.xpose.msk.msra.mxu1 %vm837_vm3, %v4967_v3  ;;  %4239 = vmatprep.mubr.msk.f32.mxu1 %vm4655_vm2, %v4656_v10 }
 0x162   : > { %4403 = vmatprep.subr.bf16.mxu1 %v4654_v6 }
 0x164   : > { %4240 = vmatmul.mubr.msk.f32.vlgmr.msra.gmra.mrb[36].mxu1 %vm837_vm3, %v2501_v34  ;;  %v5268_v34 = vld [vmem:[%s5878_s17 + $0x10] sm:$0x3] }
 0x165   : > { %4406 = vmatpush3.bf16.xpose.msk.msra.mxu1 %vm4948_vm4, %v4952_v57  ;;  %4242 = vmatprep.mubr.msk.f32.mxu1 %vm4655_vm2, %v4656_v10  ;;  %v5196_v57 = vmul.f32 %v5016_v17, %v1112_v50  ;;  %vm1408_vm4 = vcmask 1041408  }
 0x166   : > { %4267 = vmatprep.subr.mxu1 %v4656_v10  ;;  %4088 = vmatpush3.msk.msra.mxu0 %vm1408_vm4, %v1276_v16 }
 0x167   : > { %v4373_v63 = vpack.c.bf16 %v5196_v57, %v5193_v56  ;;  %4365 = vmatprep.subr.bf16.mxu0 %v4654_v6 }
 0x168   : > { %4243 = vmatmul.mubr.msk.f32.gmra.mrb[38].mxu1 %vm837_vm3, %v2502_v35 }
 0x169   : > { %4245 = vmatprep.mubr.msk.f32.mxu1 %vm4655_vm2, %v4656_v10 }
 0x16c   : > { %4246 = vmatmul.mubr.msk.f32.gmra.mrb[40].mxu1 %vm837_vm3, %v2503_v36 }
 0x16d   : > { %4268 = vmatpush3.xpose.msk.msra.mxu1 %vm837_vm3, %v4967_v3  ;;  %4269 = vmatprep.mubr.msk.f32.mxu1 %vm4655_vm2, %v4656_v10  ;;  %v5220_v3 = vmul.f32 %v5100_v29, %v1112_v50 }
 0x16e   : > { %4410 = vmatprep.subr.bf16.mxu1 %v4654_v6 }
 0x170   : > { %4270 = vmatmul.mubr.msk.f32.vlgmr.msra.gmra.mrb[42].mxu1 %vm837_vm3, %v2729_v40 }
 0x171   : > { %4272 = vmatprep.mubr.msk.f32.mxu1 %vm4655_vm2, %v4656_v10 }
 0x174   : > { %4273 = vmatmul.mubr.msk.f32.gmra.mrb[44].mxu1 %vm837_vm3, %v2730_v43 }
 0x175   : > { %4275 = vmatprep.mubr.msk.f32.mxu1 %vm4655_vm2, %v4656_v10 }
 0x178   : > { %4276 = vmatmul.mubr.msk.f32.gmra.mrb[46].mxu1 %vm837_vm3, %v2731_v47 }
 0x179   : > { %4309 = vmatprep.mubr.msk.f32.mxu1 %vm4655_vm2, %v4656_v10 }
 0x1fb   : > { %v1352_v19 = vpop.f32.mrb[6].mxu1  ;;  %v1217_v20 = vpop.f32.mrb[12].mxu0 }
 0x1fc   : > { %v5253_v22 = vadd.f32 %v1352_v19, %v5250_v18  ;;  %v4061_v23 = vpop.f32.mrb[13].mxu0  ;;  %v4076_v24 = vpop.f32.mrb[7].mxu1  ;;  %v5279_v43 = vadd.f32 %v1217_v20, %v5250_v18 }
 0x1fe   : > { %v1366_v26 = vsel %vm1231_vm14, %v5253_v22, -inf  ;;  %v1232_v52 = vsel %vm1231_vm14, %v5279_v43, -inf }
 0x1ff   : > { %1367 = vmax.xlane.f32.xlu0 %v1366_v26  ;;  %v1357_v27 = vpop.f32.mrb[8].mxu1  ;;  %v1222_v28 = vpop.f32.mrb[14].mxu0 }
 0x200   : > { %v5263_v30 = vadd.f32 %v1357_v27, %v5258_v4  ;;  %v4064_v31 = vpop.f32.mrb[15].mxu0  ;;  %v4079_v32 = vpop.f32.mrb[9].mxu1  ;;  %v5271_v35 = vadd.f32 %v1222_v28, %v5258_v4 }
 0x202   : > { %v1369_v36 = vsel %vm1231_vm14, %v5263_v30, -inf  ;;  %v1235_v46 = vsel %vm1231_vm14, %v5271_v35, -inf }
 0x203   : > { %1370 = vmax.xlane.f32.xlu0 %v1369_v36  ;;  %v1362_v37 = vpop.f32.mrb[10].mxu1  ;;  %v1227_v39 = vpop.f32.mrb[16].mxu0 }
 0x204   : > { %v5276_v40 = vadd.f32 %v1362_v37, %v5268_v34  ;;  %v4067_v41 = vpop.f32.mrb[17].mxu0  ;;  %v4082_v42 = vpop.f32.mrb[11].mxu1  ;;  %v5289_v50 = vadd.f32 %v1227_v39, %v5268_v34 }
 0x206   : > { %v1372_v45 = vsel %vm1238_vm15, %v5276_v40, -inf  ;;  %v1239_v20 = vsel %vm1238_vm15, %v5289_v50, -inf }
 0x207   : > { %1373 = vmax.xlane.f32.xlu1 %v1372_v45  ;;  %v1670_v47 = vpop.f32.mrb[12].mxu1  ;;  %1236 = vmax.xlane.f32.xlu0 %v1235_v46 }
 0x208   : > { %v5286_v48 = vadd.f32 %v1670_v47, %v5250_v18  ;;  %v4121_v49 = vpop.f32.mrb[13].mxu1 }
 0x20a   : > { %v1684_v53 = vsel %vm1231_vm14, %v5286_v48, -inf }
 0x20b   : > { %v1675_v58 = vpop.f32.mrb[14].mxu1  ;;  %1233 = vmax.xlane.f32.xlu1 %v1232_v52  ;;  %1685 = vmax.xlane.f32.xlu0 %v1684_v53 }
 0x20c   : > { %v4124_v16 = vpop.f32.mrb[15].mxu1  ;;  %v5296_v19 = vadd.f32 %v1675_v58, %v5258_v4 }
 0x20e   : > { %v1687_v28 = vsel %vm1231_vm14, %v5296_v19, -inf }
 0x20f   : > { %v1680_v23 = vpop.f32.mrb[16].mxu1  ;;  %1240 = vmax.xlane.f32.xlu1 %v1239_v20 }
 0x210   : > { %v5301_v24 = vadd.f32 %v1680_v23, %v5268_v34  ;;  %v4127_v26 = vpop.f32.mrb[17].mxu1 }
 0x212   : > { %v1690_v27 = vsel %vm1238_vm15, %v5301_v24, -inf }
 0x213   : > { %v1898_v31 = vpop.f32.mrb[18].mxu1  ;;  %1691 = vmax.xlane.f32.xlu0 %v1690_v27  ;;  %1688 = vmax.xlane.f32.xlu1 %v1687_v28 }
 0x214   : > { %v5308_v32 = vadd.f32 %v1898_v31, %v5250_v18  ;;  %v4151_v36 = vpop.f32.mrb[19].mxu1 }
 0x216   : > { %v1912_v37 = vsel %vm1231_vm14, %v5308_v32, -inf }
 0x217   : > { %v1903_v39 = vpop.f32.mrb[20].mxu1  ;;  %1913 = vmax.xlane.f32.xlu1 %v1912_v37 }
 0x218   : > { %v5313_v41 = vadd.f32 %v1903_v39, %v5258_v4  ;;  %v4154_v42 = vpop.f32.mrb[21].mxu1 }
 0x21a   : > { %v1915_v45 = vsel %vm1231_vm14, %v5313_v41, -inf }
 0x21b   : > { %v1908_v46 = vpop.f32.mrb[22].mxu1  ;;  %1916 = vmax.xlane.f32.xlu0 %v1915_v45 }
 0x21c   : > { %v5318_v47 = vadd.f32 %v1908_v46, %v5268_v34  ;;  %v4157_v49 = vpop.f32.mrb[23].mxu1 }
 0x21e   : > { %v1918_v52 = vsel %vm1238_vm15, %v5318_v47, -inf }
 0x21f   : > { %v2126_v53 = vpop.f32.mrb[24].mxu1  ;;  %1919 = vmax.xlane.f32.xlu1 %v1918_v52 }
 0x220   : > { %v5323_v58 = vadd.f32 %v2126_v53, %v5250_v18  ;;  %v4181_v16 = vpop.f32.mrb[25].mxu1 }
 0x222   : > { %v2140_v20 = vsel %vm1231_vm14, %v5323_v58, -inf }
 0x223   : > { %v2131_v23 = vpop.f32.mrb[26].mxu1  ;;  %2141 = vmax.xlane.f32.xlu0 %v2140_v20 }
 0x224   : > { %v5328_v26 = vadd.f32 %v2131_v23, %v5258_v4  ;;  %v4184_v27 = vpop.f32.mrb[27].mxu1 }
 0x226   : > { %v2143_v28 = vsel %vm1231_vm14, %v5328_v26, -inf }
 0x227   : > { %v2136_v31 = vpop.f32.mrb[28].mxu1  ;;  %2144 = vmax.xlane.f32.xlu1 %v2143_v28 }
 0x228   : > { %v5333_v36 = vadd.f32 %v2136_v31, %v5268_v34  ;;  %v4187_v37 = vpop.f32.mrb[29].mxu1 }
 0x22a   : > { %v2146_v39 = vsel %vm1238_vm15, %v5333_v36, -inf }
 0x22b   : > { %v2354_v42 = vpop.f32.mrb[30].mxu1  ;;  %2147 = vmax.xlane.f32.xlu0 %v2146_v39 }
 0x22c   : > { %v5338_v45 = vadd.f32 %v2354_v42, %v5250_v18  ;;  %v4211_v46 = vpop.f32.mrb[31].mxu1 }
 0x22e   : > { %v2368_v49 = vsel %vm1231_vm14, %v5338_v45, -inf }
 0x22f   : > { %v2359_v52 = vpop.f32.mrb[32].mxu1  ;;  %2369 = vmax.xlane.f32.xlu1 %v2368_v49 }
 0x230   : > { %v5343_v53 = vadd.f32 %v2359_v52, %v5258_v4  ;;  %v4214_v16 = vpop.f32.mrb[33].mxu1 }
 0x232   : > { %v2371_v20 = vsel %vm1231_vm14, %v5343_v53, -inf }
 0x233   : > { %v2364_v23 = vpop.f32.mrb[34].mxu1  ;;  %2372 = vmax.xlane.f32.xlu0 %v2371_v20 }
 0x234   : > { %v5348_v27 = vadd.f32 %v2364_v23, %v5268_v34  ;;  %v4217_v28 = vpop.f32.mrb[35].mxu1 }
 0x236   : > { %v2374_v31 = vsel %vm1238_vm15, %v5348_v27, -inf }
 0x237   : > { %v2582_v37 = vpop.f32.mrb[36].mxu1  ;;  %2375 = vmax.xlane.f32.xlu1 %v2374_v31 }
 0x238   : > { %v5353_v39 = vadd.f32 %v2582_v37, %v5250_v18  ;;  %v4241_v42 = vpop.f32.mrb[37].mxu1 }
 0x23a   : > { %v2596_v46 = vsel %vm1231_vm14, %v5353_v39, -inf }
 0x23b   : > { %v2587_v49 = vpop.f32.mrb[38].mxu1  ;;  %2597 = vmax.xlane.f32.xlu0 %v2596_v46 }
 0x23c   : > { %v5358_v52 = vadd.f32 %v2587_v49, %v5258_v4  ;;  %v4244_v16 = vpop.f32.mrb[39].mxu1 }
 0x23e   : > { %v2599_v20 = vsel %vm1231_vm14, %v5358_v52, -inf }
 0x23f   : > { %v2592_v23 = vpop.f32.mrb[40].mxu1  ;;  %2600 = vmax.xlane.f32.xlu1 %v2599_v20 }
 0x240   : > { %v5363_v28 = vadd.f32 %v2592_v23, %v5268_v34  ;;  %v4247_v31 = vpop.f32.mrb[41].mxu1 }
 0x242   : > { %v2602_v37 = vsel %vm1238_vm15, %v5363_v28, -inf }
 0x243   : > { %v2810_v42 = vpop.f32.mrb[42].mxu1  ;;  %2603 = vmax.xlane.f32.xlu0 %v2602_v37 }
 0x244   : > { %v5368_v46 = vadd.f32 %v2810_v42, %v5250_v18  ;;  %v4271_v49 = vpop.f32.mrb[43].mxu1 }
 0x246   : > { %v2824_v16 = vsel %vm1231_vm14, %v5368_v46, -inf }
 0x247   : > { %v2815_v44 = vpop.f32.mrb[44].mxu1  ;;  %2825 = vmax.xlane.f32.xlu1 %v2824_v16 }
 0x248   : > { %v5373_v20 = vadd.f32 %v2815_v44, %v5258_v4  ;;  %v4274_v23 = vpop.f32.mrb[45].mxu1 }
 0x24a   : > { %v2827_v31 = vsel %vm1231_vm14, %v5373_v20, -inf }
 0x24b   : > { %v2820_v15 = vpop.f32.mrb[46].mxu1  ;;  %2828 = vmax.xlane.f32.xlu1 %v2827_v31 }
 0x24c   : > { %v5378_v37 = vadd.f32 %v2820_v15, %v5268_v34  ;;  %v4277_v18 = vpop.f32.mrb[47].mxu1 }
 0x24e   : > { %v2830_v42 = vsel %vm1238_vm15, %v5378_v37, -inf }
 0x24f   : > { %2831 = vmax.xlane.f32.xlu1 %v2830_v42 }
 0x28c   : > { %v1368_v49 = vpop.xlane.xlu0 %1367 }
 0x28d   : > { %v1375_v16 = vsub.f32 %v5253_v22, %v1368_v49 }
 0x28f   : > { %v1378_v14 = vmul.f32 1.442695, %v1375_v16 }
 0x290   : > { %v1371_v44 = vpop.xlane.xlu0 %1370 }
 0x291   : > { %4523 = vpow2.f32 %v1378_v14  ;;  %v1376_v4 = vsub.f32 %v5263_v30, %v1371_v44 }
 0x293   : > { %v1380_v23 = vmul.f32 1.442695, %v1376_v4 }
 0x294   : > { %v1374_v13 = vpop.xlane.xlu1 %1373  ;;  %v1237_v9 = vpop.xlane.xlu0 %1236 }
 0x295   : > { %4525 = vpow2.f32 %v1380_v23  ;;  %v1377_v15 = vsub.f32 %v5276_v40, %v1374_v13  ;;  %v1243_v34 = vsub.f32 %v5271_v35, %v1237_v9 }
 0x297   : > { %v1382_v31 = vmul.f32 1.442695, %v1377_v15  ;;  %v1247_v18 = vmul.f32 1.442695, %v1243_v34 }
 0x298   : > { %v1234_v2 = vpop.xlane.xlu1 %1233  ;;  %v1686_v42 = vpop.xlane.xlu0 %1685 }
 0x299   : > { %4527 = vpow2.f32 %v1382_v31  ;;  %v1242_v22 = vsub.f32 %v5279_v43, %v1234_v2  ;;  %v1693_v49 = vsub.f32 %v5286_v48, %v1686_v42 }
 0x29a   : > { %4529 = vpow2.f32 %v1247_v18 }
 0x29b   : > { %v5388_v14 = vpop.eup %4523  ;;  %v1245_v30 = vmul.f32 1.442695, %v1242_v22  ;;  %v1696_v16 = vmul.f32 1.442695, %v1693_v49 }
 0x29c   : > { %v1241_v44 = vpop.xlane.xlu1 %1240  ;;  %v1384_v13 = vsel %vm1231_vm14, %v5388_v14, 0.0 }
 0x29d   : > { %4531 = vpow2.f32 %v1245_v30  ;;  %v1244_v9 = vsub.f32 %v5289_v50, %v1241_v44  ;;  %1385 = vadd.xlane.f32.xlu0 %v1384_v13 }
 0x29e   : > { %4533 = vpow2.f32 %v1696_v16 }
 0x29f   : > { %v5393_v35 = vpop.eup %4525  ;;  %v1249_v40 = vmul.f32 1.442695, %v1244_v9 }
 0x2a0   : > { %v1692_v2 = vpop.xlane.xlu0 %1691  ;;  %v1689_v43 = vpop.xlane.xlu1 %1688  ;;  %v1387_v48 = vsel %vm1231_vm14, %v5393_v35, 0.0 }
 0x2a1   : > { %4535 = vpow2.f32 %v1249_v40  ;;  %v1695_v4 = vsub.f32 %v5301_v24, %v1692_v2  ;;  %v1694_v23 = vsub.f32 %v5296_v19, %v1689_v43  ;;  %1388 = vadd.xlane.f32.xlu0 %v1387_v48 }
 0x2a3   : > { %v5399_v15 = vpop.eup %4527  ;;  %v1700_v34 = vmul.f32 1.442695, %v1695_v4  ;;  %v1698_v50 = vmul.f32 1.442695, %v1694_v23 }
 0x2a4   : > { %v1914_v31 = vpop.xlane.xlu1 %1913  ;;  %v1390_v18 = vsel %vm1238_vm15, %v5399_v15, 0.0  ;;  %v5403_v42 = vpop.eup %4529 }
 0x2a5   : > { %4537 = vpow2.f32 %v1700_v34  ;;  %v1921_v22 = vsub.f32 %v5308_v32, %v1914_v31  ;;  %1391 = vadd.xlane.f32.xlu0 %v1390_v18  ;;  %v1254_v30 = vsel %vm1231_vm14, %v5403_v42, 0.0 }
 0x2a6   : > { %4539 = vpow2.f32 %v1698_v50 }
 0x2a7   : > { %v5406_v49 = vpop.eup %4531  ;;  %v1924_v24 = vmul.f32 1.442695, %v1921_v22 }
 0x2a8   : > { %v1917_v19 = vpop.xlane.xlu0 %1916  ;;  %v1251_v16 = vsel %vm1231_vm14, %v5406_v49, 0.0  ;;  %v5412_v44 = vpop.eup %4533 }
 0x2a9   : > { %4541 = vpow2.f32 %v1924_v24  ;;  %v1922_v13 = vsub.f32 %v5313_v41, %v1917_v19  ;;  %1255 = vadd.xlane.f32.xlu0 %v1254_v30  ;;  %1252 = vadd.xlane.f32.xlu1 %v1251_v16  ;;  %v1702_v2 = vsel %vm1231_vm14, %v5412_v44, 0.0 }
 0x2ab   : > { %v5415_v32 = vpop.eup %4535  ;;  %v1926_v9 = vmul.f32 1.442695, %v1922_v13 }
 0x2ac   : > { %v1920_v40 = vpop.xlane.xlu1 %1919  ;;  %v1257_v43 = vsel %vm1238_vm15, %v5415_v32, 0.0 }
 0x2ad   : > { %4543 = vpow2.f32 %v1926_v9  ;;  %v1923_v48 = vsub.f32 %v5318_v47, %v1920_v40  ;;  %1703 = vadd.xlane.f32.xlu0 %v1702_v2  ;;  %1258 = vadd.xlane.f32.xlu1 %v1257_v43 }
 0x2af   : > { %v5422_v4 = vpop.eup %4537  ;;  %v1928_v41 = vmul.f32 1.442695, %v1923_v48 }
 0x2b0   : > { %v5424_v23 = vpop.eup %4539  ;;  %v2142_v34 = vpop.xlane.xlu0 %2141  ;;  %v1708_v50 = vsel %vm1238_vm15, %v5422_v4, 0.0 }
 0x2b1   : > { %4545 = vpow2.f32 %v1928_v41  ;;  %v2149_v31 = vsub.f32 %v5323_v58, %v2142_v34  ;;  %1709 = vadd.xlane.f32.xlu0 %v1708_v50  ;;  %v1705_v18 = vsel %vm1231_vm14, %v5424_v23, 0.0 }
 0x2b2   : > { %1706 = vadd.xlane.f32.xlu1 %v1705_v18 }
 0x2b3   : > { %v5431_v47 = vpop.eup %4541  ;;  %v2152_v22 = vmul.f32 1.442695, %v2149_v31 }
 0x2b4   : > { %v2145_v24 = vpop.xlane.xlu1 %2144  ;;  %v1930_v19 = vsel %vm1231_vm14, %v5431_v47, 0.0 }
 0x2b5   : > { %4547 = vpow2.f32 %v2152_v22  ;;  %v2150_v30 = vsub.f32 %v5328_v26, %v2145_v24 }
 0x2b6   : > { %1931 = vadd.xlane.f32.xlu1 %v1930_v19 }
 0x2b7   : > { %v5436_v16 = vpop.eup %4543  ;;  %v2154_v13 = vmul.f32 1.442695, %v2150_v30 }
 0x2b8   : > { %v2148_v58 = vpop.xlane.xlu0 %2147  ;;  %v1933_v9 = vsel %vm1231_vm14, %v5436_v16, 0.0 }
 0x2b9   : > { %4549 = vpow2.f32 %v2154_v13  ;;  %v2151_v40 = vsub.f32 %v5333_v36, %v2148_v58  ;;  %1934 = vadd.xlane.f32.xlu0 %v1933_v9 }
 0x2bb   : > { %v5441_v2 = vpop.eup %4545  ;;  %v2156_v43 = vmul.f32 1.442695, %v2151_v40 }
 0x2bc   : > { %v2370_v48 = vpop.xlane.xlu1 %2369  ;;  %v1936_v41 = vsel %vm1238_vm15, %v5441_v2, 0.0 }
 0x2bd   : > { %4551 = vpow2.f32 %v2156_v43  ;;  %v2377_v26 = vsub.f32 %v5338_v45, %v2370_v48  ;;  %1937 = vadd.xlane.f32.xlu1 %v1936_v41 }
 0x2bf   : > { %v5446_v34 = vpop.eup %4547  ;;  %v2380_v50 = vmul.f32 1.442695, %v2377_v26 }
 0x2c0   : > { %v2373_v31 = vpop.xlane.xlu0 %2372  ;;  %v2158_v18 = vsel %vm1231_vm14, %v5446_v34, 0.0 }
 0x2c1   : > { %4553 = vpow2.f32 %v2380_v50  ;;  %v2378_v36 = vsub.f32 %v5343_v53, %v2373_v31  ;;  %2159 = vadd.xlane.f32.xlu0 %v2158_v18 }
 0x2c3   : > { %v5451_v22 = vpop.eup %4549  ;;  %v2382_v24 = vmul.f32 1.442695, %v2378_v36 }
 0x2c4   : > { %v2376_v19 = vpop.xlane.xlu1 %2375  ;;  %v2161_v30 = vsel %vm1231_vm14, %v5451_v22, 0.0 }
 0x2c5   : > { %4555 = vpow2.f32 %v2382_v24  ;;  %v2379_v45 = vsub.f32 %v5348_v27, %v2376_v19  ;;  %2162 = vadd.xlane.f32.xlu1 %v2161_v30 }
 0x2c7   : > { %v5456_v13 = vpop.eup %4551  ;;  %v2384_v58 = vmul.f32 1.442695, %v2379_v45 }
 0x2c8   : > { %v2598_v9 = vpop.xlane.xlu0 %2597  ;;  %v2164_v40 = vsel %vm1238_vm15, %v5456_v13, 0.0 }
 0x2c9   : > { %4557 = vpow2.f32 %v2384_v58  ;;  %v2605_v53 = vsub.f32 %v5353_v39, %v2598_v9  ;;  %2165 = vadd.xlane.f32.xlu0 %v2164_v40 }
 0x2cb   : > { %v5461_v43 = vpop.eup %4553  ;;  %v2608_v48 = vmul.f32 1.442695, %v2605_v53 }
 0x2cc   : > { %v2601_v41 = vpop.xlane.xlu1 %2600  ;;  %v2386_v26 = vsel %vm1231_vm14, %v5461_v43, 0.0 }
 0x2cd   : > { %4559 = vpow2.f32 %v2608_v48  ;;  %v2606_v27 = vsub.f32 %v5358_v52, %v2601_v41  ;;  %2387 = vadd.xlane.f32.xlu1 %v2386_v26 }
 0x2cf   : > { %v5466_v50 = vpop.eup %4555  ;;  %v2610_v31 = vmul.f32 1.442695, %v2606_v27 }
 0x2d0   : > { %v2604_v18 = vpop.xlane.xlu0 %2603  ;;  %v2389_v36 = vsel %vm1231_vm14, %v5466_v50, 0.0 }
 0x2d1   : > { %4561 = vpow2.f32 %v2610_v31  ;;  %v2607_v39 = vsub.f32 %v5363_v28, %v2604_v18  ;;  %2390 = vadd.xlane.f32.xlu0 %v2389_v36 }
 0x2d3   : > { %v5471_v24 = vpop.eup %4557  ;;  %v2612_v19 = vmul.f32 1.442695, %v2607_v39 }
 0x2d4   : > { %v2826_v30 = vpop.xlane.xlu1 %2825  ;;  %v2392_v45 = vsel %vm1238_vm15, %v5471_v24, 0.0 }
 0x2d5   : > { %4563 = vpow2.f32 %v2612_v19  ;;  %v2833_v52 = vsub.f32 %v5368_v46, %v2826_v30  ;;  %2393 = vadd.xlane.f32.xlu1 %v2392_v45 }
 0x2d7   : > { %v5476_v58 = vpop.eup %4559  ;;  %v2836_v9 = vmul.f32 1.442695, %v2833_v52  ;;  %v2952_v52 = vld [vmem:[%s4793_s23] sm:$0xff] }
 0x2d8   : > { %v2829_v40 = vpop.xlane.xlu1 %2828  ;;  %v2614_v53 = vsel %vm1231_vm14, %v5476_v58, 0.0 }
 0x2d9   : > { %4565 = vpow2.f32 %v2836_v9  ;;  %v2834_v28 = vsub.f32 %v5373_v20, %v2829_v40  ;;  %2615 = vadd.xlane.f32.xlu0 %v2614_v53  ;;  %v2953_v9 = vld [vmem:[%s4793_s23 + $0x8] sm:$0xff]  ;;  %v2954_v40 = vld [vmem:[%s4793_s23 + $0x10] sm:$0xff] }
 0x2da   : > { %v4411_v53 = vpack.c.bf16 %v2953_v9, %v2952_v52 }
 0x2db   : > { %v5481_v48 = vpop.eup %4561  ;;  %v2838_v41 = vmul.f32 1.442695, %v2834_v28  ;;  %v2955_v28 = vld [vmem:[%s4793_s23 + $0x18] sm:$0xff] }
 0x2dc   : > { %v2832_v26 = vpop.xlane.xlu1 %2831  ;;  %v2617_v27 = vsel %vm1231_vm14, %v5481_v48, 0.0  ;;  %4412 = vmatpush3.bf16.msra.mxu1 %v4411_v53 }
 0x2dd   : > { %4567 = vpow2.f32 %v2838_v41  ;;  %v2835_v46 = vsub.f32 %v5378_v37, %v2832_v26  ;;  %2618 = vadd.xlane.f32.xlu1 %v2617_v27  ;;  %v4414_v41 = vpack.c.bf16 %v2955_v28, %v2954_v40  ;;  %4413 = vmatprep.subr.bf16.mxu1 %v4654_v6  ;;  %v2956_v26 = vld [vmem:[%s4793_s23 + $0x20] sm:$0xff]  ;;  %v2957_v27 = vld [vmem:[%s4793_s23 + $0x28] sm:$0xff] }
 0x2df   : > { %v5486_v31 = vpop.eup %4563  ;;  %v2840_v18 = vmul.f32 1.442695, %v2835_v46  ;;  %v4417_v46 = vpack.c.bf16 %v2957_v27, %v2956_v26 }
 0x2e0   : > { %v2620_v20 = vsel %vm1238_vm15, %v5486_v31, 0.0  ;;  %4415 = vmatpush3.bf16.msra.mxu1 %v4414_v41 }
 0x2e1   : > { %4569 = vpow2.f32 %v2840_v18  ;;  %2621 = vadd.xlane.f32.xlu0 %v2620_v20  ;;  %4416 = vmatprep.subr.bf16.mxu1 %v4654_v6  ;;  %v2958_v18 = vld [vmem:[%s4793_s23 + $0x30] sm:$0xff]  ;;  %v2959_v20 = vld [vmem:[%s4793_s23 + $0x38] sm:$0xff] }
 0x2e3   : > { %v5490_v36 = vpop.eup %4565 }
 0x2e4   : > { %v2842_v39 = vsel %vm1231_vm14, %v5490_v36, 0.0  ;;  %4418 = vmatpush3.bf16.msra.mxu1 %v4417_v46 }
 0x2e5   : > { %2843 = vadd.xlane.f32.xlu1 %v2842_v39  ;;  %v4420_v39 = vpack.c.bf16 %v2959_v20, %v2958_v18  ;;  %4419 = vmatprep.subr.bf16.mxu1 %v4654_v6 }
 0x2e7   : > { %v5494_v37 = vpop.eup %4567 }
 0x2e8   : > { %v2845_v19 = vsel %vm1231_vm14, %v5494_v37, 0.0  ;;  %4421 = vmatpush3.bf16.msra.mxu1 %v4420_v39 }
 0x2e9   : > { %2846 = vadd.xlane.f32.xlu0 %v2845_v19 }
 0x2eb   : > { %v5498_v30 = vpop.eup %4569 }
 0x2ec   : > { %v2848_v45 = vsel %vm1238_vm15, %v5498_v30, 0.0 }
 0x2ed   : > { %2849 = vadd.xlane.f32.xlu1 %v2848_v45 }
 0x32a   : > { %v1386_v19 = vpop.xlane.xlu0 %1385 }
 0x32b   : > { %4571 = vrcp.f32 %v1386_v19 }
 0x32e   : > { %v1389_v45 = vpop.xlane.xlu0 %1388 }
 0x32f   : > { %4573 = vrcp.f32 %v1389_v45  ;;  %v5879_v45 = vpack.c.bf16 %v5202_v60, %v5199_v59 }
 0x332   : > { %v1392_v52 = vpop.xlane.xlu0 %1391 }
 0x333   : > { %4575 = vrcp.f32 %v1392_v52 }
 0x335   : > { %v4572_v9 = vpop.eup %4571 }
 0x336   : > { %v1394_v40 = vmul.f32 %v4572_v9, %v5388_v14  ;;  %v1253_v53 = vpop.xlane.xlu1 %1252  ;;  %v1256_v28 = vpop.xlane.xlu0 %1255  ;;  %v1132_v14 = vmul.f32 %v4973_v5, %v5182_v51 }
 0x337   : > { %4577 = vrcp.f32 %v1253_v53 }
 0x338   : > { %4090 = vmatmul.mubr.msk.f32.vlgmr.msra.gmra.mrb[18].mxu0 %vm1231_vm14, %v1394_v40  ;;  %4579 = vrcp.f32 %v1256_v28  ;;  %v5880_v28 = vpack.c.bf16 %v5212_v0, %v5205_v61 }
 0x339   : > { %v4574_v41 = vpop.eup %4573  ;;  %4367 = vmatpush3.bf16.msra.mxu0 %v4366_v62  ;;  %4092 = vmatprep.mubr.msk.f32.mxu0 %vm4655_vm2, %v4656_v10 }
 0x33a   : > { %4102 = vmatprep.subr.mxu0 %v4656_v10  ;;  %v1396_v26 = vmul.f32 %v4574_v41, %v5393_v35  ;;  %v1259_v27 = vpop.xlane.xlu1 %1258  ;;  %v1704_v55 = vpop.xlane.xlu0 %1703 }
 0x33b   : > { %4581 = vrcp.f32 %v1259_v27 }
 0x33c   : > { %4093 = vmatmul.mubr.msk.f32.gmra.mrb[20].mxu0 %vm1231_vm14, %v1396_v26  ;;  %4583 = vrcp.f32 %v1704_v55 }
 0x33d   : > { %v4576_v46 = vpop.eup %4575  ;;  %4103 = vmatpush3.msk.msra.mxu0 %vm1408_vm4, %v1132_v14  ;;  %4095 = vmatprep.mubr.msk.f32.mxu0 %vm4655_vm2, %v4656_v10 }
 0x33e   : > { %v1398_v54 = vmul.f32 %v4576_v46, %v5399_v15  ;;  %4372 = vmatprep.subr.bf16.mxu0 %v4654_v6  ;;  %v1710_v15 = vpop.xlane.xlu0 %1709  ;;  %v5881_v46 = vpack.c.bf16 %v5220_v3, %v5215_v1 }
 0x33f   : > { %v1707_v35 = vpop.xlane.xlu1 %1706 }
 0x340   : > { %4096 = vmatmul.mubr.msk.f32.gmra.mrb[22].mxu0 %vm1231_vm14, %v1398_v54  ;;  %4585 = vrcp.f32 %v1707_v35  ;;  %v5882_v35 = vpack.c.bf16 %v5226_v8, %v5223_v7 }
 0x341   : > { %4104 = vmatprep.mubr.msk.f32.mxu0 %vm4655_vm2, %v4656_v10  ;;  %v4578_v5 = vpop.eup %4577  ;;  %4587 = vrcp.f32 %v1710_v15 }
 0x342   : > { %v1261_v62 = vmul.f32 %v4578_v5, %v5406_v49  ;;  %v4580_v18 = vpop.eup %4579  ;;  %v1594_v49 = vmul.f32 %v5016_v17, %v5182_v51 }
 0x343   : > { %v1263_v20 = vmul.f32 %v4580_v18, %v5403_v42  ;;  %v1932_v56 = vpop.xlane.xlu1 %1931 }
 0x344   : > { %4105 = vmatmul.mubr.msk.f32.vlgmr.msra.gmra.mrb[18].mxu0 %vm1231_vm14, %v1261_v62  ;;  %4589 = vrcp.f32 %v1932_v56 }
 0x345   : > { %4374 = vmatpush3.bf16.msra.mxu0 %v4373_v63  ;;  %4107 = vmatprep.mubr.msk.f32.mxu0 %vm4655_vm2, %v4656_v10  ;;  %v4582_v39 = vpop.eup %4581 }
 0x346   : > { %4132 = vmatprep.subr.mxu0 %v4656_v10  ;;  %v1265_v57 = vmul.f32 %v4582_v39, %v5415_v32  ;;  %v4584_v63 = vpop.eup %4583  ;;  %v1935_v42 = vpop.xlane.xlu0 %1934 }
 0x347   : > { %v1712_v17 = vmul.f32 %v4584_v63, %v5412_v44  ;;  %4591 = vrcp.f32 %v1935_v42  ;;  %v1822_v44 = vmul.f32 %v5046_v21, %v5182_v51 }
 0x348   : > { %4108 = vmatmul.mubr.msk.f32.gmra.mrb[20].mxu0 %vm1231_vm14, %v1263_v20 }
 0x349   : > { %4133 = vmatpush3.msk.msra.mxu0 %vm1408_vm4, %v1594_v49  ;;  %4110 = vmatprep.mubr.msk.f32.mxu0 %vm4655_vm2, %v4656_v10  ;;  %v5883_v49 = vpack.c.bf16 %v5235_v12, %v5232_v11 }
 0x34a   : > { %4379 = vmatprep.subr.bf16.mxu0 %v4654_v6  ;;  %v4586_v19 = vpop.eup %4585  ;;  %v1938_v32 = vpop.xlane.xlu1 %1937 }
 0x34b   : > { %v1714_v52 = vmul.f32 %v4586_v19, %v5424_v23  ;;  %v4588_v9 = vpop.eup %4587  ;;  %4593 = vrcp.f32 %v1938_v32  ;;  %v3777_v19 = vld [vmem:[%s5884_s20] ss:$0 sm:$0xff] }
 0x34c   : > { %4111 = vmatmul.mubr.msk.f32.gmra.mrb[22].mxu0 %vm1231_vm14, %v1265_v57  ;;  %v1716_v60 = vmul.f32 %v4588_v9, %v5422_v4  ;;  %v4643_v9 = vld [vmem:[%s5870_s24] sm:$0xff] }
 0x34d   : > { %4134 = vmatprep.mubr.msk.f32.mxu0 %vm4655_vm2, %v4656_v10 }
 0x34e   : > { %v2160_v59 = vpop.xlane.xlu0 %2159  ;;  %v4590_v40 = vpop.eup %4589 }
 0x34f   : > { %4595 = vrcp.f32 %v2160_v59  ;;  %v1940_v21 = vmul.f32 %v4590_v40, %v5431_v47  ;;  %v2050_v47 = vmul.f32 %v5073_v25, %v5182_v51 }
 0x350   : > { %4135 = vmatmul.mubr.msk.f32.vlgmr.msra.gmra.mrb[18].mxu0 %vm1231_vm14, %v1712_v17 }
 0x351   : > { %4381 = vmatpush3.bf16.msra.mxu0 %v5879_v45  ;;  %4137 = vmatprep.mubr.msk.f32.mxu0 %vm4655_vm2, %v4656_v10  ;;  %v4592_v53 = vpop.eup %4591 }
 0x352   : > { %4162 = vmatprep.subr.mxu0 %v4656_v10  ;;  %v2163_v23 = vpop.xlane.xlu1 %2162  ;;  %v1942_v41 = vmul.f32 %v4592_v53, %v5436_v16 }
 0x353   : > { %4597 = vrcp.f32 %v2163_v23  ;;  %v4644_v23 = vld [vmem:[%s5870_s24 + $0x8] sm:$0xff] }
 0x354   : > { %4138 = vmatmul.mubr.msk.f32.gmra.mrb[20].mxu0 %vm1231_vm14, %v1714_v52 }
 0x355   : > { %4163 = vmatpush3.msk.msra.mxu0 %vm1408_vm4, %v1822_v44  ;;  %4140 = vmatprep.mubr.msk.f32.mxu0 %vm4655_vm2, %v4656_v10  ;;  %v4594_v26 = vpop.eup %4593 }
 0x356   : > { %4386 = vmatprep.subr.bf16.mxu0 %v4654_v6  ;;  %v2166_v4 = vpop.xlane.xlu0 %2165  ;;  %v1944_v0 = vmul.f32 %v4594_v26, %v5441_v2 }
 0x357   : > { %4599 = vrcp.f32 %v2166_v4 }
 0x358   : > { %4141 = vmatmul.mubr.msk.f32.gmra.mrb[22].mxu0 %vm1231_vm14, %v1716_v60 }
 0x359   : > { %4164 = vmatprep.mubr.msk.f32.mxu0 %vm4655_vm2, %v4656_v10  ;;  %v4596_v27 = vpop.eup %4595 }
 0x35a   : > { %v2388_v61 = vpop.xlane.xlu1 %2387  ;;  %v2168_v25 = vmul.f32 %v4596_v27, %v5446_v34  ;;  %v2278_v34 = vmul.f32 %v5100_v29, %v5182_v51 }
 0x35b   : > { %4601 = vrcp.f32 %v2388_v61 }
 0x35c   : > { %4165 = vmatmul.mubr.msk.f32.vlgmr.msra.gmra.mrb[18].mxu0 %vm1231_vm14, %v1940_v21 }
 0x35d   : > { %4388 = vmatpush3.bf16.msra.mxu0 %v5880_v28  ;;  %4167 = vmatprep.mubr.msk.f32.mxu0 %vm4655_vm2, %v4656_v10  ;;  %v4598_v14 = vpop.eup %4597 }
 0x35e   : > { %4192 = vmatprep.subr.mxu0 %v4656_v10  ;;  %v2391_v16 = vpop.xlane.xlu0 %2390  ;;  %v2170_v54 = vmul.f32 %v4598_v14, %v5451_v22 }
 0x35f   : > { %4603 = vrcp.f32 %v2391_v16 }
 0x360   : > { %4168 = vmatmul.mubr.msk.f32.gmra.mrb[20].mxu0 %vm1231_vm14, %v1942_v41 }
 0x361   : > { %4193 = vmatpush3.msk.msra.mxu0 %vm1408_vm4, %v2050_v47  ;;  %4170 = vmatprep.mubr.msk.f32.mxu0 %vm4655_vm2, %v4656_v10  ;;  %v4600_v55 = vpop.eup %4599  ;;  %v4645_v47 = vld [vmem:[%s5870_s24 + $0x10] sm:$0x3] }
 0x362   : > { %4393 = vmatprep.subr.bf16.mxu0 %v4654_v6  ;;  %v2394_v2 = vpop.xlane.xlu1 %2393  ;;  %v2172_v3 = vmul.f32 %v4600_v55, %v5456_v13 }
 0x363   : > { %4605 = vrcp.f32 %v2394_v2 }
 0x364   : > { %4171 = vmatmul.mubr.msk.f32.gmra.mrb[22].mxu0 %vm1231_vm14, %v1944_v0 }
 0x365   : > { %4194 = vmatprep.mubr.msk.f32.mxu0 %vm4655_vm2, %v4656_v10  ;;  %v4602_v5 = vpop.eup %4601 }
 0x366   : > { %v2616_v1 = vpop.xlane.xlu0 %2615  ;;  %v2396_v29 = vmul.f32 %v4602_v5, %v5461_v43  ;;  %v2506_v43 = vmul.f32 %v5127_v33, %v5182_v51 }
 0x367   : > { %4607 = vrcp.f32 %v2616_v1 }
 0x368   : > { %4195 = vmatmul.mubr.msk.f32.vlgmr.msra.gmra.mrb[18].mxu0 %vm1231_vm14, %v2168_v25 }
 0x369   : > { %4395 = vmatpush3.bf16.msra.mxu0 %v5881_v46  ;;  %4197 = vmatprep.mubr.msk.f32.mxu0 %vm4655_vm2, %v4656_v10  ;;  %v4604_v62 = vpop.eup %4603 }
 0x36a   : > { %4222 = vmatprep.subr.mxu0 %v4656_v10  ;;  %v2619_v22 = vpop.xlane.xlu1 %2618  ;;  %v2398_v18 = vmul.f32 %v4604_v62, %v5466_v50 }
 0x36b   : > { %4609 = vrcp.f32 %v2619_v22 }
 0x36c   : > { %4198 = vmatmul.mubr.msk.f32.gmra.mrb[20].mxu0 %vm1231_vm14, %v2170_v54 }
 0x36d   : > { %4223 = vmatpush3.msk.msra.mxu0 %vm1408_vm4, %v2278_v34  ;;  %4200 = vmatprep.mubr.msk.f32.mxu0 %vm4655_vm2, %v4656_v10  ;;  %v4606_v15 = vpop.eup %4605 }
 0x36e   : > { %4400 = vmatprep.subr.bf16.mxu0 %v4654_v6  ;;  %v2622_v13 = vpop.xlane.xlu0 %2621  ;;  %v2400_v8 = vmul.f32 %v4606_v15, %v5471_v24  ;;  %v3120_v15 = vld [vmem:[%s4811_s22] sm:$0xff] }
 0x36f   : > { %4611 = vrcp.f32 %v2622_v13  ;;  %v3123_v13 = vld [vmem:[%s4811_s22 + $0x18] sm:$0xff] }
 0x370   : > { %4201 = vmatmul.mubr.msk.f32.gmra.mrb[22].mxu0 %vm1231_vm14, %v2172_v3 }
 0x371   : > { %4224 = vmatprep.mubr.msk.f32.mxu0 %vm4655_vm2, %v4656_v10  ;;  %v4608_v20 = vpop.eup %4607 }
 0x372   : > { %v2844_v7 = vpop.xlane.xlu1 %2843  ;;  %v2624_v33 = vmul.f32 %v4608_v20, %v5476_v58  ;;  %v2734_v58 = vmul.f32 %v5154_v38, %v5182_v51  ;;  %v3127_v20 = vld [vmem:[%s4811_s22 + $0x38] sm:$0xff] }
 0x373   : > { %4613 = vrcp.f32 %v2844_v7 }
 0x374   : > { %4225 = vmatmul.mubr.msk.f32.vlgmr.msra.gmra.mrb[18].mxu0 %vm1231_vm14, %v2396_v29 }
 0x375   : > { %4402 = vmatpush3.bf16.msra.mxu0 %v5882_v35  ;;  %4227 = vmatprep.mubr.msk.f32.mxu0 %vm4655_vm2, %v4656_v10  ;;  %v4610_v39 = vpop.eup %4609  ;;  %v3121_v35 = vld [vmem:[%s4811_s22 + $0x8] sm:$0xff] }
 0x376   : > { %4252 = vmatprep.subr.mxu0 %v4656_v10  ;;  %v2847_v50 = vpop.xlane.xlu0 %2846  ;;  %v2626_v24 = vmul.f32 %v4610_v39, %v5481_v48  ;;  %v3126_v39 = vld [vmem:[%s4811_s22 + $0x30] sm:$0xff] }
 0x377   : > { %4615 = vrcp.f32 %v2847_v50  ;;  %v3124_v50 = vld [vmem:[%s4811_s22 + $0x20] sm:$0xff] }
 0x378   : > { %4228 = vmatmul.mubr.msk.f32.gmra.mrb[20].mxu0 %vm1231_vm14, %v2398_v18  ;;  %v4422_v18 = vpack.c.bf16 %v3123_v13, %v3121_v35  ;;  %v3316_v13 = vld [vmem:[%s4823_s26 + $0xb0] sm:$0xff] }
 0x379   : > { %4253 = vmatpush3.msk.msra.mxu0 %vm1408_vm4, %v2506_v43  ;;  %4230 = vmatprep.mubr.msk.f32.mxu0 %vm4655_vm2, %v4656_v10  ;;  %v4612_v56 = vpop.eup %4611  ;;  %v3122_v43 = vld [vmem:[%s4811_s22 + $0x10] sm:$0xff] }
 0x37a   : > { %4407 = vmatprep.subr.bf16.mxu0 %v4654_v6  ;;  %v2850_v6 = vpop.xlane.xlu1 %2849  ;;  %v2628_v11 = vmul.f32 %v4612_v56, %v5486_v31  ;;  %v4424_v7 = vpack.c.bf16 %v3122_v43, %v3120_v15  ;;  %v3300_v43 = vld [vmem:[%s4823_s26 + $0x30] sm:$0xff] }
 0x37b   : > { %4617 = vrcp.f32 %v2850_v6  ;;  %v3129_v6 = vld [vmem:[%s4811_s22 + $0x48] sm:$0xff] }
 0x37c   : > { %4231 = vmatmul.mubr.msk.f32.gmra.mrb[22].mxu0 %vm1231_vm14, %v2400_v8  ;;  %v3125_v8 = vld [vmem:[%s4811_s22 + $0x28] sm:$0xff] }
 0x37d   : > { %4254 = vmatprep.mubr.msk.f32.mxu0 %vm4655_vm2, %v4656_v10  ;;  %v4614_v12 = vpop.eup %4613 }
 0x37e   : > { %v2852_v48 = vmul.f32 %v4614_v12, %v5490_v36 }
 0x380   : > { %4255 = vmatmul.mubr.msk.f32.vlgmr.msra.gmra.mrb[18].mxu0 %vm1231_vm14, %v2624_v33  ;;  %v4426_v33 = vpack.c.bf16 %v3127_v20, %v3125_v8  ;;  %v3318_v20 = vld [vmem:[%s4823_s26 + $0xc0] sm:$0xff] }
 0x381   : > { %4409 = vmatpush3.bf16.msra.mxu0 %v5883_v49  ;;  %4257 = vmatprep.mubr.msk.f32.mxu0 %vm4655_vm2, %v4656_v10  ;;  %v4616_v57 = vpop.eup %4615  ;;  %v4428_v49 = vpack.c.bf16 %v3126_v39, %v3124_v50  ;;  %v3302_v39 = vld [vmem:[%s4823_s26 + $0x40] sm:$0xff] }
 0x382   : > { %4282 = vmatprep.subr.mxu0 %v4656_v10  ;;  %v2854_v38 = vmul.f32 %v4616_v57, %v5494_v37  ;;  %v3135_v57 = vld [vmem:[%s4811_s22 + $0x78] sm:$0xff] }
 0x384   : > { %4258 = vmatmul.mubr.msk.f32.gmra.mrb[20].mxu0 %vm1231_vm14, %v2626_v24  ;;  %v3131_v24 = vld [vmem:[%s4811_s22 + $0x58] sm:$0xff] }
 0x385   : > { %4283 = vmatpush3.msk.msra.mxu0 %vm1408_vm4, %v2734_v58  ;;  %4260 = vmatprep.mubr.msk.f32.mxu0 %vm4655_vm2, %v4656_v10  ;;  %v4618_v51 = vpop.eup %4617  ;;  %v4430_v56 = vpack.c.bf16 %v3131_v24, %v3129_v6  ;;  %v3128_v58 = vld [vmem:[%s4811_s22 + $0x40] sm:$0xff]  ;;  %v3320_v24 = vld [vmem:[%s4823_s26 + $0xd0] sm:$0xff] }
 0x386   : > { %v2856_v31 = vmul.f32 %v4618_v51, %v5498_v30  ;;  %4423 = vmatprep.subr.bf16.mxu0 %v4422_v18  ;;  %v3132_v51 = vld [vmem:[%s4811_s22 + $0x60] sm:$0xff]  ;;  %v3317_v18 = vld [vmem:[%s4823_s26 + $0xb8] sm:$0xff] }
 0x387   : > { %v4450_v15 = vpack.c.bf16 %v3317_v18, %v3316_v13 }
 0x388   : > { %4261 = vmatmul.mubr.msk.f32.gmra.mrb[22].mxu0 %vm1231_vm14, %v2628_v11  ;;  %v3130_v11 = vld [vmem:[%s4811_s22 + $0x50] sm:$0xff] }
 0x389   : > { %4284 = vmatprep.mubr.msk.f32.mxu0 %vm4655_vm2, %v4656_v10  ;;  %v4432_v12 = vpack.c.bf16 %v3130_v11, %v3128_v58  ;;  %v3304_v58 = vld [vmem:[%s4823_s26 + $0x50] sm:$0xff] }
 0x38c   : > { %4285 = vmatmul.mubr.msk.f32.vlgmr.msra.gmra.mrb[18].mxu0 %vm1231_vm14, %v2852_v48  ;;  %v3133_v48 = vld [vmem:[%s4811_s22 + $0x68] sm:$0xff] }
 0x38d   : > { %4287 = vmatprep.mubr.msk.f32.mxu0 %vm4655_vm2, %v4656_v10  ;;  %4425 = vmatpush1.bf16.msra.mxu0 %v4424_v7  ;;  %v3301_v7 = vld [vmem:[%s4823_s26 + $0x38] sm:$0xff] }
 0x38e   : > { %4427 = vmatprep.subr.bf16.mxu0 %v4426_v33  ;;  %v4452_v8 = vpack.c.bf16 %v3301_v7, %v3300_v43  ;;  %v3319_v33 = vld [vmem:[%s4823_s26 + $0xc8] sm:$0xff] }
 0x38f   : > { %v4454_v50 = vpack.c.bf16 %v3319_v33, %v3318_v20 }
 0x390   : > { %4288 = vmatmul.mubr.msk.f32.gmra.mrb[20].mxu0 %vm1231_vm14, %v2854_v38  ;;  %v4434_v38 = vpack.c.bf16 %v3135_v57, %v3133_v48  ;;  %v3322_v48 = vld [vmem:[%s4823_s26 + $0xe0] sm:$0xff]  ;;  %v3323_v57 = vld [vmem:[%s4823_s26 + $0xe8] sm:$0xff] }
 0x391   : > { %4290 = vmatprep.mubr.msk.f32.mxu0 %vm4655_vm2, %v4656_v10  ;;  %4429 = vmatpush1.bf16.msra.mxu0 %v4428_v49  ;;  %v3303_v49 = vld [vmem:[%s4823_s26 + $0x48] sm:$0xff] }
 0x392   : > { %4431 = vmatprep.subr.bf16.mxu0 %v4430_v56  ;;  %v4456_v6 = vpack.c.bf16 %v3303_v49, %v3302_v39  ;;  %v3321_v56 = vld [vmem:[%s4823_s26 + $0xd8] sm:$0xff] }
 0x393   : > { %v4458_v11 = vpack.c.bf16 %v3321_v56, %v3320_v24 }
 0x394   : > { %4291 = vmatmul.mubr.msk.f32.gmra.mrb[22].mxu0 %vm1231_vm14, %v2856_v31  ;;  %v3134_v31 = vld [vmem:[%s4811_s22 + $0x70] sm:$0xff] }
 0x395   : > { %3221 = vmatprep.mubr.f32.mxu0 %v4656_v10  ;;  %4433 = vmatpush1.bf16.msra.mxu0 %v4432_v12  ;;  %v3305_v12 = vld [vmem:[%s4823_s26 + $0x58] sm:$0xff] }
 0x396   : > { %4435 = vmatprep.subr.bf16.mxu0 %v4434_v38  ;;  %v4460_v38 = vpack.c.bf16 %v3305_v12, %v3304_v58 }
 0x45f   : > { %v2935_v36 = vpop.f32.mrb[18].mxu0 }
 0x460   : > { %v4286_v63 = vpop.f32.mrb[19].mxu0  ;;  %4310 = vmatmul.mubr.msk.f32.vlgmr.msra.gmra.mrb[48].mxu1 %vm837_vm3, %v2935_v36  ;;  %v4436_v36 = vpack.c.bf16 %v3134_v31, %v3132_v51  ;;  %v4462_v51 = vpack.c.bf16 %v3323_v57, %v3322_v48  ;;  %v3306_v31 = vld [vmem:[%s4823_s26 + $0x60] sm:$0xff] }
 0x461   : > { %4312 = vmatprep.mubr.msk.f32.mxu1 %vm4655_vm2, %v4656_v10  ;;  %v3310_v63 = vld [vmem:[%s4823_s26 + $0x80] sm:$0xff] }
 0x462   : > { %4437 = vmatpush1.bf16.msra.mxu0 %v4436_v36  ;;  %v3307_v36 = vld [vmem:[%s4823_s26 + $0x68] sm:$0xff] }
 0x463   : > { %v2940_v37 = vpop.f32.mrb[20].mxu0 }
 0x464   : > { %v4289_v17 = vpop.f32.mrb[21].mxu0  ;;  %4313 = vmatmul.mubr.msk.f32.gmra.mrb[50].mxu1 %vm837_vm3, %v2940_v37  ;;  %v3311_v37 = vld [vmem:[%s4823_s26 + $0x88] sm:$0xff] }
 0x465   : > { %4315 = vmatprep.mubr.msk.f32.mxu1 %vm4655_vm2, %v4656_v10  ;;  %vm3067_vm2 = vcmask 517120   ;;  %v3294_v17 = vld [vmem:[%s4823_s26] sm:$0xff] }
 0x467   : > { %v2945_v42 = vpop.f32.mrb[22].mxu0 }
 0x468   : > { %v4292_v30 = vpop.f32.mrb[23].mxu0  ;;  %4316 = vmatmul.mubr.msk.f32.gmra.mrb[52].mxu1 %vm837_vm3, %v2945_v42  ;;  %v4438_v42 = vpack.c.bf16 %v3311_v37, %v3310_v63  ;;  %v3324_v63 = vld [vmem:[%s4823_s26 + $0xf0] sm:$0xff]  ;;  %v3325_v37 = vld [vmem:[%s4823_s26 + $0xf8] sm:$0xff] }
 0x469   : > { %v3295_v30 = vld [vmem:[%s4823_s26 + $0x8] sm:$0xff] }
 0x46a   : > { %4439 = vmatprep.subr.bf16.mxu1 %v4438_v42  ;;  %v4466_v42 = vpack.c.bf16 %v3325_v37, %v3324_v63 }
 0x533   : > { %v3042_v45 = vpop.f32.mrb[48].mxu1 }
 0x534   : > { %v3043_v32 = vadd.f32 %v3777_v19, %v3042_v45  ;;  %v4311_v52 = vpop.f32.mrb[49].mxu1 }
 0x536   : > { %v3056_v44 = vadd.f32 %v4643_v9, %v3043_v32 }
 0x537   : > { %v3047_v59 = vpop.f32.mrb[50].mxu1 }
 0x538   : > { %v3048_v60 = vadd.f32 %v3777_v19, %v3047_v59  ;;  %v4314_v40 = vpop.f32.mrb[51].mxu1  ;;  %v3061_v21 = vsel %vm837_vm3, %v3056_v44, 0.0 }
 0x539   : > { %3062 = vadd.xlane.f32.xlu0 %v3061_v21 }
 0x53a   : > { %v3057_v53 = vadd.f32 %v4644_v23, %v3048_v60 }
 0x53b   : > { %v3052_v28 = vpop.f32.mrb[52].mxu1 }
 0x53c   : > { %v3053_v4 = vadd.f32 %v3777_v19, %v3052_v28  ;;  %v4317_v41 = vpop.f32.mrb[53].mxu1  ;;  %v3064_v26 = vsel %vm837_vm3, %v3057_v53, 0.0  ;;  %v4440_v19 = vpack.c.bf16 %v3295_v30, %v3294_v17  ;;  %v4464_v17 = vpack.c.bf16 %v3307_v36, %v3306_v31  ;;  %v3308_v30 = vld [vmem:[%s4823_s26 + $0x70] sm:$0xff] }
 0x53d   : > { %3065 = vadd.xlane.f32.xlu1 %v3064_v26 }
 0x53e   : > { %v3058_v61 = vadd.f32 %v4645_v47, %v3053_v4  ;;  %4441 = vmatpush3.bf16.msra.mxu1 %v4440_v19  ;;  %v3782_v4 = vld [vmem:[%s5886_s12] ss:$0 sm:$0xff]  ;;  %v3309_v19 = vld [vmem:[%s4823_s26 + $0x78] sm:$0xff] }
 0x540   : > { %v3068_v0 = vsel %vm3067_vm2, %v3058_v61, 0.0 }
 0x541   : > { %3069 = vadd.xlane.f32.xlu0 %v3068_v0 }
 0x5c6   : > { %v3063_v27 = vpop.xlane.xlu0 %3062 }
 0x5c7   : > { %v3072_v25 = vmul.f32 0.015625, %v3063_v27 }
 0x5c9   : > { %v5687_v16 = vsub.f32 %v3056_v44, %v3072_v25 }
 0x5ca   : > { %v3066_v14 = vpop.xlane.xlu1 %3065 }
 0x5cb   : > { %v3073_v46 = vmul.f32 0.015625, %v3066_v14  ;;  %v3078_v2 = vmul.f32 %v5687_v16, %v5687_v16 }
 0x5cd   : > { %v5691_v54 = vsub.f32 %v3057_v53, %v3073_v46  ;;  %v3081_v55 = vsel %vm837_vm3, %v3078_v2, 0.0  ;;  %v3781_v53 = vld [vmem:[%s5885_s5] ss:$0 sm:$0xff]  ;;  %v3312_v2 = vld [vmem:[%s4823_s26 + $0x90] sm:$0xff] }
 0x5ce   : > { %3082 = vadd.xlane.f32.xlu1 %v3081_v55  ;;  %v3070_v34 = vpop.xlane.xlu0 %3069 }
 0x5cf   : > { %v3074_v1 = vmul.f32 0.015625, %v3070_v34  ;;  %v3079_v3 = vmul.f32 %v5691_v54, %v5691_v54  ;;  %v3296_v34 = vld [vmem:[%s4823_s26 + $0x10] sm:$0xff] }
 0x5d1   : > { %v5696_v5 = vsub.f32 %v3058_v61, %v3074_v1  ;;  %v3084_v29 = vsel %vm837_vm3, %v3079_v3, 0.0  ;;  %v3297_v1 = vld [vmem:[%s4823_s26 + $0x18] sm:$0xff] }
 0x5d2   : > { %3085 = vadd.xlane.f32.xlu0 %v3084_v29  ;;  %v4444_v3 = vpack.c.bf16 %v3297_v1, %v3296_v34 }
 0x5d3   : > { %v3080_v22 = vmul.f32 %v5696_v5, %v5696_v5 }
 0x5d5   : > { %v3087_v62 = vsel %vm3067_vm2, %v3080_v22, 0.0  ;;  %v3298_v22 = vld [vmem:[%s4823_s26 + $0x20] sm:$0xff] }
 0x5d6   : > { %3088 = vadd.xlane.f32.xlu1 %v3087_v62  ;;  %v3299_v62 = vld [vmem:[%s4823_s26 + $0x28] sm:$0xff] }
 0x5d7   : > { %v4448_v35 = vpack.c.bf16 %v3299_v62, %v3298_v22 }
 0x65b   : > { %v3083_v45 = vpop.xlane.xlu1 %3082 }
 0x65c   : > { %v3090_v32 = vmul.f32 0.015625, %v3083_v45  ;;  %v4468_v45 = vpack.c.bf16 %v3309_v19, %v3308_v30 }
 0x65e   : > { %v3093_v52 = vadd.f32 1e-05, %v3090_v32  ;;  %v5887_v32 = vlaneseq }
 0x65f   : > { %v3086_v9 = vpop.xlane.xlu0 %3085 }
 0x660   : > { %4619 = vrsqrt.f32 %v3093_v52  ;;  %v3091_v44 = vmul.f32 0.015625, %v3086_v9  ;;  %v3139_v52 = vshrl.u32 %v5887_v32, 7 }
 0x662   : > { %v3094_v59 = vadd.f32 1e-05, %v3091_v44  ;;  %v3140_v9 = vsub.s32 0, %v3139_v52  ;;  %v3136_v44 = vld [vmem:[%s4817_s4] sm:$0x3] }
 0x663   : > { %v3089_v60 = vpop.xlane.xlu1 %3088 }
 0x664   : > { %4621 = vrsqrt.f32 %v3094_v59  ;;  %v3092_v40 = vmul.f32 0.015625, %v3089_v60  ;;  %v3144_v59 = vsub.s32 1, %v3139_v52  ;;  %v3141_v60 = vrot.slane %v3136_v44, %v3140_v9 }
 0x666   : > { %v3095_v21 = vadd.f32 1e-05, %v3092_v40  ;;  %v3145_v40 = vrot.slane %v3136_v44, %v3144_v59 }
 0x668   : > { %4623 = vrsqrt.f32 %v3095_v21 }
 0x66a   : > { %v4620_v23 = vpop.eup %4619 }
 0x66b   : > { %v3099_v28 = vmul.f32 %v4620_v23, %v5687_v16 }
 0x66d   : > { %v3108_v41 = vmul.f32 %v3781_v53, %v3099_v28 }
 0x66e   : > { %v4622_v26 = vpop.eup %4621 }
 0x66f   : > { %v5733_v47 = vadd.f32 %v3782_v4, %v3108_v41  ;;  %v3100_v61 = vmul.f32 %v4622_v26, %v5691_v54  ;;  %v3313_v54 = vld [vmem:[%s4823_s26 + $0x98] sm:$0xff] }
 0x670   : > { %v4442_v55 = vpack.c.bf16 %v3313_v54, %v3312_v2 }
 0x671   : > { %3783 = vmatmul.mubr.msk.f32.vlgmr.msra.gmra.mrb[24].mxu0 %vm837_vm3, %v5733_v47  ;;  %v3109_v0 = vmul.f32 %v3781_v53, %v3100_v61 }
 0x672   : > { %v4624_v27 = vpop.eup %4623  ;;  %3227 = vmatprep.mubr.f32.mxu0 %v4656_v10  ;;  %4443 = vmatprep.subr.bf16.mxu1 %v4442_v55 }
 0x673   : > { %v5739_v25 = vadd.f32 %v3782_v4, %v3109_v0  ;;  %v3101_v16 = vmul.f32 %v4624_v27, %v5696_v5  ;;  %4445 = vmatpush3.bf16.msra.mxu1 %v4444_v3  ;;  %v3314_v5 = vld [vmem:[%s4823_s26 + $0xa0] sm:$0xff] }
 0x675   : > { %3784 = vmatmul.mubr.msk.f32.gmra.mrb[26].mxu0 %vm837_vm3, %v5739_v25  ;;  %v3110_v14 = vmul.f32 %v3781_v53, %v3101_v16 }
 0x676   : > { %3233 = vmatprep.mubr.f32.mxu0 %v4656_v10  ;;  %v3315_v10 = vld [vmem:[%s4823_s26 + $0xa8] sm:$0xff] }
 0x677   : > { %v5745_v46 = vadd.f32 %v3782_v4, %v3110_v14  ;;  %v4446_v29 = vpack.c.bf16 %v3315_v10, %v3314_v5 }
 0x679   : > { %3785 = vmatmul.mubr.msk.f32.gmra.mrb[28].mxu0 %vm837_vm3, %v5745_v46  ;;  %4447 = vmatprep.subr.bf16.mxu1 %v4446_v29 }
 0x67a   : > { %4449 = vmatpush3.bf16.msra.mxu1 %v4448_v35 }
 0x67b   : > { %4451 = vmatprep.subr.bf16.mxu1 %v4450_v15 }
 0x67e   : > { %4453 = vmatpush3.bf16.msra.mxu1 %v4452_v8 }
 0x67f   : > { %4455 = vmatprep.subr.bf16.mxu1 %v4454_v50 }
 0x682   : > { %4457 = vmatpush3.bf16.msra.mxu1 %v4456_v6 }
 0x683   : > { %4459 = vmatprep.subr.bf16.mxu1 %v4458_v11 }
 0x686   : > { %4461 = vmatpush3.bf16.msra.mxu1 %v4460_v38 }
 0x687   : > { %4463 = vmatprep.subr.bf16.mxu1 %v4462_v51 }
 0x68a   : > { %4465 = vmatpush3.bf16.msra.mxu1 %v4464_v17 }
 0x68b   : > { %4467 = vmatprep.subr.bf16.mxu1 %v4466_v42 }
 0x68e   : > { %4469 = vmatpush3.bf16.msra.mxu1 %v4468_v45 }
 0x744   : > { %v3223_v21 = vpop.f32.mrb[24].mxu0 }
 0x745   : > { %v3224_v23 = vadd.f32 %v3223_v21, %v3141_v60  ;;  %v3225_v53 = vpop.f32.mrb[25].mxu0 }
 0x746   : > { %v3226_v28 = vadd.f32 %v3225_v53, %v3145_v40 }
 0x747   : > { %v3246_v4 = vmul.f32 0.044715, %v3224_v23  ;;  %v3240_v63 = vmul.f32 0.5, %v3224_v23 }
 0x748   : > { %v3247_v41 = vmul.f32 0.044715, %v3226_v28  ;;  %v3229_v26 = vpop.f32.mrb[26].mxu0  ;;  %v3241_v31 = vmul.f32 0.5, %v3226_v28 }
 0x749   : > { %v3252_v61 = vmul.f32 %v3246_v4, %v3224_v23  ;;  %v3230_v0 = vadd.f32 %v3229_v26, %v3141_v60  ;;  %v3231_v27 = vpop.f32.mrb[27].mxu0  ;;  %v3786_v26 = vld [vmem:[%s797_s6] ss:$0 sm:$0xff] }
 0x74a   : > { %v3253_v16 = vmul.f32 %v3247_v41, %v3226_v28  ;;  %v3232_v14 = vadd.f32 %v3231_v27, %v3145_v40 }
 0x74b   : > { %v3258_v2 = vmul.f32 %v3252_v61, %v3224_v23  ;;  %v3248_v54 = vmul.f32 0.044715, %v3230_v0  ;;  %v3242_v52 = vmul.f32 0.5, %v3230_v0 }
 0x74c   : > { %v3249_v55 = vmul.f32 0.044715, %v3232_v14  ;;  %v3235_v34 = vpop.f32.mrb[28].mxu0  ;;  %v3259_v1 = vmul.f32 %v3253_v16, %v3226_v28  ;;  %v3243_v45 = vmul.f32 0.5, %v3232_v14 }
 0x74d   : > { %v3264_v3 = vadd.f32 %v3258_v2, %v3224_v23  ;;  %v3254_v5 = vmul.f32 %v3248_v54, %v3230_v0  ;;  %v3236_v10 = vadd.f32 %v3235_v34, %v3141_v60  ;;  %v3237_v29 = vpop.f32.mrb[29].mxu0 }
 0x74e   : > { %v3255_v22 = vmul.f32 %v3249_v55, %v3232_v14  ;;  %v3238_v62 = vadd.f32 %v3237_v29, %v3145_v40  ;;  %v3265_v35 = vadd.f32 %v3259_v1, %v3226_v28 }
 0x74f   : > { %v3270_v13 = vmul.f32 0.7978846, %v3264_v3  ;;  %v3250_v18 = vmul.f32 0.044715, %v3236_v10  ;;  %v3260_v15 = vmul.f32 %v3254_v5, %v3230_v0  ;;  %v3244_v23 = vmul.f32 0.5, %v3236_v10 }
 0x750   : > { %v3251_v43 = vmul.f32 0.044715, %v3238_v62  ;;  %v3271_v7 = vmul.f32 0.7978846, %v3265_v35  ;;  %v3261_v8 = vmul.f32 %v3255_v22, %v3232_v14  ;;  %v3245_v21 = vmul.f32 0.5, %v3238_v62 }
 0x751   : > { %4625 = vtanh.f32 %v3270_v13  ;;  %v3256_v20 = vmul.f32 %v3250_v18, %v3236_v10  ;;  %v3266_v33 = vadd.f32 %v3260_v15, %v3230_v0 }
 0x752   : > { %v3257_v50 = vmul.f32 %v3251_v43, %v3238_v62  ;;  %4627 = vtanh.f32 %v3271_v7  ;;  %v3267_v39 = vadd.f32 %v3261_v8, %v3232_v14 }
 0x753   : > { %v3272_v49 = vmul.f32 0.7978846, %v3266_v33  ;;  %v3262_v6 = vmul.f32 %v3256_v20, %v3236_v10 }
 0x754   : > { %v3273_v24 = vmul.f32 0.7978846, %v3267_v39  ;;  %v3263_v56 = vmul.f32 %v3257_v50, %v3238_v62 }
 0x755   : > { %4629 = vtanh.f32 %v3272_v49  ;;  %v3268_v58 = vadd.f32 %v3262_v6, %v3236_v10 }
 0x756   : > { %4631 = vtanh.f32 %v3273_v24  ;;  %v3269_v11 = vadd.f32 %v3263_v56, %v3238_v62 }
 0x757   : > { %v3274_v12 = vmul.f32 0.7978846, %v3268_v58 }
 0x758   : > { %v3275_v48 = vmul.f32 0.7978846, %v3269_v11 }
 0x759   : > { %4633 = vtanh.f32 %v3274_v12 }
 0x75a   : > { %4635 = vtanh.f32 %v3275_v48 }
 0x75b   : > { %v4626_v57 = vpop.eup %4625 }
 0x75c   : > { %v4628_v38 = vpop.eup %4627  ;;  %v3282_v51 = vadd.f32 1.0, %v4626_v57 }
 0x75d   : > { %v3283_v36 = vadd.f32 1.0, %v4628_v38 }
 0x75e   : > { %v3288_v30 = vmul.f32 %v3282_v51, %v3240_v63 }
 0x75f   : > { %v4630_v37 = vpop.eup %4629  ;;  %v3289_v17 = vmul.f32 %v3283_v36, %v3241_v31  ;;  %v3787_v36 = vld [vmem:[%s800_s19] ss:$0 sm:$0xff] }
 0x760   : > { %v4632_v42 = vpop.eup %4631  ;;  %v3284_v19 = vadd.f32 1.0, %v4630_v37  ;;  %v3788_v37 = vld [vmem:[%s803_s30] ss:$0 sm:$0xff] }
 0x761   : > { %3397 = vmatprep.mubr.f32.mxu1 %v3289_v17  ;;  %v3285_v32 = vadd.f32 1.0, %v4632_v42 }
 0x762   : > { %3398 = vmatmul.mubr.f32.vlgmr.msra.gmra.mrb[54].mxu1 %v3288_v30  ;;  %v3290_v60 = vmul.f32 %v3284_v19, %v3242_v52 }
 0x763   : > { %v4634_v9 = vpop.eup %4633  ;;  %v3291_v44 = vmul.f32 %v3285_v32, %v3243_v45 }
 0x764   : > { %v4636_v59 = vpop.eup %4635  ;;  %v3286_v40 = vadd.f32 1.0, %v4634_v9 }
 0x765   : > { %3402 = vmatprep.mubr.f32.mxu1 %v3291_v44  ;;  %v3287_v53 = vadd.f32 1.0, %v4636_v59 }
 0x766   : > { %3403 = vmatmul.mubr.f32.gmra.mrb[56].mxu1 %v3290_v60  ;;  %v3292_v4 = vmul.f32 %v3286_v40, %v3244_v23 }
 0x767   : > { %v3293_v28 = vmul.f32 %v3287_v53, %v3245_v21 }
 0x769   : > { %3407 = vmatprep.mubr.f32.mxu1 %v3293_v28 }
 0x76a   : > { %3408 = vmatmul.mubr.f32.gmra.mrb[58].mxu1 %v3292_v4 }
 0x835   : > { %v3969_v41 = vpop.f32.mrb[54].mxu1 }
 0x836   : > { %v3970_v61 = vpop.f32.mrb[55].mxu1 }
 0x837   : > { %v3971_v0 = vadd.f32 %v3970_v61, %v3969_v41 }
 0x839   : > { %v3400_v27 = vadd.f32 %v3971_v0, %v3786_v26  ;;  %v3972_v16 = vpop.f32.mrb[56].mxu1 }
 0x83a   : > { %v3973_v14 = vpop.f32.mrb[57].mxu1 }
 0x83b   : > { %v3974_v2 = vadd.f32 %v3973_v14, %v3972_v16  ;;  %v3413_v54 = vadd.f32 %v3400_v27, %v5733_v47 }
 0x83d   : > { %v3405_v55 = vadd.f32 %v3974_v2, %v3786_v26  ;;  %v3975_v34 = vpop.f32.mrb[58].mxu1  ;;  %v3418_v1 = vsel %vm837_vm3, %v3413_v54, 0.0 }
 0x83e   : > { %v3976_v3 = vpop.f32.mrb[59].mxu1  ;;  %3419 = vadd.xlane.f32.xlu0 %v3418_v1 }
 0x83f   : > { %v3977_v5 = vadd.f32 %v3976_v3, %v3975_v34  ;;  %v3414_v10 = vadd.f32 %v3405_v55, %v5739_v25 }
 0x841   : > { %v3410_v29 = vadd.f32 %v3977_v5, %v3786_v26  ;;  %v3421_v22 = vsel %vm837_vm3, %v3414_v10, 0.0 }
 0x842   : > { %3422 = vadd.xlane.f32.xlu1 %v3421_v22 }
 0x843   : > { %v3415_v62 = vadd.f32 %v3410_v29, %v5745_v46 }
 0x845   : > { %v3424_v35 = vsel %vm3067_vm2, %v3415_v62, 0.0 }
 0x846   : > { %3425 = vadd.xlane.f32.xlu0 %v3424_v35 }
 0x8cb   : > { %v3420_v13 = vpop.xlane.xlu0 %3419 }
 0x8cc   : > { %v3427_v47 = vmul.f32 0.015625, %v3420_v13 }
 0x8ce   : > { %v3430_v18 = vsub.f32 %v3413_v54, %v3427_v47 }
 0x8cf   : > { %v3423_v15 = vpop.xlane.xlu1 %3422 }
 0x8d0   : > { %v3428_v43 = vmul.f32 0.015625, %v3423_v15  ;;  %v3433_v7 = vmul.f32 %v3430_v18, %v3430_v18 }
 0x8d2   : > { %v3431_v8 = vsub.f32 %v3414_v10, %v3428_v43  ;;  %v3436_v20 = vsel %vm837_vm3, %v3433_v7, 0.0 }
 0x8d3   : > { %3437 = vadd.xlane.f32.xlu1 %v3436_v20  ;;  %v3426_v25 = vpop.xlane.xlu0 %3425 }
 0x8d4   : > { %v3429_v33 = vmul.f32 0.015625, %v3426_v25  ;;  %v3434_v50 = vmul.f32 %v3431_v8, %v3431_v8 }
 0x8d6   : > { %v3432_v39 = vsub.f32 %v3415_v62, %v3429_v33  ;;  %v3439_v49 = vsel %vm837_vm3, %v3434_v50, 0.0 }
 0x8d7   : > { %3440 = vadd.xlane.f32.xlu0 %v3439_v49 }
 0x8d8   : > { %v3435_v46 = vmul.f32 %v3432_v39, %v3432_v39 }
 0x8da   : > { %v3442_v6 = vsel %vm3067_vm2, %v3435_v46, 0.0 }
 0x8db   : > { %3443 = vadd.xlane.f32.xlu1 %v3442_v6 }
 0x960   : > { %v3438_v24 = vpop.xlane.xlu1 %3437 }
 0x961   : > { %v3445_v56 = vmul.f32 0.015625, %v3438_v24 }
 0x963   : > { %v3448_v58 = vadd.f32 1e-05, %v3445_v56 }
 0x964   : > { %v3441_v11 = vpop.xlane.xlu0 %3440 }
 0x965   : > { %4637 = vrsqrt.f32 %v3448_v58  ;;  %v3446_v12 = vmul.f32 0.015625, %v3441_v11 }
 0x967   : > { %v3449_v48 = vadd.f32 1e-05, %v3446_v12 }
 0x968   : > { %v3444_v57 = vpop.xlane.xlu1 %3443 }
 0x969   : > { %4639 = vrsqrt.f32 %v3449_v48  ;;  %v3447_v38 = vmul.f32 0.015625, %v3444_v57 }
 0x96b   : > { %v3450_v51 = vadd.f32 1e-05, %v3447_v38 }
 0x96d   : > { %4641 = vrsqrt.f32 %v3450_v51 }
 0x96f   : > { %v4638_v31 = vpop.eup %4637 }
 0x970   : > { %v3454_v63 = vmul.f32 %v4638_v31, %v3430_v18 }
 0x972   : > { %v3463_v17 = vmul.f32 %v3787_v36, %v3454_v63 }
 0x973   : > { %v4640_v42 = vpop.eup %4639 }
 0x974   : > { %v3472_v30 = vadd.f32 %v3788_v37, %v3463_v17  ;;  %v3455_v19 = vmul.f32 %v4640_v42, %v3431_v8 }
 0x976   : > { %3475 = vst.msk [vmem:[%s5870_s24] sm:$0xff] %vm837_vm3, %v3472_v30  ;;  %v3464_v45 = vmul.f32 %v3787_v36, %v3455_v19 }
 0x977   : > { %v4642_v32 = vpop.eup %4641 }
 0x978   : > { %v3473_v52 = vadd.f32 %v3788_v37, %v3464_v45  ;;  %v3456_v9 = vmul.f32 %v4642_v32, %v3432_v39 }
 0x97a   : > { %3476 = vst.msk [vmem:[%s5870_s24 + $0x8] sm:$0xff] %vm837_vm3, %v3473_v52  ;;  %v3465_v44 = vmul.f32 %v3787_v36, %v3456_v9 }
 0x97c   : > { %v3474_v59 = vadd.f32 %v3788_v37, %v3465_v44 }
 0x97e   : > { %3477 = vst.msk [vmem:[%s5870_s24 + $0x10] sm:$0x3] %vm3067_vm2, %v3474_v59 }
 0x97f PF: > { %s5889_s2 = sld [smem:[#allocation2_spill]] }
 0x985   : > { %s28_s27 = sadd.s32 1, %s5889_s2  }
 0x986   : > { %p25_p5 = scmp.ge.s32.totalorder %s28_s27, 8  }
 0x988   :  { %27 = sbr.rel (!%p25_p5) target bundleno = 13 (0xd), region = 167 }

// kernel: semantic_decoder_forward.2
= control target key start
LH: loop header
LB: loop body
LE: loop exit
PB: predicated region body
PF: predicated region fallthrough
CT: control target
= control target key end

     0   :  { %s10825_s27 = smov 0   ;;  %s14860_s0 = inlined_call_operand.vmem [shape: f32[128,16], index: 0, kind: input, shape index: {}]   ;;  %s14861_s1 = inlined_call_operand.vmem [shape: f32[128,128], index: 1, kind: input, shape index: {}]   ;;  %s14862_s2 = inlined_call_operand.vmem [shape: f32[6,16,16], index: 2, kind: input, shape index: {}]   ;;  %s14863_s3 = inlined_call_operand.vmem [shape: f32[6,1,16], index: 3, kind: input, shape index: {}]   ;;  %s14864_s4 = inlined_call_operand.vmem [shape: f32[6,16,16], index: 4, kind: input, shape index: {}]   ;;  %s14865_s5 = inlined_call_operand.vmem [shape: f32[6,1,16], index: 5, kind: input, shape index: {}]   ;;  %s14866_s6 = inlined_call_operand.vmem [shape: f32[6,16,16], index: 6, kind: input, shape index: {}]   ;;  %s14867_s7 = inlined_call_operand.vmem [shape: f32[6,1,16], index: 7, kind: input, shape index: {}]   ;;  %s14868_s8 = inlined_call_operand.vmem [shape: f32[6,16,16], index: 8, kind: input, shape index: {}]   ;;  %s14869_s9 = inlined_call_operand.vmem [shape: f32[6,1,16], index: 9, kind: input, shape index: {}]   ;;  %s14870_s10 = inlined_call_operand.vmem [shape: f32[6,1,16], index: 10, kind: input, shape index: {}]   ;;  %s14871_s11 = inlined_call_operand.vmem [shape: f32[6,1,16], index: 11, kind: input, shape index: {}]   ;;  %s14872_s12 = inlined_call_operand.vmem [shape: f32[6,16,64], index: 12, kind: input, shape index: {}]   ;;  %s14873_s13 = inlined_call_operand.vmem [shape: f32[6,1,64], index: 13, kind: input, shape index: {}]   ;;  %s14874_s14 = inlined_call_operand.vmem [shape: f32[6,64,16], index: 14, kind: input, shape index: {}]   ;;  %s14875_s15 = inlined_call_operand.vmem [shape: f32[6,1,16], index: 15, kind: input, shape index: {}]   ;;  %s14876_s16 = inlined_call_operand.vmem [shape: f32[6,1,16], index: 16, kind: input, shape index: {}]   ;;  %s14877_s17 = inlined_call_operand.vmem [shape: f32[6,1,16], index: 17, kind: input, shape index: {}]   ;;  %s14878_s18 = inlined_call_operand.vmem [shape: f32[128,16], index: 18, kind: output, shape index: {}]  }
   0x1   :  { %15095 = sst [smem:[#allocation134_spill]] %s14860_s0 }
   0x2   :  { %15096 = sst [smem:[#allocation135_spill]] %s14861_s1 }
   0x3   :  { %15097 = sst [smem:[#allocation136_spill]] %s14862_s2 }
   0x4   :  { %15098 = sst [smem:[#allocation137_spill]] %s14863_s3 }
   0x5   :  { %15099 = sst [smem:[#allocation138_spill]] %s14864_s4 }
   0x6   :  { %15100 = sst [smem:[#allocation139_spill]] %s14865_s5 }
   0x7   :  { %15101 = sst [smem:[#allocation140_spill]] %s14866_s6 }
   0x8   :  { %15102 = sst [smem:[#allocation141_spill]] %s14868_s8 }
   0x9   :  { %15103 = sst [smem:[#allocation142_spill]] %s14871_s11 }
   0xa   :  { %15104 = sst [smem:[#allocation143_spill]] %s14872_s12 }
   0xb   :  { %15105 = sst [smem:[#allocation144_spill]] %s14876_s16 }
   0xc   :  { %15106 = sst [smem:[#allocation145_spill]] %s14877_s17 }
   0xd   :  { %15107 = sst [smem:[#allocation146_spill]] %s14878_s18 }
   0xe LB: > { %15108 = sst [smem:[#allocation2_spill]] %s10727_s27  ;;  %s7187_s28 = sadd.s32 4294967295, %s10727_s27   ;;  %s10727_s27 = sphi %s10825_s27, %s28_s27  }
   0xf   : > { %p7190_p0 = scmp.ge.s32.totalorder %s10727_s27, 1  ;;  %p637_p1 = scmp.lt.s32.totalorder %s10727_s27, 7 }
  0x11   : > { %p638_p2 = pnand %p7190_p0, %p637_p1 }
  0x13   : > { %641 = sbr.rel (%p638_p2) target bundleno = 3368 (0xd28), region = 92 }
  0x1a   : > { %p741_p3 = scmp.lt.s32.totalorder %s7187_s28, 5  ;;  %s15110_s22 = sld [smem:[#allocation136_spill]] }
  0x1b   : > { %s15111_s4 = sld [smem:[#allocation138_spill]]  ;;  %s15113_s6 = sld [smem:[#allocation140_spill]] }
  0x1c   : > { %s10833_s29 = scalar_select %p741_p3, %s7187_s28, 5 }
  0x1d   : > { %s15114_s8 = sld [smem:[#allocation141_spill]]  ;;  %s15116_s12 = sld [smem:[#allocation143_spill]] }
  0x1e   : > { %s7576_s30 = sshll.u32 %s10833_s29, 4  ;;  %s794_s16 = scalar_lea.vmem %s14875_s15, %s10833_s29 }
  0x1f   : > { %s15117_s18 = sld [smem:[#allocation144_spill]]  ;;  %p7203_p4 = scmp.ne.s32.totalorder %s7187_s28, 0 }
  0x20   : > { %s10843_s2 = scalar_lea.vmem %s15110_s22, %s7576_s30  ;;  %s15119_s20 = sld [smem:[#allocation134_spill]] (!%p7203_p4)  ;;  %vm821_vm0 = vcmask (!%p7203_p4), 130048  }
  0x21   : > { %s10848_s25 = scalar_lea.vmem %s15111_s4, %s7576_s30  ;;  %s10857_s0 = scalar_lea.vmem %s15113_s6, %s7576_s30 }
  0x22   : > { %s15120_s26 = sld [smem:[#allocation146_spill]] (!%p7203_p4) }
  0x23   : > { %s10866_s3 = scalar_lea.vmem %s15114_s8, %s7576_s30  ;;  %s10883_s19 = scalar_lea.vmem %s15116_s12, %s7576_s30 }
  0x24   : > { %s7581_s8 = sshll.u32 %s10833_s29, 6  ;;  %s15118_s12 = sld [smem:[#allocation145_spill]] }
  0x25   : > { %s10893_s4 = scalar_lea.vmem %s14874_s14, %s7581_s8  ;;  %s797_s5 = scalar_lea.vmem %s15117_s18, %s10833_s29 }
  0x26   : > { %804 = sbr.rel (%p7203_p4) target bundleno = 48 (0x30), region = 96  ;;  %v805_v0 = vld [vmem:[%s15119_s20] sm:$0xff] (!%p7203_p4)  ;;  %v806_v1 = vld [vmem:[%s15119_s20 + $0x8] sm:$0xff] (!%p7203_p4)  ;;  %v807_v2 = vld [vmem:[%s15119_s20 + $0x10] sm:$0xff] (!%p7203_p4) }
  0x27   : > { %v808_v3 = vld [vmem:[%s15119_s20 + $0x18] sm:$0xff] (!%p7203_p4)  ;;  %v809_v4 = vld [vmem:[%s15119_s20 + $0x20] sm:$0xff] (!%p7203_p4)  ;;  %v810_v5 = vld [vmem:[%s15119_s20 + $0x28] sm:$0xff] (!%p7203_p4) }
  0x28   : > { %822 = vst.msk [vmem:[%s15120_s26] sm:$0xff] (!%p7203_p4), %vm821_vm0, %v805_v0  ;;  %823 = vst.msk [vmem:[%s15120_s26 + $0x8] sm:$0xff] (!%p7203_p4), %vm821_vm0, %v806_v1  ;;  %v811_v6 = vld [vmem:[%s15119_s20 + $0x30] sm:$0xff] (!%p7203_p4)  ;;  %v812_v7 = vld [vmem:[%s15119_s20 + $0x38] sm:$0xff] (!%p7203_p4) }
  0x29   : > { %824 = vst.msk [vmem:[%s15120_s26 + $0x10] sm:$0xff] (!%p7203_p4), %vm821_vm0, %v807_v2  ;;  %825 = vst.msk [vmem:[%s15120_s26 + $0x18] sm:$0xff] (!%p7203_p4), %vm821_vm0, %v808_v3  ;;  %v813_v8 = vld [vmem:[%s15119_s20 + $0x40] sm:$0xff] (!%p7203_p4)  ;;  %v814_v9 = vld [vmem:[%s15119_s20 + $0x48] sm:$0xff] (!%p7203_p4) }
  0x2a   : > { %s800_s11 = scalar_lea.vmem %s15118_s12, %s10833_s29  ;;  %826 = vst.msk [vmem:[%s15120_s26 + $0x20] sm:$0xff] (!%p7203_p4), %vm821_vm0, %v809_v4  ;;  %827 = vst.msk [vmem:[%s15120_s26 + $0x28] sm:$0xff] (!%p7203_p4), %vm821_vm0, %v810_v5  ;;  %v815_v10 = vld [vmem:[%s15119_s20 + $0x50] sm:$0xff] (!%p7203_p4)  ;;  %v816_v11 = vld [vmem:[%s15119_s20 + $0x58] sm:$0xff] (!%p7203_p4) }
  0x2b   : > { %828 = vst.msk [vmem:[%s15120_s26 + $0x30] sm:$0xff] (!%p7203_p4), %vm821_vm0, %v811_v6  ;;  %829 = vst.msk [vmem:[%s15120_s26 + $0x38] sm:$0xff] (!%p7203_p4), %vm821_vm0, %v812_v7  ;;  %v817_v12 = vld [vmem:[%s15119_s20 + $0x60] sm:$0xff] (!%p7203_p4)  ;;  %v818_v13 = vld [vmem:[%s15119_s20 + $0x68] sm:$0xff] (!%p7203_p4) }
  0x2c   : > { %830 = vst.msk [vmem:[%s15120_s26 + $0x40] sm:$0xff] (!%p7203_p4), %vm821_vm0, %v813_v8  ;;  %831 = vst.msk [vmem:[%s15120_s26 + $0x48] sm:$0xff] (!%p7203_p4), %vm821_vm0, %v814_v9  ;;  %v819_v14 = vld [vmem:[%s15119_s20 + $0x70] sm:$0xff] (!%p7203_p4)  ;;  %v820_v15 = vld [vmem:[%s15119_s20 + $0x78] sm:$0xff] (!%p7203_p4) }
  0x2d   : > { %832 = vst.msk [vmem:[%s15120_s26 + $0x50] sm:$0xff] %vm821_vm0, %v815_v10  ;;  %833 = vst.msk [vmem:[%s15120_s26 + $0x58] sm:$0xff] %vm821_vm0, %v816_v11 }
  0x2e   : > { %834 = vst.msk [vmem:[%s15120_s26 + $0x60] sm:$0xff] %vm821_vm0, %v817_v12  ;;  %835 = vst.msk [vmem:[%s15120_s26 + $0x68] sm:$0xff] %vm821_vm0, %v818_v13 }
  0x2f   : > { %836 = vst.msk [vmem:[%s15120_s26 + $0x70] sm:$0xff] %vm821_vm0, %v819_v14  ;;  %837 = vst.msk [vmem:[%s15120_s26 + $0x78] sm:$0xff] %vm821_vm0, %v820_v15 }
  0x30 PF: > { %v1089_v16 = vld [vmem:[%s10848_s25] sm:$0xff]  ;;  %v1090_v17 = vld [vmem:[%s10848_s25 + $0x8] sm:$0xff]  ;;  %s15121_s22 = sld [smem:[#allocation146_spill]]  ;;  %vm14884_vm1 = vcmask 130048   ;;  %v1397_v41 = vlaneseq  ;;  %v10729_v43 = vmov 0.0   ;;  %s15128_s26 = sld [smem:[#allocation139_spill]] }
  0x31   : > { %v9288_v19 = vpack.c.bf16 %v1090_v17, %v1089_v16  ;;  %v870_v22 = vld [vmem:[%s10843_s2] sm:$0xff]  ;;  %v871_v23 = vld [vmem:[%s10843_s2 + $0x8] sm:$0xff]  ;;  %v15131_v55 = vmov 0  ;;  %s15135_s25 = sld [smem:[#allocation137_spill]]  ;;  %s15148_s2 = scalar_lea.vmem %s14867_s7, %s10833_s29 }
  0x32   : > { %v1243_v24 = vld [vmem:[%s10857_s0] sm:$0xff]  ;;  %v9284_v25 = vpack.c.bf16 %v871_v23, %v870_v22  ;;  %v1244_v26 = vld [vmem:[%s10857_s0 + $0x8] sm:$0xff]  ;;  %v1398_v42 = vand.u32 127, %v1397_v41  ;;  %s15254_s28 = sld [smem:[#allocation135_spill]]  ;;  %s15708_s21 = scalar_lea.vmem %s14869_s9, %s10833_s29 }
  0x33   : > { %9289 = vmatprep.subr.bf16.mxu1 %v9288_v19  ;;  %v9292_v28 = vpack.c.bf16 %v1244_v26, %v1243_v24 }
  0x34   : > { %9291 = vmatpush3.bf16.msra.mxu1 %v9288_v19  ;;  %9285 = vmatprep.subr.bf16.mxu0 %v9284_v25  ;;  %vm2485_vm2 = vcmp.ge.s32.totalorder %v1398_v42, 4  ;;  %vm2486_vm3 = vcmp.lt.s32.totalorder %v1398_v42, 6  ;;  %vm3020_vm4 = vcmp.ge.s32.totalorder %v1398_v42, 6  ;;  %vm3021_vm5 = vcmp.lt.s32.totalorder %v1398_v42, 8 }
  0x35   : > { %9287 = vmatpush3.bf16.msra.mxu0 %v9284_v25  ;;  %vm2487_vm6 = vmand %vm2485_vm2, %vm2486_vm3  ;;  %vm4090_vm7 = vcmp.ge.s32.totalorder %v1398_v42, 10  ;;  %vm4091_vm8 = vcmp.lt.s32.totalorder %v1398_v42, 12  ;;  %vm4625_vm10 = vcmp.ge.s32.totalorder %v1398_v42, 12  ;;  %vm4626_vm11 = vcmp.lt.s32.totalorder %v1398_v42, 14 }
  0x36   : > { %v838_v18 = vld [vmem:[%s15121_s22] sm:$0xff]  ;;  %v839_v20 = vld [vmem:[%s15121_s22 + $0x8] sm:$0xff]  ;;  %v840_v21 = vld [vmem:[%s15121_s22 + $0x10] sm:$0xff]  ;;  %9293 = vmatprep.subr.bf16.mxu0 %v9292_v28  ;;  %v11121_v44 = vsel %vm2487_vm6, 1.0, %v10729_v43  ;;  %vm5160_vm12 = vcmp.ge.s32.totalorder %v1398_v42, 14  ;;  %vm5161_vm14 = vcmp.lt.s32.totalorder %v1398_v42, 16  ;;  %s15129_s8 = scalar_lea.vmem %s15128_s26, %s10833_s29 }
  0x37   : > { %8240 = vmatprep.mubr.msk.f32.mxu1 %vm14884_vm1, %v838_v18  ;;  %8212 = vmatprep.mubr.msk.f32.mxu0 %vm14884_vm1, %v838_v18  ;;  %v841_v27 = vld [vmem:[%s15121_s22 + $0x18] sm:$0xff]  ;;  %v842_v29 = vld [vmem:[%s15121_s22 + $0x20] sm:$0xff]  ;;  %v843_v30 = vld [vmem:[%s15121_s22 + $0x28] sm:$0xff]  ;;  %15122 = vst [vmem:[#allocation3_spill] sm:$0xff] %v11121_v44  ;;  %vm3555_vm15 = vcmp.ge.s32.totalorder %v1398_v42, 8  ;;  %vm3556_vm0 = vcmp.lt.s32.totalorder %v1398_v42, 10  ;;  %s15136_s27 = scalar_lea.vmem %s15135_s25, %s10833_s29 }
  0x38   : > { %8241 = vmatmul.mubr.msk.f32.vlgmr.msra.gmra.mrb[0].mxu1 %vm14884_vm1, %v839_v20  ;;  %v844_v31 = vld [vmem:[%s15121_s22 + $0x30] sm:$0xff]  ;;  %8213 = vmatmul.mubr.msk.f32.vlgmr.msra.gmra.mrb[0].mxu0 %vm14884_vm1, %v839_v20  ;;  %v845_v32 = vld [vmem:[%s15121_s22 + $0x38] sm:$0xff]  ;;  %v846_v33 = vld [vmem:[%s15121_s22 + $0x40] sm:$0xff]  ;;  %vm1822_vm6 = vcmp.lt.s32.totalorder %v1398_v42, 4  ;;  %s15740_s25 = sld [smem:[#allocation142_spill]] }
  0x39   : > { %8243 = vmatprep.mubr.msk.f32.mxu1 %vm14884_vm1, %v840_v21  ;;  %8215 = vmatprep.mubr.msk.f32.mxu0 %vm14884_vm1, %v840_v21  ;;  %v847_v34 = vld [vmem:[%s15121_s22 + $0x48] sm:$0xff]  ;;  %v848_v35 = vld [vmem:[%s15121_s22 + $0x50] sm:$0xff]  ;;  %v849_v36 = vld [vmem:[%s15121_s22 + $0x58] sm:$0xff] }
  0x3a   : > { %9295 = vmatpush3.bf16.msra.mxu0 %v9292_v28  ;;  %v850_v37 = vld [vmem:[%s15121_s22 + $0x60] sm:$0xff]  ;;  %v851_v38 = vld [vmem:[%s15121_s22 + $0x68] sm:$0xff]  ;;  %v852_v39 = vld [vmem:[%s15121_s22 + $0x70] sm:$0xff] }
  0x3b   : > { %v853_v40 = vld [vmem:[%s15121_s22 + $0x78] sm:$0xff]  ;;  %vm3022_vm9 = vmand %vm3020_vm4, %vm3021_vm5  ;;  %v11138_v50 = vld [vmem:[%s15129_s8] ss:$0 sm:$0xff]  ;;  %vm1821_vm5 = vcmp.ge.s32.totalorder %v1398_v42, 2  ;;  %s15739_s8 = scalar_lea.vmem %s14870_s10, %s10833_s29 }
  0x3c   : > { %8244 = vmatmul.mubr.msk.f32.gmra.mrb[2].mxu1 %vm14884_vm1, %v841_v27  ;;  %8216 = vmatmul.mubr.msk.f32.gmra.mrb[2].mxu0 %vm14884_vm1, %v841_v27  ;;  %v11123_v45 = vsel %vm3022_vm9, 1.0, %v10729_v43  ;;  %vm4092_vm13 = vmand %vm4090_vm7, %vm4091_vm8  ;;  %v11156_v60 = vld [vmem:[%s15136_s27] ss:$0 sm:$0xff]  ;;  %vm1400_vm7 = vcmp.lt.s32.totalorder %v1398_v42, 2 }
  0x3d   : > { %8246 = vmatprep.mubr.msk.f32.mxu1 %vm14884_vm1, %v842_v29  ;;  %8218 = vmatprep.mubr.msk.f32.mxu0 %vm14884_vm1, %v842_v29  ;;  %15123 = vst [vmem:[#allocation4_spill] sm:$0xff] %v11123_v45  ;;  %v11125_v46 = vsel %vm4092_vm13, 1.0, %v10729_v43  ;;  %vm5162_vm2 = vmand %vm5160_vm12, %vm5161_vm14  ;;  %v11177_v5 = vsel %vm1400_vm7, 1.0, %v10729_v43 }
  0x3e   : > { %15124 = vst [vmem:[#allocation5_spill] sm:$0xff] %v11125_v46  ;;  %v11129_v48 = vsel %vm5162_vm2, 1.0, %v10729_v43  ;;  %vm3557_vm3 = vmand %vm3555_vm15, %vm3556_vm0  ;;  %s15741_s27 = scalar_lea.vmem %s15740_s25, %s10833_s29 }
  0x3f   : > { %15126 = vst [vmem:[#allocation7_spill] sm:$0xff] %v11129_v48  ;;  %v11131_v49 = vsel %vm3557_vm3, 1.0, %v10729_v43  ;;  %vm1823_vm8 = vmand %vm1821_vm5, %vm1822_vm6 }
  0x40   : > { %8247 = vmatmul.mubr.msk.f32.gmra.mrb[4].mxu1 %vm14884_vm1, %v843_v30  ;;  %8219 = vmatmul.mubr.msk.f32.gmra.mrb[4].mxu0 %vm14884_vm1, %v843_v30  ;;  %15127 = vst [vmem:[#allocation8_spill] sm:$0xff] %v11131_v49  ;;  %15138 = vst [vmem:[#allocation12_spill] sm:$0xff] %v11177_v5  ;;  %v11179_v6 = vsel %vm1823_vm8, 1.0, %v10729_v43 }
  0x41   : > { %8249 = vmatprep.mubr.msk.f32.mxu1 %vm14884_vm1, %v844_v31  ;;  %8221 = vmatprep.mubr.msk.f32.mxu0 %vm14884_vm1, %v844_v31 }
  0x44   : > { %8250 = vmatmul.mubr.msk.f32.gmra.mrb[6].mxu1 %vm14884_vm1, %v845_v32  ;;  %8222 = vmatmul.mubr.msk.f32.gmra.mrb[6].mxu0 %vm14884_vm1, %v845_v32 }
  0x45   : > { %8252 = vmatprep.mubr.msk.f32.mxu1 %vm14884_vm1, %v846_v33  ;;  %8224 = vmatprep.mubr.msk.f32.mxu0 %vm14884_vm1, %v846_v33 }
  0x48   : > { %8253 = vmatmul.mubr.msk.f32.gmra.mrb[8].mxu1 %vm14884_vm1, %v847_v34  ;;  %8225 = vmatmul.mubr.msk.f32.gmra.mrb[8].mxu0 %vm14884_vm1, %v847_v34 }
  0x49   : > { %8255 = vmatprep.mubr.msk.f32.mxu1 %vm14884_vm1, %v848_v35  ;;  %8227 = vmatprep.mubr.msk.f32.mxu0 %vm14884_vm1, %v848_v35 }
  0x4c   : > { %8256 = vmatmul.mubr.msk.f32.gmra.mrb[10].mxu1 %vm14884_vm1, %v849_v36  ;;  %8228 = vmatmul.mubr.msk.f32.gmra.mrb[10].mxu0 %vm14884_vm1, %v849_v36 }
  0x4d   : > { %8258 = vmatprep.mubr.msk.f32.mxu1 %vm14884_vm1, %v850_v37  ;;  %8230 = vmatprep.mubr.msk.f32.mxu0 %vm14884_vm1, %v850_v37 }
  0x50   : > { %8259 = vmatmul.mubr.msk.f32.gmra.mrb[12].mxu1 %vm14884_vm1, %v851_v38  ;;  %8231 = vmatmul.mubr.msk.f32.gmra.mrb[12].mxu0 %vm14884_vm1, %v851_v38 }
  0x51   : > { %8261 = vmatprep.mubr.msk.f32.mxu1 %vm14884_vm1, %v852_v39  ;;  %8233 = vmatprep.mubr.msk.f32.mxu0 %vm14884_vm1, %v852_v39 }
  0x54   : > { %8262 = vmatmul.mubr.msk.f32.gmra.mrb[14].mxu1 %vm14884_vm1, %v853_v40  ;;  %8234 = vmatmul.mubr.msk.f32.gmra.mrb[14].mxu0 %vm14884_vm1, %v853_v40 }
  0x55   : > { %8268 = vmatprep.mubr.msk.f32.mxu0 %vm14884_vm1, %v838_v18 }
  0x58   : > { %8269 = vmatmul.mubr.msk.f32.vlgmr.msra.gmra.mrb[16].mxu0 %vm14884_vm1, %v839_v20 }
  0x59   : > { %8271 = vmatprep.mubr.msk.f32.mxu0 %vm14884_vm1, %v840_v21 }
  0x5c   : > { %8272 = vmatmul.mubr.msk.f32.gmra.mrb[18].mxu0 %vm14884_vm1, %v841_v27 }
  0x5d   : > { %8274 = vmatprep.mubr.msk.f32.mxu0 %vm14884_vm1, %v842_v29 }
  0x60   : > { %8275 = vmatmul.mubr.msk.f32.gmra.mrb[20].mxu0 %vm14884_vm1, %v843_v30 }
  0x61   : > { %8277 = vmatprep.mubr.msk.f32.mxu0 %vm14884_vm1, %v844_v31 }
  0x64   : > { %8278 = vmatmul.mubr.msk.f32.gmra.mrb[22].mxu0 %vm14884_vm1, %v845_v32 }
  0x65   : > { %8280 = vmatprep.mubr.msk.f32.mxu0 %vm14884_vm1, %v846_v33 }
  0x68   : > { %8281 = vmatmul.mubr.msk.f32.gmra.mrb[24].mxu0 %vm14884_vm1, %v847_v34 }
  0x69   : > { %8283 = vmatprep.mubr.msk.f32.mxu0 %vm14884_vm1, %v848_v35 }
  0x6c   : > { %8284 = vmatmul.mubr.msk.f32.gmra.mrb[26].mxu0 %vm14884_vm1, %v849_v36 }
  0x6d   : > { %8286 = vmatprep.mubr.msk.f32.mxu0 %vm14884_vm1, %v850_v37 }
  0x70   : > { %8287 = vmatmul.mubr.msk.f32.gmra.mrb[28].mxu0 %vm14884_vm1, %v851_v38 }
  0x71   : > { %8289 = vmatprep.mubr.msk.f32.mxu0 %vm14884_vm1, %v852_v39 }
  0x74   : > { %8290 = vmatmul.mubr.msk.f32.gmra.mrb[30].mxu0 %vm14884_vm1, %v853_v40  ;;  %vm4627_vm1 = vmand %vm4625_vm10, %vm4626_vm11 }
  0x75   : > { %v11127_v47 = vsel %vm4627_vm1, 1.0, %v10729_v43  ;;  %vm15130_vm1 = vcmask 130048  }
  0x76   : > { %15125 = vst [vmem:[#allocation6_spill] sm:$0xff] %v11127_v47  ;;  %vm11144_vm4 = vmpackc.low %vm15130_vm1, %vm15130_vm1 }
  0x77   : > { %v15132_v55 = vsel %vm11144_vm4, 4294967295, %v15131_v55  ;;  %vm15141_vm9 = vmmov %vm15130_vm1 }
  0x78   : > { %15133 = vst [vmem:[#allocation9_spill] sm:$0xff] %v15132_v55  ;;  %vm15142_vm10 = vmmov %vm15130_vm1 }
  0x79   : > { %vm15158_vm11 = vmmov %vm15130_vm1 }
  0x7a   : > { %vm15159_vm12 = vmmov %vm15130_vm1 }
  0x7b   : > { %vm15160_vm13 = vmmov %vm15130_vm1 }
  0x7c   : > { %vm15162_vm14 = vmmov %vm15130_vm1 }
  0x7d   : > { %vm15166_vm15 = vmmov %vm15130_vm1 }
  0x7e   : > { %vm15167_vm0 = vmmov %vm15130_vm1 }
  0x7f   : > { %vm15168_vm2 = vmmov %vm15167_vm0 }
  0x80   : > { %vm15170_vm3 = vmmov %vm15167_vm0 }
  0x81   : > { %vm15172_vm1 = vmmov %vm15167_vm0 }
  0x82   : > { %vm15173_vm5 = vmmov %vm15167_vm0 }
  0x83   : > { %vm15174_vm6 = vmmov %vm15167_vm0 }
  0x84   : > { %vm15176_vm7 = vmmov %vm15167_vm0 }
  0x85   : > { %vm15180_vm8 = vmmov %vm15167_vm0 }
 0x10b   : > { %v8242_v51 = vpop.f32.mrb[0].mxu1  ;;  %v11165_v62 = vpop.f32.mrb[0].mxu0 }
 0x10c   : > { %v1170_v52 = vadd.f32 %v8242_v51, %v11138_v50  ;;  %v1164_v53 = vpop.f32.mrb[1].mxu1  ;;  %v994_v63 = vpop.f32.mrb[1].mxu0 }
 0x10d   : > { %v1165_v54 = vadd.f32 %v11138_v50, %v1164_v53  ;;  %v995_v2 = vadd.f32 %v11156_v60, %v994_v63 }
 0x10f   : > { %v11148_v56 = vpack.c.bf16 %v1170_v52, %v1165_v54  ;;  %v8245_v57 = vpop.f32.mrb[2].mxu1  ;;  %v11188_v8 = vmul.f32 0.70710677, %v995_v2  ;;  %v11190_v9 = vpop.f32.mrb[2].mxu0 }
 0x110   : > { %v1180_v58 = vadd.f32 %v8245_v57, %v11138_v50  ;;  %v1174_v59 = vpop.f32.mrb[3].mxu1  ;;  %v11192_v10 = vpop.f32.mrb[3].mxu0 }
 0x111   : > { %15134 = vst [vmem:[#allocation10_spill] sm:$0xff] %v11148_v56  ;;  %9298 = vmatprep.subr.msk.bf16.mxu1 %vm11144_vm4, %v11148_v56  ;;  %9346 = vmatprep.subr.msk.bf16.mxu0 %vm11144_vm4, %v11148_v56  ;;  %v1175_v61 = vadd.f32 %v11138_v50, %v1174_v59  ;;  %15139 = vst [vmem:[#allocation13_spill] sm:$0xff] %v11188_v8  ;;  %v1404_v13 = vmul.f32 %v11177_v5, %v11188_v8 }
 0x112   : > { %9301 = vmatpush3.bf16.xpose.msk.msra.mxu1 %vm11144_vm4, %v11148_v56  ;;  %9349 = vmatpush3.bf16.xpose.msk.msra.mxu0 %vm11144_vm4, %v11148_v56  ;;  %v1826_v14 = vmul.f32 %v11179_v6, %v11188_v8 }
 0x113   : > { %v11173_v0 = vpack.c.bf16 %v1180_v58, %v1175_v61  ;;  %v8248_v1 = vpop.f32.mrb[4].mxu1  ;;  %8324 = vmatprep.mubr.msk.f32.mxu1 %vm15141_vm9, %v1404_v13  ;;  %v8220_v18 = vpop.f32.mrb[4].mxu0  ;;  %vm15181_vm9 = vmmov %vm15167_vm0 }
 0x114   : > { %v1190_v3 = vadd.f32 %v8248_v1, %v11138_v50  ;;  %v1184_v4 = vpop.f32.mrb[5].mxu1  ;;  %8380 = vmatprep.mubr.msk.f32.mxu0 %vm15142_vm10, %v1826_v14  ;;  %v11211_v19 = vadd.f32 %v8220_v18, %v11156_v60  ;;  %v11213_v20 = vpop.f32.mrb[5].mxu0  ;;  %v1000_v18 = vadd.f32 %v11165_v62, %v11156_v60  ;;  %vm15182_vm10 = vmmov %vm15167_vm0 }
 0x115   : > { %15137 = vst [vmem:[#allocation11_spill] sm:$0xff] %v11173_v0  ;;  %9304 = vmatprep.subr.msk.bf16.mxu1 %vm11144_vm4, %v11173_v0  ;;  %9352 = vmatprep.subr.msk.bf16.mxu0 %vm11144_vm4, %v11173_v0  ;;  %v1185_v7 = vadd.f32 %v11138_v50, %v1184_v4 }
 0x117   : > { %v11194_v11 = vpack.c.bf16 %v1190_v3, %v1185_v7  ;;  %v8251_v12 = vpop.f32.mrb[6].mxu1  ;;  %v8223_v26 = vpop.f32.mrb[6].mxu0 }
 0x118   : > { %v1200_v15 = vadd.f32 %v8251_v12, %v11138_v50  ;;  %v1194_v16 = vpop.f32.mrb[7].mxu1  ;;  %v11226_v27 = vadd.f32 %v8223_v26, %v11156_v60  ;;  %v1024_v28 = vpop.f32.mrb[7].mxu0  ;;  %v11346_v26 = vmul.f32 0.70710677, %v1000_v18 }
 0x119   : > { %15140 = vst [vmem:[#allocation14_spill] sm:$0xff] %v11194_v11  ;;  %v1195_v17 = vadd.f32 %v11138_v50, %v1194_v16  ;;  %v11231_v31 = vadd.f32 %v11156_v60, %v1024_v28  ;;  %v11334_v16 = vld [vmem:[%s15148_s2] ss:$0 sm:$0xff]  ;;  %s15757_s2 = scalar_lea.vmem %s14873_s13, %s10833_s29 }
 0x11a   : > { %9307 = vmatpush3.bf16.xpose.msk.msra.mxu1 %vm11144_vm4, %v11173_v0  ;;  %9355 = vmatpush3.bf16.xpose.msk.msra.mxu0 %vm11144_vm4, %v11173_v0  ;;  %15149 = vst [vmem:[#allocation20_spill] sm:$0xff] %v11346_v26 }
 0x11b   : > { %9310 = vmatprep.subr.msk.bf16.mxu1 %vm11144_vm4, %v11194_v11  ;;  %9358 = vmatprep.subr.msk.bf16.mxu0 %vm11144_vm4, %v11194_v11  ;;  %v11221_v21 = vpack.c.bf16 %v1200_v15, %v1195_v17  ;;  %v8254_v22 = vpop.f32.mrb[8].mxu1  ;;  %v8226_v35 = vpop.f32.mrb[8].mxu0 }
 0x11c   : > { %v1210_v23 = vadd.f32 %v8254_v22, %v11138_v50  ;;  %v1204_v24 = vpop.f32.mrb[9].mxu1  ;;  %v11242_v36 = vadd.f32 %v8226_v35, %v11156_v60  ;;  %v1034_v37 = vpop.f32.mrb[9].mxu0 }
 0x11d   : > { %15143 = vst [vmem:[#allocation15_spill] sm:$0xff] %v11221_v21  ;;  %v1205_v25 = vadd.f32 %v11138_v50, %v1204_v24  ;;  %v11253_v40 = vadd.f32 %v11156_v60, %v1034_v37 }
 0x11f   : > { %v11228_v29 = vpack.c.bf16 %v1210_v23, %v1205_v25  ;;  %v8257_v30 = vpop.f32.mrb[10].mxu1  ;;  %v8229_v51 = vpop.f32.mrb[10].mxu0  ;;  %v1005_v23 = vadd.f32 %v11156_v60, %v11192_v10  ;;  %v1015_v10 = vadd.f32 %v11156_v60, %v11213_v20 }
 0x120   : > { %v1220_v32 = vadd.f32 %v8257_v30, %v11138_v50  ;;  %v1214_v33 = vpop.f32.mrb[11].mxu1  ;;  %v11258_v52 = vadd.f32 %v8229_v51, %v11156_v60  ;;  %v1044_v53 = vpop.f32.mrb[11].mxu0 }
 0x121   : > { %15144 = vst [vmem:[#allocation16_spill] sm:$0xff] %v11228_v29  ;;  %v1215_v34 = vadd.f32 %v11138_v50, %v1214_v33  ;;  %v11263_v58 = vadd.f32 %v11156_v60, %v1044_v53  ;;  %v11354_v62 = vmul.f32 0.70710677, %v1005_v23  ;;  %v1010_v33 = vadd.f32 %v11190_v9, %v11156_v60 }
 0x122   : > { %9313 = vmatpush3.bf16.xpose.msk.msra.mxu1 %vm11144_vm4, %v11194_v11  ;;  %9361 = vmatpush3.bf16.xpose.msk.msra.mxu0 %vm11144_vm4, %v11194_v11 }
 0x123   : > { %9316 = vmatprep.subr.msk.bf16.mxu1 %vm11144_vm4, %v11221_v21  ;;  %9364 = vmatprep.subr.msk.bf16.mxu0 %vm11144_vm4, %v11221_v21  ;;  %v11250_v38 = vpack.c.bf16 %v1220_v32, %v1215_v34  ;;  %v8260_v39 = vpop.f32.mrb[12].mxu1  ;;  %v8232_v1 = vpop.f32.mrb[12].mxu0  ;;  %15150 = vst [vmem:[#allocation21_spill] sm:$0xff] %v11354_v62  ;;  %v1406_v9 = vmul.f32 %v11177_v5, %v11354_v62 }
 0x124   : > { %v1230_v41 = vadd.f32 %v8260_v39, %v11138_v50  ;;  %v1224_v42 = vpop.f32.mrb[13].mxu1  ;;  %v11274_v2 = vadd.f32 %v8232_v1, %v11156_v60  ;;  %v1054_v3 = vpop.f32.mrb[13].mxu0  ;;  %v1828_v51 = vmul.f32 %v11179_v6, %v11354_v62 }
 0x125   : > { %15145 = vst [vmem:[#allocation17_spill] sm:$0xff] %v11250_v38  ;;  %v1225_v43 = vadd.f32 %v11138_v50, %v1224_v42  ;;  %v11285_v4 = vadd.f32 %v11156_v60, %v1054_v3  ;;  %v1405_v42 = vmul.f32 %v11177_v5, %v11346_v26  ;;  %v11405_v3 = vmul.f32 0.70710677, %v11231_v31 }
 0x127   : > { %v11260_v54 = vpack.c.bf16 %v1230_v41, %v1225_v43  ;;  %v8263_v57 = vpop.f32.mrb[14].mxu1  ;;  %v8235_v7 = vpop.f32.mrb[14].mxu0  ;;  %v11373_v41 = vmul.f32 0.70710677, %v1015_v10  ;;  %v11381_v43 = vmul.f32 0.70710677, %v1010_v33 }
 0x128   : > { %v1240_v59 = vadd.f32 %v8263_v57, %v11138_v50  ;;  %v1234_v61 = vpop.f32.mrb[15].mxu1  ;;  %v11288_v12 = vadd.f32 %v8235_v7, %v11156_v60  ;;  %v1064_v13 = vpop.f32.mrb[15].mxu0  ;;  %15161 = vst [vmem:[#allocation29_spill] sm:$0xff] %v11405_v3 }
 0x129   : > { %15146 = vst [vmem:[#allocation18_spill] sm:$0xff] %v11260_v54  ;;  %v1235_v63 = vadd.f32 %v11138_v50, %v1234_v61  ;;  %v11291_v14 = vadd.f32 %v11156_v60, %v1064_v13  ;;  %15153 = vst [vmem:[#allocation24_spill] sm:$0xff] %v11373_v41  ;;  %v1827_v60 = vmul.f32 %v11179_v6, %v11346_v26 }
 0x12a   : > { %9319 = vmatpush3.bf16.xpose.msk.msra.mxu1 %vm11144_vm4, %v11221_v21  ;;  %9367 = vmatpush3.bf16.xpose.msk.msra.mxu0 %vm11144_vm4, %v11221_v21  ;;  %15154 = vst [vmem:[#allocation25_spill] sm:$0xff] %v11381_v43  ;;  %v1830_v7 = vmul.f32 %v11179_v6, %v11373_v41  ;;  %v1829_v31 = vmul.f32 %v11179_v6, %v11381_v43 }
 0x12b   : > { %9322 = vmatprep.subr.msk.bf16.mxu1 %vm11144_vm4, %v11228_v29  ;;  %9370 = vmatprep.subr.msk.bf16.mxu0 %vm11144_vm4, %v11228_v29  ;;  %v11282_v50 = vpack.c.bf16 %v1240_v59, %v1235_v63  ;;  %v8270_v15 = vpop.f32.mrb[16].mxu0  ;;  %v11396_v63 = vmul.f32 0.70710677, %v11211_v19  ;;  %v1408_v19 = vmul.f32 %v11177_v5, %v11373_v41 }
 0x12c   : > { %v1318_v17 = vpop.f32.mrb[17].mxu0  ;;  %v11341_v24 = vadd.f32 %v8270_v15, %v11334_v16  ;;  %v1407_v15 = vmul.f32 %v11177_v5, %v11381_v43 }
 0x12d   : > { %15147 = vst [vmem:[#allocation19_spill] sm:$0xff] %v11282_v50  ;;  %v11344_v25 = vadd.f32 %v11334_v16, %v1318_v17  ;;  %15157 = vst [vmem:[#allocation28_spill] sm:$0xff] %v11396_v63 }
 0x12e   : > { %v1843_v32 = vmul.f32 %v11179_v6, %v11341_v24 }
 0x12f   : > { %v8273_v22 = vpop.f32.mrb[18].mxu0  ;;  %v1842_v30 = vmul.f32 %v11179_v6, %v11344_v25 }
 0x130   : > { %v1328_v28 = vpop.f32.mrb[19].mxu0  ;;  %v11368_v34 = vadd.f32 %v8273_v22, %v11334_v16 }
 0x131   : > { %v11371_v35 = vadd.f32 %v11334_v16, %v1328_v28  ;;  %v9392_v37 = vpack.c.bf16 %v1843_v32, %v1842_v30  ;;  %v11430_v28 = vmul.f32 0.70710677, %v11226_v27  ;;  %v1831_v30 = vmul.f32 %v11179_v6, %v11396_v63 }
 0x132   : > { %9325 = vmatpush3.bf16.xpose.msk.msra.mxu1 %vm11144_vm4, %v11228_v29  ;;  %9373 = vmatpush3.bf16.xpose.msk.msra.mxu0 %vm11144_vm4, %v11228_v29  ;;  %15151 = vst [vmem:[#allocation22_spill] sm:$0xff] %v11368_v34  ;;  %v1845_v57 = vmul.f32 %v11179_v6, %v11368_v34  ;;  %v1409_v32 = vmul.f32 %v11177_v5, %v11396_v63 }
 0x133   : > { %9328 = vmatprep.subr.msk.bf16.mxu1 %vm11144_vm4, %v11250_v38  ;;  %9376 = vmatprep.subr.msk.bf16.mxu0 %vm11144_vm4, %v11250_v38  ;;  %15152 = vst [vmem:[#allocation23_spill] sm:$0xff] %v11371_v35  ;;  %v8276_v20 = vpop.f32.mrb[20].mxu0  ;;  %v1844_v53 = vmul.f32 %v11179_v6, %v11371_v35  ;;  %15165 = vst [vmem:[#allocation32_spill] sm:$0xff] %v11430_v28  ;;  %v1832_v27 = vmul.f32 %v11179_v6, %v11405_v3 }
 0x134   : > { %v1338_v39 = vpop.f32.mrb[21].mxu0  ;;  %v11390_v59 = vadd.f32 %v8276_v20, %v11334_v16  ;;  %v11440_v20 = vmul.f32 0.70710677, %v11253_v40  ;;  %v11452_v40 = vmul.f32 0.70710677, %v11242_v36 }
 0x135   : > { %v11393_v61 = vadd.f32 %v11334_v16, %v1338_v39  ;;  %v9396_v17 = vpack.c.bf16 %v1845_v57, %v1844_v53  ;;  %v1410_v39 = vmul.f32 %v11177_v5, %v11405_v3  ;;  %v1411_v53 = vmul.f32 %v11177_v5, %v11430_v28 }
 0x136   : > { %15155 = vst [vmem:[#allocation26_spill] sm:$0xff] %v11390_v59  ;;  %v1847_v10 = vmul.f32 %v11179_v6, %v11390_v59  ;;  %15169 = vst [vmem:[#allocation33_spill] sm:$0xff] %v11440_v20  ;;  %v11465_v36 = vmul.f32 0.70710677, %v11263_v58  ;;  %v11482_v58 = vmul.f32 0.70710677, %v11258_v52 }
 0x137   : > { %15156 = vst [vmem:[#allocation27_spill] sm:$0xff] %v11393_v61  ;;  %v8279_v1 = vpop.f32.mrb[22].mxu0  ;;  %v1846_v23 = vmul.f32 %v11179_v6, %v11393_v61  ;;  %15171 = vst [vmem:[#allocation34_spill] sm:$0xff] %v11452_v40 }
 0x138   : > { %v1348_v13 = vpop.f32.mrb[23].mxu0  ;;  %v11420_v18 = vadd.f32 %v8279_v1, %v11334_v16  ;;  %15175 = vst [vmem:[#allocation35_spill] sm:$0xff] %v11465_v36  ;;  %v1834_v1 = vmul.f32 %v11179_v6, %v11440_v20  ;;  %15179 = vst [vmem:[#allocation38_spill] sm:$0xff] %v11482_v58  ;;  %v1836_v52 = vmul.f32 %v11179_v6, %v11465_v36 }
 0x139   : > { %v11423_v22 = vadd.f32 %v11334_v16, %v1348_v13 }
 0x13a   : > { %9331 = vmatpush3.bf16.xpose.msk.msra.mxu1 %vm11144_vm4, %v11250_v38  ;;  %9379 = vmatpush3.bf16.xpose.msk.msra.mxu0 %vm11144_vm4, %v11250_v38  ;;  %15163 = vst [vmem:[#allocation30_spill] sm:$0xff] %v11420_v18 }
 0x13b   : > { %9334 = vmatprep.subr.msk.bf16.mxu1 %vm11144_vm4, %v11260_v54  ;;  %9382 = vmatprep.subr.msk.bf16.mxu0 %vm11144_vm4, %v11260_v54  ;;  %15164 = vst [vmem:[#allocation31_spill] sm:$0xff] %v11423_v22  ;;  %v8282_v33 = vpop.f32.mrb[24].mxu0 }
 0x13c   : > { %v11476_v13 = vadd.f32 %v8282_v33, %v11334_v16  ;;  %v1414_v33 = vmul.f32 %v11177_v5, %v11465_v36 }
 0x13e   : > { %15177 = vst [vmem:[#allocation36_spill] sm:$0xff] %v11476_v13 }
 0x142   : > { %9337 = vmatpush3.bf16.xpose.msk.msra.mxu1 %vm11144_vm4, %v11260_v54  ;;  %9385 = vmatpush3.bf16.xpose.msk.msra.mxu0 %vm11144_vm4, %v11260_v54 }
 0x143   : > { %9340 = vmatprep.subr.msk.bf16.mxu1 %vm11144_vm4, %v11282_v50  ;;  %9388 = vmatprep.subr.msk.bf16.mxu0 %vm11144_vm4, %v11282_v50 }
 0x14a   : > { %9343 = vmatpush3.bf16.xpose.msk.msra.mxu1 %vm11144_vm4, %v11282_v50  ;;  %9391 = vmatpush3.bf16.xpose.msk.msra.mxu0 %vm11144_vm4, %v11282_v50 }
 0x14b   : > { %9458 = vmatprep.subr.msk.bf16.mxu0 %vm11144_vm4, %v11148_v56  ;;  %9393 = vmatprep.subr.bf16.mxu1 %v9392_v37 }
 0x151   : > { %8325 = vmatmul.mubr.msk.f32.vlgmr.msra.gmra.mrb[16].mxu1 %vm15158_vm11, %v1405_v42  ;;  %8381 = vmatmul.mubr.msk.f32.vlgmr.msra.gmra.mrb[32].mxu0 %vm15159_vm12, %v1827_v60  ;;  %v9400_v42 = vpack.c.bf16 %v1847_v10, %v1846_v23  ;;  %v1848_v60 = vmul.f32 %v11179_v6, %v11423_v22  ;;  %v1413_v23 = vmul.f32 %v11177_v5, %v11452_v40  ;;  %vm15184_vm11 = vmmov %vm15167_vm0 }
 0x152   : > { %9461 = vmatpush3.bf16.xpose.msk.msra.mxu0 %vm11144_vm4, %v11148_v56  ;;  %8327 = vmatprep.mubr.msk.f32.mxu1 %vm15160_vm13, %v1406_v9  ;;  %v1849_v9 = vmul.f32 %v11179_v6, %v11420_v18  ;;  %vm15188_vm12 = vmmov %vm15167_vm0 }
 0x153   : > { %8383 = vmatprep.mubr.msk.f32.mxu0 %vm15162_vm14, %v1828_v51  ;;  %9464 = vmatprep.subr.msk.bf16.mxu0 %vm11144_vm4, %v11173_v0  ;;  %v1833_v51 = vmul.f32 %v11179_v6, %v11430_v28  ;;  %vm15189_vm13 = vmmov %vm15167_vm0 }
 0x154   : > { %9395 = vmatpush3.bf16.msra.mxu1 %v9392_v37  ;;  %v1358_v37 = vpop.f32.mrb[25].mxu0  ;;  %vm15192_vm14 = vmmov %vm15167_vm0 }
 0x155   : > { %8328 = vmatmul.mubr.msk.f32.gmra.mrb[18].mxu1 %vm15166_vm15, %v1407_v15  ;;  %8384 = vmatmul.mubr.msk.f32.gmra.mrb[34].mxu0 %vm15167_vm0, %v1829_v31  ;;  %v8285_v57 = vpop.f32.mrb[26].mxu0  ;;  %v11479_v15 = vadd.f32 %v11334_v16, %v1358_v37  ;;  %v9404_v31 = vpack.c.bf16 %v1849_v9, %v1848_v60  ;;  %v1851_v37 = vmul.f32 %v11179_v6, %v11476_v13  ;;  %vm15194_vm15 = vmmov %vm15167_vm0 }
 0x156   : > { %8386 = vmatprep.mubr.msk.f32.mxu0 %vm15168_vm2, %v1830_v7  ;;  %8330 = vmatprep.mubr.msk.f32.mxu1 %vm15170_vm3, %v1408_v19  ;;  %v1412_v7 = vmul.f32 %v11177_v5, %v11440_v20  ;;  %v1368_v19 = vpop.f32.mrb[27].mxu0  ;;  %v11509_v60 = vadd.f32 %v8285_v57, %v11334_v16  ;;  %v11529_v57 = vmul.f32 0.70710677, %v11291_v14  ;;  %vm15196_vm2 = vmmov %vm15167_vm0 }
 0x157   : > { %9397 = vmatprep.subr.bf16.mxu1 %v9396_v17  ;;  %15178 = vst [vmem:[#allocation37_spill] sm:$0xff] %v11479_v15  ;;  %v8288_v10 = vpop.f32.mrb[28].mxu0  ;;  %v11512_v9 = vadd.f32 %v11334_v16, %v1368_v19  ;;  %vm15197_vm3 = vmmov %vm15167_vm0 }
 0x158   : > { %9399 = vmatpush3.bf16.msra.mxu1 %v9396_v17  ;;  %v1835_v17 = vmul.f32 %v11179_v6, %v11452_v40  ;;  %15186 = vst [vmem:[#allocation41_spill] sm:$0xff] %v11509_v60  ;;  %15193 = vst [vmem:[#allocation45_spill] sm:$0xff] %v11529_v57 }
 0x159   : > { %8387 = vmatmul.mubr.msk.f32.gmra.mrb[36].mxu0 %vm15172_vm1, %v1831_v30  ;;  %8331 = vmatmul.mubr.msk.f32.gmra.mrb[20].mxu1 %vm15173_vm5, %v1409_v32  ;;  %v11492_v30 = vmul.f32 0.70710677, %v11285_v4  ;;  %v1378_v32 = vpop.f32.mrb[29].mxu0  ;;  %v1837_v4 = vmul.f32 %v11179_v6, %v11482_v58  ;;  %15187 = vst [vmem:[#allocation42_spill] sm:$0xff] %v11512_v9  ;;  %v1852_v14 = vmul.f32 %v11179_v6, %v11512_v9  ;;  %vm15198_vm1 = vmmov %vm15167_vm0 }
 0x15a   : > { %9467 = vmatpush3.bf16.xpose.msk.msra.mxu0 %vm11144_vm4, %v11173_v0  ;;  %8389 = vmatprep.mubr.msk.f32.mxu0 %vm15174_vm6, %v1832_v27  ;;  %v1850_v27 = vmul.f32 %v11179_v6, %v11479_v15  ;;  %vm15201_vm5 = vmmov %vm15167_vm0 }
 0x15b   : > { %9470 = vmatprep.subr.msk.bf16.mxu0 %vm11144_vm4, %v11194_v11  ;;  %8333 = vmatprep.mubr.msk.f32.mxu1 %vm15176_vm7, %v1410_v39  ;;  %15183 = vst [vmem:[#allocation39_spill] sm:$0xff] %v11492_v30  ;;  %v11504_v39 = vmul.f32 0.70710677, %v11274_v2  ;;  %v11519_v2 = vadd.f32 %v8288_v10, %v11334_v16  ;;  %v1853_v10 = vmul.f32 %v11179_v6, %v11509_v60  ;;  %vm15202_vm6 = vmmov %vm15167_vm0 }
 0x15c   : > { %9401 = vmatprep.subr.bf16.mxu1 %v9400_v42  ;;  %vm15203_vm7 = vmmov %vm15167_vm0 }
 0x15d   : > { %8390 = vmatmul.mubr.msk.f32.gmra.mrb[38].mxu0 %vm15180_vm8, %v1833_v51  ;;  %8334 = vmatmul.mubr.msk.f32.gmra.mrb[22].mxu1 %vm15181_vm9, %v1411_v53  ;;  %15185 = vst [vmem:[#allocation40_spill] sm:$0xff] %v11504_v39  ;;  %15190 = vst [vmem:[#allocation43_spill] sm:$0xff] %v11519_v2  ;;  %v11522_v51 = vadd.f32 %v11334_v16, %v1378_v32  ;;  %v8291_v53 = vpop.f32.mrb[30].mxu0  ;;  %v1417_v32 = vmul.f32 %v11177_v5, %v11504_v39 }
 0x15e   : > { %8392 = vmatprep.mubr.msk.f32.mxu0 %vm15182_vm10, %v1834_v1  ;;  %8336 = vmatprep.mubr.msk.f32.mxu1 %vm15184_vm11, %v1412_v7  ;;  %v1838_v1 = vmul.f32 %v11179_v6, %v11492_v30  ;;  %v1416_v7 = vmul.f32 %v11177_v5, %v11492_v30  ;;  %v1388_v19 = vpop.f32.mrb[31].mxu0  ;;  %vm15205_vm8 = vmmov %vm15167_vm0 }
 0x15f   : > { %9403 = vmatpush3.bf16.msra.mxu1 %v9400_v42  ;;  %v1415_v42 = vmul.f32 %v11177_v5, %v11482_v58  ;;  %15191 = vst [vmem:[#allocation44_spill] sm:$0xff] %v11522_v51  ;;  %vm15206_vm9 = vmmov %vm15167_vm0 }
 0x160   : > { %9405 = vmatprep.subr.bf16.mxu1 %v9404_v31  ;;  %vm15207_vm10 = vmmov %vm15167_vm0 }
 0x161   : > { %8393 = vmatmul.mubr.msk.f32.gmra.mrb[40].mxu0 %vm15188_vm12, %v1835_v17  ;;  %8337 = vmatmul.mubr.msk.f32.gmra.mrb[24].mxu1 %vm15189_vm13, %v1413_v23  ;;  %v9408_v17 = vpack.c.bf16 %v1851_v37, %v1850_v27  ;;  %v1839_v23 = vmul.f32 %v11179_v6, %v11504_v39  ;;  %v1840_v27 = vmul.f32 %v11179_v6, %v11529_v57  ;;  %vm15209_vm11 = vmmov %vm15167_vm0 }
 0x162   : > { %9473 = vmatpush3.bf16.xpose.msk.msra.mxu0 %vm11144_vm4, %v11194_v11  ;;  %8395 = vmatprep.mubr.msk.f32.mxu0 %vm15192_vm14, %v1836_v52  ;;  %v11546_v52 = vmul.f32 0.70710677, %v11288_v12  ;;  %v11561_v12 = vadd.f32 %v8291_v53, %v11334_v16  ;;  %v11564_v37 = vadd.f32 %v11334_v16, %v1388_v19  ;;  %vm15215_vm12 = vmmov %vm15167_vm0 }
 0x163   : > { %9476 = vmatprep.subr.msk.bf16.mxu0 %vm11144_vm4, %v11221_v21  ;;  %8339 = vmatprep.mubr.msk.f32.mxu1 %vm15194_vm15, %v1414_v33  ;;  %v1854_v33 = vmul.f32 %v11179_v6, %v11522_v51  ;;  %vm15216_vm13 = vmmov %vm15167_vm0 }
 0x164   : > { %9407 = vmatpush3.bf16.msra.mxu1 %v9404_v31  ;;  %15195 = vst [vmem:[#allocation46_spill] sm:$0xff] %v11546_v52  ;;  %v1855_v31 = vmul.f32 %v11179_v6, %v11519_v2  ;;  %15199 = vst [vmem:[#allocation47_spill] sm:$0xff] %v11561_v12  ;;  %v1420_v2 = vmul.f32 %v11177_v5, %v11344_v25  ;;  %v1841_v16 = vmul.f32 %v11179_v6, %v11546_v52 }
 0x165   : > { %8396 = vmatmul.mubr.msk.f32.gmra.mrb[42].mxu0 %vm15167_vm0, %v1837_v4  ;;  %8340 = vmatmul.mubr.msk.f32.gmra.mrb[26].mxu1 %vm15196_vm2, %v1415_v42  ;;  %15200 = vst [vmem:[#allocation48_spill] sm:$0xff] %v11564_v37  ;;  %v1418_v4 = vmul.f32 %v11177_v5, %v11529_v57  ;;  %v2490_v42 = vmul.f32 %v11121_v44, %v11188_v8  ;;  %vm15217_vm14 = vmmov %vm15167_vm0 }
 0x166   : > { %8398 = vmatprep.mubr.msk.f32.mxu0 %vm15197_vm3, %v1838_v1  ;;  %8342 = vmatprep.mubr.msk.f32.mxu1 %vm15198_vm1, %v1416_v7  ;;  %v9412_v1 = vpack.c.bf16 %v1853_v10, %v1852_v14  ;;  %v1421_v7 = vmul.f32 %v11177_v5, %v11341_v24  ;;  %v1419_v53 = vmul.f32 %v11177_v5, %v11546_v52  ;;  %vm15218_vm15 = vmmov %vm15167_vm0 }
 0x167   : > { %9409 = vmatprep.subr.bf16.mxu1 %v9408_v17  ;;  %v9416_v19 = vpack.c.bf16 %v1855_v31, %v1854_v33  ;;  %v2506_v10 = vmul.f32 %v11121_v44, %v11344_v25  ;;  %v3041_v33 = vmul.f32 %v11123_v45, %v11344_v25  ;;  %v3577_v31 = vmul.f32 %v11131_v49, %v11341_v24  ;;  %vm15219_vm2 = vmmov %vm15167_vm0 }
 0x168   : > { %9411 = vmatpush3.bf16.msra.mxu1 %v9408_v17  ;;  %v1856_v17 = vmul.f32 %v11179_v6, %v11564_v37  ;;  %v11588_v14 = vpack.c.bf16 %v1421_v7, %v1420_v2  ;;  %v3576_v2 = vmul.f32 %v11131_v49, %v11344_v25  ;;  %v4112_v7 = vmul.f32 %v11125_v46, %v11341_v24  ;;  %vm15220_vm3 = vmmov %vm15167_vm0 }
 0x169   : > { %8399 = vmatmul.mubr.msk.f32.gmra.mrb[44].mxu0 %vm15201_vm5, %v1839_v23  ;;  %8343 = vmatmul.mubr.msk.f32.gmra.mrb[28].mxu1 %vm15202_vm6, %v1417_v32  ;;  %v1857_v23 = vmul.f32 %v11179_v6, %v11561_v12  ;;  %v2507_v32 = vmul.f32 %v11121_v44, %v11341_v24  ;;  %v3042_v6 = vmul.f32 %v11123_v45, %v11341_v24  ;;  %vm15221_vm1 = vmmov %vm15167_vm0 }
 0x16a   : > { %9479 = vmatpush3.bf16.xpose.msk.msra.mxu0 %vm11144_vm4, %v11221_v21  ;;  %8401 = vmatprep.mubr.msk.f32.mxu0 %vm15203_vm7, %v1840_v27  ;;  %15204 = vst [vmem:[#allocation49_spill] sm:$0xff] %v11588_v14  ;;  %v4111_v27 = vmul.f32 %v11125_v46, %v11344_v25  ;;  %v4646_v12 = vmul.f32 %v11127_v47, %v11344_v25  ;;  %vm15222_vm5 = vmmov %vm15167_vm0 }
 0x16b   : > { %9482 = vmatprep.subr.msk.bf16.mxu0 %vm11144_vm4, %v11228_v29  ;;  %8345 = vmatprep.mubr.msk.f32.mxu1 %vm15205_vm8, %v1418_v4  ;;  %v11610_v4 = vpack.c.bf16 %v2507_v32, %v2506_v10  ;;  %v11617_v37 = vpack.c.bf16 %v3042_v6, %v3041_v33  ;;  %v11619_v49 = vpack.c.bf16 %v3577_v31, %v3576_v2  ;;  %vm15223_vm6 = vmmov %vm15167_vm0 }
 0x16c   : > { %9413 = vmatprep.subr.bf16.mxu1 %v9412_v1  ;;  %v11623_v10 = vpack.c.bf16 %v4112_v7, %v4111_v27  ;;  %v5181_v32 = vmul.f32 %v11129_v48, %v11344_v25  ;;  %v2492_v25 = vmul.f32 %v11121_v44, %v11354_v62  ;;  %v2498_v33 = vmul.f32 %v11121_v44, %v11440_v20  ;;  %vm15224_vm7 = vmmov %vm15167_vm0 }
 0x16d   : > { %8402 = vmatmul.mubr.msk.f32.gmra.mrb[46].mxu0 %vm15206_vm9, %v1841_v16  ;;  %8346 = vmatmul.mubr.msk.f32.gmra.mrb[30].mxu1 %vm15207_vm10, %v1419_v53  ;;  %15208 = vst [vmem:[#allocation50_spill] sm:$0xff] %v11610_v4  ;;  %15210 = vst [vmem:[#allocation51_spill] sm:$0xff] %v11617_v37  ;;  %v4647_v16 = vmul.f32 %v11127_v47, %v11341_v24  ;;  %v9420_v53 = vpack.c.bf16 %v1857_v23, %v1856_v17 }
 0x16e   : > { %8548 = vmatprep.mubr.msk.f32.mxu0 %vm15209_vm11, %v2490_v42  ;;  %9415 = vmatpush3.bf16.msra.mxu1 %v9412_v1  ;;  %15211 = vst [vmem:[#allocation52_spill] sm:$0xff] %v11619_v49  ;;  %15212 = vst [vmem:[#allocation53_spill] sm:$0xff] %v11623_v10  ;;  %v5182_v4 = vmul.f32 %v11129_v48, %v11341_v24  ;;  %v2491_v24 = vmul.f32 %v11121_v44, %v11346_v26 }
 0x16f   : > { %9417 = vmatprep.subr.bf16.mxu1 %v9416_v19  ;;  %v11629_v51 = vpack.c.bf16 %v4647_v16, %v4646_v12  ;;  %v2493_v12 = vmul.f32 %v11121_v44, %v11381_v43  ;;  %v2494_v1 = vmul.f32 %v11121_v44, %v11373_v41  ;;  %v2496_v17 = vmul.f32 %v11121_v44, %v11405_v3  ;;  %vm15225_vm8 = vmmov %vm15167_vm0 }
 0x170   : > { %v11631_v42 = vpack.c.bf16 %v5182_v4, %v5181_v32  ;;  %v2497_v23 = vmul.f32 %v11121_v44, %v11430_v28  ;;  %v2499_v6 = vmul.f32 %v11121_v44, %v11452_v40  ;;  %v2500_v2 = vmul.f32 %v11121_v44, %v11465_v36  ;;  %vm15226_vm9 = vmmov %vm15167_vm0 }
 0x171   : > { %15213 = vst [vmem:[#allocation54_spill] sm:$0xff] %v11629_v51  ;;  %v2501_v31 = vmul.f32 %v11121_v44, %v11482_v58  ;;  %v2502_v27 = vmul.f32 %v11121_v44, %v11492_v30  ;;  %v2503_v4 = vmul.f32 %v11121_v44, %v11504_v39  ;;  %v2504_v7 = vmul.f32 %v11121_v44, %v11529_v57  ;;  %vm15227_vm10 = vmmov %vm15167_vm0 }
 0x172   : > { %15214 = vst [vmem:[#allocation55_spill] sm:$0xff] %v11631_v42  ;;  %9485 = vmatpush3.bf16.xpose.msk.msra.mxu0 %vm11144_vm4, %v11228_v29  ;;  %9419 = vmatpush3.bf16.msra.mxu1 %v9416_v19  ;;  %v2495_v19 = vmul.f32 %v11121_v44, %v11396_v63  ;;  %v2505_v16 = vmul.f32 %v11121_v44, %v11546_v52  ;;  %vm15228_vm11 = vmmov %vm15167_vm0 }
 0x173   : > { %9488 = vmatprep.subr.msk.bf16.mxu0 %vm11144_vm4, %v11250_v38  ;;  %9421 = vmatprep.subr.bf16.mxu1 %v9420_v53  ;;  %v3026_v32 = vmul.f32 %v11123_v45, %v11346_v26 }
 0x176   : > { %9423 = vmatpush3.bf16.msra.mxu1 %v9420_v53  ;;  %v3025_v53 = vmul.f32 %v11123_v45, %v11188_v8 }
 0x177   : > { %9425 = vmatprep.subr.bf16.mxu1 %v11588_v14 }
 0x17a   : > { %9491 = vmatpush3.bf16.xpose.msk.msra.mxu0 %vm11144_vm4, %v11250_v38 }
 0x17b   : > { %9494 = vmatprep.subr.msk.bf16.mxu0 %vm11144_vm4, %v11260_v54 }
 0x182   : > { %9497 = vmatpush3.bf16.xpose.msk.msra.mxu0 %vm11144_vm4, %v11260_v54 }
 0x183   : > { %9500 = vmatprep.subr.msk.bf16.mxu0 %vm11144_vm4, %v11282_v50 }
 0x18a   : > { %9503 = vmatpush3.bf16.xpose.msk.msra.mxu0 %vm11144_vm4, %v11282_v50 }
 0x18b   : > { %9538 = vmatprep.subr.msk.bf16.mxu0 %vm11144_vm4, %v11148_v56 }
 0x191   : > { %8549 = vmatmul.mubr.msk.f32.vlgmr.msra.gmra.mrb[48].mxu0 %vm15215_vm12, %v2491_v24  ;;  %vm15229_vm12 = vmmov %vm15167_vm0  ;;  %v3027_v24 = vmul.f32 %v11123_v45, %v11354_v62 }
 0x192   : > { %8551 = vmatprep.mubr.msk.f32.mxu0 %vm15216_vm13, %v2492_v25  ;;  %9541 = vmatpush3.bf16.xpose.msk.msra.mxu0 %vm11144_vm4, %v11148_v56  ;;  %vm15230_vm13 = vmmov %vm15167_vm0  ;;  %v3028_v25 = vmul.f32 %v11123_v45, %v11381_v43 }
 0x193   : > { %9544 = vmatprep.subr.msk.bf16.mxu0 %vm11144_vm4, %v11173_v0 }
 0x195   : > { %8552 = vmatmul.mubr.msk.f32.gmra.mrb[50].mxu0 %vm15217_vm14, %v2493_v12  ;;  %vm15231_vm14 = vmmov %vm15167_vm0  ;;  %v3029_v12 = vmul.f32 %v11123_v45, %v11373_v41 }
 0x196   : > { %8554 = vmatprep.mubr.msk.f32.mxu0 %vm15218_vm15, %v2494_v1  ;;  %vm15232_vm15 = vmmov %vm15167_vm0  ;;  %v3030_v1 = vmul.f32 %v11123_v45, %v11396_v63 }
 0x199   : > { %8555 = vmatmul.mubr.msk.f32.gmra.mrb[52].mxu0 %vm15167_vm0, %v2495_v19  ;;  %v3031_v19 = vmul.f32 %v11123_v45, %v11405_v3 }
 0x19a   : > { %8557 = vmatprep.mubr.msk.f32.mxu0 %vm15219_vm2, %v2496_v17  ;;  %9547 = vmatpush3.bf16.xpose.msk.msra.mxu0 %vm11144_vm4, %v11173_v0  ;;  %vm15233_vm2 = vmmov %vm15167_vm0  ;;  %v3032_v17 = vmul.f32 %v11123_v45, %v11430_v28 }
 0x19b   : > { %9550 = vmatprep.subr.msk.bf16.mxu0 %vm11144_vm4, %v11194_v11 }
 0x19d   : > { %8558 = vmatmul.mubr.msk.f32.gmra.mrb[54].mxu0 %vm15220_vm3, %v2497_v23  ;;  %vm15234_vm3 = vmmov %vm15167_vm0  ;;  %v3033_v23 = vmul.f32 %v11123_v45, %v11440_v20 }
 0x19e   : > { %8560 = vmatprep.mubr.msk.f32.mxu0 %vm15221_vm1, %v2498_v33  ;;  %vm15235_vm1 = vmmov %vm15167_vm0  ;;  %v3034_v33 = vmul.f32 %v11123_v45, %v11452_v40 }
 0x1a1   : > { %8561 = vmatmul.mubr.msk.f32.gmra.mrb[56].mxu0 %vm15222_vm5, %v2499_v6  ;;  %vm15236_vm5 = vmmov %vm15167_vm0  ;;  %v3035_v6 = vmul.f32 %v11123_v45, %v11465_v36 }
 0x1a2   : > { %8563 = vmatprep.mubr.msk.f32.mxu0 %vm15223_vm6, %v2500_v2  ;;  %9553 = vmatpush3.bf16.xpose.msk.msra.mxu0 %vm11144_vm4, %v11194_v11  ;;  %vm15237_vm6 = vmmov %vm15167_vm0  ;;  %v3036_v2 = vmul.f32 %v11123_v45, %v11482_v58 }
 0x1a3   : > { %9556 = vmatprep.subr.msk.bf16.mxu0 %vm11144_vm4, %v11221_v21 }
 0x1a5   : > { %8564 = vmatmul.mubr.msk.f32.gmra.mrb[58].mxu0 %vm15224_vm7, %v2501_v31  ;;  %vm15238_vm7 = vmmov %vm15167_vm0  ;;  %v3037_v31 = vmul.f32 %v11123_v45, %v11492_v30 }
 0x1a6   : > { %8566 = vmatprep.mubr.msk.f32.mxu0 %vm15225_vm8, %v2502_v27  ;;  %vm15239_vm8 = vmmov %vm15167_vm0  ;;  %v3038_v27 = vmul.f32 %v11123_v45, %v11504_v39 }
 0x1a9   : > { %8567 = vmatmul.mubr.msk.f32.gmra.mrb[60].mxu0 %vm15226_vm9, %v2503_v4  ;;  %vm15240_vm9 = vmmov %vm15167_vm0  ;;  %v3039_v4 = vmul.f32 %v11123_v45, %v11529_v57 }
 0x1aa   : > { %8569 = vmatprep.mubr.msk.f32.mxu0 %vm15227_vm10, %v2504_v7  ;;  %9559 = vmatpush3.bf16.xpose.msk.msra.mxu0 %vm11144_vm4, %v11221_v21  ;;  %vm15241_vm10 = vmmov %vm15167_vm0  ;;  %v3040_v7 = vmul.f32 %v11123_v45, %v11546_v52  ;;  %v11975_v45 = vld [vmem:[%s15254_s28 + $0x20] sm:$0xff] }
 0x1ab   : > { %9562 = vmatprep.subr.msk.bf16.mxu0 %vm11144_vm4, %v11228_v29 }
 0x1ad   : > { %8570 = vmatmul.mubr.msk.f32.gmra.mrb[62].mxu0 %vm15228_vm11, %v2505_v16  ;;  %vm15242_vm11 = vmmov %vm15167_vm0  ;;  %v4095_v16 = vmul.f32 %v11125_v46, %v11188_v8 }
 0x1ae   : > { %8660 = vmatprep.mubr.msk.f32.mxu0 %vm15229_vm12, %v3025_v53  ;;  %vm15243_vm12 = vmmov %vm15167_vm0  ;;  %v4096_v53 = vmul.f32 %v11125_v46, %v11346_v26 }
 0x1b2   : > { %9565 = vmatpush3.bf16.xpose.msk.msra.mxu0 %vm11144_vm4, %v11228_v29 }
 0x1b3   : > { %9568 = vmatprep.subr.msk.bf16.mxu0 %vm11144_vm4, %v11250_v38 }
 0x1ba   : > { %9571 = vmatpush3.bf16.xpose.msk.msra.mxu0 %vm11144_vm4, %v11250_v38 }
 0x1bb   : > { %9574 = vmatprep.subr.msk.bf16.mxu0 %vm11144_vm4, %v11260_v54 }
 0x1c2   : > { %9577 = vmatpush3.bf16.xpose.msk.msra.mxu0 %vm11144_vm4, %v11260_v54 }
 0x1c3   : > { %9580 = vmatprep.subr.msk.bf16.mxu0 %vm11144_vm4, %v11282_v50 }
 0x1ca   : > { %9583 = vmatpush3.bf16.xpose.msk.msra.mxu0 %vm11144_vm4, %v11282_v50 }
 0x1cb   : > { %9698 = vmatprep.subr.msk.bf16.mxu0 %vm11144_vm4, %v11148_v56 }
 0x1d1   : > { %8661 = vmatmul.mubr.msk.f32.vlgmr.msra.gmra.mrb[64].mxu0 %vm15230_vm13, %v3026_v32  ;;  %vm15244_vm13 = vmmov %vm15167_vm0  ;;  %v4097_v32 = vmul.f32 %v11125_v46, %v11354_v62 }
 0x1d2   : > { %8663 = vmatprep.mubr.msk.f32.mxu0 %vm15231_vm14, %v3027_v24  ;;  %9701 = vmatpush3.bf16.xpose.msk.msra.mxu0 %vm11144_vm4, %v11148_v56  ;;  %vm15245_vm14 = vmmov %vm15167_vm0  ;;  %v4098_v24 = vmul.f32 %v11125_v46, %v11381_v43 }
 0x1d3   : > { %9704 = vmatprep.subr.msk.bf16.mxu0 %vm11144_vm4, %v11173_v0 }
 0x1d5   : > { %8664 = vmatmul.mubr.msk.f32.gmra.mrb[66].mxu0 %vm15232_vm15, %v3028_v25  ;;  %vm15246_vm15 = vmmov %vm15167_vm0  ;;  %v4099_v25 = vmul.f32 %v11125_v46, %v11373_v41 }
 0x1d6   : > { %8666 = vmatprep.mubr.msk.f32.mxu0 %vm15167_vm0, %v3029_v12  ;;  %v4100_v12 = vmul.f32 %v11125_v46, %v11396_v63 }
 0x1d9   : > { %8667 = vmatmul.mubr.msk.f32.gmra.mrb[68].mxu0 %vm15233_vm2, %v3030_v1  ;;  %vm15247_vm2 = vmmov %vm15167_vm0  ;;  %v4101_v1 = vmul.f32 %v11125_v46, %v11405_v3 }
 0x1da   : > { %8669 = vmatprep.mubr.msk.f32.mxu0 %vm15234_vm3, %v3031_v19  ;;  %9707 = vmatpush3.bf16.xpose.msk.msra.mxu0 %vm11144_vm4, %v11173_v0  ;;  %vm15248_vm3 = vmmov %vm15167_vm0  ;;  %v4102_v19 = vmul.f32 %v11125_v46, %v11430_v28 }
 0x1db   : > { %9710 = vmatprep.subr.msk.bf16.mxu0 %vm11144_vm4, %v11194_v11 }
 0x1dd   : > { %8670 = vmatmul.mubr.msk.f32.gmra.mrb[70].mxu0 %vm15235_vm1, %v3032_v17  ;;  %vm15249_vm1 = vmmov %vm15167_vm0  ;;  %v4103_v17 = vmul.f32 %v11125_v46, %v11440_v20 }
 0x1de   : > { %8672 = vmatprep.mubr.msk.f32.mxu0 %vm15236_vm5, %v3033_v23  ;;  %vm15250_vm5 = vmmov %vm15167_vm0  ;;  %v4104_v23 = vmul.f32 %v11125_v46, %v11452_v40 }
 0x1e1   : > { %8673 = vmatmul.mubr.msk.f32.gmra.mrb[72].mxu0 %vm15237_vm6, %v3034_v33  ;;  %vm15251_vm6 = vmmov %vm15167_vm0  ;;  %v4105_v33 = vmul.f32 %v11125_v46, %v11465_v36 }
 0x1e2   : > { %8675 = vmatprep.mubr.msk.f32.mxu0 %vm15238_vm7, %v3035_v6  ;;  %9713 = vmatpush3.bf16.xpose.msk.msra.mxu0 %vm11144_vm4, %v11194_v11  ;;  %vm15252_vm7 = vmmov %vm15167_vm0  ;;  %v11898_v6 = vld [vmem:[%s15254_s28 + $0x8] sm:$0xff] }
 0x1e3   : > { %9716 = vmatprep.subr.msk.bf16.mxu0 %vm11144_vm4, %v11221_v21 }
 0x1e5   : > { %8676 = vmatmul.mubr.msk.f32.gmra.mrb[74].mxu0 %vm15239_vm8, %v3036_v2  ;;  %vm15253_vm8 = vmmov %vm15167_vm0  ;;  %v4106_v2 = vmul.f32 %v11125_v46, %v11482_v58 }
 0x1e6   : > { %8678 = vmatprep.mubr.msk.f32.mxu0 %vm15240_vm9, %v3037_v31  ;;  %vm15255_vm9 = vmmov %vm15167_vm0 }
 0x1e9   : > { %8679 = vmatmul.mubr.msk.f32.gmra.mrb[76].mxu0 %vm15241_vm10, %v3038_v27  ;;  %vm15256_vm10 = vmmov %vm15167_vm0 }
 0x1ea   : > { %8681 = vmatprep.mubr.msk.f32.mxu0 %vm15242_vm11, %v3039_v4  ;;  %9719 = vmatpush3.bf16.xpose.msk.msra.mxu0 %vm11144_vm4, %v11221_v21  ;;  %v4107_v4 = vmul.f32 %v11125_v46, %v11492_v30  ;;  %vm15257_vm11 = vmmov %vm15167_vm0 }
 0x1eb   : > { %9722 = vmatprep.subr.msk.bf16.mxu0 %vm11144_vm4, %v11228_v29 }
 0x1ed   : > { %8682 = vmatmul.mubr.msk.f32.gmra.mrb[78].mxu0 %vm15243_vm12, %v3040_v7  ;;  %vm15258_vm12 = vmmov %vm15167_vm0 }
 0x1ee   : > { %8884 = vmatprep.mubr.msk.f32.mxu0 %vm15244_vm13, %v4095_v16  ;;  %vm15259_vm13 = vmmov %vm15167_vm0 }
 0x1f2   : > { %9725 = vmatpush3.bf16.xpose.msk.msra.mxu0 %vm11144_vm4, %v11228_v29 }
 0x1f3   : > { %9728 = vmatprep.subr.msk.bf16.mxu0 %vm11144_vm4, %v11250_v38 }
 0x1fa   : > { %9731 = vmatpush3.bf16.xpose.msk.msra.mxu0 %vm11144_vm4, %v11250_v38 }
 0x1fb   : > { %9734 = vmatprep.subr.msk.bf16.mxu0 %vm11144_vm4, %v11260_v54 }
 0x202   : > { %9737 = vmatpush3.bf16.xpose.msk.msra.mxu0 %vm11144_vm4, %v11260_v54 }
 0x203   : > { %9740 = vmatprep.subr.msk.bf16.mxu0 %vm11144_vm4, %v11282_v50 }
 0x20a   : > { %9743 = vmatpush3.bf16.xpose.msk.msra.mxu0 %vm11144_vm4, %v11282_v50 }
 0x20b   : > { %9778 = vmatprep.subr.msk.bf16.mxu0 %vm11144_vm4, %v11148_v56 }
 0x211   : > { %8885 = vmatmul.mubr.msk.f32.vlgmr.msra.gmra.mrb[80].mxu0 %vm15245_vm14, %v4096_v53  ;;  %vm15261_vm14 = vmmov %vm15167_vm0 }
 0x212   : > { %8887 = vmatprep.mubr.msk.f32.mxu0 %vm15246_vm15, %v4097_v32  ;;  %9781 = vmatpush3.bf16.xpose.msk.msra.mxu0 %vm11144_vm4, %v11148_v56  ;;  %vm15274_vm15 = vmmov %vm15167_vm0 }
 0x213   : > { %9784 = vmatprep.subr.msk.bf16.mxu0 %vm11144_vm4, %v11173_v0 }
 0x215   : > { %8888 = vmatmul.mubr.msk.f32.gmra.mrb[82].mxu0 %vm15167_vm0, %v4098_v24  ;;  %v11917_v24 = vld [vmem:[%s15254_s28] sm:$0xff] }
 0x216   : > { %8890 = vmatprep.mubr.msk.f32.mxu0 %vm15247_vm2, %v4099_v25  ;;  %v11923_v25 = vld [vmem:[%s15254_s28 + $0x18] sm:$0xff]  ;;  %vm15276_vm2 = vmmov %vm15167_vm0 }
 0x219   : > { %8891 = vmatmul.mubr.msk.f32.gmra.mrb[84].mxu0 %vm15248_vm3, %v4100_v12  ;;  %v4108_v12 = vmul.f32 %v11125_v46, %v11504_v39  ;;  %vm15277_vm3 = vmmov %vm15167_vm0 }
 0x21a   : > { %8893 = vmatprep.mubr.msk.f32.mxu0 %vm15249_vm1, %v4101_v1  ;;  %9787 = vmatpush3.bf16.xpose.msk.msra.mxu0 %vm11144_vm4, %v11173_v0  ;;  %vm15278_vm1 = vmmov %vm15167_vm0 }
 0x21b   : > { %9790 = vmatprep.subr.msk.bf16.mxu0 %vm11144_vm4, %v11194_v11 }
 0x21d   : > { %8894 = vmatmul.mubr.msk.f32.gmra.mrb[86].mxu0 %vm15250_vm5, %v4102_v19  ;;  %vm15280_vm5 = vmmov %vm15167_vm0 }
 0x21e   : > { %8896 = vmatprep.mubr.msk.f32.mxu0 %vm15251_vm6, %v4103_v17  ;;  %v4109_v17 = vmul.f32 %v11125_v46, %v11529_v57  ;;  %vm15281_vm6 = vmmov %vm15167_vm0 }
 0x221   : > { %8897 = vmatmul.mubr.msk.f32.gmra.mrb[88].mxu0 %vm15252_vm7, %v4104_v23  ;;  %vm15282_vm7 = vmmov %vm15167_vm0 }
 0x222   : > { %8899 = vmatprep.mubr.msk.f32.mxu0 %vm15253_vm8, %v4105_v33  ;;  %9793 = vmatpush3.bf16.xpose.msk.msra.mxu0 %vm11144_vm4, %v11194_v11  ;;  %vm15284_vm8 = vmmov %vm15167_vm0 }
 0x223   : > { %9796 = vmatprep.subr.msk.bf16.mxu0 %vm11144_vm4, %v11221_v21 }
 0x224   : > { %v8326_v31 = vpop.f32.mrb[16].mxu1  ;;  %v8382_v27 = vpop.f32.mrb[32].mxu0 }
 0x225   : > { %v11908_v7 = vadd.f32 %v8326_v31, %v11898_v6  ;;  %v11911_v16 = vadd.f32 %v8382_v27, %v11898_v6  ;;  %v1598_v53 = vpop.f32.mrb[17].mxu1  ;;  %v1972_v32 = vpop.f32.mrb[33].mxu0  ;;  %8900 = vmatmul.mubr.msk.f32.gmra.mrb[90].mxu0 %vm15255_vm9, %v4106_v2  ;;  %v4110_v27 = vmul.f32 %v11125_v46, %v11546_v52  ;;  %v11961_v46 = vld [vmem:[%s15254_s28 + $0x10] sm:$0xff]  ;;  %vm15286_vm9 = vmmov %vm15167_vm0 }
 0x226   : > { %8902 = vmatprep.mubr.msk.f32.mxu0 %vm15256_vm10, %v4107_v4  ;;  %v11932_v23 = vadd.f32 %v1972_v32, %v11917_v24  ;;  %v4630_v4 = vmul.f32 %v11127_v47, %v11188_v8  ;;  %vm15287_vm10 = vmmov %vm15167_vm0 }
 0x227   : > { %2053 = vmax.xlane.f32.xlu0 %v11911_v16  ;;  %1679 = vmax.xlane.f32.xlu1 %v11908_v7 }
 0x228   : > { %v8329_v1 = vpop.f32.mrb[18].mxu1  ;;  %v8385_v19 = vpop.f32.mrb[34].mxu0 }
 0x229   : > { %v11935_v33 = vadd.f32 %v8385_v19, %v11923_v25  ;;  %v1608_v2 = vpop.f32.mrb[19].mxu1  ;;  %v1982_v31 = vpop.f32.mrb[35].mxu0  ;;  %8903 = vmatmul.mubr.msk.f32.gmra.mrb[92].mxu0 %vm15257_vm11, %v4108_v12  ;;  %v11952_v19 = vadd.f32 %v1598_v53, %v11917_v24  ;;  %v11956_v51 = vadd.f32 %v8329_v1, %v11923_v25  ;;  %vm15288_vm11 = vmmov %vm15167_vm0 }
 0x22a   : > { %8905 = vmatprep.mubr.msk.f32.mxu0 %vm15258_vm12, %v4109_v17  ;;  %9799 = vmatpush3.bf16.xpose.msk.msra.mxu0 %vm11144_vm4, %v11221_v21  ;;  %v11970_v1 = vadd.f32 %v1982_v31, %v11961_v46  ;;  %vm15289_vm12 = vmmov %vm15167_vm0 }
 0x22b   : > { %9802 = vmatprep.subr.msk.bf16.mxu0 %vm11144_vm4, %v11228_v29  ;;  %2051 = vmax.xlane.f32.xlu0 %v11932_v23  ;;  %15260 = vst [vmem:[#allocation56_spill] sm:$0xff] %v11956_v51 }
 0x22c   : > { %2057 = vmax.xlane.f32.xlu1 %v11935_v33  ;;  %v8332_v32 = vpop.f32.mrb[20].mxu1  ;;  %v8388_v12 = vpop.f32.mrb[36].mxu0  ;;  %15263 = vst [vmem:[#allocation58_spill] sm:$0xff] %v11970_v1 }
 0x22d   : > { %8906 = vmatmul.mubr.msk.f32.gmra.mrb[94].mxu0 %vm15259_vm13, %v4110_v27  ;;  %v1618_v17 = vpop.f32.mrb[21].mxu1  ;;  %v1992_v42 = vpop.f32.mrb[37].mxu0  ;;  %v11967_v27 = vadd.f32 %v1608_v2, %v11961_v46  ;;  %vm15291_vm13 = vmmov %vm15167_vm0 }
 0x22e   : > { %8996 = vmatprep.mubr.msk.f32.mxu0 %vm15261_vm14, %v4630_v4  ;;  %v11983_v4 = vld [vmem:[%s15254_s28 + $0x28] sm:$0xff]  ;;  %v11991_v44 = vadd.f32 %v1992_v42, %v11975_v45  ;;  %v11999_v22 = vadd.f32 %v1618_v17, %v11975_v45  ;;  %v12007_v42 = vld [vmem:[%s15254_s28 + $0x30] sm:$0xff]  ;;  %vm15293_vm14 = vmmov %vm15167_vm0 }
 0x22f   : > { %1677 = vmax.xlane.f32.xlu0 %v11952_v19  ;;  %15262 = vst [vmem:[#allocation57_spill] sm:$0xff] %v11967_v27  ;;  %v11994_v13 = vadd.f32 %v8388_v12, %v11983_v4  ;;  %v12002_v61 = vadd.f32 %v8332_v32, %v11983_v4  ;;  %v12015_v12 = vld [vmem:[%s15254_s28 + $0x38] sm:$0xff] }
 0x230   : > { %1683 = vmax.xlane.f32.xlu1 %v11956_v51  ;;  %v8335_v53 = vpop.f32.mrb[22].mxu1  ;;  %v8391_v10 = vpop.f32.mrb[38].mxu0  ;;  %15264 = vst [vmem:[#allocation59_spill] sm:$0xff] %v11991_v44  ;;  %15266 = vst [vmem:[#allocation61_spill] sm:$0xff] %v11999_v22 }
 0x231   : > { %v1628_v49 = vpop.f32.mrb[23].mxu1  ;;  %v2002_v37 = vpop.f32.mrb[39].mxu0  ;;  %15265 = vst [vmem:[#allocation60_spill] sm:$0xff] %v11994_v13  ;;  %15267 = vst [vmem:[#allocation62_spill] sm:$0xff] %v12002_v61 }
 0x232   : > { %9805 = vmatpush3.bf16.xpose.msk.msra.mxu0 %vm11144_vm4, %v11228_v29  ;;  %v12023_v34 = vadd.f32 %v2002_v37, %v12007_v42 }
 0x233   : > { %9808 = vmatprep.subr.msk.bf16.mxu0 %vm11144_vm4, %v11250_v38  ;;  %1681 = vmax.xlane.f32.xlu0 %v11967_v27  ;;  %v12040_v27 = vadd.f32 %v8335_v53, %v12015_v12 }
 0x234   : > { %2055 = vmax.xlane.f32.xlu1 %v11970_v1  ;;  %v8338_v2 = vpop.f32.mrb[24].mxu1  ;;  %v8394_v31 = vpop.f32.mrb[40].mxu0  ;;  %15268 = vst [vmem:[#allocation63_spill] sm:$0xff] %v12023_v34 }
 0x235   : > { %v1638_v60 = vpop.f32.mrb[25].mxu1  ;;  %v2012_v9 = vpop.f32.mrb[41].mxu0  ;;  %15270 = vst [vmem:[#allocation65_spill] sm:$0xff] %v12040_v27 }
 0x237   : > { %2059 = vmax.xlane.f32.xlu0 %v11991_v44 }
 0x238   : > { %2061 = vmax.xlane.f32.xlu1 %v11994_v13  ;;  %v8341_v15 = vpop.f32.mrb[26].mxu1  ;;  %v8397_v18 = vpop.f32.mrb[42].mxu0  ;;  %v12026_v13 = vadd.f32 %v8391_v10, %v12015_v12  ;;  %v12045_v10 = vld [vmem:[%s15254_s28 + $0x40] sm:$0xff] }
 0x239   : > { %v1648_v14 = vpop.f32.mrb[27].mxu1  ;;  %v2022_v59 = vpop.f32.mrb[43].mxu0  ;;  %v12061_v53 = vadd.f32 %v2012_v9, %v12045_v10  ;;  %v12085_v9 = vld [vmem:[%s15254_s28 + $0x58] sm:$0xff] }
 0x23a   : > { %9811 = vmatpush3.bf16.xpose.msk.msra.mxu0 %vm11144_vm4, %v11250_v38  ;;  %15269 = vst [vmem:[#allocation64_spill] sm:$0xff] %v12026_v13 }
 0x23b   : > { %9814 = vmatprep.subr.msk.bf16.mxu0 %vm11144_vm4, %v11260_v54  ;;  %1685 = vmax.xlane.f32.xlu0 %v11999_v22 }
 0x23c   : > { %1687 = vmax.xlane.f32.xlu1 %v12002_v61  ;;  %v8344_v32 = vpop.f32.mrb[28].mxu1  ;;  %v8400_v17 = vpop.f32.mrb[44].mxu0  ;;  %v12035_v61 = vadd.f32 %v1628_v49, %v12007_v42  ;;  %v12053_v49 = vld [vmem:[%s15254_s28 + $0x48] sm:$0xff] }
 0x23d   : > { %v1658_v5 = vpop.f32.mrb[29].mxu1  ;;  %v2032_v35 = vpop.f32.mrb[45].mxu0  ;;  %v12072_v51 = vadd.f32 %v8338_v2, %v12053_v49  ;;  %v12096_v2 = vadd.f32 %v8397_v18, %v12085_v9  ;;  %v12114_v18 = vld [vmem:[%s15254_s28 + $0x60] sm:$0xff] }
 0x23f   : > { %2063 = vmax.xlane.f32.xlu0 %v12023_v34  ;;  %v12069_v34 = vadd.f32 %v1638_v60, %v12045_v10 }
 0x240   : > { %2065 = vmax.xlane.f32.xlu1 %v12026_v13  ;;  %v12030_v44 = vpop.f32.mrb[30].mxu1  ;;  %v12032_v1 = vpop.f32.mrb[46].mxu0  ;;  %v12064_v13 = vadd.f32 %v8394_v31, %v12053_v49  ;;  %v4631_v31 = vmul.f32 %v11127_v47, %v11346_v26 }
 0x241   : > { %v12037_v22 = vpop.f32.mrb[31].mxu1  ;;  %v2042_v37 = vpop.f32.mrb[47].mxu0  ;;  %15272 = vst [vmem:[#allocation67_spill] sm:$0xff] %v12069_v34 }
 0x242   : > { %9817 = vmatpush3.bf16.xpose.msk.msra.mxu0 %vm11144_vm4, %v11260_v54  ;;  %15271 = vst [vmem:[#allocation66_spill] sm:$0xff] %v12064_v13 }
 0x243   : > { %9820 = vmatprep.subr.msk.bf16.mxu0 %vm11144_vm4, %v11282_v50  ;;  %1689 = vmax.xlane.f32.xlu0 %v12035_v61 }
 0x244   : > { %1691 = vmax.xlane.f32.xlu1 %v12040_v27  ;;  %v12077_v27 = vld [vmem:[%s15254_s28 + $0x50] sm:$0xff] }
 0x245   : > { %v12093_v60 = vadd.f32 %v2022_v59, %v12077_v27  ;;  %v12109_v59 = vadd.f32 %v8341_v15, %v12085_v9  ;;  %v4633_v15 = vmul.f32 %v11127_v47, %v11381_v43 }
 0x247   : > { %2067 = vmax.xlane.f32.xlu0 %v12061_v53  ;;  %15275 = vst [vmem:[#allocation69_spill] sm:$0xff] %v12109_v59 }
 0x248   : > { %2069 = vmax.xlane.f32.xlu1 %v12064_v13  ;;  %v4632_v13 = vmul.f32 %v11127_v47, %v11354_v62 }
 0x24a   : > { %9823 = vmatpush3.bf16.xpose.msk.msra.mxu0 %vm11144_vm4, %v11282_v50 }
 0x24b   : > { %9858 = vmatprep.subr.msk.bf16.mxu0 %vm11144_vm4, %v11148_v56  ;;  %1693 = vmax.xlane.f32.xlu0 %v12069_v34  ;;  %v12105_v34 = vadd.f32 %v1648_v14, %v12077_v27  ;;  %v12123_v14 = vld [vmem:[%s15254_s28 + $0x68] sm:$0xff] }
 0x24c   : > { %1695 = vmax.xlane.f32.xlu1 %v12072_v51 }
 0x24d   : > { %15273 = vst [vmem:[#allocation68_spill] sm:$0xff] %v12105_v34 }
 0x24f   : > { %2071 = vmax.xlane.f32.xlu0 %v12093_v60 }
 0x250   : > { %2073 = vmax.xlane.f32.xlu1 %v12096_v2 }
 0x251   : > { %8997 = vmatmul.mubr.msk.f32.vlgmr.msra.gmra.mrb[96].mxu0 %vm15274_vm15, %v4631_v31  ;;  %v12135_v31 = vadd.f32 %v2032_v35, %v12114_v18  ;;  %v12149_v35 = vadd.f32 %v1658_v5, %v12114_v18  ;;  %v12167_v5 = vld [vmem:[%s15254_s28 + $0x78] sm:$0xff]  ;;  %vm15294_vm15 = vmmov %vm15167_vm0 }
 0x252   : > { %8999 = vmatprep.mubr.msk.f32.mxu0 %vm15167_vm0, %v4632_v13  ;;  %9861 = vmatpush3.bf16.xpose.msk.msra.mxu0 %vm11144_vm4, %v11148_v56  ;;  %v4634_v13 = vmul.f32 %v11127_v47, %v11373_v41  ;;  %v12139_v56 = vadd.f32 %v8400_v17, %v12123_v14  ;;  %v12153_v17 = vadd.f32 %v8344_v32, %v12123_v14 }
 0x253   : > { %9864 = vmatprep.subr.msk.bf16.mxu0 %vm11144_vm4, %v11173_v0  ;;  %1697 = vmax.xlane.f32.xlu0 %v12105_v34  ;;  %v4635_v34 = vmul.f32 %v11127_v47, %v11396_v63  ;;  %v4638_v32 = vmul.f32 %v11127_v47, %v11440_v20 }
 0x254   : > { %1699 = vmax.xlane.f32.xlu1 %v12109_v59  ;;  %v4636_v59 = vmul.f32 %v11127_v47, %v11405_v3  ;;  %15279 = vst [vmem:[#allocation70_spill] sm:$0xff] %v12153_v17 }
 0x255   : > { %9000 = vmatmul.mubr.msk.f32.gmra.mrb[98].mxu0 %vm15276_vm2, %v4633_v15  ;;  %v12158_v15 = vld [vmem:[%s15254_s28 + $0x70] sm:$0xff]  ;;  %vm15300_vm2 = vmmov %vm15167_vm0 }
 0x256   : > { %9002 = vmatprep.mubr.msk.f32.mxu0 %vm15277_vm3, %v4634_v13  ;;  %v12184_v13 = vadd.f32 %v12032_v1, %v12167_v5  ;;  %v12200_v1 = vadd.f32 %v12030_v44, %v12167_v5  ;;  %v4642_v44 = vmul.f32 %v11127_v47, %v11492_v30  ;;  %vm15301_vm3 = vmmov %vm15167_vm0 }
 0x257   : > { %2075 = vmax.xlane.f32.xlu0 %v12135_v31 }
 0x258   : > { %2077 = vmax.xlane.f32.xlu1 %v12139_v56  ;;  %15285 = vst [vmem:[#allocation72_spill] sm:$0xff] %v12200_v1 }
 0x259   : > { %9003 = vmatmul.mubr.msk.f32.gmra.mrb[100].mxu0 %vm15278_vm1, %v4635_v34  ;;  %v4637_v34 = vmul.f32 %v11127_v47, %v11430_v28  ;;  %vm15302_vm1 = vmmov %vm15167_vm0 }
 0x25a   : > { %9005 = vmatprep.mubr.msk.f32.mxu0 %vm15280_vm5, %v4636_v59  ;;  %9867 = vmatpush3.bf16.xpose.msk.msra.mxu0 %vm11144_vm4, %v11173_v0  ;;  %v12179_v59 = vadd.f32 %v2042_v37, %v12158_v15  ;;  %v4639_v0 = vmul.f32 %v11127_v47, %v11452_v40  ;;  %v12195_v37 = vadd.f32 %v12037_v22, %v12158_v15  ;;  %vm15303_vm5 = vmmov %vm15167_vm0 }
 0x25b   : > { %9870 = vmatprep.subr.msk.bf16.mxu0 %vm11144_vm4, %v11194_v11  ;;  %1701 = vmax.xlane.f32.xlu0 %v12149_v35  ;;  %v4641_v22 = vmul.f32 %v11127_v47, %v11482_v58 }
 0x25c   : > { %1703 = vmax.xlane.f32.xlu1 %v12153_v17  ;;  %v4640_v17 = vmul.f32 %v11127_v47, %v11465_v36  ;;  %15283 = vst [vmem:[#allocation71_spill] sm:$0xff] %v12195_v37 }
 0x25d   : > { %9006 = vmatmul.mubr.msk.f32.gmra.mrb[102].mxu0 %vm15281_vm6, %v4637_v34  ;;  %vm15304_vm6 = vmmov %vm15167_vm0 }
 0x25e   : > { %9008 = vmatprep.mubr.msk.f32.mxu0 %vm15282_vm7, %v4638_v32  ;;  %vm15305_vm7 = vmmov %vm15167_vm0 }
 0x25f   : > { %2079 = vmax.xlane.f32.xlu0 %v12179_v59 }
 0x260   : > { %2081 = vmax.xlane.f32.xlu1 %v12184_v13 }
 0x261   : > { %9009 = vmatmul.mubr.msk.f32.gmra.mrb[104].mxu0 %vm15284_vm8, %v4639_v0  ;;  %vm15306_vm8 = vmmov %vm15167_vm0 }
 0x262   : > { %9011 = vmatprep.mubr.msk.f32.mxu0 %vm15286_vm9, %v4640_v17  ;;  %9873 = vmatpush3.bf16.xpose.msk.msra.mxu0 %vm11144_vm4, %v11194_v11  ;;  %v4643_v11 = vmul.f32 %v11127_v47, %v11504_v39  ;;  %vm15307_vm9 = vmmov %vm15167_vm0 }
 0x263   : > { %9876 = vmatprep.subr.msk.bf16.mxu0 %vm11144_vm4, %v11221_v21  ;;  %1705 = vmax.xlane.f32.xlu0 %v12195_v37 }
 0x264   : > { %1707 = vmax.xlane.f32.xlu1 %v12200_v1  ;;  %v8550_v0 = vpop.f32.mrb[48].mxu0 }
 0x265   : > { %v12216_v17 = vadd.f32 %v8550_v0, %v11898_v6  ;;  %v2636_v34 = vpop.f32.mrb[49].mxu0  ;;  %9012 = vmatmul.mubr.msk.f32.gmra.mrb[106].mxu0 %vm15287_vm10, %v4641_v22  ;;  %v4644_v0 = vmul.f32 %v11127_v47, %v11529_v57  ;;  %vm15308_vm10 = vmmov %vm15167_vm0 }
 0x266   : > { %v12220_v32 = vadd.f32 %v2636_v34, %v11917_v24  ;;  %9014 = vmatprep.mubr.msk.f32.mxu0 %vm15288_vm11, %v4642_v44  ;;  %vm15310_vm11 = vmmov %vm15167_vm0 }
 0x268   : > { %2717 = vmax.xlane.f32.xlu1 %v12216_v17  ;;  %v8553_v37 = vpop.f32.mrb[50].mxu0  ;;  %2715 = vmax.xlane.f32.xlu0 %v12220_v32 }
 0x269   : > { %v12230_v1 = vadd.f32 %v8553_v37, %v11923_v25  ;;  %v2646_v22 = vpop.f32.mrb[51].mxu0  ;;  %9015 = vmatmul.mubr.msk.f32.gmra.mrb[108].mxu0 %vm15289_vm12, %v4643_v11  ;;  %v4645_v37 = vmul.f32 %v11127_v47, %v11546_v52  ;;  %v5165_v11 = vmul.f32 %v11129_v48, %v11188_v8  ;;  %vm15312_vm12 = vmmov %vm15167_vm0 }
 0x26a   : > { %v12234_v34 = vadd.f32 %v2646_v22, %v11961_v46  ;;  %9017 = vmatprep.mubr.msk.f32.mxu0 %vm15291_vm13, %v4644_v0  ;;  %9879 = vmatpush3.bf16.xpose.msk.msra.mxu0 %vm11144_vm4, %v11221_v21  ;;  %vm15313_vm13 = vmmov %vm15167_vm0 }
 0x26b   : > { %9882 = vmatprep.subr.msk.bf16.mxu0 %vm11144_vm4, %v11228_v29 }
 0x26c   : > { %15290 = vst [vmem:[#allocation73_spill] sm:$0xff] %v12234_v34  ;;  %2721 = vmax.xlane.f32.xlu1 %v12230_v1  ;;  %v8556_v44 = vpop.f32.mrb[52].mxu0  ;;  %2719 = vmax.xlane.f32.xlu0 %v12234_v34 }
 0x26d   : > { %v12250_v0 = vadd.f32 %v8556_v44, %v11983_v4  ;;  %v2656_v22 = vpop.f32.mrb[53].mxu0  ;;  %9018 = vmatmul.mubr.msk.f32.gmra.mrb[110].mxu0 %vm15293_vm14, %v4645_v37  ;;  %vm15314_vm14 = vmmov %vm15167_vm0 }
 0x26e   : > { %v12254_v21 = vadd.f32 %v2656_v22, %v11975_v45  ;;  %9108 = vmatprep.mubr.msk.f32.mxu0 %vm15294_vm15, %v5165_v11  ;;  %vm15315_vm15 = vmmov %vm15167_vm0 }
 0x26f   : > { %15292 = vst [vmem:[#allocation74_spill] sm:$0xff] %v12250_v0 }
 0x270   : > { %2725 = vmax.xlane.f32.xlu1 %v12250_v0  ;;  %v8559_v47 = vpop.f32.mrb[54].mxu0  ;;  %2723 = vmax.xlane.f32.xlu0 %v12254_v21 }
 0x271   : > { %v12260_v34 = vadd.f32 %v8559_v47, %v12015_v12  ;;  %v2666_v8 = vpop.f32.mrb[55].mxu0 }
 0x272   : > { %v12263_v44 = vadd.f32 %v2666_v8, %v12007_v42  ;;  %9885 = vmatpush3.bf16.xpose.msk.msra.mxu0 %vm11144_vm4, %v11228_v29 }
 0x273   : > { %15295 = vst [vmem:[#allocation75_spill] sm:$0xff] %v12260_v34  ;;  %9888 = vmatprep.subr.msk.bf16.mxu0 %vm11144_vm4, %v11250_v38 }
 0x274   : > { %2729 = vmax.xlane.f32.xlu1 %v12260_v34  ;;  %v8562_v37 = vpop.f32.mrb[56].mxu0  ;;  %2727 = vmax.xlane.f32.xlu0 %v12263_v44 }
 0x275   : > { %v12274_v47 = vadd.f32 %v8562_v37, %v12053_v49  ;;  %v2676_v11 = vpop.f32.mrb[57].mxu0 }
 0x276   : > { %v12277_v8 = vadd.f32 %v2676_v11, %v12045_v10 }
 0x277   : > { %15296 = vst [vmem:[#allocation76_spill] sm:$0xff] %v12274_v47 }
 0x278   : > { %15297 = vst [vmem:[#allocation77_spill] sm:$0xff] %v12277_v8  ;;  %2733 = vmax.xlane.f32.xlu1 %v12274_v47  ;;  %v8565_v22 = vpop.f32.mrb[58].mxu0  ;;  %2731 = vmax.xlane.f32.xlu0 %v12277_v8 }
 0x279   : > { %v12282_v29 = vadd.f32 %v8565_v22, %v12085_v9  ;;  %v2686_v0 = vpop.f32.mrb[59].mxu0 }
 0x27a   : > { %v12285_v34 = vadd.f32 %v2686_v0, %v12077_v27  ;;  %9891 = vmatpush3.bf16.xpose.msk.msra.mxu0 %vm11144_vm4, %v11250_v38 }
 0x27b   : > { %15298 = vst [vmem:[#allocation78_spill] sm:$0xff] %v12282_v29  ;;  %9894 = vmatprep.subr.msk.bf16.mxu0 %vm11144_vm4, %v11260_v54 }
 0x27c   : > { %2737 = vmax.xlane.f32.xlu1 %v12282_v29  ;;  %v8568_v37 = vpop.f32.mrb[60].mxu0  ;;  %2735 = vmax.xlane.f32.xlu0 %v12285_v34 }
 0x27d   : > { %v12296_v11 = vadd.f32 %v8568_v37, %v12123_v14  ;;  %v2696_v22 = vpop.f32.mrb[61].mxu0  ;;  %v5168_v37 = vmul.f32 %v11129_v48, %v11381_v43 }
 0x27e   : > { %v12299_v0 = vadd.f32 %v2696_v22, %v12114_v18  ;;  %v5169_v22 = vmul.f32 %v11129_v48, %v11373_v41 }
 0x280   : > { %2741 = vmax.xlane.f32.xlu1 %v12296_v11  ;;  %v8571_v47 = vpop.f32.mrb[62].mxu0  ;;  %2739 = vmax.xlane.f32.xlu0 %v12299_v0 }
 0x281   : > { %v12304_v38 = vadd.f32 %v8571_v47, %v12167_v5  ;;  %v2706_v8 = vpop.f32.mrb[63].mxu0  ;;  %v5166_v47 = vmul.f32 %v11129_v48, %v11346_v26  ;;  %v5170_v26 = vmul.f32 %v11129_v48, %v11396_v63 }
 0x282   : > { %v12307_v29 = vadd.f32 %v2706_v8, %v12158_v15  ;;  %9897 = vmatpush3.bf16.xpose.msk.msra.mxu0 %vm11144_vm4, %v11260_v54  ;;  %v5167_v8 = vmul.f32 %v11129_v48, %v11354_v62  ;;  %v5171_v62 = vmul.f32 %v11129_v48, %v11405_v3 }
 0x283   : > { %15299 = vst [vmem:[#allocation79_spill] sm:$0xff] %v12304_v38  ;;  %9900 = vmatprep.subr.msk.bf16.mxu0 %vm11144_vm4, %v11282_v50 }
 0x284   : > { %2745 = vmax.xlane.f32.xlu1 %v12304_v38  ;;  %2743 = vmax.xlane.f32.xlu0 %v12307_v29 }
 0x28a   : > { %9903 = vmatpush3.bf16.xpose.msk.msra.mxu0 %vm11144_vm4, %v11282_v50 }
 0x291   : > { %9109 = vmatmul.mubr.msk.f32.vlgmr.msra.gmra.mrb[112].mxu0 %vm15167_vm0, %v5166_v47  ;;  %v5172_v47 = vmul.f32 %v11129_v48, %v11430_v28 }
 0x292   : > { %9111 = vmatprep.mubr.msk.f32.mxu0 %vm15300_vm2, %v5167_v8  ;;  %v5173_v8 = vmul.f32 %v11129_v48, %v11440_v20  ;;  %v5177_v20 = vmul.f32 %v11129_v48, %v11492_v30  ;;  %vm15528_vm2 = vmmov %vm15167_vm0 }
 0x295   : > { %9112 = vmatmul.mubr.msk.f32.gmra.mrb[114].mxu0 %vm15301_vm3, %v5168_v37  ;;  %v5174_v37 = vmul.f32 %v11129_v48, %v11452_v40  ;;  %vm15531_vm3 = vmmov %vm15167_vm0 }
 0x296   : > { %9114 = vmatprep.mubr.msk.f32.mxu0 %vm15302_vm1, %v5169_v22  ;;  %v5175_v22 = vmul.f32 %v11129_v48, %v11465_v36  ;;  %vm15532_vm1 = vmmov %vm15167_vm0 }
 0x299   : > { %9115 = vmatmul.mubr.msk.f32.gmra.mrb[116].mxu0 %vm15303_vm5, %v5170_v26  ;;  %v5176_v26 = vmul.f32 %v11129_v48, %v11482_v58  ;;  %vm15535_vm5 = vmmov %vm15167_vm0 }
 0x29a   : > { %9117 = vmatprep.mubr.msk.f32.mxu0 %vm15304_vm6, %v5171_v62  ;;  %vm15536_vm6 = vmmov %vm15167_vm0 }
 0x29d   : > { %9118 = vmatmul.mubr.msk.f32.gmra.mrb[118].mxu0 %vm15305_vm7, %v5172_v47  ;;  %vm15539_vm7 = vmmov %vm15167_vm0 }
 0x29e   : > { %9120 = vmatprep.mubr.msk.f32.mxu0 %vm15306_vm8, %v5173_v8  ;;  %vm15540_vm8 = vmmov %vm15167_vm0 }
 0x2a1   : > { %9121 = vmatmul.mubr.msk.f32.gmra.mrb[120].mxu0 %vm15307_vm9, %v5174_v37  ;;  %v5178_v37 = vmul.f32 %v11129_v48, %v11504_v39  ;;  %vm15543_vm9 = vmmov %vm15167_vm0 }
 0x2a2   : > { %9123 = vmatprep.mubr.msk.f32.mxu0 %vm15308_vm10, %v5175_v22  ;;  %vm15544_vm10 = vmmov %vm15167_vm0 }
 0x2a4   : > { %v8662_v62 = vpop.f32.mrb[64].mxu0 }
 0x2a5   : > { %v12355_v47 = vadd.f32 %v8662_v62, %v11898_v6  ;;  %v3171_v8 = vpop.f32.mrb[65].mxu0  ;;  %9124 = vmatmul.mubr.msk.f32.gmra.mrb[122].mxu0 %vm15310_vm11, %v5176_v26  ;;  %v5179_v6 = vmul.f32 %v11129_v48, %v11529_v57  ;;  %vm15547_vm11 = vmmov %vm15167_vm0 }
 0x2a6   : > { %v12359_v40 = vadd.f32 %v3171_v8, %v11917_v24  ;;  %9126 = vmatprep.mubr.msk.f32.mxu0 %vm15312_vm12, %v5177_v20  ;;  %v5180_v20 = vmul.f32 %v11129_v48, %v11546_v52  ;;  %vm15548_vm12 = vmmov %vm15167_vm0 }
 0x2a7   : > { %15309 = vst [vmem:[#allocation80_spill] sm:$0xff] %v12355_v47  ;;  %3252 = vmax.xlane.f32.xlu1 %v12355_v47 }
 0x2a8   : > { %15311 = vst [vmem:[#allocation81_spill] sm:$0xff] %v12359_v40  ;;  %v12365_v22 = vpop.f32.mrb[66].mxu0  ;;  %3250 = vmax.xlane.f32.xlu0 %v12359_v40 }
 0x2a9   : > { %v12370_v62 = vpop.f32.mrb[67].mxu0  ;;  %9127 = vmatmul.mubr.msk.f32.gmra.mrb[124].mxu0 %vm15313_vm13, %v5178_v37  ;;  %vm15551_vm13 = vmmov %vm15167_vm0 }
 0x2aa   : > { %9129 = vmatprep.mubr.msk.f32.mxu0 %vm15314_vm14, %v5179_v6  ;;  %vm15552_vm14 = vmmov %vm15167_vm0 }
 0x2ac   : > { %v12376_v24 = vpop.f32.mrb[68].mxu0 }
 0x2ad   : > { %v12378_v26 = vpop.f32.mrb[69].mxu0  ;;  %9130 = vmatmul.mubr.msk.f32.gmra.mrb[126].mxu0 %vm15315_vm15, %v5180_v20  ;;  %vm15554_vm15 = vmmov %vm15167_vm0 }
 0x2b0   : > { %v12381_v8 = vpop.f32.mrb[70].mxu0 }
 0x2b1   : > { %v12383_v39 = vpop.f32.mrb[71].mxu0 }
 0x2b4   : > { %v2054_v57 = vpop.xlane.xlu0 %2053  ;;  %v12385_v30 = vpop.f32.mrb[72].mxu0 }
 0x2b5   : > { %v2084_v37 = vsub.f32 %v11911_v16, %v2054_v57  ;;  %v1680_v58 = vpop.xlane.xlu1 %1679  ;;  %v12388_v6 = vpop.f32.mrb[73].mxu0 }
 0x2b6   : > { %v1710_v48 = vsub.f32 %v11908_v7, %v1680_v58 }
 0x2b7   : > { %v2101_v52 = vmul.f32 1.442695, %v2084_v37 }
 0x2b8   : > { %v1727_v36 = vmul.f32 1.442695, %v1710_v48  ;;  %v12391_v28 = vpop.f32.mrb[74].mxu0  ;;  %v2052_v3 = vpop.xlane.xlu0 %2051 }
 0x2b9   : > { %10081 = vpow2.f32 %v2101_v52  ;;  %v2083_v20 = vsub.f32 %v11932_v23, %v2052_v3  ;;  %v2058_v63 = vpop.xlane.xlu1 %2057  ;;  %v12394_v41 = vpop.f32.mrb[75].mxu0  ;;  %v15316_v52 = vld [vmem:[#allocation56_spill] sm:$0xff] }
 0x2ba   : > { %v2086_v43 = vsub.f32 %v11935_v33, %v2058_v63  ;;  %10083 = vpow2.f32 %v1727_v36 }
 0x2bb   : > { %v2099_v50 = vmul.f32 1.442695, %v2083_v20 }
 0x2bc   : > { %v2105_v57 = vmul.f32 1.442695, %v2086_v43  ;;  %v12397_v16 = vpop.f32.mrb[76].mxu0  ;;  %v1678_v54 = vpop.xlane.xlu0 %1677  ;;  %v15317_v43 = vld [vmem:[#allocation57_spill] sm:$0xff] }
 0x2bd   : > { %10085 = vpow2.f32 %v2099_v50  ;;  %v1684_v58 = vpop.xlane.xlu1 %1683  ;;  %v1709_v48 = vsub.f32 %v11952_v19, %v1678_v54  ;;  %v12400_v7 = vpop.f32.mrb[77].mxu0  ;;  %v15318_v50 = vld [vmem:[#allocation58_spill] sm:$0xff] }
 0x2be   : > { %v1712_v37 = vsub.f32 %v15316_v52, %v1684_v58  ;;  %10087 = vpow2.f32 %v2105_v57 }
 0x2bf   : > { %v1725_v3 = vmul.f32 1.442695, %v1709_v48  ;;  %v15320_v48 = vld [vmem:[#allocation59_spill] sm:$0xff] }
 0x2c0   : > { %v12403_v23 = vpop.f32.mrb[78].mxu0  ;;  %v1682_v55 = vpop.xlane.xlu0 %1681  ;;  %v1731_v63 = vmul.f32 1.442695, %v1712_v37 }
 0x2c1   : > { %10089 = vpow2.f32 %v1725_v3  ;;  %v2056_v36 = vpop.xlane.xlu1 %2055  ;;  %v1711_v33 = vsub.f32 %v15317_v43, %v1682_v55  ;;  %v12406_v20 = vpop.f32.mrb[79].mxu0  ;;  %v15322_v3 = vld [vmem:[#allocation60_spill] sm:$0xff] }
 0x2c2   : > { %v2085_v40 = vsub.f32 %v15318_v50, %v2056_v36  ;;  %10091 = vpow2.f32 %v1731_v63 }
 0x2c3   : > { %v12409_v47 = vpop.eup %10081  ;;  %v1729_v57 = vmul.f32 1.442695, %v1711_v33  ;;  %v15324_v33 = vld [vmem:[#allocation61_spill] sm:$0xff] }
 0x2c4   : > { %15319 = vst [vmem:[#allocation56_spill] sm:$0xff] %v12409_v47  ;;  %v2103_v54 = vmul.f32 1.442695, %v2085_v40  ;;  %2133 = vadd.xlane.f32.xlu1 %v12409_v47  ;;  %v2060_v19 = vpop.xlane.xlu0 %2059  ;;  %v12413_v37 = vpop.eup %10083 }
 0x2c5   : > { %v2062_v58 = vpop.xlane.xlu1 %2061  ;;  %v2087_v52 = vsub.f32 %v15320_v48, %v2060_v19  ;;  %15321 = vst [vmem:[#allocation57_spill] sm:$0xff] %v12413_v37  ;;  %v15325_v19 = vld [vmem:[#allocation62_spill] sm:$0xff] }
 0x2c6   : > { %10093 = vpow2.f32 %v2103_v54  ;;  %v2088_v55 = vsub.f32 %v15322_v3, %v2062_v58 }
 0x2c7   : > { %v12416_v43 = vpop.eup %10085  ;;  %10095 = vpow2.f32 %v1729_v57  ;;  %v2107_v36 = vmul.f32 1.442695, %v2087_v52  ;;  %v15327_v52 = vld [vmem:[#allocation63_spill] sm:$0xff] }
 0x2c8   : > { %15323 = vst [vmem:[#allocation58_spill] sm:$0xff] %v12416_v43  ;;  %v2109_v38 = vmul.f32 1.442695, %v2088_v55  ;;  %1759 = vadd.xlane.f32.xlu1 %v12413_v37  ;;  %2131 = vadd.xlane.f32.xlu0 %v12416_v43  ;;  %v1686_v40 = vpop.xlane.xlu0 %1685  ;;  %v12421_v47 = vpop.eup %10087 }
 0x2c9   : > { %v1688_v63 = vpop.xlane.xlu1 %1687  ;;  %v1713_v50 = vsub.f32 %v15324_v33, %v1686_v40  ;;  %v15328_v40 = vld [vmem:[#allocation64_spill] sm:$0xff] }
 0x2ca   : > { %10097 = vpow2.f32 %v2109_v38  ;;  %v1714_v54 = vsub.f32 %v15325_v19, %v1688_v63 }
 0x2cb   : > { %v12424_v48 = vpop.eup %10089  ;;  %10099 = vpow2.f32 %v2107_v36  ;;  %v1733_v55 = vmul.f32 1.442695, %v1713_v50  ;;  %v15330_v50 = vld [vmem:[#allocation65_spill] sm:$0xff] }
 0x2cc   : > { %15326 = vst [vmem:[#allocation59_spill] sm:$0xff] %v12424_v48  ;;  %v1735_v58 = vmul.f32 1.442695, %v1714_v54  ;;  %2137 = vadd.xlane.f32.xlu1 %v12421_v47  ;;  %1757 = vadd.xlane.f32.xlu0 %v12424_v48  ;;  %v2064_v3 = vpop.xlane.xlu0 %2063  ;;  %v12430_v43 = vpop.eup %10091 }
 0x2cd   : > { %v2066_v57 = vpop.xlane.xlu1 %2065  ;;  %v2089_v37 = vsub.f32 %v15327_v52, %v2064_v3  ;;  %15329 = vst [vmem:[#allocation60_spill] sm:$0xff] %v12430_v43 }
 0x2ce   : > { %10101 = vpow2.f32 %v1735_v58  ;;  %v2090_v33 = vsub.f32 %v15328_v40, %v2066_v57 }
 0x2cf   : > { %10103 = vpow2.f32 %v1733_v55  ;;  %v2111_v54 = vmul.f32 1.442695, %v2089_v37 }
 0x2d0   : > { %v12432_v38 = vpop.eup %10093  ;;  %v2113_v63 = vmul.f32 1.442695, %v2090_v33  ;;  %1763 = vadd.xlane.f32.xlu1 %v12430_v43  ;;  %v1690_v19 = vpop.xlane.xlu0 %1689 }
 0x2d1   : > { %v1692_v48 = vpop.xlane.xlu1 %1691  ;;  %2135 = vadd.xlane.f32.xlu0 %v12432_v38  ;;  %v1715_v36 = vsub.f32 %v12035_v61, %v1690_v19  ;;  %v12438_v3 = vpop.eup %10095  ;;  %v15332_v61 = vld [vmem:[#allocation66_spill] sm:$0xff] }
 0x2d2   : > { %10105 = vpow2.f32 %v2113_v63  ;;  %v1716_v58 = vsub.f32 %v15330_v50, %v1692_v48  ;;  %15331 = vst [vmem:[#allocation61_spill] sm:$0xff] %v12438_v3 }
 0x2d3   : > { %10107 = vpow2.f32 %v2111_v54  ;;  %v1737_v33 = vmul.f32 1.442695, %v1715_v36  ;;  %v15334_v36 = vld [vmem:[#allocation67_spill] sm:$0xff] }
 0x2d4   : > { %v12440_v57 = vpop.eup %10097  ;;  %v1739_v52 = vmul.f32 1.442695, %v1716_v58  ;;  %v2068_v40 = vpop.xlane.xlu0 %2067 }
 0x2d5   : > { %v2070_v43 = vpop.xlane.xlu1 %2069  ;;  %2141 = vadd.xlane.f32.xlu1 %v12440_v57  ;;  %1761 = vadd.xlane.f32.xlu0 %v12438_v3  ;;  %v2091_v37 = vsub.f32 %v12061_v53, %v2068_v40  ;;  %v12446_v63 = vpop.eup %10099 }
 0x2d6   : > { %10109 = vpow2.f32 %v1739_v52  ;;  %v2092_v55 = vsub.f32 %v15332_v61, %v2070_v43 }
 0x2d7   : > { %10111 = vpow2.f32 %v1737_v33  ;;  %v2115_v58 = vmul.f32 1.442695, %v2091_v37 }
 0x2d8   : > { %v12448_v48 = vpop.eup %10101  ;;  %v2117_v19 = vmul.f32 1.442695, %v2092_v55  ;;  %v1694_v50 = vpop.xlane.xlu0 %1693 }
 0x2d9   : > { %15333 = vst [vmem:[#allocation62_spill] sm:$0xff] %v12448_v48  ;;  %v1696_v54 = vpop.xlane.xlu1 %1695  ;;  %1767 = vadd.xlane.f32.xlu1 %v12448_v48  ;;  %2139 = vadd.xlane.f32.xlu0 %v12446_v63  ;;  %v1717_v3 = vsub.f32 %v15334_v36, %v1694_v50  ;;  %v12454_v52 = vpop.eup %10103 }
 0x2da   : > { %10113 = vpow2.f32 %v2117_v19  ;;  %v1718_v53 = vsub.f32 %v12072_v51, %v1696_v54  ;;  %15335 = vst [vmem:[#allocation63_spill] sm:$0xff] %v12454_v52 }
 0x2db   : > { %10115 = vpow2.f32 %v2115_v58  ;;  %v1741_v55 = vmul.f32 1.442695, %v1717_v3 }
 0x2dc   : > { %v12456_v43 = vpop.eup %10105  ;;  %v1743_v40 = vmul.f32 1.442695, %v1718_v53  ;;  %v2072_v61 = vpop.xlane.xlu0 %2071 }
 0x2dd   : > { %v2074_v33 = vpop.xlane.xlu1 %2073  ;;  %2145 = vadd.xlane.f32.xlu1 %v12456_v43  ;;  %1765 = vadd.xlane.f32.xlu0 %v12454_v52  ;;  %v2093_v19 = vsub.f32 %v12093_v60, %v2072_v61  ;;  %v12462_v50 = vpop.eup %10107 }
 0x2de   : > { %10117 = vpow2.f32 %v1743_v40  ;;  %v2094_v37 = vsub.f32 %v12096_v2, %v2074_v33 }
 0x2df   : > { %10119 = vpow2.f32 %v1741_v55  ;;  %v2119_v3 = vmul.f32 1.442695, %v2093_v19 }
 0x2e0   : > { %v12464_v51 = vpop.eup %10109  ;;  %v2121_v54 = vmul.f32 1.442695, %v2094_v37  ;;  %v1698_v36 = vpop.xlane.xlu0 %1697 }
 0x2e1   : > { %15336 = vst [vmem:[#allocation64_spill] sm:$0xff] %v12464_v51  ;;  %v1700_v53 = vpop.xlane.xlu1 %1699  ;;  %1771 = vadd.xlane.f32.xlu1 %v12464_v51  ;;  %2143 = vadd.xlane.f32.xlu0 %v12462_v50  ;;  %v12468_v58 = vpop.eup %10111 }
 0x2e2   : > { %10121 = vpow2.f32 %v2121_v54  ;;  %15337 = vst [vmem:[#allocation65_spill] sm:$0xff] %v12468_v58 }
 0x2e3   : > { %10123 = vpow2.f32 %v2119_v3 }
 0x2e4   : > { %v12470_v40 = vpop.eup %10113  ;;  %v12472_v2 = vpop.f32.mrb[80].mxu0 }
 0x2e5   : > { %15338 = vst [vmem:[#allocation66_spill] sm:$0xff] %v12470_v40  ;;  %15339 = vst [vmem:[#allocation67_spill] sm:$0xff] %v12472_v2  ;;  %v2076_v60 = vpop.xlane.xlu0 %2075  ;;  %v2078_v61 = vpop.xlane.xlu1 %2077  ;;  %2149 = vadd.xlane.f32.xlu1 %v12470_v40  ;;  %1769 = vadd.xlane.f32.xlu0 %v12468_v58  ;;  %v15350_v58 = vld [vmem:[#allocation68_spill] sm:$0xff] }
 0x2e6   : > { %v2095_v55 = vsub.f32 %v12135_v31, %v2076_v60  ;;  %v12477_v33 = vpop.f32.mrb[81].mxu0  ;;  %v2096_v37 = vsub.f32 %v12139_v56, %v2078_v61  ;;  %v12480_v19 = vpop.eup %10115 }
 0x2e7   : > { %15340 = vst [vmem:[#allocation82_spill] sm:$0xff] %v12477_v33  ;;  %15341 = vst [vmem:[#allocation83_spill] sm:$0xff] %v12480_v19 }
 0x2e8   : > { %v2123_v54 = vmul.f32 1.442695, %v2095_v55  ;;  %v12482_v51 = vpop.eup %10117  ;;  %v2125_v48 = vmul.f32 1.442695, %v2096_v37  ;;  %v12484_v2 = vpop.f32.mrb[82].mxu0 }
 0x2e9   : > { %15342 = vst [vmem:[#allocation84_spill] sm:$0xff] %v12482_v51  ;;  %15343 = vst [vmem:[#allocation85_spill] sm:$0xff] %v12484_v2  ;;  %v1702_v52 = vpop.xlane.xlu0 %1701  ;;  %v1704_v40 = vpop.xlane.xlu1 %1703  ;;  %1775 = vadd.xlane.f32.xlu1 %v12482_v51  ;;  %2147 = vadd.xlane.f32.xlu0 %v12480_v19 }
 0x2ea   : > { %10125 = vpow2.f32 %v2123_v54  ;;  %v12488_v31 = vpop.f32.mrb[83].mxu0  ;;  %v12490_v3 = vpop.eup %10119 }
 0x2eb   : > { %15344 = vst [vmem:[#allocation86_spill] sm:$0xff] %v12488_v31  ;;  %10127 = vpow2.f32 %v2125_v48  ;;  %15345 = vst [vmem:[#allocation87_spill] sm:$0xff] %v12490_v3 }
 0x2ec   : > { %v12492_v56 = vpop.eup %10121  ;;  %v12494_v60 = vpop.f32.mrb[84].mxu0 }
 0x2ed   : > { %15346 = vst [vmem:[#allocation88_spill] sm:$0xff] %v12492_v56  ;;  %15347 = vst [vmem:[#allocation89_spill] sm:$0xff] %v12494_v60  ;;  %v2080_v61 = vpop.xlane.xlu0 %2079  ;;  %v2082_v55 = vpop.xlane.xlu1 %2081  ;;  %2153 = vadd.xlane.f32.xlu1 %v12492_v56  ;;  %1773 = vadd.xlane.f32.xlu0 %v12490_v3  ;;  %v1719_v60 = vsub.f32 %v15350_v58, %v1698_v36  ;;  %v15352_v3 = vld [vmem:[#allocation69_spill] sm:$0xff] }
 0x2ee   : > { %v2097_v37 = vsub.f32 %v12179_v59, %v2080_v61  ;;  %v12499_v54 = vpop.f32.mrb[85].mxu0  ;;  %v2098_v2 = vsub.f32 %v12184_v13, %v2082_v55  ;;  %v12502_v48 = vpop.eup %10123  ;;  %v1720_v19 = vsub.f32 %v15352_v3, %v1700_v53  ;;  %v1721_v53 = vsub.f32 %v12149_v35, %v1702_v52 }
 0x2ef   : > { %15348 = vst [vmem:[#allocation90_spill] sm:$0xff] %v12499_v54  ;;  %v1745_v55 = vmul.f32 1.442695, %v1719_v60  ;;  %v12539_v35 = vadd.f32 %v12370_v62, %v11961_v46 }
 0x2f0   : > { %v2127_v31 = vmul.f32 1.442695, %v2097_v37  ;;  %v2129_v33 = vmul.f32 1.442695, %v2098_v2  ;;  %v12504_v51 = vpop.f32.mrb[86].mxu0 }
 0x2f1   : > { %15349 = vst [vmem:[#allocation91_spill] sm:$0xff] %v12504_v51  ;;  %2151 = vadd.xlane.f32.xlu0 %v12502_v48  ;;  %v12508_v56 = vpop.f32.mrb[87].mxu0  ;;  %v1747_v58 = vmul.f32 1.442695, %v1720_v19 }
 0x2f2   : > { %10129 = vpow2.f32 %v2127_v31  ;;  %15351 = vst [vmem:[#allocation68_spill] sm:$0xff] %v12508_v56  ;;  %v15357_v31 = vld [vmem:[#allocation70_spill] sm:$0xff] }
 0x2f3   : > { %10131 = vpow2.f32 %v2129_v33  ;;  %v1722_v3 = vsub.f32 %v15357_v31, %v1704_v40  ;;  %v12543_v40 = vadd.f32 %v12365_v22, %v11923_v25  ;;  %v12560_v22 = vadd.f32 %v12378_v26, %v11975_v45  ;;  %v15417_v56 = vld [vmem:[#allocation26_spill] sm:$0xff] }
 0x2f4   : > { %v12511_v59 = vpop.eup %10125  ;;  %v12515_v13 = vpop.f32.mrb[88].mxu0  ;;  %10133 = vpow2.f32 %v1745_v55 }
 0x2f5   : > { %v12513_v61 = vpop.eup %10127  ;;  %15353 = vst [vmem:[#allocation69_spill] sm:$0xff] %v12515_v13  ;;  %2155 = vadd.xlane.f32.xlu0 %v12511_v59  ;;  %v12519_v36 = vpop.f32.mrb[89].mxu0  ;;  %10135 = vpow2.f32 %v1747_v58  ;;  %v1751_v52 = vmul.f32 1.442695, %v1722_v3 }
 0x2f6   : > { %2157 = vadd.xlane.f32.xlu1 %v12513_v61  ;;  %15354 = vst [vmem:[#allocation92_spill] sm:$0xff] %v12519_v36  ;;  %v1749_v36 = vmul.f32 1.442695, %v1721_v53  ;;  %v1706_v55 = vpop.xlane.xlu0 %1705  ;;  %v1708_v58 = vpop.xlane.xlu1 %1707 }
 0x2f8   : > { %v12521_v2 = vpop.f32.mrb[90].mxu0  ;;  %10137 = vpow2.f32 %v1749_v36 }
 0x2f9   : > { %15355 = vst [vmem:[#allocation93_spill] sm:$0xff] %v12521_v2  ;;  %v12524_v33 = vpop.f32.mrb[91].mxu0  ;;  %10139 = vpow2.f32 %v1751_v52  ;;  %v12564_v52 = vadd.f32 %v12376_v24, %v11983_v4  ;;  %v12578_v4 = vadd.f32 %v12383_v39, %v12007_v42 }
 0x2fa   : > { %15356 = vst [vmem:[#allocation94_spill] sm:$0xff] %v12524_v33  ;;  %v2718_v25 = vpop.xlane.xlu1 %2717 }
 0x2fb   : > { %v2748_v24 = vsub.f32 %v12216_v17, %v2718_v25  ;;  %v12598_v17 = vadd.f32 %v12394_v41, %v12077_v27  ;;  %v15365_v25 = vld [vmem:[#allocation73_spill] sm:$0xff]  ;;  %v12611_v41 = vadd.f32 %v12391_v28, %v12085_v9 }
 0x2fc   : > { %v12527_v37 = vpop.eup %10129  ;;  %v12531_v13 = vpop.f32.mrb[92].mxu0 }
 0x2fd   : > { %v12529_v60 = vpop.eup %10131  ;;  %15358 = vst [vmem:[#allocation70_spill] sm:$0xff] %v12531_v13  ;;  %2159 = vadd.xlane.f32.xlu0 %v12527_v37  ;;  %v12535_v19 = vpop.f32.mrb[93].mxu0  ;;  %v15362_v13 = vld [vmem:[#allocation72_spill] sm:$0xff]  ;;  %v2765_v39 = vmul.f32 1.442695, %v2748_v24 }
 0x2fe   : > { %2161 = vadd.xlane.f32.xlu1 %v12529_v60  ;;  %15359 = vst [vmem:[#allocation95_spill] sm:$0xff] %v12535_v19  ;;  %v1724_v46 = vsub.f32 %v15362_v13, %v1708_v58  ;;  %v12552_v62 = vpop.eup %10133  ;;  %v2716_v19 = vpop.xlane.xlu0 %2715  ;;  %v15363_v13 = vld [vmem:[#allocation71_spill] sm:$0xff] }
 0x2ff   : > { %v12554_v3 = vpop.eup %10135  ;;  %v1723_v58 = vsub.f32 %v15363_v13, %v1706_v55  ;;  %v2722_v2 = vpop.xlane.xlu1 %2721  ;;  %v2747_v26 = vsub.f32 %v12220_v32, %v2716_v19  ;;  %v12583_v55 = vadd.f32 %v12381_v8, %v12015_v12  ;;  %v12589_v32 = vadd.f32 %v12388_v6, %v12045_v10 }
 0x300   : > { %v12545_v31 = vpop.f32.mrb[94].mxu0  ;;  %v1755_v36 = vmul.f32 1.442695, %v1724_v46  ;;  %v2750_v12 = vsub.f32 %v12230_v1, %v2722_v2  ;;  %v12602_v10 = vadd.f32 %v12385_v30, %v12053_v49 }
 0x301   : > { %15360 = vst [vmem:[#allocation96_spill] sm:$0xff] %v12545_v31  ;;  %3254 = vmax.xlane.f32.xlu0 %v12539_v35  ;;  %v12549_v53 = vpop.f32.mrb[95].mxu0  ;;  %v1753_v45 = vmul.f32 1.442695, %v1723_v58 }
 0x302   : > { %3256 = vmax.xlane.f32.xlu1 %v12543_v40  ;;  %15361 = vst [vmem:[#allocation97_spill] sm:$0xff] %v12549_v53  ;;  %10141 = vpow2.f32 %v1755_v36  ;;  %v2720_v31 = vpop.xlane.xlu0 %2719  ;;  %v12569_v53 = vpop.eup %10137  ;;  %v2763_v36 = vmul.f32 1.442695, %v2747_v26  ;;  %v2769_v19 = vmul.f32 1.442695, %v2750_v12  ;;  %v12631_v12 = vadd.f32 %v12397_v16, %v12123_v14 }
 0x303   : > { %v12571_v33 = vpop.eup %10139  ;;  %10143 = vpow2.f32 %v1753_v45  ;;  %v2726_v13 = vpop.xlane.xlu1 %2725  ;;  %v2749_v58 = vsub.f32 %v15365_v25, %v2720_v31  ;;  %v15366_v45 = vld [vmem:[#allocation74_spill] sm:$0xff]  ;;  %v12645_v14 = vadd.f32 %v12406_v20, %v12158_v15  ;;  %v12659_v20 = vadd.f32 %v12403_v23, %v12167_v5 }
 0x304   : > { %10145 = vpow2.f32 %v2763_v36  ;;  %v2752_v31 = vsub.f32 %v15366_v45, %v2726_v13  ;;  %v15369_v36 = vld [vmem:[#allocation75_spill] sm:$0xff] }
 0x305   : > { %1777 = vadd.xlane.f32.xlu0 %v12552_v62  ;;  %10147 = vpow2.f32 %v2765_v39  ;;  %v2767_v30 = vmul.f32 1.442695, %v2749_v58  ;;  %15379 = vst [vmem:[#allocation99_spill] sm:$0xff] %v12659_v20 }
 0x306   : > { %1779 = vadd.xlane.f32.xlu1 %v12554_v3  ;;  %v2724_v46 = vpop.xlane.xlu0 %2723  ;;  %10149 = vpow2.f32 %v2769_v19 }
 0x307   : > { %v2730_v6 = vpop.xlane.xlu1 %2729  ;;  %v2751_v49 = vsub.f32 %v12254_v21, %v2724_v46  ;;  %10151 = vpow2.f32 %v2767_v30  ;;  %v12626_v21 = vadd.f32 %v12400_v7, %v12114_v18  ;;  %v2773_v46 = vmul.f32 1.442695, %v2752_v31 }
 0x308   : > { %v2754_v39 = vsub.f32 %v15369_v36, %v2730_v6  ;;  %v15373_v6 = vld [vmem:[#allocation76_spill] sm:$0xff] }
 0x309   : > { %3258 = vmax.xlane.f32.xlu0 %v12560_v22  ;;  %v2771_v28 = vmul.f32 1.442695, %v2751_v49 }
 0x30a   : > { %3260 = vmax.xlane.f32.xlu1 %v12564_v52  ;;  %v2728_v8 = vpop.xlane.xlu0 %2727  ;;  %v2777_v7 = vmul.f32 1.442695, %v2754_v39 }
 0x30b   : > { %v2734_v2 = vpop.xlane.xlu1 %2733  ;;  %v2753_v9 = vsub.f32 %v12263_v44, %v2728_v8  ;;  %10153 = vpow2.f32 %v2771_v28  ;;  %v15371_v8 = vld [vmem:[#allocation77_spill] sm:$0xff] }
 0x30c   : > { %v12591_v42 = vpop.eup %10141  ;;  %10155 = vpow2.f32 %v2773_v46  ;;  %v2756_v30 = vsub.f32 %v15373_v6, %v2734_v2  ;;  %v15377_v46 = vld [vmem:[#allocation78_spill] sm:$0xff] }
 0x30d   : > { %1781 = vadd.xlane.f32.xlu0 %v12569_v53  ;;  %15364 = vst [vmem:[#allocation72_spill] sm:$0xff] %v12591_v42  ;;  %v12607_v1 = vpop.eup %10143  ;;  %v2775_v44 = vmul.f32 1.442695, %v2753_v9 }
 0x30e   : > { %1783 = vadd.xlane.f32.xlu1 %v12571_v33  ;;  %v2732_v27 = vpop.xlane.xlu0 %2731  ;;  %v12617_v26 = vpop.eup %10145  ;;  %v2781_v2 = vmul.f32 1.442695, %v2756_v30 }
 0x30f   : > { %15367 = vst [vmem:[#allocation71_spill] sm:$0xff] %v12617_v26  ;;  %v12619_v24 = vpop.eup %10147  ;;  %v2738_v19 = vpop.xlane.xlu1 %2737  ;;  %v2755_v58 = vsub.f32 %v15371_v8, %v2732_v27  ;;  %10157 = vpow2.f32 %v2775_v44 }
 0x310   : > { %15368 = vst [vmem:[#allocation73_spill] sm:$0xff] %v12619_v24  ;;  %v12641_v49 = vpop.eup %10149  ;;  %10159 = vpow2.f32 %v2777_v7  ;;  %v2758_v36 = vsub.f32 %v15377_v46, %v2738_v19 }
 0x311   : > { %3262 = vmax.xlane.f32.xlu0 %v12578_v4  ;;  %15374 = vst [vmem:[#allocation77_spill] sm:$0xff] %v12641_v49  ;;  %v2779_v27 = vmul.f32 1.442695, %v2755_v58  ;;  %v12655_v15 = vpop.eup %10151 }
 0x312   : > { %3264 = vmax.xlane.f32.xlu1 %v12583_v55  ;;  %v2736_v13 = vpop.xlane.xlu0 %2735  ;;  %15378 = vst [vmem:[#allocation78_spill] sm:$0xff] %v12655_v15  ;;  %v2785_v19 = vmul.f32 1.442695, %v2758_v36 }
 0x313   : > { %v2757_v31 = vsub.f32 %v12285_v34, %v2736_v13  ;;  %v2742_v28 = vpop.xlane.xlu1 %2741  ;;  %10161 = vpow2.f32 %v2779_v27  ;;  %v15386_v27 = vld [vmem:[#allocation79_spill] sm:$0xff] }
 0x314   : > { %10163 = vpow2.f32 %v2781_v2  ;;  %v2760_v8 = vsub.f32 %v12296_v11, %v2742_v28 }
 0x315   : > { %3266 = vmax.xlane.f32.xlu0 %v12589_v32  ;;  %v2783_v34 = vmul.f32 1.442695, %v2757_v31  ;;  %v12669_v7 = vpop.eup %10153 }
 0x316   : > { %1787 = vadd.xlane.f32.xlu1 %v12591_v42  ;;  %v2740_v16 = vpop.xlane.xlu0 %2739  ;;  %15382 = vst [vmem:[#allocation102_spill] sm:$0xff] %v12669_v7  ;;  %v12671_v23 = vpop.eup %10155  ;;  %v2789_v11 = vmul.f32 1.442695, %v2760_v8  ;;  %v15391_v8 = vld [vmem:[#allocation80_spill] sm:$0xff] }
 0x317   : > { %v2759_v13 = vsub.f32 %v12299_v0, %v2740_v16  ;;  %v2746_v5 = vpop.xlane.xlu1 %2745  ;;  %15383 = vst [vmem:[#allocation103_spill] sm:$0xff] %v12671_v23  ;;  %10165 = vpow2.f32 %v2783_v34 }
 0x318   : > { %10167 = vpow2.f32 %v2785_v19  ;;  %v2762_v31 = vsub.f32 %v15386_v27, %v2746_v5  ;;  %v15392_v5 = vld [vmem:[#allocation81_spill] sm:$0xff] }
 0x319   : > { %3270 = vmax.xlane.f32.xlu0 %v12598_v17  ;;  %v2787_v0 = vmul.f32 1.442695, %v2759_v13  ;;  %v12681_v28 = vpop.eup %10157 }
 0x31a   : > { %3268 = vmax.xlane.f32.xlu1 %v12602_v10  ;;  %v2744_v58 = vpop.xlane.xlu0 %2743  ;;  %15387 = vst [vmem:[#allocation79_spill] sm:$0xff] %v12681_v28  ;;  %v12683_v2 = vpop.eup %10159  ;;  %v2793_v19 = vmul.f32 1.442695, %v2762_v31 }
 0x31b   : > { %v2761_v30 = vsub.f32 %v12307_v29, %v2744_v58  ;;  %15388 = vst [vmem:[#allocation106_spill] sm:$0xff] %v12683_v2  ;;  %10169 = vpow2.f32 %v2787_v0 }
 0x31c   : > { %10171 = vpow2.f32 %v2789_v11 }
 0x31d   : > { %1785 = vadd.xlane.f32.xlu0 %v12607_v1  ;;  %v2791_v34 = vmul.f32 1.442695, %v2761_v30 }
 0x31e   : > { %3272 = vmax.xlane.f32.xlu1 %v12611_v41 }
 0x31f   : > { %10173 = vpow2.f32 %v2791_v34 }
 0x320   : > { %10175 = vpow2.f32 %v2793_v19 }
 0x321   : > { %2795 = vadd.xlane.f32.xlu0 %v12617_v26 }
 0x322   : > { %2797 = vadd.xlane.f32.xlu1 %v12619_v24 }
 0x324   : > { %v12633_v25 = vpop.f32.mrb[96].mxu0 }
 0x325   : > { %15370 = vst [vmem:[#allocation74_spill] sm:$0xff] %v12633_v25  ;;  %3274 = vmax.xlane.f32.xlu0 %v12626_v21  ;;  %v12638_v18 = vpop.f32.mrb[97].mxu0  ;;  %v15410_v25 = vld [vmem:[#allocation12_spill] sm:$0xff] }
 0x326   : > { %3276 = vmax.xlane.f32.xlu1 %v12631_v12  ;;  %15372 = vst [vmem:[#allocation75_spill] sm:$0xff] %v12638_v18 }
 0x328   : > { %v12647_v45 = vpop.f32.mrb[98].mxu0 }
 0x329   : > { %15375 = vst [vmem:[#allocation76_spill] sm:$0xff] %v12647_v45  ;;  %2801 = vadd.xlane.f32.xlu0 %v12641_v49  ;;  %v12652_v9 = vpop.f32.mrb[99].mxu0 }
 0x32a   : > { %3278 = vmax.xlane.f32.xlu1 %v12645_v14  ;;  %15376 = vst [vmem:[#allocation98_spill] sm:$0xff] %v12652_v9  ;;  %v15409_v9 = vld [vmem:[#allocation23_spill] sm:$0xff] }
 0x32b   : > { %v1422_v18 = vmul.f32 %v15410_v25, %v15409_v9 }
 0x32c   : > { %v12661_v39 = vpop.f32.mrb[100].mxu0 }
 0x32d   : > { %15380 = vst [vmem:[#allocation100_spill] sm:$0xff] %v12661_v39  ;;  %2799 = vadd.xlane.f32.xlu0 %v12655_v15  ;;  %v12666_v44 = vpop.f32.mrb[101].mxu0  ;;  %v15433_v15 = vld [vmem:[#allocation44_spill] sm:$0xff] }
 0x32e   : > { %3280 = vmax.xlane.f32.xlu1 %v12659_v20  ;;  %15381 = vst [vmem:[#allocation101_spill] sm:$0xff] %v12666_v44  ;;  %v1432_v24 = vmul.f32 %v15410_v25, %v15433_v15  ;;  %v15434_v20 = vld [vmem:[#allocation43_spill] sm:$0xff] }
 0x32f   : > { %v1433_v26 = vmul.f32 %v15410_v25, %v15434_v20 }
 0x330   : > { %v12673_v6 = vpop.f32.mrb[102].mxu0 }
 0x331   : > { %15384 = vst [vmem:[#allocation104_spill] sm:$0xff] %v12673_v6  ;;  %2803 = vadd.xlane.f32.xlu0 %v12669_v7  ;;  %v12678_v16 = vpop.f32.mrb[103].mxu0 }
 0x332   : > { %2805 = vadd.xlane.f32.xlu1 %v12671_v23  ;;  %15385 = vst [vmem:[#allocation105_spill] sm:$0xff] %v12678_v16  ;;  %v12693_v16 = vpop.eup %10161  ;;  %v15426_v23 = vld [vmem:[#allocation36_spill] sm:$0xff] }
 0x333   : > { %15393 = vst [vmem:[#allocation80_spill] sm:$0xff] %v12693_v16  ;;  %v12695_v6 = vpop.eup %10163 }
 0x334   : > { %v12685_v46 = vpop.f32.mrb[104].mxu0  ;;  %v3253_v36 = vpop.xlane.xlu1 %3252  ;;  %15394 = vst [vmem:[#allocation81_spill] sm:$0xff] %v12695_v6 }
 0x335   : > { %15389 = vst [vmem:[#allocation107_spill] sm:$0xff] %v12685_v46  ;;  %2807 = vadd.xlane.f32.xlu0 %v12681_v28  ;;  %v12689_v29 = vpop.f32.mrb[105].mxu0  ;;  %v3251_v13 = vpop.xlane.xlu0 %3250  ;;  %v3283_v58 = vsub.f32 %v15391_v8, %v3253_v36 }
 0x336   : > { %2809 = vadd.xlane.f32.xlu1 %v12683_v2  ;;  %15390 = vst [vmem:[#allocation108_spill] sm:$0xff] %v12689_v29  ;;  %v3282_v27 = vsub.f32 %v15392_v5, %v3251_v13  ;;  %v12703_v31 = vpop.eup %10165 }
 0x337   : > { %v3300_v11 = vmul.f32 1.442695, %v3283_v58  ;;  %15397 = vst [vmem:[#allocation111_spill] sm:$0xff] %v12703_v31  ;;  %v12705_v36 = vpop.eup %10167 }
 0x338   : > { %v12697_v46 = vpop.f32.mrb[106].mxu0  ;;  %v3298_v0 = vmul.f32 1.442695, %v3282_v27  ;;  %15398 = vst [vmem:[#allocation112_spill] sm:$0xff] %v12705_v36  ;;  %v12713_v34 = vpop.eup %10169 }
 0x339   : > { %15395 = vst [vmem:[#allocation109_spill] sm:$0xff] %v12697_v46  ;;  %2811 = vadd.xlane.f32.xlu0 %v12693_v16  ;;  %v12701_v30 = vpop.f32.mrb[107].mxu0  ;;  %15401 = vst [vmem:[#allocation115_spill] sm:$0xff] %v12713_v34  ;;  %v12715_v5 = vpop.eup %10171  ;;  %v15418_v16 = vld [vmem:[#allocation49_spill] sm:$0xff] }
 0x33a   : > { %2813 = vadd.xlane.f32.xlu1 %v12695_v6  ;;  %15396 = vst [vmem:[#allocation110_spill] sm:$0xff] %v12701_v30  ;;  %10177 = vpow2.f32 %v3298_v0  ;;  %15402 = vst [vmem:[#allocation116_spill] sm:$0xff] %v12715_v5  ;;  %v12723_v27 = vpop.eup %10173  ;;  %v1425_v6 = vmul.f32 %v15410_v25, %v15417_v56 }
 0x33b   : > { %10179 = vpow2.f32 %v3300_v11  ;;  %15405 = vst [vmem:[#allocation119_spill] sm:$0xff] %v12723_v27  ;;  %v12725_v0 = vpop.eup %10175 }
 0x33c   : > { %v12707_v13 = vpop.f32.mrb[108].mxu0  ;;  %15406 = vst [vmem:[#allocation120_spill] sm:$0xff] %v12725_v0 }
 0x33d   : > { %15399 = vst [vmem:[#allocation113_spill] sm:$0xff] %v12707_v13  ;;  %2815 = vadd.xlane.f32.xlu0 %v12703_v31  ;;  %v12711_v8 = vpop.f32.mrb[109].mxu0 }
 0x33e   : > { %2817 = vadd.xlane.f32.xlu1 %v12705_v36  ;;  %15400 = vst [vmem:[#allocation114_spill] sm:$0xff] %v12711_v8  ;;  %v15416_v36 = vld [vmem:[#allocation27_spill] sm:$0xff] }
 0x33f   : > { %v1424_v31 = vmul.f32 %v15410_v25, %v15416_v36 }
 0x340   : > { %v12717_v19 = vpop.f32.mrb[110].mxu0 }
 0x341   : > { %15403 = vst [vmem:[#allocation117_spill] sm:$0xff] %v12717_v19  ;;  %2819 = vadd.xlane.f32.xlu0 %v12713_v34  ;;  %v12721_v58 = vpop.f32.mrb[111].mxu0 }
 0x342   : > { %2821 = vadd.xlane.f32.xlu1 %v12715_v5  ;;  %15404 = vst [vmem:[#allocation118_spill] sm:$0xff] %v12721_v58  ;;  %v15413_v5 = vld [vmem:[#allocation56_spill] sm:$0xff] }
 0x344   : > { %v12729_v11 = vpop.eup %10177 }
 0x345   : > { %2823 = vadd.xlane.f32.xlu0 %v12723_v27  ;;  %15407 = vst [vmem:[#allocation121_spill] sm:$0xff] %v12729_v11  ;;  %v12731_v8 = vpop.eup %10179 }
 0x346   : > { %2825 = vadd.xlane.f32.xlu1 %v12725_v0  ;;  %15408 = vst [vmem:[#allocation122_spill] sm:$0xff] %v12731_v8 }
 0x349   : > { %3330 = vadd.xlane.f32.xlu0 %v12729_v11 }
 0x34a   : > { %3332 = vadd.xlane.f32.xlu1 %v12731_v8  ;;  %v15411_v8 = vld [vmem:[#allocation22_spill] sm:$0xff] }
 0x34b   : > { %v1423_v11 = vmul.f32 %v15410_v25, %v15411_v8 }
 0x351   : > { %v2134_v19 = vpop.xlane.xlu1 %2133 }
 0x352   : > { %10181 = vrcp.f32 %v2134_v19  ;;  %v15412_v19 = vld [vmem:[#allocation58_spill] sm:$0xff] }
 0x355   : > { %v12735_v13 = vpop.xlane.xlu1 %1759  ;;  %v2132_v58 = vpop.xlane.xlu0 %2131 }
 0x356   : > { %10183 = vrcp.f32 %v2132_v58 }
 0x359   : > { %v2138_v30 = vpop.xlane.xlu1 %2137  ;;  %v12737_v46 = vpop.xlane.xlu0 %1757 }
 0x35a   : > { %10185 = vrcp.f32 %v2138_v30  ;;  %v9428_v30 = vpack.c.bf16 %v1423_v11, %v1422_v18  ;;  %v9432_v18 = vpack.c.bf16 %v1425_v6, %v1424_v31  ;;  %v15421_v11 = vld [vmem:[#allocation31_spill] sm:$0xff] }
 0x35c   : > { %v10182_v39 = vpop.eup %10181 }
 0x35d   : > { %v12739_v29 = vpop.xlane.xlu1 %1763  ;;  %v2166_v34 = vmul.f32 %v10182_v39, %v15413_v5 }
 0x35e   : > { %v2136_v44 = vpop.xlane.xlu0 %2135 }
 0x35f   : > { %10187 = vrcp.f32 %v2136_v44 }
 0x360   : > { %v10184_v45 = vpop.eup %10183 }
 0x361   : > { %v2164_v58 = vmul.f32 %v10184_v45, %v15412_v19 }
 0x362   : > { %v2142_v0 = vpop.xlane.xlu1 %2141  ;;  %v12745_v27 = vpop.xlane.xlu0 %1761 }
 0x363   : > { %8436 = vmatprep.mubr.f32.mxu1 %v2164_v58  ;;  %10189 = vrcp.f32 %v2142_v0  ;;  %v1426_v58 = vmul.f32 %v15410_v25, %v15421_v11 }
 0x364   : > { %v12749_v51 = vpop.f32.mrb[112].mxu0  ;;  %8437 = vmatmul.mubr.f32.vlgmr.msra.gmra.mrb[32].mxu1 %v2166_v34  ;;  %v10186_v39 = vpop.eup %10185 }
 0x365   : > { %15414 = vst [vmem:[#allocation12_spill] sm:$0xff] %v12749_v51  ;;  %v12751_v44 = vpop.f32.mrb[113].mxu0  ;;  %9427 = vmatpush3.bf16.msra.mxu1 %v15418_v16 }
 0x366   : > { %15415 = vst [vmem:[#allocation58_spill] sm:$0xff] %v12751_v44  ;;  %v12758_v54 = vpop.xlane.xlu1 %1767  ;;  %v2140_v45 = vpop.xlane.xlu0 %2139  ;;  %9429 = vmatprep.subr.bf16.mxu1 %v9428_v30  ;;  %v15422_v44 = vld [vmem:[#allocation30_spill] sm:$0xff] }
 0x367   : > { %10191 = vrcp.f32 %v2140_v45  ;;  %v1427_v51 = vmul.f32 %v15410_v25, %v15422_v44  ;;  %v2170_v45 = vmul.f32 %v10186_v39, %v12421_v47 }
 0x368   : > { %v12760_v5 = vpop.f32.mrb[114].mxu0 }
 0x369   : > { %15419 = vst [vmem:[#allocation56_spill] sm:$0xff] %v12760_v5  ;;  %v10188_v34 = vpop.eup %10187  ;;  %v12762_v19 = vpop.f32.mrb[115].mxu0  ;;  %9431 = vmatpush3.bf16.msra.mxu1 %v9428_v30  ;;  %v9436_v31 = vpack.c.bf16 %v1427_v51, %v1426_v58  ;;  %v1429_v30 = vmul.f32 %v15410_v25, %v15426_v23 }
 0x36a   : > { %15420 = vst [vmem:[#allocation49_spill] sm:$0xff] %v12762_v19  ;;  %v2146_v16 = vpop.xlane.xlu1 %2145  ;;  %v12768_v2 = vpop.xlane.xlu0 %1765  ;;  %v2168_v0 = vmul.f32 %v10188_v34, %v12432_v38  ;;  %9433 = vmatprep.subr.bf16.mxu1 %v9432_v18  ;;  %v15425_v19 = vld [vmem:[#allocation37_spill] sm:$0xff] }
 0x36b   : > { %v1428_v28 = vmul.f32 %v15410_v25, %v15425_v19  ;;  %10193 = vrcp.f32 %v2146_v16 }
 0x36c   : > { %8439 = vmatprep.mubr.f32.mxu1 %v2168_v0  ;;  %v12772_v5 = vpop.f32.mrb[116].mxu0 }
 0x36d   : > { %15423 = vst [vmem:[#allocation123_spill] sm:$0xff] %v12772_v5  ;;  %8440 = vmatmul.mubr.f32.gmra.mrb[34].mxu1 %v2170_v45  ;;  %v12774_v6 = vpop.f32.mrb[117].mxu0  ;;  %v10190_v39 = vpop.eup %10189  ;;  %v9440_v0 = vpack.c.bf16 %v1429_v30, %v1428_v28  ;;  %v15430_v5 = vld [vmem:[#allocation41_spill] sm:$0xff] }
 0x36e   : > { %15424 = vst [vmem:[#allocation124_spill] sm:$0xff] %v12774_v6  ;;  %9435 = vmatpush3.bf16.msra.mxu1 %v9432_v18  ;;  %v12780_v7 = vpop.xlane.xlu1 %1771  ;;  %v2144_v38 = vpop.xlane.xlu0 %2143  ;;  %v15429_v6 = vld [vmem:[#allocation42_spill] sm:$0xff]  ;;  %v1431_v49 = vmul.f32 %v15410_v25, %v15430_v5 }
 0x36f   : > { %9437 = vmatprep.subr.bf16.mxu1 %v9436_v31  ;;  %10195 = vrcp.f32 %v2144_v38  ;;  %v1430_v18 = vmul.f32 %v15410_v25, %v15429_v6  ;;  %v2174_v38 = vmul.f32 %v10190_v39, %v12440_v57 }
 0x370   : > { %v12782_v47 = vpop.f32.mrb[118].mxu0 }
 0x371   : > { %15427 = vst [vmem:[#allocation125_spill] sm:$0xff] %v12782_v47  ;;  %v12784_v34 = vpop.f32.mrb[119].mxu0  ;;  %v10192_v51 = vpop.eup %10191  ;;  %v9444_v30 = vpack.c.bf16 %v1431_v49, %v1430_v18  ;;  %v15437_v49 = vld [vmem:[#allocation48_spill] sm:$0xff] }
 0x372   : > { %15428 = vst [vmem:[#allocation126_spill] sm:$0xff] %v12784_v34  ;;  %9439 = vmatpush3.bf16.msra.mxu1 %v9436_v31  ;;  %v2150_v58 = vpop.xlane.xlu1 %2149  ;;  %v12786_v45 = vpop.xlane.xlu0 %1769  ;;  %v2172_v16 = vmul.f32 %v10192_v51, %v12446_v63  ;;  %v1434_v18 = vmul.f32 %v15410_v25, %v15437_v49 }
 0x373   : > { %9441 = vmatprep.subr.bf16.mxu1 %v9440_v0  ;;  %10197 = vrcp.f32 %v2150_v58 }
 0x374   : > { %v12794_v47 = vpop.f32.mrb[120].mxu0  ;;  %8442 = vmatprep.mubr.f32.mxu1 %v2172_v16  ;;  %v9448_v16 = vpack.c.bf16 %v1433_v26, %v1432_v24 }
 0x375   : > { %15431 = vst [vmem:[#allocation127_spill] sm:$0xff] %v12794_v47  ;;  %v12796_v28 = vpop.f32.mrb[121].mxu0  ;;  %8443 = vmatmul.mubr.f32.gmra.mrb[36].mxu1 %v2174_v38  ;;  %v10194_v63 = vpop.eup %10193 }
 0x376   : > { %15432 = vst [vmem:[#allocation128_spill] sm:$0xff] %v12796_v28  ;;  %v12798_v31 = vpop.xlane.xlu1 %1775  ;;  %v2148_v34 = vpop.xlane.xlu0 %2147  ;;  %9443 = vmatpush3.bf16.msra.mxu1 %v9440_v0  ;;  %v15438_v28 = vld [vmem:[#allocation47_spill] sm:$0xff] }
 0x377   : > { %9445 = vmatprep.subr.bf16.mxu1 %v9444_v30  ;;  %10199 = vrcp.f32 %v2148_v34  ;;  %v1435_v47 = vmul.f32 %v15410_v25, %v15438_v28  ;;  %v2178_v34 = vmul.f32 %v10194_v63, %v12456_v43  ;;  %v15442_v63 = vld [vmem:[#allocation83_spill] sm:$0xff] }
 0x378   : > { %v12804_v57 = vpop.f32.mrb[122].mxu0 }
 0x379   : > { %15435 = vst [vmem:[#allocation129_spill] sm:$0xff] %v12804_v57  ;;  %v12806_v39 = vpop.f32.mrb[123].mxu0  ;;  %v10196_v51 = vpop.eup %10195  ;;  %v9452_v26 = vpack.c.bf16 %v1435_v47, %v1434_v18  ;;  %v15444_v47 = vld [vmem:[#allocation66_spill] sm:$0xff] }
 0x37a   : > { %15436 = vst [vmem:[#allocation130_spill] sm:$0xff] %v12806_v39  ;;  %v12808_v38 = vpop.xlane.xlu0 %1773  ;;  %9447 = vmatpush3.bf16.msra.mxu1 %v9444_v30  ;;  %v2154_v58 = vpop.xlane.xlu1 %2153  ;;  %v2176_v0 = vmul.f32 %v10196_v51, %v12462_v50 }
 0x37b   : > { %9449 = vmatprep.subr.bf16.mxu1 %v9448_v16  ;;  %10201 = vrcp.f32 %v2154_v58 }
 0x37c   : > { %v12816_v57 = vpop.f32.mrb[124].mxu0  ;;  %8445 = vmatprep.mubr.f32.mxu1 %v2176_v0 }
 0x37d   : > { %v12818_v39 = vpop.f32.mrb[125].mxu0  ;;  %8446 = vmatmul.mubr.f32.gmra.mrb[38].mxu1 %v2178_v34  ;;  %v10198_v30 = vpop.eup %10197 }
 0x37e   : > { %15439 = vst [vmem:[#allocation131_spill] sm:$0xff] %v12818_v39  ;;  %v2152_v24 = vpop.xlane.xlu0 %2151  ;;  %9451 = vmatpush3.bf16.msra.mxu1 %v9448_v16  ;;  %v15443_v39 = vld [vmem:[#allocation50_spill] sm:$0xff]  ;;  %v2182_v18 = vmul.f32 %v10198_v30, %v15444_v47 }
 0x37f   : > { %10203 = vrcp.f32 %v2152_v24  ;;  %9453 = vmatprep.subr.bf16.mxu1 %v9452_v26 }
 0x380   : > { %v12820_v25 = vpop.f32.mrb[126].mxu0 }
 0x381   : > { %15440 = vst [vmem:[#allocation132_spill] sm:$0xff] %v12820_v25  ;;  %v12822_v42 = vpop.f32.mrb[127].mxu0  ;;  %v10200_v50 = vpop.eup %10199 }
 0x382   : > { %15441 = vst [vmem:[#allocation133_spill] sm:$0xff] %v12822_v42  ;;  %v2156_v43 = vpop.xlane.xlu0 %2155  ;;  %9455 = vmatpush3.bf16.msra.mxu1 %v9452_v26  ;;  %v2180_v0 = vmul.f32 %v10200_v50, %v15442_v63  ;;  %v15445_v26 = vld [vmem:[#allocation88_spill] sm:$0xff] }
 0x383   : > { %v2158_v51 = vpop.xlane.xlu1 %2157  ;;  %9505 = vmatprep.subr.bf16.mxu1 %v15443_v39 }
 0x384   : > { %10205 = vrcp.f32 %v2158_v51  ;;  %8448 = vmatprep.mubr.f32.mxu1 %v2180_v0 }
 0x385   : > { %10207 = vrcp.f32 %v2156_v43  ;;  %8449 = vmatmul.mubr.f32.gmra.mrb[40].mxu1 %v2182_v18  ;;  %v10202_v16 = vpop.eup %10201 }
 0x386   : > { %10209 = vrcp.f32 %v12737_v46  ;;  %v2186_v51 = vmul.f32 %v10202_v16, %v15445_v26  ;;  %v15446_v26 = vld [vmem:[#allocation59_spill] sm:$0xff] }
 0x389   : > { %v10204_v58 = vpop.eup %10203 }
 0x38a   : > { %v2160_v34 = vpop.xlane.xlu0 %2159  ;;  %v2184_v42 = vmul.f32 %v10204_v58, %v12502_v48 }
 0x38b   : > { %v2162_v24 = vpop.xlane.xlu1 %2161  ;;  %10211 = vrcp.f32 %v2160_v34 }
 0x38c   : > { %10213 = vrcp.f32 %v2162_v24  ;;  %8451 = vmatprep.mubr.f32.mxu1 %v2184_v42 }
 0x38d   : > { %10215 = vrcp.f32 %v12735_v13  ;;  %8452 = vmatmul.mubr.f32.gmra.mrb[42].mxu1 %v2186_v51 }
 0x38e   : > { %v10206_v50 = vpop.eup %10205  ;;  %v3255_v30 = vpop.xlane.xlu0 %3254  ;;  %10217 = vrcp.f32 %v12745_v27 }
 0x38f   : > { %v10208_v43 = vpop.eup %10207  ;;  %v3257_v63 = vpop.xlane.xlu1 %3256  ;;  %v3284_v46 = vsub.f32 %v12539_v35, %v3255_v30  ;;  %v2190_v0 = vmul.f32 %v10206_v50, %v12513_v61  ;;  %10219 = vrcp.f32 %v12739_v29 }
 0x390   : > { %v3285_v47 = vsub.f32 %v12543_v40, %v3257_v63  ;;  %v2188_v48 = vmul.f32 %v10208_v43, %v12511_v59  ;;  %10221 = vrcp.f32 %v12768_v2  ;;  %v10210_v16 = vpop.eup %10209  ;;  %v15448_v63 = vld [vmem:[#allocation57_spill] sm:$0xff] }
 0x391   : > { %v3302_v42 = vmul.f32 1.442695, %v3284_v46  ;;  %v1790_v51 = vmul.f32 %v10210_v16, %v15446_v26 }
 0x392   : > { %v3304_v13 = vmul.f32 1.442695, %v3285_v47  ;;  %8454 = vmatprep.mubr.f32.mxu1 %v2188_v48  ;;  %v1778_v18 = vpop.xlane.xlu0 %1777 }
 0x393   : > { %10223 = vpow2.f32 %v3302_v42  ;;  %8455 = vmatmul.mubr.f32.gmra.mrb[44].mxu1 %v2190_v0  ;;  %v1780_v27 = vpop.xlane.xlu1 %1779 }
 0x394   : > { %10225 = vpow2.f32 %v3304_v13 }
 0x395   : > { %v10212_v35 = vpop.eup %10211  ;;  %10227 = vrcp.f32 %v12758_v54 }
 0x396   : > { %v10214_v58 = vpop.eup %10213  ;;  %v3259_v61 = vpop.xlane.xlu0 %3258  ;;  %v2192_v59 = vmul.f32 %v10212_v35, %v12527_v37  ;;  %10229 = vrcp.f32 %v12786_v45  ;;  %v15447_v37 = vld [vmem:[#allocation3_spill] sm:$0xff] }
 0x397   : > { %v3261_v40 = vpop.xlane.xlu1 %3260  ;;  %v3286_v2 = vsub.f32 %v12560_v22, %v3259_v61  ;;  %v2194_v29 = vmul.f32 %v10214_v58, %v12529_v60  ;;  %v10216_v34 = vpop.eup %10215  ;;  %10231 = vrcp.f32 %v12780_v7  ;;  %v2508_v30 = vmul.f32 %v15447_v37, %v15409_v9  ;;  %v15449_v7 = vld [vmem:[#allocation61_spill] sm:$0xff] }
 0x398   : > { %v3287_v24 = vsub.f32 %v12564_v52, %v3261_v40  ;;  %8457 = vmatprep.mubr.f32.mxu1 %v2192_v59  ;;  %v10218_v50 = vpop.eup %10217  ;;  %v2509_v45 = vmul.f32 %v15447_v37, %v15411_v8  ;;  %10233 = vrcp.f32 %v12808_v38  ;;  %v1792_v46 = vmul.f32 %v10216_v34, %v15448_v63  ;;  %v15450_v59 = vld [vmem:[#allocation60_spill] sm:$0xff]  ;;  %v15451_v34 = vld [vmem:[#allocation63_spill] sm:$0xff] }
 0x399   : > { %v3306_v54 = vmul.f32 1.442695, %v3286_v2  ;;  %8458 = vmatmul.mubr.f32.gmra.mrb[46].mxu1 %v2194_v29  ;;  %v10220_v52 = vpop.eup %10219  ;;  %v1794_v47 = vmul.f32 %v10218_v50, %v15449_v7  ;;  %v2510_v48 = vmul.f32 %v15447_v37, %v15416_v36  ;;  %v2511_v42 = vmul.f32 %v15447_v37, %v15417_v56 }
 0x39a   : > { %v3308_v60 = vmul.f32 1.442695, %v3287_v24  ;;  %8492 = vmatprep.mubr.f32.mxu1 %v1790_v51  ;;  %v1782_v22 = vpop.xlane.xlu0 %1781  ;;  %v10222_v0 = vpop.eup %10221  ;;  %v9508_v38 = vpack.c.bf16 %v2509_v45, %v2508_v30  ;;  %v1796_v40 = vmul.f32 %v10220_v52, %v15450_v59  ;;  %v15453_v52 = vld [vmem:[#allocation65_spill] sm:$0xff]  ;;  %v2514_v7 = vmul.f32 %v15447_v37, %v15425_v19 }
 0x39b   : > { %10235 = vpow2.f32 %v3306_v54  ;;  %v1784_v43 = vpop.xlane.xlu1 %1783  ;;  %v9512_v24 = vpack.c.bf16 %v2511_v42, %v2510_v48 }
 0x39c   : > { %10237 = vpow2.f32 %v3308_v60 }
 0x39d   : > { %v12857_v13 = vpop.eup %10223  ;;  %8493 = vmatmul.mubr.f32.vlgmr.msra.gmra.mrb[32].mxu1 %v1792_v46  ;;  %10239 = vrcp.f32 %v12798_v31  ;;  %v1798_v31 = vmul.f32 %v10222_v0, %v15451_v34 }
 0x39e   : > { %v12859_v16 = vpop.eup %10225  ;;  %9507 = vmatpush3.bf16.msra.mxu1 %v15443_v39  ;;  %8495 = vmatprep.mubr.f32.mxu1 %v1794_v47  ;;  %v3263_v35 = vpop.xlane.xlu0 %3262  ;;  %10241 = vrcp.f32 %v1778_v18  ;;  %v2512_v18 = vmul.f32 %v15447_v37, %v15421_v11  ;;  %v2515_v47 = vmul.f32 %v15447_v37, %v15426_v23 }
 0x39f   : > { %3336 = vadd.xlane.f32.xlu1 %v12859_v16  ;;  %v3265_v58 = vpop.xlane.xlu1 %3264  ;;  %9509 = vmatprep.subr.bf16.mxu1 %v9508_v38  ;;  %v3288_v61 = vsub.f32 %v12578_v4, %v3263_v35  ;;  %v10228_v2 = vpop.eup %10227  ;;  %10243 = vrcp.f32 %v1780_v27  ;;  %v2513_v4 = vmul.f32 %v15447_v37, %v15422_v44  ;;  %v15452_v27 = vld [vmem:[#allocation62_spill] sm:$0xff]  ;;  %v15454_v35 = vld [vmem:[#allocation64_spill] sm:$0xff] }
 0x3a0   : > { %v3289_v29 = vsub.f32 %v12583_v55, %v3265_v58  ;;  %3334 = vadd.xlane.f32.xlu0 %v12857_v13  ;;  %v10230_v39 = vpop.eup %10229  ;;  %10245 = vrcp.f32 %v1782_v22  ;;  %v1800_v45 = vmul.f32 %v10228_v2, %v15452_v27  ;;  %v9520_v34 = vpack.c.bf16 %v2515_v47, %v2514_v7 }
 0x3a1   : > { %v3310_v26 = vmul.f32 1.442695, %v3288_v61  ;;  %8496 = vmatmul.mubr.f32.gmra.mrb[34].mxu1 %v1796_v40  ;;  %v10232_v50 = vpop.eup %10231  ;;  %v1802_v63 = vmul.f32 %v10230_v39, %v15453_v52  ;;  %v9516_v22 = vpack.c.bf16 %v2513_v4, %v2512_v18  ;;  %v15455_v40 = vld [vmem:[#allocation87_spill] sm:$0xff]  ;;  %v15456_v18 = vld [vmem:[#allocation84_spill] sm:$0xff]  ;;  %v2518_v27 = vmul.f32 %v15447_v37, %v15433_v15 }
 0x3a2   : > { %v3312_v51 = vmul.f32 1.442695, %v3289_v29  ;;  %9511 = vmatpush3.bf16.msra.mxu1 %v9508_v38  ;;  %8498 = vmatprep.mubr.f32.mxu1 %v1798_v31  ;;  %v3267_v55 = vpop.xlane.xlu0 %3266  ;;  %v10234_v60 = vpop.eup %10233  ;;  %v1804_v58 = vmul.f32 %v10232_v50, %v15454_v35  ;;  %v2516_v31 = vmul.f32 %v15447_v37, %v15429_v6 }
 0x3a3   : > { %10247 = vpow2.f32 %v3310_v26  ;;  %v1788_v54 = vpop.xlane.xlu1 %1787  ;;  %9513 = vmatprep.subr.bf16.mxu1 %v9512_v24  ;;  %v3290_v30 = vsub.f32 %v12589_v32, %v3267_v55  ;;  %v1806_v2 = vmul.f32 %v10234_v60, %v15455_v40 }
 0x3a4   : > { %10249 = vpow2.f32 %v3312_v51 }
 0x3a5   : > { %v12876_v46 = vpop.eup %10235  ;;  %v3314_v0 = vmul.f32 1.442695, %v3290_v30  ;;  %8499 = vmatmul.mubr.f32.gmra.mrb[36].mxu1 %v1800_v45  ;;  %10251 = vrcp.f32 %v1784_v43  ;;  %v2519_v45 = vmul.f32 %v15447_v37, %v15434_v20 }
 0x3a6   : > { %v12882_v48 = vpop.eup %10237  ;;  %9515 = vmatpush3.bf16.msra.mxu1 %v9512_v24  ;;  %8501 = vmatprep.mubr.f32.mxu1 %v1802_v63  ;;  %v3271_v32 = vpop.xlane.xlu0 %3270  ;;  %v2517_v24 = vmul.f32 %v15447_v37, %v15430_v5 }
 0x3a7   : > { %10253 = vpow2.f32 %v3314_v0  ;;  %3340 = vadd.xlane.f32.xlu1 %v12882_v48  ;;  %v3269_v42 = vpop.xlane.xlu1 %3268  ;;  %9517 = vmatprep.subr.bf16.mxu1 %v9516_v22  ;;  %v3292_v38 = vsub.f32 %v12598_v17, %v3271_v32  ;;  %v10240_v61 = vpop.eup %10239  ;;  %v9528_v47 = vpack.c.bf16 %v2519_v45, %v2518_v27  ;;  %v2520_v32 = vmul.f32 %v15447_v37, %v15437_v49  ;;  %v15461_v45 = vld [vmem:[#allocation51_spill] sm:$0xff] }
 0x3a8   : > { %v3291_v59 = vsub.f32 %v12602_v10, %v3269_v42  ;;  %3338 = vadd.xlane.f32.xlu0 %v12876_v46  ;;  %v10242_v43 = vpop.eup %10241  ;;  %10255 = vrcp.f32 %v1788_v54  ;;  %v1808_v4 = vmul.f32 %v10240_v61, %v15456_v18  ;;  %v9524_v54 = vpack.c.bf16 %v2517_v24, %v2516_v31  ;;  %v15457_v24 = vld [vmem:[#allocation72_spill] sm:$0xff]  ;;  %v15458_v18 = vld [vmem:[#allocation71_spill] sm:$0xff] }
 0x3a9   : > { %v3318_v29 = vmul.f32 1.442695, %v3292_v38  ;;  %8502 = vmatmul.mubr.f32.gmra.mrb[38].mxu1 %v1804_v58  ;;  %v10244_v10 = vpop.eup %10243  ;;  %v1810_v50 = vmul.f32 %v10242_v43, %v12552_v62  ;;  %v2521_v42 = vmul.f32 %v15447_v37, %v15438_v28 }
 0x3aa   : > { %v3316_v17 = vmul.f32 1.442695, %v3291_v59  ;;  %9519 = vmatpush3.bf16.msra.mxu1 %v9516_v22  ;;  %8504 = vmatprep.mubr.f32.mxu1 %v1806_v2  ;;  %v1786_v39 = vpop.xlane.xlu0 %1785  ;;  %v10246_v51 = vpop.eup %10245 }
 0x3ab   : > { %10257 = vpow2.f32 %v3318_v29  ;;  %v3273_v26 = vpop.xlane.xlu1 %3272  ;;  %9521 = vmatprep.subr.bf16.mxu1 %v9520_v34  ;;  %v1814_v22 = vmul.f32 %v10246_v51, %v12569_v53  ;;  %v9532_v2 = vpack.c.bf16 %v2521_v42, %v2520_v32 }
 0x3ac   : > { %10259 = vpow2.f32 %v3316_v17  ;;  %v3293_v55 = vsub.f32 %v12611_v41, %v3273_v26  ;;  %v1812_v41 = vmul.f32 %v10244_v10, %v12554_v3 }
 0x3ad   : > { %v12897_v30 = vpop.eup %10247  ;;  %10261 = vrcp.f32 %v1786_v39  ;;  %8505 = vmatmul.mubr.f32.gmra.mrb[40].mxu1 %v1808_v4 }
 0x3ae   : > { %v12903_v60 = vpop.eup %10249  ;;  %v3320_v52 = vmul.f32 1.442695, %v3293_v55  ;;  %9523 = vmatpush3.bf16.msra.mxu1 %v9520_v34  ;;  %8507 = vmatprep.mubr.f32.mxu1 %v1810_v50  ;;  %v2796_v63 = vpop.xlane.xlu0 %2795 }
 0x3af   : > { %3344 = vadd.xlane.f32.xlu1 %v12903_v60  ;;  %v2798_v62 = vpop.xlane.xlu1 %2797  ;;  %9525 = vmatprep.subr.bf16.mxu1 %v9524_v54  ;;  %10263 = vrcp.f32 %v2796_v63  ;;  %v10252_v0 = vpop.eup %10251 }
 0x3b0   : > { %10265 = vpow2.f32 %v3320_v52  ;;  %3342 = vadd.xlane.f32.xlu0 %v12897_v30  ;;  %v1816_v53 = vmul.f32 %v10252_v0, %v12571_v33  ;;  %v15462_v52 = vld [vmem:[#allocation73_spill] sm:$0xff] }
 0x3b1   : > { %v12909_v7 = vpop.eup %10253  ;;  %10267 = vrcp.f32 %v2798_v62  ;;  %8508 = vmatmul.mubr.f32.gmra.mrb[42].mxu1 %v1812_v41 }
 0x3b2   : > { %9527 = vmatpush3.bf16.msra.mxu1 %v9524_v54  ;;  %8510 = vmatprep.mubr.f32.mxu1 %v1814_v22  ;;  %v3275_v3 = vpop.xlane.xlu0 %3274  ;;  %v10256_v58 = vpop.eup %10255  ;;  %v15460_v54 = vld [vmem:[#allocation99_spill] sm:$0xff] }
 0x3b3   : > { %v3277_v38 = vpop.xlane.xlu1 %3276  ;;  %9529 = vmatprep.subr.bf16.mxu1 %v9528_v47  ;;  %v3294_v35 = vsub.f32 %v12626_v21, %v3275_v3  ;;  %v1820_v17 = vmul.f32 %v10256_v58, %v15457_v24 }
 0x3b4   : > { %v3295_v61 = vsub.f32 %v12631_v12, %v3277_v38  ;;  %3346 = vadd.xlane.f32.xlu0 %v12909_v7 }
 0x3b5   : > { %v12919_v59 = vpop.eup %10257  ;;  %v3322_v40 = vmul.f32 1.442695, %v3294_v35  ;;  %8511 = vmatmul.mubr.f32.gmra.mrb[44].mxu1 %v1816_v53 }
 0x3b6   : > { %v12921_v37 = vpop.eup %10259  ;;  %v3324_v43 = vmul.f32 1.442695, %v3295_v61  ;;  %9531 = vmatpush3.bf16.msra.mxu1 %v9528_v47  ;;  %v2802_v29 = vpop.xlane.xlu0 %2801 }
 0x3b7   : > { %v10262_v34 = vpop.eup %10261  ;;  %10269 = vpow2.f32 %v3322_v40  ;;  %3348 = vadd.xlane.f32.xlu1 %v12921_v37  ;;  %v3279_v33 = vpop.xlane.xlu1 %3278  ;;  %9533 = vmatprep.subr.bf16.mxu1 %v9532_v2 }
 0x3b8   : > { %10271 = vpow2.f32 %v3324_v43  ;;  %v3296_v21 = vsub.f32 %v12645_v14, %v3279_v33  ;;  %3350 = vadd.xlane.f32.xlu0 %v12919_v59  ;;  %v1818_v12 = vmul.f32 %v10262_v34, %v12607_v1  ;;  %v15459_v1 = vld [vmem:[#allocation4_spill] sm:$0xff]  ;;  %v15463_v33 = vld [vmem:[#allocation78_spill] sm:$0xff] }
 0x3b9   : > { %v10264_v31 = vpop.eup %10263  ;;  %10273 = vrcp.f32 %v2802_v29  ;;  %v3043_v55 = vmul.f32 %v15459_v1, %v15409_v9  ;;  %v3044_v50 = vmul.f32 %v15459_v1, %v15411_v8  ;;  %v3045_v47 = vmul.f32 %v15459_v1, %v15416_v36 }
 0x3ba   : > { %v12928_v39 = vpop.eup %10265  ;;  %v3326_v10 = vmul.f32 1.442695, %v3296_v21  ;;  %8513 = vmatprep.mubr.f32.mxu1 %v1818_v12  ;;  %9535 = vmatpush3.bf16.msra.mxu1 %v9532_v2  ;;  %v2800_v26 = vpop.xlane.xlu0 %2799  ;;  %v2828_v4 = vmul.f32 %v10264_v31, %v15458_v18  ;;  %v3046_v32 = vmul.f32 %v15459_v1, %v15417_v56  ;;  %v3047_v35 = vmul.f32 %v15459_v1, %v15421_v11  ;;  %v15464_v31 = vld [vmem:[#allocation77_spill] sm:$0xff]  ;;  %v12966_v18 = vld [vmem:[%s15254_s28] sm:$0xff] }
 0x3bb   : > { %v10268_v51 = vpop.eup %10267  ;;  %8514 = vmatmul.mubr.f32.gmra.mrb[46].mxu1 %v1820_v17  ;;  %3352 = vadd.xlane.f32.xlu1 %v12928_v39  ;;  %v3281_v14 = vpop.xlane.xlu1 %3280  ;;  %10275 = vrcp.f32 %v2800_v26  ;;  %v9588_v22 = vpack.c.bf16 %v3044_v50, %v3043_v55  ;;  %v3048_v53 = vmul.f32 %v15459_v1, %v15422_v44  ;;  %v3049_v17 = vmul.f32 %v15459_v1, %v15425_v19  ;;  %v15466_v50 = vld [vmem:[#allocation102_spill] sm:$0xff] }
 0x3bc   : > { %10277 = vpow2.f32 %v3326_v10  ;;  %v3297_v27 = vsub.f32 %v15460_v54, %v3281_v14  ;;  %9585 = vmatprep.subr.bf16.mxu1 %v15461_v45  ;;  %8604 = vmatprep.mubr.f32.mxu1 %v2828_v4  ;;  %v2830_v63 = vmul.f32 %v10268_v51, %v15462_v52  ;;  %v9592_v61 = vpack.c.bf16 %v3046_v32, %v3045_v47  ;;  %v15465_v4 = vld [vmem:[#allocation82_spill] sm:$0xff]  ;;  %v12985_v47 = vld [vmem:[%s15254_s28 + $0x8] sm:$0xff]  ;;  %v15468_v32 = vld [vmem:[#allocation67_spill] sm:$0xff] }
 0x3bd   : > { %v9596_v29 = vpack.c.bf16 %v3048_v53, %v3047_v35  ;;  %v3050_v10 = vmul.f32 %v15459_v1, %v15426_v23  ;;  %v12970_v51 = vadd.f32 %v12966_v18, %v15465_v4  ;;  %v12994_v35 = vld [vmem:[%s15254_s28 + $0x10] sm:$0xff]  ;;  %v15469_v53 = vld [vmem:[#allocation86_spill] sm:$0xff] }
 0x3be   : > { %v3328_v62 = vmul.f32 1.442695, %v3297_v27  ;;  %v2804_v41 = vpop.xlane.xlu0 %2803 }
 0x3bf   : > { %8605 = vmatmul.mubr.f32.vlgmr.msra.gmra.mrb[32].mxu1 %v2830_v63  ;;  %v2806_v0 = vpop.xlane.xlu1 %2805  ;;  %10279 = vrcp.f32 %v2804_v41  ;;  %v9600_v52 = vpack.c.bf16 %v3050_v10, %v3049_v17  ;;  %v3051_v63 = vmul.f32 %v15459_v1, %v15429_v6  ;;  %v15467_v41 = vld [vmem:[#allocation103_spill] sm:$0xff]  ;;  %v13011_v10 = vld [vmem:[%s15254_s28 + $0x18] sm:$0xff] }
 0x3c0   : > { %10281 = vpow2.f32 %v3328_v62  ;;  %9587 = vmatpush3.bf16.msra.mxu1 %v15461_v45  ;;  %v3052_v62 = vmul.f32 %v15459_v1, %v15430_v5 }
 0x3c1   : > { %v12944_v42 = vpop.eup %10269  ;;  %10283 = vrcp.f32 %v2806_v0  ;;  %9589 = vmatprep.subr.bf16.mxu1 %v9588_v22 }
 0x3c2   : > { %v12946_v3 = vpop.eup %10271  ;;  %3354 = vadd.xlane.f32.xlu0 %v12944_v42  ;;  %v2808_v38 = vpop.xlane.xlu0 %2807 }
 0x3c3   : > { %3356 = vadd.xlane.f32.xlu1 %v12946_v3  ;;  %v2810_v58 = vpop.xlane.xlu1 %2809  ;;  %10285 = vrcp.f32 %v2808_v38  ;;  %v10274_v40 = vpop.eup %10273  ;;  %v12989_v38 = vadd.f32 %v12985_v47, %v15468_v32  ;;  %v3055_v32 = vmul.f32 %v15459_v1, %v15437_v49 }
 0x3c4   : > { %9591 = vmatpush3.bf16.msra.mxu1 %v9588_v22  ;;  %10287 = vrcp.f32 %v2810_v58  ;;  %v2834_v24 = vmul.f32 %v10274_v40, %v15464_v31  ;;  %v12998_v58 = vadd.f32 %v12994_v35, %v15469_v53  ;;  %v15471_v31 = vld [vmem:[#allocation106_spill] sm:$0xff]  ;;  %v3056_v53 = vmul.f32 %v15459_v1, %v15438_v28 }
 0x3c5   : > { %v10276_v2 = vpop.eup %10275  ;;  %9593 = vmatprep.subr.bf16.mxu1 %v9592_v61 }
 0x3c6   : > { %v12954_v43 = vpop.eup %10277  ;;  %v2812_v34 = vpop.xlane.xlu0 %2811  ;;  %v2832_v21 = vmul.f32 %v10276_v2, %v15463_v33  ;;  %v15470_v2 = vld [vmem:[#allocation79_spill] sm:$0xff]  ;;  %v3054_v33 = vmul.f32 %v15459_v1, %v15434_v20 }
 0x3c7   : > { %v2814_v12 = vpop.xlane.xlu1 %2813  ;;  %3358 = vadd.xlane.f32.xlu0 %v12954_v43  ;;  %10289 = vrcp.f32 %v2812_v34  ;;  %v3053_v34 = vmul.f32 %v15459_v1, %v15433_v15 }
 0x3c8   : > { %9595 = vmatpush3.bf16.msra.mxu1 %v9592_v61  ;;  %10291 = vrcp.f32 %v2814_v12  ;;  %8607 = vmatprep.mubr.f32.mxu1 %v2832_v21  ;;  %v9604_v12 = vpack.c.bf16 %v3052_v62, %v3051_v63  ;;  %v15474_v63 = vld [vmem:[#allocation80_spill] sm:$0xff] }
 0x3c9   : > { %v10280_v26 = vpop.eup %10279  ;;  %9597 = vmatprep.subr.bf16.mxu1 %v9596_v29  ;;  %8608 = vmatmul.mubr.f32.gmra.mrb[34].mxu1 %v2834_v24 }
 0x3ca   : > { %v12972_v14 = vpop.eup %10281  ;;  %v2816_v55 = vpop.xlane.xlu0 %2815  ;;  %v2836_v54 = vmul.f32 %v10280_v26, %v15466_v50  ;;  %v15472_v26 = vld [vmem:[#allocation85_spill] sm:$0xff]  ;;  %v15473_v50 = vld [vmem:[#allocation90_spill] sm:$0xff] }
 0x3cb   : > { %v10284_v27 = vpop.eup %10283  ;;  %3360 = vadd.xlane.f32.xlu1 %v12972_v14  ;;  %v2818_v45 = vpop.xlane.xlu1 %2817  ;;  %4320 = vmax.xlane.f32.xlu0 %v12970_v51  ;;  %10293 = vrcp.f32 %v2816_v55  ;;  %v13015_v4 = vadd.f32 %v13011_v10, %v15472_v26  ;;  %v13020_v55 = vld [vmem:[%s15254_s28 + $0x20] sm:$0xff]  ;;  %v9612_v26 = vpack.c.bf16 %v3056_v53, %v3055_v32 }
 0x3cc   : > { %9599 = vmatpush3.bf16.msra.mxu1 %v9596_v29  ;;  %10295 = vrcp.f32 %v2818_v45  ;;  %8610 = vmatprep.mubr.f32.mxu1 %v2836_v54  ;;  %v2838_v0 = vmul.f32 %v10284_v27, %v15467_v41  ;;  %v13024_v54 = vadd.f32 %v13020_v55, %v15473_v50  ;;  %v9608_v45 = vpack.c.bf16 %v3054_v33, %v3053_v34  ;;  %v13046_v34 = vld [vmem:[%s15254_s28 + $0x30] sm:$0xff]  ;;  %v15477_v33 = vld [vmem:[#allocation68_spill] sm:$0xff]  ;;  %v15485_v53 = vld [vmem:[#allocation115_spill] sm:$0xff] }
 0x3cd   : > { %v10286_v22 = vpop.eup %10285  ;;  %9601 = vmatprep.subr.bf16.mxu1 %v9600_v52  ;;  %v13050_v1 = vadd.f32 %v13046_v34, %v15477_v33  ;;  %v15480_v50 = vld [vmem:[#allocation112_spill] sm:$0xff] }
 0x3ce   : > { %v10288_v61 = vpop.eup %10287  ;;  %8611 = vmatmul.mubr.f32.gmra.mrb[36].mxu1 %v2838_v0  ;;  %v2820_v40 = vpop.xlane.xlu0 %2819  ;;  %v2840_v29 = vmul.f32 %v10286_v22, %v15470_v2  ;;  %v15475_v0 = vld [vmem:[#allocation81_spill] sm:$0xff] }
 0x3cf   : > { %4322 = vmax.xlane.f32.xlu1 %v12989_v38  ;;  %v2822_v21 = vpop.xlane.xlu1 %2821  ;;  %4324 = vmax.xlane.f32.xlu0 %v12998_v58  ;;  %10297 = vrcp.f32 %v2820_v40  ;;  %v2842_v24 = vmul.f32 %v10288_v61, %v15471_v31  ;;  %v13037_v40 = vld [vmem:[%s15254_s28 + $0x28] sm:$0xff]  ;;  %v15476_v2 = vld [vmem:[#allocation89_spill] sm:$0xff]  ;;  %15478 = vst [vmem:[#allocation83_spill] sm:$0xff] %v13050_v1  ;;  %v15479_v31 = vld [vmem:[#allocation111_spill] sm:$0xff] }
 0x3d0   : > { %9603 = vmatpush3.bf16.msra.mxu1 %v9600_v52  ;;  %10299 = vrcp.f32 %v2822_v21  ;;  %8613 = vmatprep.mubr.f32.mxu1 %v2840_v29  ;;  %v13041_v29 = vadd.f32 %v13037_v40, %v15476_v2  ;;  %v15486_v2 = vld [vmem:[#allocation116_spill] sm:$0xff] }
 0x3d1   : > { %v10290_v17 = vpop.eup %10289  ;;  %9605 = vmatprep.subr.bf16.mxu1 %v9604_v12 }
 0x3d2   : > { %v10292_v27 = vpop.eup %10291  ;;  %8614 = vmatmul.mubr.f32.gmra.mrb[38].mxu1 %v2842_v24  ;;  %v2824_v52 = vpop.xlane.xlu0 %2823  ;;  %v2844_v62 = vmul.f32 %v10290_v17, %v15474_v63  ;;  %v13059_v63 = vld [vmem:[%s15254_s28 + $0x38] sm:$0xff] }
 0x3d3   : > { %4326 = vmax.xlane.f32.xlu1 %v13015_v4  ;;  %v2826_v41 = vpop.xlane.xlu1 %2825  ;;  %4328 = vmax.xlane.f32.xlu0 %v13024_v54  ;;  %10301 = vrcp.f32 %v2824_v52  ;;  %v2846_v22 = vmul.f32 %v10292_v27, %v15475_v0  ;;  %v13068_v0 = vld [vmem:[%s15254_s28 + $0x40] sm:$0xff] }
 0x3d4   : > { %9607 = vmatpush3.bf16.msra.mxu1 %v9604_v12  ;;  %10303 = vrcp.f32 %v2826_v41  ;;  %8616 = vmatprep.mubr.f32.mxu1 %v2844_v62  ;;  %v15481_v62 = vld [vmem:[#allocation91_spill] sm:$0xff] }
 0x3d5   : > { %v10294_v61 = vpop.eup %10293  ;;  %9609 = vmatprep.subr.bf16.mxu1 %v9608_v45  ;;  %v13063_v41 = vadd.f32 %v13059_v63, %v15481_v62 }
 0x3d6   : > { %v10296_v21 = vpop.eup %10295  ;;  %8617 = vmatmul.mubr.f32.gmra.mrb[40].mxu1 %v2846_v22  ;;  %v3331_v12 = vpop.xlane.xlu0 %3330  ;;  %v2848_v24 = vmul.f32 %v10294_v61, %v15479_v31  ;;  %v15483_v22 = vld [vmem:[#allocation92_spill] sm:$0xff]  ;;  %v15487_v31 = vld [vmem:[#allocation69_spill] sm:$0xff] }
 0x3d7   : > { %4330 = vmax.xlane.f32.xlu1 %v13041_v29  ;;  %v3333_v17 = vpop.xlane.xlu1 %3332  ;;  %4332 = vmax.xlane.f32.xlu0 %v13050_v1  ;;  %10305 = vrcp.f32 %v3331_v12  ;;  %v2850_v27 = vmul.f32 %v10296_v21, %v15480_v50  ;;  %15482 = vst [vmem:[#allocation50_spill] sm:$0xff] %v13063_v41  ;;  %v13081_v12 = vld [vmem:[%s15254_s28 + $0x48] sm:$0xff]  ;;  %v15489_v50 = vld [vmem:[#allocation94_spill] sm:$0xff] }
 0x3d8   : > { %9611 = vmatpush3.bf16.msra.mxu1 %v9608_v45  ;;  %10307 = vrcp.f32 %v3333_v17  ;;  %8619 = vmatprep.mubr.f32.mxu1 %v2848_v24  ;;  %v13072_v45 = vadd.f32 %v13068_v0, %v15483_v22  ;;  %v13085_v24 = vadd.f32 %v13081_v12, %v15487_v31  ;;  %v13090_v17 = vld [vmem:[%s15254_s28 + $0x50] sm:$0xff]  ;;  %v15493_v22 = vld [vmem:[#allocation119_spill] sm:$0xff]  ;;  %v13106_v31 = vld [vmem:[%s15254_s28 + $0x58] sm:$0xff] }
 0x3d9   : > { %v10298_v52 = vpop.eup %10297  ;;  %9613 = vmatprep.subr.bf16.mxu1 %v9612_v26 }
 0x3da   : > { %15484 = vst [vmem:[#allocation66_spill] sm:$0xff] %v13072_v45  ;;  %v10300_v32 = vpop.eup %10299  ;;  %8620 = vmatmul.mubr.f32.gmra.mrb[42].mxu1 %v2850_v27  ;;  %v2852_v61 = vmul.f32 %v10298_v52, %v15485_v53  ;;  %15488 = vst [vmem:[#allocation88_spill] sm:$0xff] %v13085_v24  ;;  %v13094_v27 = vadd.f32 %v13090_v17, %v15489_v50  ;;  %v15494_v53 = vld [vmem:[#allocation120_spill] sm:$0xff]  ;;  %v15495_v50 = vld [vmem:[#allocation93_spill] sm:$0xff] }
 0x3db   : > { %4334 = vmax.xlane.f32.xlu1 %v13063_v41  ;;  %4336 = vmax.xlane.f32.xlu0 %v13072_v45  ;;  %v2854_v33 = vmul.f32 %v10300_v32, %v15486_v2  ;;  %v13110_v25 = vadd.f32 %v13106_v31, %v15495_v50  ;;  %v13128_v45 = vld [vmem:[%s15254_s28 + $0x68] sm:$0xff] }
 0x3dc   : > { %9615 = vmatpush3.bf16.msra.mxu1 %v9612_v26  ;;  %8622 = vmatprep.mubr.f32.mxu1 %v2852_v61  ;;  %15490 = vst [vmem:[#allocation59_spill] sm:$0xff] %v13094_v27  ;;  %v15491_v26 = vld [vmem:[#allocation10_spill] sm:$0xff] }
 0x3dd   : > { %v10302_v21 = vpop.eup %10301  ;;  %9618 = vmatprep.subr.msk.bf16.mxu1 %vm11144_vm4, %v15491_v26  ;;  %15496 = vst [vmem:[#allocation3_spill] sm:$0xff] %v13110_v25 }
 0x3de   : > { %v10304_v62 = vpop.eup %10303  ;;  %8623 = vmatmul.mubr.f32.gmra.mrb[44].mxu1 %v2854_v33  ;;  %v2856_v32 = vmul.f32 %v10302_v21, %v15493_v22  ;;  %v13115_v33 = vld [vmem:[%s15254_s28 + $0x60] sm:$0xff] }
 0x3df   : > { %4338 = vmax.xlane.f32.xlu1 %v13085_v24  ;;  %4340 = vmax.xlane.f32.xlu0 %v13094_v27  ;;  %v2858_v61 = vmul.f32 %v10304_v62, %v15494_v53  ;;  %v15497_v21 = vld [vmem:[#allocation95_spill] sm:$0xff]  ;;  %v15500_v27 = vld [vmem:[#allocation122_spill] sm:$0xff] }
 0x3e0   : > { %8625 = vmatprep.mubr.f32.mxu1 %v2856_v32  ;;  %v13119_v22 = vadd.f32 %v13115_v33, %v15497_v21  ;;  %v15499_v32 = vld [vmem:[#allocation121_spill] sm:$0xff]  ;;  %v15501_v24 = vld [vmem:[#allocation70_spill] sm:$0xff] }
 0x3e1   : > { %v10306_v2 = vpop.eup %10305  ;;  %v13132_v21 = vadd.f32 %v13128_v45, %v15501_v24  ;;  %v15505_v24 = vld [vmem:[#allocation11_spill] sm:$0xff] }
 0x3e2   : > { %15498 = vst [vmem:[#allocation57_spill] sm:$0xff] %v13119_v22  ;;  %v10308_v62 = vpop.eup %10307  ;;  %8626 = vmatmul.mubr.f32.gmra.mrb[46].mxu1 %v2858_v61  ;;  %v3363_v53 = vmul.f32 %v10306_v2, %v15499_v32  ;;  %v13137_v61 = vld [vmem:[%s15254_s28 + $0x70] sm:$0xff] }
 0x3e3   : > { %4342 = vmax.xlane.f32.xlu1 %v13110_v25  ;;  %4344 = vmax.xlane.f32.xlu0 %v13119_v22  ;;  %v3365_v50 = vmul.f32 %v10308_v62, %v15500_v27  ;;  %15502 = vst [vmem:[#allocation61_spill] sm:$0xff] %v13132_v21  ;;  %v15503_v2 = vld [vmem:[#allocation97_spill] sm:$0xff]  ;;  %v13154_v27 = vld [vmem:[%s15254_s28 + $0x78] sm:$0xff]  ;;  %v15506_v62 = vld [vmem:[#allocation96_spill] sm:$0xff] }
 0x3e4   : > { %8716 = vmatprep.mubr.f32.mxu1 %v3363_v53  ;;  %v13141_v32 = vadd.f32 %v13137_v61, %v15503_v2  ;;  %v13158_v53 = vadd.f32 %v13154_v27, %v15506_v62  ;;  %v15510_v2 = vld [vmem:[#allocation74_spill] sm:$0xff] }
 0x3e5   : > { %v15512_v22 = vld [vmem:[#allocation98_spill] sm:$0xff] }
 0x3e6   : > { %15504 = vst [vmem:[#allocation60_spill] sm:$0xff] %v13141_v32  ;;  %8717 = vmatmul.mubr.f32.vlgmr.msra.gmra.mrb[32].mxu1 %v3365_v50  ;;  %15507 = vst [vmem:[#allocation63_spill] sm:$0xff] %v13158_v53  ;;  %v15508_v50 = vld [vmem:[#allocation75_spill] sm:$0xff]  ;;  %v15514_v62 = vld [vmem:[#allocation14_spill] sm:$0xff] }
 0x3e7   : > { %9621 = vmatpush3.bf16.xpose.msk.msra.mxu1 %vm11144_vm4, %v15491_v26  ;;  %4346 = vmax.xlane.f32.xlu1 %v13132_v21  ;;  %v13162_v26 = vadd.f32 %v12966_v18, %v15508_v50  ;;  %v13172_v21 = vadd.f32 %v12994_v35, %v15512_v22  ;;  %v15515_v50 = vld [vmem:[#allocation76_spill] sm:$0xff]  ;;  %v15517_v22 = vld [vmem:[#allocation15_spill] sm:$0xff] }
 0x3e8   : > { %4348 = vmax.xlane.f32.xlu0 %v13141_v32  ;;  %9624 = vmatprep.subr.msk.bf16.mxu1 %vm11144_vm4, %v15505_v24  ;;  %v13168_v32 = vadd.f32 %v12985_v47, %v15510_v2  ;;  %v13184_v2 = vadd.f32 %v13011_v10, %v15515_v50  ;;  %v15519_v50 = vld [vmem:[#allocation17_spill] sm:$0xff] }
 0x3e9   : > { %15509 = vst [vmem:[#allocation62_spill] sm:$0xff] %v13162_v26  ;;  %15513 = vst [vmem:[#allocation64_spill] sm:$0xff] %v13172_v21 }
 0x3ea   : > { %15511 = vst [vmem:[#allocation65_spill] sm:$0xff] %v13168_v32  ;;  %15516 = vst [vmem:[#allocation87_spill] sm:$0xff] %v13184_v2 }
 0x3eb   : > { %4350 = vmax.xlane.f32.xlu1 %v13158_v53 }
 0x3ec   : > { %4855 = vmax.xlane.f32.xlu0 %v13162_v26 }
 0x3ef   : > { %9627 = vmatpush3.bf16.xpose.msk.msra.mxu1 %vm11144_vm4, %v15505_v24  ;;  %4857 = vmax.xlane.f32.xlu1 %v13168_v32  ;;  %v15518_v24 = vld [vmem:[#allocation16_spill] sm:$0xff] }
 0x3f0   : > { %4859 = vmax.xlane.f32.xlu0 %v13172_v21  ;;  %9630 = vmatprep.subr.msk.bf16.mxu1 %vm11144_vm4, %v15514_v62 }
 0x3f3   : > { %4861 = vmax.xlane.f32.xlu1 %v13184_v2 }
 0x3f7   : > { %9633 = vmatpush3.bf16.xpose.msk.msra.mxu1 %vm11144_vm4, %v15514_v62  ;;  %v15520_v62 = vld [vmem:[#allocation18_spill] sm:$0xff] }
 0x3f8   : > { %9636 = vmatprep.subr.msk.bf16.mxu1 %vm11144_vm4, %v15517_v22 }
 0x3ff   : > { %9639 = vmatpush3.bf16.xpose.msk.msra.mxu1 %vm11144_vm4, %v15517_v22  ;;  %v15521_v22 = vld [vmem:[#allocation19_spill] sm:$0xff] }
 0x400   : > { %9642 = vmatprep.subr.msk.bf16.mxu1 %vm11144_vm4, %v15518_v24 }
 0x407   : > { %9645 = vmatpush3.bf16.xpose.msk.msra.mxu1 %vm11144_vm4, %v15518_v24  ;;  %v15522_v24 = vld [vmem:[#allocation52_spill] sm:$0xff] }
 0x408   : > { %9648 = vmatprep.subr.msk.bf16.mxu1 %vm11144_vm4, %v15519_v50 }
 0x40f   : > { %9651 = vmatpush3.bf16.xpose.msk.msra.mxu1 %vm11144_vm4, %v15519_v50 }
 0x410   : > { %9654 = vmatprep.subr.msk.bf16.mxu1 %vm11144_vm4, %v15520_v62 }
 0x417   : > { %9657 = vmatpush3.bf16.xpose.msk.msra.mxu1 %vm11144_vm4, %v15520_v62 }
 0x418   : > { %9660 = vmatprep.subr.msk.bf16.mxu1 %vm11144_vm4, %v15521_v22 }
 0x41f   : > { %9663 = vmatpush3.bf16.xpose.msk.msra.mxu1 %vm11144_vm4, %v15521_v22  ;;  %vm15525_vm4 = vmmov %vm15167_vm0 }
 0x420   : > { %9665 = vmatprep.subr.bf16.mxu1 %v15522_v24 }
 0x42c   : > { %v3337_v21 = vpop.xlane.xlu1 %3336 }
 0x42d   : > { %10309 = vrcp.f32 %v3337_v21  ;;  %v3335_v50 = vpop.xlane.xlu0 %3334 }
 0x42e   : > { %10311 = vrcp.f32 %v3335_v50 }
 0x434   : > { %v3341_v2 = vpop.xlane.xlu1 %3340 }
 0x435   : > { %10313 = vrcp.f32 %v3341_v2  ;;  %v3339_v26 = vpop.xlane.xlu0 %3338 }
 0x436   : > { %10315 = vrcp.f32 %v3339_v26 }
 0x437   : > { %v10310_v32 = vpop.eup %10309 }
 0x438   : > { %v10312_v62 = vpop.eup %10311  ;;  %v3369_v53 = vmul.f32 %v10310_v32, %v12859_v16 }
 0x439   : > { %v3367_v25 = vmul.f32 %v10312_v62, %v12857_v13 }
 0x43b   : > { %8719 = vmatprep.mubr.f32.mxu1 %v3367_v25 }
 0x43c   : > { %8720 = vmatmul.mubr.f32.gmra.mrb[34].mxu1 %v3369_v53  ;;  %v3345_v52 = vpop.xlane.xlu1 %3344 }
 0x43d   : > { %10317 = vrcp.f32 %v3345_v52  ;;  %v3343_v22 = vpop.xlane.xlu0 %3342 }
 0x43e   : > { %10319 = vrcp.f32 %v3343_v22 }
 0x43f   : > { %v10314_v1 = vpop.eup %10313 }
 0x440   : > { %v10316_v21 = vpop.eup %10315  ;;  %v3373_v50 = vmul.f32 %v10314_v1, %v12882_v48 }
 0x441   : > { %v3347_v41 = vpop.xlane.xlu0 %3346  ;;  %v3371_v2 = vmul.f32 %v10316_v21, %v12876_v46 }
 0x442   : > { %10321 = vrcp.f32 %v3347_v41 }
 0x443   : > { %8722 = vmatprep.mubr.f32.mxu1 %v3371_v2 }
 0x444   : > { %8723 = vmatmul.mubr.f32.gmra.mrb[36].mxu1 %v3373_v50  ;;  %v3349_v26 = vpop.xlane.xlu1 %3348 }
 0x445   : > { %10323 = vrcp.f32 %v3349_v26  ;;  %v3351_v16 = vpop.xlane.xlu0 %3350 }
 0x446   : > { %10325 = vrcp.f32 %v3351_v16 }
 0x447   : > { %v10318_v25 = vpop.eup %10317 }
 0x448   : > { %v10320_v13 = vpop.eup %10319  ;;  %v3353_v32 = vpop.xlane.xlu1 %3352  ;;  %v3377_v53 = vmul.f32 %v10318_v25, %v12903_v60 }
 0x449   : > { %10327 = vrcp.f32 %v3353_v32  ;;  %v3375_v62 = vmul.f32 %v10320_v13, %v12897_v30 }
 0x44b   : > { %8725 = vmatprep.mubr.f32.mxu1 %v3375_v62  ;;  %v15524_v62 = vld [vmem:[#allocation8_spill] sm:$0xff] }
 0x44c   : > { %v10322_v48 = vpop.eup %10321  ;;  %8726 = vmatmul.mubr.f32.gmra.mrb[38].mxu1 %v3377_v53 }
 0x44d   : > { %v3379_v46 = vmul.f32 %v10322_v48, %v12909_v7 }
 0x44f   : > { %v10324_v1 = vpop.eup %10323  ;;  %8728 = vmatprep.mubr.f32.mxu1 %v3379_v46  ;;  %v3355_v41 = vpop.xlane.xlu0 %3354  ;;  %v3578_v46 = vmul.f32 %v15524_v62, %v15409_v9 }
 0x450   : > { %v10326_v52 = vpop.eup %10325  ;;  %v3357_v22 = vpop.xlane.xlu1 %3356  ;;  %10329 = vrcp.f32 %v3355_v41  ;;  %v3381_v21 = vmul.f32 %v10324_v1, %v12921_v37 }
 0x451   : > { %10331 = vrcp.f32 %v3357_v22  ;;  %v3383_v50 = vmul.f32 %v10326_v52, %v12919_v59  ;;  %v3580_v52 = vmul.f32 %v15524_v62, %v15416_v36  ;;  %v3581_v22 = vmul.f32 %v15524_v62, %v15417_v56  ;;  %v15584_v36 = vld [vmem:[#allocation126_spill] sm:$0xff] }
 0x452   : > { %8729 = vmatmul.mubr.f32.gmra.mrb[40].mxu1 %v3381_v21  ;;  %v15529_v21 = vld [vmem:[#allocation25_spill] sm:$0xff] }
 0x453   : > { %v10328_v60 = vpop.eup %10327  ;;  %8731 = vmatprep.mubr.f32.mxu1 %v3383_v50  ;;  %v3563_v50 = vmul.f32 %v15524_v62, %v15529_v21  ;;  %v3588_v21 = vmul.f32 %v15524_v62, %v15433_v15 }
 0x454   : > { %v3359_v30 = vpop.xlane.xlu0 %3358  ;;  %v3385_v2 = vmul.f32 %v10328_v60, %v12928_v39  ;;  %v15523_v39 = vld [vmem:[#allocation13_spill] sm:$0xff]  ;;  %v15530_v60 = vld [vmem:[#allocation24_spill] sm:$0xff] }
 0x455   : > { %10333 = vrcp.f32 %v3359_v30  ;;  %v3560_v48 = vmul.f32 %v15524_v62, %v15523_v39  ;;  %v3564_v30 = vmul.f32 %v15524_v62, %v15530_v60  ;;  %v15545_v60 = vld [vmem:[#allocation38_spill] sm:$0xff] }
 0x456   : > { %8732 = vmatmul.mubr.f32.gmra.mrb[42].mxu1 %v3385_v2  ;;  %v9672_v2 = vpack.c.bf16 %v3581_v22, %v3580_v52 }
 0x458   : > { %v3361_v7 = vpop.xlane.xlu1 %3360  ;;  %v4321_v56 = vpop.xlane.xlu0 %4320 }
 0x459   : > { %10335 = vrcp.f32 %v3361_v7  ;;  %v3582_v7 = vmul.f32 %v15524_v62, %v15421_v11  ;;  %v15576_v11 = vld [vmem:[#allocation49_spill] sm:$0xff] }
 0x45a   : > { %v10330_v26 = vpop.eup %10329 }
 0x45b   : > { %v10332_v16 = vpop.eup %10331  ;;  %v3387_v25 = vmul.f32 %v10330_v26, %v12944_v42  ;;  %v3579_v42 = vmul.f32 %v15524_v62, %v15411_v8  ;;  %v3583_v26 = vmul.f32 %v15524_v62, %v15422_v44 }
 0x45c   : > { %v3389_v13 = vmul.f32 %v10332_v16, %v12946_v3  ;;  %v15526_v3 = vld [vmem:[#allocation20_spill] sm:$0xff]  ;;  %v4323_v44 = vpop.xlane.xlu1 %4322 }
 0x45d   : > { %8734 = vmatprep.mubr.f32.mxu1 %v3387_v25  ;;  %v3561_v1 = vmul.f32 %v15524_v62, %v15526_v3  ;;  %v15534_v25 = vld [vmem:[#allocation29_spill] sm:$0xff]  ;;  %v3586_v3 = vmul.f32 %v15524_v62, %v15429_v6 }
 0x45e   : > { %8735 = vmatmul.mubr.f32.gmra.mrb[44].mxu1 %v3389_v13  ;;  %v3566_v13 = vmul.f32 %v15524_v62, %v15534_v25  ;;  %v15549_v25 = vld [vmem:[#allocation40_spill] sm:$0xff] }
 0x45f   : > { %v10334_v37 = vpop.eup %10333 }
 0x460   : > { %v3391_v59 = vmul.f32 %v10334_v37, %v12954_v43  ;;  %v15527_v43 = vld [vmem:[#allocation21_spill] sm:$0xff]  ;;  %v9676_v37 = vpack.c.bf16 %v3583_v26, %v3582_v7 }
 0x461   : > { %v3562_v41 = vmul.f32 %v15524_v62, %v15527_v43  ;;  %v15541_v43 = vld [vmem:[#allocation34_spill] sm:$0xff] }
 0x462   : > { %8737 = vmatprep.mubr.f32.mxu1 %v3391_v59  ;;  %v3584_v59 = vmul.f32 %v15524_v62, %v15425_v19 }
 0x463   : > { %v10336_v32 = vpop.eup %10335 }
 0x464   : > { %v3393_v53 = vmul.f32 %v10336_v32, %v12972_v14  ;;  %v9668_v14 = vpack.c.bf16 %v3579_v42, %v3578_v46  ;;  %v3585_v32 = vmul.f32 %v15524_v62, %v15426_v23  ;;  %v15572_v23 = vld [vmem:[#allocation58_spill] sm:$0xff] }
 0x465   : > { %v13443_v19 = vadd.f32 %v12966_v18, %v15572_v23  ;;  %v15578_v23 = vld [vmem:[#allocation123_spill] sm:$0xff] }
 0x466   : > { %8738 = vmatmul.mubr.f32.gmra.mrb[46].mxu1 %v3393_v53  ;;  %v15537_v53 = vld [vmem:[#allocation32_spill] sm:$0xff]  ;;  %v9680_v42 = vpack.c.bf16 %v3585_v32, %v3584_v59 }
 0x467   : > { %8772 = vmatprep.mubr.msk.f32.mxu1 %vm15525_vm4, %v3560_v48  ;;  %v3567_v39 = vmul.f32 %v15524_v62, %v15537_v53  ;;  %v15538_v48 = vld [vmem:[#allocation33_spill] sm:$0xff]  ;;  %v15553_v53 = vld [vmem:[#allocation46_spill] sm:$0xff]  ;;  %15573 = vst [vmem:[#allocation4_spill] sm:$0xff] %v13443_v19  ;;  %vm15693_vm4 = vmmov %vm15167_vm0 }
 0x468   : > { %v3568_v46 = vmul.f32 %v15524_v62, %v15538_v48  ;;  %v15555_v48 = vld [vmem:[#allocation53_spill] sm:$0xff] }
 0x46a   : > { %8773 = vmatmul.mubr.msk.f32.vlgmr.msra.gmra.mrb[48].mxu1 %vm15167_vm0, %v3561_v1  ;;  %v3587_v1 = vmul.f32 %v15524_v62, %v15430_v5  ;;  %v15568_v5 = vld [vmem:[#allocation118_spill] sm:$0xff] }
 0x46b   : > { %9667 = vmatpush3.bf16.msra.mxu1 %v15522_v24  ;;  %8775 = vmatprep.mubr.msk.f32.mxu1 %vm15528_vm2, %v3562_v41  ;;  %v15533_v24 = vld [vmem:[#allocation28_spill] sm:$0xff]  ;;  %v3569_v41 = vmul.f32 %v15524_v62, %v15541_v43  ;;  %v13433_v6 = vadd.f32 %v13137_v61, %v15568_v5  ;;  %vm15694_vm2 = vmmov %vm15167_vm0 }
 0x46c   : > { %9669 = vmatprep.subr.bf16.mxu1 %v9668_v14  ;;  %v3565_v16 = vmul.f32 %v15524_v62, %v15533_v24  ;;  %v9684_v22 = vpack.c.bf16 %v3587_v1, %v3586_v3  ;;  %v3590_v24 = vmul.f32 %v15524_v62, %v15437_v49 }
 0x46d   : > { %15569 = vst [vmem:[#allocation72_spill] sm:$0xff] %v13433_v6 }
 0x46e   : > { %8776 = vmatmul.mubr.msk.f32.gmra.mrb[50].mxu1 %vm15531_vm3, %v3563_v50  ;;  %v3589_v50 = vmul.f32 %v15524_v62, %v15434_v20  ;;  %v15565_v20 = vld [vmem:[#allocation114_spill] sm:$0xff]  ;;  %vm15695_vm3 = vmmov %vm15167_vm0 }
 0x46f   : > { %9671 = vmatpush3.bf16.msra.mxu1 %v9668_v14  ;;  %8778 = vmatprep.mubr.msk.f32.mxu1 %vm15532_vm1, %v3564_v30  ;;  %v15542_v14 = vld [vmem:[#allocation35_spill] sm:$0xff]  ;;  %v3571_v30 = vmul.f32 %v15524_v62, %v15545_v60  ;;  %v13423_v15 = vadd.f32 %v13115_v33, %v15565_v20  ;;  %vm15696_vm1 = vmmov %vm15167_vm0 }
 0x470   : > { %9673 = vmatprep.subr.bf16.mxu1 %v9672_v2  ;;  %v3570_v52 = vmul.f32 %v15524_v62, %v15542_v14  ;;  %v9688_v26 = vpack.c.bf16 %v3589_v50, %v3588_v21 }
 0x472   : > { %8779 = vmatmul.mubr.msk.f32.gmra.mrb[52].mxu1 %vm15535_vm5, %v3565_v16  ;;  %v3591_v16 = vmul.f32 %v15524_v62, %v15438_v28  ;;  %v15563_v28 = vld [vmem:[#allocation110_spill] sm:$0xff]  ;;  %vm15697_vm5 = vmmov %vm15167_vm0 }
 0x473   : > { %9675 = vmatpush3.bf16.msra.mxu1 %v9672_v2  ;;  %8781 = vmatprep.mubr.msk.f32.mxu1 %vm15536_vm6, %v3566_v13  ;;  %v15546_v2 = vld [vmem:[#allocation39_spill] sm:$0xff]  ;;  %v3573_v13 = vmul.f32 %v15524_v62, %v15549_v25  ;;  %v13413_v49 = vadd.f32 %v13090_v17, %v15563_v28  ;;  %vm15698_vm6 = vmmov %vm15167_vm0 }
 0x474   : > { %9677 = vmatprep.subr.bf16.mxu1 %v9676_v37  ;;  %v3572_v7 = vmul.f32 %v15524_v62, %v15546_v2  ;;  %v9692_v32 = vpack.c.bf16 %v3591_v16, %v3590_v24 }
 0x476   : > { %8782 = vmatmul.mubr.msk.f32.gmra.mrb[54].mxu1 %vm15539_vm7, %v3567_v39  ;;  %v3575_v39 = vmul.f32 %v15524_v62, %v15553_v53  ;;  %vm15699_vm7 = vmmov %vm15167_vm0 }
 0x477   : > { %9679 = vmatpush3.bf16.msra.mxu1 %v9676_v37  ;;  %8784 = vmatprep.mubr.msk.f32.mxu1 %vm15540_vm8, %v3568_v46  ;;  %v15550_v37 = vld [vmem:[#allocation45_spill] sm:$0xff]  ;;  %vm15700_vm8 = vmmov %vm15167_vm0 }
 0x478   : > { %9681 = vmatprep.subr.bf16.mxu1 %v9680_v42  ;;  %v3574_v59 = vmul.f32 %v15524_v62, %v15550_v37 }
 0x47a   : > { %8785 = vmatmul.mubr.msk.f32.gmra.mrb[56].mxu1 %vm15543_vm9, %v3569_v41  ;;  %vm15701_vm9 = vmmov %vm15167_vm0 }
 0x47b   : > { %9683 = vmatpush3.bf16.msra.mxu1 %v9680_v42  ;;  %8787 = vmatprep.mubr.msk.f32.mxu1 %vm15544_vm10, %v3570_v52  ;;  %vm15702_vm10 = vmmov %vm15167_vm0 }
 0x47c   : > { %9685 = vmatprep.subr.bf16.mxu1 %v9684_v22 }
 0x47e   : > { %8788 = vmatmul.mubr.msk.f32.gmra.mrb[58].mxu1 %vm15547_vm11, %v3571_v30  ;;  %vm15703_vm11 = vmmov %vm15167_vm0 }
 0x47f   : > { %9687 = vmatpush3.bf16.msra.mxu1 %v9684_v22  ;;  %8790 = vmatprep.mubr.msk.f32.mxu1 %vm15548_vm12, %v3572_v7  ;;  %vm15704_vm12 = vmmov %vm15167_vm0 }
 0x480   : > { %9689 = vmatprep.subr.bf16.mxu1 %v9688_v26 }
 0x482   : > { %8791 = vmatmul.mubr.msk.f32.gmra.mrb[60].mxu1 %vm15551_vm13, %v3573_v13  ;;  %vm15705_vm13 = vmmov %vm15167_vm0 }
 0x483   : > { %9691 = vmatpush3.bf16.msra.mxu1 %v9688_v26  ;;  %8793 = vmatprep.mubr.msk.f32.mxu1 %vm15552_vm14, %v3574_v59  ;;  %vm15706_vm14 = vmmov %vm15167_vm0 }
 0x484   : > { %9693 = vmatprep.subr.bf16.mxu1 %v9692_v32 }
 0x486   : > { %8794 = vmatmul.mubr.msk.f32.gmra.mrb[62].mxu1 %vm15554_vm15, %v3575_v39  ;;  %vm15707_vm15 = vmmov %vm15167_vm0 }
 0x487   : > { %9695 = vmatpush3.bf16.msra.mxu1 %v9692_v32 }
 0x488   : > { %9745 = vmatprep.subr.bf16.mxu1 %v15555_v48  ;;  %v13453_v48 = vadd.f32 %v12994_v35, %v15576_v11 }
 0x48a   : > { %15577 = vst [vmem:[#allocation51_spill] sm:$0xff] %v13453_v48 }
 0x53d   : > { %v8774_v46 = vpop.f32.mrb[48].mxu1 }
 0x53e   : > { %v13314_v42 = vadd.f32 %v12985_v47, %v8774_v46  ;;  %v3706_v3 = vpop.f32.mrb[49].mxu1 }
 0x53f   : > { %v13317_v1 = vadd.f32 %v12966_v18, %v3706_v3  ;;  %v13460_v18 = vadd.f32 %v13037_v40, %v15578_v23 }
 0x540   : > { %3787 = vmax.xlane.f32.xlu1 %v13314_v42 }
 0x541   : > { %v8777_v43 = vpop.f32.mrb[50].mxu1  ;;  %3785 = vmax.xlane.f32.xlu0 %v13317_v1  ;;  %15579 = vst [vmem:[#allocation73_spill] sm:$0xff] %v13460_v18 }
 0x542   : > { %v13322_v62 = vadd.f32 %v13011_v10, %v8777_v43  ;;  %v3716_v41 = vpop.f32.mrb[51].mxu1 }
 0x543   : > { %v13325_v14 = vadd.f32 %v12994_v35, %v3716_v41  ;;  %v15582_v35 = vld [vmem:[#allocation125_spill] sm:$0xff] }
 0x544   : > { %3791 = vmax.xlane.f32.xlu1 %v13322_v62 }
 0x545   : > { %v8780_v52 = vpop.f32.mrb[52].mxu1  ;;  %3789 = vmax.xlane.f32.xlu0 %v13325_v14 }
 0x546   : > { %v13330_v22 = vadd.f32 %v13037_v40, %v8780_v52  ;;  %v3726_v21 = vpop.f32.mrb[53].mxu1 }
 0x547   : > { %v13333_v50 = vadd.f32 %v13020_v55, %v3726_v21 }
 0x548   : > { %3795 = vmax.xlane.f32.xlu1 %v13330_v22 }
 0x549   : > { %v8783_v60 = vpop.f32.mrb[54].mxu1  ;;  %3793 = vmax.xlane.f32.xlu0 %v13333_v50 }
 0x54a   : > { %v13338_v30 = vadd.f32 %v13059_v63, %v8783_v60  ;;  %v3736_v2 = vpop.f32.mrb[55].mxu1  ;;  %v15556_v60 = vld [vmem:[#allocation100_spill] sm:$0xff] }
 0x54b   : > { %v13341_v7 = vadd.f32 %v13046_v34, %v3736_v2  ;;  %v13379_v2 = vadd.f32 %v13037_v40, %v15556_v60  ;;  %v15561_v60 = vld [vmem:[#allocation108_spill] sm:$0xff]  ;;  %v13475_v40 = vadd.f32 %v13046_v34, %v15584_v36  ;;  %v15590_v36 = vld [vmem:[#allocation129_spill] sm:$0xff] }
 0x54c   : > { %3799 = vmax.xlane.f32.xlu1 %v13338_v30 }
 0x54d   : > { %v8786_v26 = vpop.f32.mrb[56].mxu1  ;;  %3797 = vmax.xlane.f32.xlu0 %v13341_v7  ;;  %15585 = vst [vmem:[#allocation82_spill] sm:$0xff] %v13475_v40 }
 0x54e   : > { %v13346_v24 = vadd.f32 %v13081_v12, %v8786_v26  ;;  %v3746_v16 = vpop.f32.mrb[57].mxu1  ;;  %v15557_v26 = vld [vmem:[#allocation101_spill] sm:$0xff] }
 0x54f   : > { %v13349_v25 = vadd.f32 %v13068_v0, %v3746_v16  ;;  %v13383_v16 = vadd.f32 %v13020_v55, %v15557_v26  ;;  %v13403_v26 = vadd.f32 %v13068_v0, %v15561_v60 }
 0x550   : > { %3803 = vmax.xlane.f32.xlu1 %v13346_v24 }
 0x551   : > { %v8789_v13 = vpop.f32.mrb[58].mxu1  ;;  %3801 = vmax.xlane.f32.xlu0 %v13349_v25 }
 0x552   : > { %v13354_v37 = vadd.f32 %v13106_v31, %v8789_v13  ;;  %v3756_v59 = vpop.f32.mrb[59].mxu1  ;;  %v15558_v13 = vld [vmem:[#allocation104_spill] sm:$0xff] }
 0x553   : > { %v13357_v32 = vadd.f32 %v13090_v17, %v3756_v59  ;;  %v13389_v59 = vadd.f32 %v13059_v63, %v15558_v13  ;;  %v15562_v13 = vld [vmem:[#allocation109_spill] sm:$0xff] }
 0x554   : > { %3807 = vmax.xlane.f32.xlu1 %v13354_v37 }
 0x555   : > { %v8792_v53 = vpop.f32.mrb[60].mxu1  ;;  %3805 = vmax.xlane.f32.xlu0 %v13357_v32 }
 0x556   : > { %v13362_v39 = vadd.f32 %v13128_v45, %v8792_v53  ;;  %v3766_v46 = vpop.f32.mrb[61].mxu1  ;;  %v15559_v53 = vld [vmem:[#allocation105_spill] sm:$0xff] }
 0x557   : > { %v13365_v3 = vadd.f32 %v13115_v33, %v3766_v46  ;;  %v13393_v46 = vadd.f32 %v13046_v34, %v15559_v53  ;;  %v13409_v53 = vadd.f32 %v13106_v31, %v15562_v13  ;;  %v15566_v13 = vld [vmem:[#allocation117_spill] sm:$0xff]  ;;  %v13491_v34 = vadd.f32 %v13106_v31, %v15590_v36 }
 0x558   : > { %3811 = vmax.xlane.f32.xlu1 %v13362_v39  ;;  %v13429_v28 = vadd.f32 %v13154_v27, %v15566_v13  ;;  %v15574_v13 = vld [vmem:[#allocation56_spill] sm:$0xff]  ;;  %v13507_v31 = vadd.f32 %v13128_v45, %v12816_v57 }
 0x559   : > { %v8795_v43 = vpop.f32.mrb[62].mxu1  ;;  %3809 = vmax.xlane.f32.xlu0 %v13365_v3  ;;  %v13449_v5 = vadd.f32 %v13011_v10, %v15574_v13  ;;  %v15580_v10 = vld [vmem:[#allocation124_spill] sm:$0xff]  ;;  %15591 = vst [vmem:[#allocation67_spill] sm:$0xff] %v13491_v34 }
 0x55a   : > { %v13370_v41 = vadd.f32 %v13154_v27, %v8795_v43  ;;  %v3776_v52 = vpop.f32.mrb[63].mxu1  ;;  %v15560_v43 = vld [vmem:[#allocation107_spill] sm:$0xff]  ;;  %15567 = vst [vmem:[#allocation84_spill] sm:$0xff] %v13429_v28  ;;  %v13465_v13 = vadd.f32 %v13020_v55, %v15580_v10  ;;  %v15588_v55 = vld [vmem:[#allocation128_spill] sm:$0xff]  ;;  %15596 = vst [vmem:[#allocation85_spill] sm:$0xff] %v13507_v31  ;;  %v13515_v10 = vpop.xlane.xlu1 %4326 }
 0x55b   : > { %v13373_v21 = vadd.f32 %v13137_v61, %v3776_v52  ;;  %v13399_v52 = vadd.f32 %v13081_v12, %v15560_v43  ;;  %v15564_v43 = vld [vmem:[#allocation113_spill] sm:$0xff]  ;;  %15575 = vst [vmem:[#allocation99_spill] sm:$0xff] %v13449_v5 }
 0x55c   : > { %3815 = vmax.xlane.f32.xlu1 %v13370_v41  ;;  %v13419_v60 = vadd.f32 %v13128_v45, %v15564_v43  ;;  %v15570_v43 = vld [vmem:[#allocation12_spill] sm:$0xff]  ;;  %15581 = vst [vmem:[#allocation78_spill] sm:$0xff] %v13465_v13 }
 0x55d   : > { %3813 = vmax.xlane.f32.xlu0 %v13373_v21  ;;  %v13439_v20 = vadd.f32 %v12985_v47, %v15570_v43  ;;  %v4353_v47 = vsub.f32 %v12989_v38, %v4323_v44  ;;  %v4352_v43 = vsub.f32 %v12970_v51, %v4321_v56  ;;  %v13471_v44 = vadd.f32 %v13059_v63, %v15582_v35  ;;  %v15586_v56 = vld [vmem:[#allocation127_spill] sm:$0xff]  ;;  %v15592_v63 = vld [vmem:[#allocation130_spill] sm:$0xff] }
 0x55e   : > { %v13481_v51 = vadd.f32 %v13081_v12, %v15586_v56  ;;  %v13495_v23 = vadd.f32 %v13090_v17, %v15592_v63  ;;  %v13519_v35 = vpop.xlane.xlu1 %4330 }
 0x55f   : > { %15571 = vst [vmem:[#allocation71_spill] sm:$0xff] %v13439_v20  ;;  %v4370_v11 = vmul.f32 1.442695, %v4353_v47  ;;  %15583 = vst [vmem:[#allocation77_spill] sm:$0xff] %v13471_v44  ;;  %v4368_v38 = vmul.f32 1.442695, %v4352_v43  ;;  %v13485_v47 = vadd.f32 %v13068_v0, %v15588_v55 }
 0x560   : > { %4865 = vmax.xlane.f32.xlu1 %v13379_v2  ;;  %15587 = vst [vmem:[#allocation102_spill] sm:$0xff] %v13481_v51  ;;  %15593 = vst [vmem:[#allocation86_spill] sm:$0xff] %v13495_v23  ;;  %v15597_v43 = vld [vmem:[#allocation131_spill] sm:$0xff] }
 0x561   : > { %4863 = vmax.xlane.f32.xlu0 %v13383_v16  ;;  %10337 = vpow2.f32 %v4370_v11  ;;  %15589 = vst [vmem:[#allocation103_spill] sm:$0xff] %v13485_v47  ;;  %v13511_v17 = vadd.f32 %v13115_v33, %v15597_v43  ;;  %v13517_v11 = vpop.xlane.xlu0 %4324 }
 0x562   : > { %10339 = vpow2.f32 %v4368_v38  ;;  %v13523_v56 = vpop.xlane.xlu1 %4334 }
 0x563   : > { %15598 = vst [vmem:[#allocation90_spill] sm:$0xff] %v13511_v17 }
 0x564   : > { %4869 = vmax.xlane.f32.xlu1 %v13389_v59 }
 0x565   : > { %4867 = vmax.xlane.f32.xlu0 %v13393_v46  ;;  %v13521_v38 = vpop.xlane.xlu0 %4328 }
 0x566   : > { %v13527_v45 = vpop.xlane.xlu1 %4338 }
 0x568   : > { %4873 = vmax.xlane.f32.xlu1 %v13399_v52 }
 0x569   : > { %4871 = vmax.xlane.f32.xlu0 %v13403_v26  ;;  %v13525_v57 = vpop.xlane.xlu0 %4332 }
 0x56a   : > { %v13531_v55 = vpop.xlane.xlu1 %4342 }
 0x56b   : > { %v13499_v12 = vpop.eup %10337 }
 0x56c   : > { %4877 = vmax.xlane.f32.xlu1 %v13409_v53  ;;  %15594 = vst [vmem:[#allocation79_spill] sm:$0xff] %v13499_v12  ;;  %v13501_v0 = vpop.eup %10339 }
 0x56d   : > { %4875 = vmax.xlane.f32.xlu0 %v13413_v49  ;;  %15595 = vst [vmem:[#allocation106_spill] sm:$0xff] %v13501_v0  ;;  %v13529_v33 = vpop.xlane.xlu0 %4336 }
 0x56e   : > { %v13535_v63 = vpop.xlane.xlu1 %4346 }
 0x570   : > { %4881 = vmax.xlane.f32.xlu1 %v13419_v60 }
 0x571   : > { %4879 = vmax.xlane.f32.xlu0 %v13423_v15  ;;  %v13533_v36 = vpop.xlane.xlu0 %4340 }
 0x574   : > { %4885 = vmax.xlane.f32.xlu1 %v13429_v28 }
 0x575   : > { %4883 = vmax.xlane.f32.xlu0 %v13433_v6  ;;  %v13537_v43 = vpop.xlane.xlu0 %4344 }
 0x578   : > { %5392 = vmax.xlane.f32.xlu1 %v13439_v20 }
 0x579   : > { %5390 = vmax.xlane.f32.xlu0 %v13443_v19 }
 0x57c   : > { %5396 = vmax.xlane.f32.xlu1 %v13449_v5 }
 0x57d   : > { %5394 = vmax.xlane.f32.xlu0 %v13453_v48 }
 0x580   : > { %5400 = vmax.xlane.f32.xlu1 %v13460_v18 }
 0x581   : > { %5398 = vmax.xlane.f32.xlu0 %v13465_v13 }
 0x584   : > { %5404 = vmax.xlane.f32.xlu1 %v13471_v44 }
 0x585   : > { %5402 = vmax.xlane.f32.xlu0 %v13475_v40 }
 0x588   : > { %5408 = vmax.xlane.f32.xlu1 %v13481_v51 }
 0x589   : > { %5406 = vmax.xlane.f32.xlu0 %v13485_v47 }
 0x58c   : > { %5412 = vmax.xlane.f32.xlu1 %v13491_v34 }
 0x58d   : > { %5410 = vmax.xlane.f32.xlu0 %v13495_v23 }
 0x590   : > { %4402 = vadd.xlane.f32.xlu1 %v13499_v12  ;;  %v13539_v12 = vpop.xlane.xlu1 %4350 }
 0x591   : > { %4400 = vadd.xlane.f32.xlu0 %v13501_v0  ;;  %v13541_v0 = vpop.xlane.xlu0 %4348 }
 0x594   : > { %5416 = vmax.xlane.f32.xlu1 %v13507_v31  ;;  %v13543_v8 = vpop.xlane.xlu1 %4857 }
 0x595   : > { %5414 = vmax.xlane.f32.xlu0 %v13511_v17  ;;  %v13545_v9 = vpop.xlane.xlu0 %4855 }
 0x598   : > { %v13547_v17 = vpop.xlane.xlu1 %4861 }
 0x599   : > { %v13549_v31 = vpop.xlane.xlu0 %4859 }
 0x5cd   : > { %v3788_v23 = vpop.xlane.xlu1 %3787 }
 0x5ce   : > { %v3818_v34 = vsub.f32 %v13314_v42, %v3788_v23  ;;  %v3786_v47 = vpop.xlane.xlu0 %3785 }
 0x5cf   : > { %v3817_v51 = vsub.f32 %v13317_v1, %v3786_v47 }
 0x5d0   : > { %v3835_v40 = vmul.f32 1.442695, %v3818_v34 }
 0x5d1   : > { %v3833_v44 = vmul.f32 1.442695, %v3817_v51  ;;  %v3792_v13 = vpop.xlane.xlu1 %3791 }
 0x5d2   : > { %10341 = vpow2.f32 %v3835_v40  ;;  %v3820_v18 = vsub.f32 %v13322_v62, %v3792_v13  ;;  %v3790_v48 = vpop.xlane.xlu0 %3789 }
 0x5d3   : > { %10343 = vpow2.f32 %v3833_v44  ;;  %v3819_v5 = vsub.f32 %v13325_v14, %v3790_v48 }
 0x5d4   : > { %v3839_v19 = vmul.f32 1.442695, %v3820_v18 }
 0x5d5   : > { %v3837_v20 = vmul.f32 1.442695, %v3819_v5  ;;  %v3796_v6 = vpop.xlane.xlu1 %3795 }
 0x5d6   : > { %10345 = vpow2.f32 %v3839_v19  ;;  %v3822_v28 = vsub.f32 %v13330_v22, %v3796_v6  ;;  %v3794_v42 = vpop.xlane.xlu0 %3793 }
 0x5d7   : > { %10347 = vpow2.f32 %v3837_v20  ;;  %v3821_v1 = vsub.f32 %v13333_v50, %v3794_v42 }
 0x5d8   : > { %v3843_v47 = vmul.f32 1.442695, %v3822_v28 }
 0x5d9   : > { %v3841_v51 = vmul.f32 1.442695, %v3821_v1  ;;  %v3800_v34 = vpop.xlane.xlu1 %3799 }
 0x5da   : > { %10349 = vpow2.f32 %v3843_v47  ;;  %v3824_v62 = vsub.f32 %v13338_v30, %v3800_v34  ;;  %v3798_v13 = vpop.xlane.xlu0 %3797 }
 0x5db   : > { %10351 = vpow2.f32 %v3841_v51  ;;  %v3823_v48 = vsub.f32 %v13341_v7, %v3798_v13 }
 0x5dc   : > { %v13559_v14 = vpop.eup %10341  ;;  %v3847_v5 = vmul.f32 1.442695, %v3824_v62 }
 0x5dd   : > { %v13561_v19 = vpop.eup %10343  ;;  %v3845_v6 = vmul.f32 1.442695, %v3823_v48  ;;  %v3804_v22 = vpop.xlane.xlu1 %3803  ;;  %3867 = vadd.xlane.f32.xlu1 %v13559_v14 }
 0x5de   : > { %10353 = vpow2.f32 %v3847_v5  ;;  %v3826_v50 = vsub.f32 %v13346_v24, %v3804_v22  ;;  %3865 = vadd.xlane.f32.xlu0 %v13561_v19  ;;  %v3802_v28 = vpop.xlane.xlu0 %3801 }
 0x5df   : > { %10355 = vpow2.f32 %v3845_v6  ;;  %v3825_v30 = vsub.f32 %v13349_v25, %v3802_v28 }
 0x5e0   : > { %v13567_v20 = vpop.eup %10345  ;;  %v3851_v7 = vmul.f32 1.442695, %v3826_v50  ;;  %v4355_v50 = vsub.f32 %v13015_v4, %v13515_v10 }
 0x5e1   : > { %v13569_v18 = vpop.eup %10347  ;;  %v3849_v44 = vmul.f32 1.442695, %v3825_v30  ;;  %v3808_v40 = vpop.xlane.xlu1 %3807  ;;  %3871 = vadd.xlane.f32.xlu1 %v13567_v20 }
 0x5e2   : > { %10357 = vpow2.f32 %v3851_v7  ;;  %v3828_v23 = vsub.f32 %v13354_v37, %v3808_v40  ;;  %3869 = vadd.xlane.f32.xlu0 %v13569_v18  ;;  %v3806_v24 = vpop.xlane.xlu0 %3805  ;;  %v4374_v4 = vmul.f32 1.442695, %v4355_v50 }
 0x5e3   : > { %10359 = vpow2.f32 %v3849_v44  ;;  %v3827_v42 = vsub.f32 %v13357_v32, %v3806_v24 }
 0x5e4   : > { %v13575_v1 = vpop.eup %10349  ;;  %v3855_v25 = vmul.f32 1.442695, %v3828_v23 }
 0x5e5   : > { %v13577_v47 = vpop.eup %10351  ;;  %v3853_v51 = vmul.f32 1.442695, %v3827_v42  ;;  %v3812_v34 = vpop.xlane.xlu1 %3811  ;;  %3875 = vadd.xlane.f32.xlu1 %v13575_v1  ;;  %v4356_v42 = vsub.f32 %v13024_v54, %v13521_v38 }
 0x5e6   : > { %10361 = vpow2.f32 %v3855_v25  ;;  %v3830_v62 = vsub.f32 %v13362_v39, %v3812_v34  ;;  %3873 = vadd.xlane.f32.xlu0 %v13577_v47  ;;  %v3810_v37 = vpop.xlane.xlu0 %3809 }
 0x5e7   : > { %10363 = vpow2.f32 %v3853_v51  ;;  %v3829_v13 = vsub.f32 %v13365_v3, %v3810_v37  ;;  %v4354_v3 = vsub.f32 %v12998_v58, %v13517_v11 }
 0x5e8   : > { %v13583_v48 = vpop.eup %10353  ;;  %v3859_v32 = vmul.f32 1.442695, %v3830_v62  ;;  %v15599_v62 = vld [vmem:[#allocation50_spill] sm:$0xff] }
 0x5e9   : > { %v13585_v5 = vpop.eup %10355  ;;  %v3857_v6 = vmul.f32 1.442695, %v3829_v13  ;;  %3879 = vadd.xlane.f32.xlu1 %v13583_v48  ;;  %v3816_v22 = vpop.xlane.xlu1 %3815  ;;  %v4359_v37 = vsub.f32 %v15599_v62, %v13523_v56  ;;  %v15601_v56 = vld [vmem:[#allocation88_spill] sm:$0xff] }
 0x5ea   : > { %10365 = vpow2.f32 %v3859_v32  ;;  %v3832_v39 = vsub.f32 %v13370_v41, %v3816_v22  ;;  %3877 = vadd.xlane.f32.xlu0 %v13585_v5  ;;  %v3814_v28 = vpop.xlane.xlu0 %3813  ;;  %v4372_v41 = vmul.f32 1.442695, %v4354_v3  ;;  %v4361_v50 = vsub.f32 %v15601_v56, %v13527_v45 }
 0x5eb   : > { %10367 = vpow2.f32 %v3857_v6  ;;  %v3831_v30 = vsub.f32 %v13373_v21, %v3814_v28  ;;  %v4357_v21 = vsub.f32 %v13041_v29, %v13519_v35  ;;  %v4376_v29 = vmul.f32 1.442695, %v4356_v42  ;;  %v15600_v35 = vld [vmem:[#allocation83_spill] sm:$0xff] }
 0x5ec   : > { %v13595_v7 = vpop.eup %10357  ;;  %v3863_v44 = vmul.f32 1.442695, %v3832_v39  ;;  %v4358_v13 = vsub.f32 %v15600_v35, %v13525_v57  ;;  %v4382_v22 = vmul.f32 1.442695, %v4359_v37  ;;  %v15602_v57 = vld [vmem:[#allocation66_spill] sm:$0xff]  ;;  %v15606_v37 = vld [vmem:[#allocation133_spill] sm:$0xff] }
 0x5ed   : > { %v13597_v40 = vpop.eup %10359  ;;  %v3861_v23 = vmul.f32 1.442695, %v3831_v30  ;;  %3883 = vadd.xlane.f32.xlu1 %v13595_v7  ;;  %v13605_v11 = vpop.xlane.xlu1 %4865  ;;  %v4378_v34 = vmul.f32 1.442695, %v4357_v21  ;;  %v4360_v28 = vsub.f32 %v15602_v57, %v13529_v33  ;;  %v15604_v21 = vld [vmem:[#allocation132_spill] sm:$0xff]  ;;  %v15607_v35 = vld [vmem:[#allocation61_spill] sm:$0xff] }
 0x5ee   : > { %10369 = vpow2.f32 %v3863_v44  ;;  %3881 = vadd.xlane.f32.xlu0 %v13597_v40  ;;  %v13610_v24 = vpop.xlane.xlu0 %4863  ;;  %v4380_v39 = vmul.f32 1.442695, %v4358_v13  ;;  %v13653_v33 = vadd.f32 %v13154_v27, %v15604_v21  ;;  %v4365_v13 = vsub.f32 %v15607_v35, %v13535_v63  ;;  %v15609_v63 = vld [vmem:[#allocation63_spill] sm:$0xff] }
 0x5ef   : > { %10371 = vpow2.f32 %v3861_v23  ;;  %v4386_v23 = vmul.f32 1.442695, %v4361_v50  ;;  %v4384_v42 = vmul.f32 1.442695, %v4360_v28  ;;  %v4367_v28 = vsub.f32 %v15609_v63, %v13539_v12  ;;  %v15614_v63 = vld [vmem:[#allocation64_spill] sm:$0xff] }
 0x5f0   : > { %v13601_v10 = vpop.eup %10361  ;;  %10373 = vpow2.f32 %v4374_v4  ;;  %v15603_v4 = vld [vmem:[#allocation3_spill] sm:$0xff]  ;;  %v4394_v57 = vmul.f32 1.442695, %v4365_v13 }
 0x5f1   : > { %v13603_v58 = vpop.eup %10363  ;;  %3887 = vadd.xlane.f32.xlu1 %v13601_v10  ;;  %10375 = vpow2.f32 %v4372_v41  ;;  %v13625_v32 = vpop.xlane.xlu1 %4869  ;;  %v4363_v45 = vsub.f32 %v15603_v4, %v13531_v55 }
 0x5f2   : > { %3885 = vadd.xlane.f32.xlu0 %v13603_v58  ;;  %v13629_v54 = vpop.xlane.xlu0 %4867  ;;  %10377 = vpow2.f32 %v4378_v34  ;;  %v15605_v34 = vld [vmem:[#allocation59_spill] sm:$0xff] }
 0x5f3   : > { %10379 = vpow2.f32 %v4376_v29  ;;  %v4362_v62 = vsub.f32 %v15605_v34, %v13533_v36  ;;  %v13659_v29 = vadd.f32 %v13137_v61, %v15606_v37  ;;  %v4390_v55 = vmul.f32 1.442695, %v4363_v45 }
 0x5f4   : > { %v13615_v25 = vpop.eup %10365  ;;  %10381 = vpow2.f32 %v4382_v22  ;;  %v15608_v22 = vld [vmem:[#allocation57_spill] sm:$0xff]  ;;  %v4398_v34 = vmul.f32 1.442695, %v4367_v28  ;;  %v4889_v28 = vsub.f32 %v15614_v63, %v13549_v31  ;;  %v4891_v31 = vsub.f32 %v13383_v16, %v13610_v24 }
 0x5f5   : > { %v13617_v51 = vpop.eup %10367  ;;  %3891 = vadd.xlane.f32.xlu1 %v13615_v25  ;;  %v13643_v44 = vpop.xlane.xlu1 %4873  ;;  %10383 = vpow2.f32 %v4380_v39  ;;  %v4388_v27 = vmul.f32 1.442695, %v4362_v62  ;;  %v4364_v56 = vsub.f32 %v15608_v22, %v13537_v43  ;;  %v15610_v43 = vld [vmem:[#allocation60_spill] sm:$0xff]  ;;  %v15611_v62 = vld [vmem:[#allocation65_spill] sm:$0xff]  ;;  %v4893_v16 = vsub.f32 %v13393_v46, %v13629_v54 }
 0x5f6   : > { %3889 = vadd.xlane.f32.xlu0 %v13617_v51  ;;  %v13648_v41 = vpop.xlane.xlu0 %4871  ;;  %10385 = vpow2.f32 %v4386_v23  ;;  %v4366_v4 = vsub.f32 %v15610_v43, %v13541_v0  ;;  %v4888_v12 = vsub.f32 %v15611_v62, %v13543_v8  ;;  %v15612_v0 = vld [vmem:[#allocation62_spill] sm:$0xff]  ;;  %v4907_v62 = vmul.f32 1.442695, %v4889_v28 }
 0x5f7   : > { %10387 = vpow2.f32 %v4384_v42  ;;  %v4392_v23 = vmul.f32 1.442695, %v4364_v56  ;;  %v4887_v35 = vsub.f32 %v15612_v0, %v13545_v9  ;;  %v15613_v56 = vld [vmem:[#allocation87_spill] sm:$0xff] }
 0x5f8   : > { %v13627_v6 = vpop.eup %10369  ;;  %10389 = vpow2.f32 %v4390_v55  ;;  %v4396_v55 = vmul.f32 1.442695, %v4366_v4  ;;  %v4905_v22 = vmul.f32 1.442695, %v4888_v12  ;;  %v4890_v8 = vsub.f32 %v15613_v56, %v13547_v17 }
 0x5f9   : > { %v13631_v38 = vpop.eup %10371  ;;  %3895 = vadd.xlane.f32.xlu1 %v13627_v6  ;;  %v13667_v50 = vpop.xlane.xlu1 %4877  ;;  %10391 = vpow2.f32 %v4388_v27  ;;  %v4892_v17 = vsub.f32 %v13379_v2, %v13605_v11  ;;  %v4894_v2 = vsub.f32 %v13389_v59, %v13625_v32  ;;  %v4896_v59 = vsub.f32 %v13399_v52, %v13643_v44 }
 0x5fa   : > { %3893 = vadd.xlane.f32.xlu0 %v13631_v38  ;;  %v13639_v3 = vpop.eup %10373  ;;  %v13671_v61 = vpop.xlane.xlu0 %4875  ;;  %10393 = vpow2.f32 %v4394_v57  ;;  %v4903_v57 = vmul.f32 1.442695, %v4887_v35  ;;  %v4915_v32 = vmul.f32 1.442695, %v4893_v16  ;;  %v4898_v52 = vsub.f32 %v13409_v53, %v13667_v50  ;;  %v15615_v16 = vld [vmem:[#allocation84_spill] sm:$0xff] }
 0x5fb   : > { %v13641_v30 = vpop.eup %10375  ;;  %10395 = vpow2.f32 %v4392_v23  ;;  %v4913_v35 = vmul.f32 1.442695, %v4892_v17 }
 0x5fc   : > { %v13669_v36 = vpop.eup %10377  ;;  %10397 = vpow2.f32 %v4398_v34  ;;  %v4909_v34 = vmul.f32 1.442695, %v4890_v8  ;;  %v4917_v8 = vmul.f32 1.442695, %v4894_v2 }
 0x5fd   : > { %4406 = vadd.xlane.f32.xlu1 %v13639_v3  ;;  %v13673_v39 = vpop.eup %10379  ;;  %v13685_v42 = vpop.xlane.xlu1 %4881  ;;  %10399 = vpow2.f32 %v4396_v55 }
 0x5fe   : > { %4404 = vadd.xlane.f32.xlu0 %v13641_v30  ;;  %v13681_v45 = vpop.eup %10381  ;;  %v13690_v37 = vpop.xlane.xlu0 %4879  ;;  %10401 = vpow2.f32 %v4905_v22  ;;  %v4911_v22 = vmul.f32 1.442695, %v4891_v31  ;;  %v4925_v31 = vmul.f32 1.442695, %v4898_v52  ;;  %v15617_v52 = vld [vmem:[#allocation71_spill] sm:$0xff] }
 0x5ff   : > { %v13683_v21 = vpop.eup %10383  ;;  %10403 = vpow2.f32 %v4903_v57  ;;  %v4895_v57 = vsub.f32 %v13403_v26, %v13648_v41  ;;  %v4897_v26 = vsub.f32 %v13413_v49, %v13671_v61  ;;  %v4899_v49 = vsub.f32 %v13423_v15, %v13690_v37 }
 0x600   : > { %v13695_v13 = vpop.eup %10385  ;;  %10405 = vpow2.f32 %v4909_v34  ;;  %v4921_v34 = vmul.f32 1.442695, %v4896_v59 }
 0x601   : > { %5420 = vmax.xlane.f32.xlu1 %v13653_v33  ;;  %v13697_v27 = vpop.eup %10387  ;;  %v13705_v23 = vpop.xlane.xlu1 %4885  ;;  %10407 = vpow2.f32 %v4907_v62  ;;  %v4919_v44 = vmul.f32 1.442695, %v4895_v57  ;;  %v4923_v50 = vmul.f32 1.442695, %v4897_v26  ;;  %v15618_v26 = vld [vmem:[#allocation4_spill] sm:$0xff] }
 0x602   : > { %5418 = vmax.xlane.f32.xlu0 %v13659_v29  ;;  %v13707_v9 = vpop.eup %10389  ;;  %v13709_v43 = vpop.xlane.xlu0 %4883  ;;  %10409 = vpow2.f32 %v4913_v35  ;;  %v4900_v35 = vsub.f32 %v13419_v60, %v13685_v42  ;;  %v4927_v60 = vmul.f32 1.442695, %v4899_v49  ;;  %v15616_v42 = vld [vmem:[#allocation72_spill] sm:$0xff] }
 0x603   : > { %v13711_v4 = vpop.eup %10391  ;;  %10411 = vpow2.f32 %v4911_v22  ;;  %v4901_v59 = vsub.f32 %v15616_v42, %v13709_v43 }
 0x604   : > { %v13719_v12 = vpop.eup %10393  ;;  %10413 = vpow2.f32 %v4917_v8  ;;  %v4929_v22 = vmul.f32 1.442695, %v4900_v35  ;;  %v4902_v8 = vsub.f32 %v15615_v16, %v13705_v23 }
 0x605   : > { %4410 = vadd.xlane.f32.xlu1 %v13669_v36  ;;  %v13721_v55 = vpop.eup %10395  ;;  %v13723_v0 = vpop.xlane.xlu1 %5392  ;;  %10415 = vpow2.f32 %v4915_v32 }
 0x606   : > { %4408 = vadd.xlane.f32.xlu0 %v13673_v39  ;;  %v13728_v11 = vpop.xlane.xlu0 %5390  ;;  %v13733_v24 = vpop.eup %10397  ;;  %10417 = vpow2.f32 %v4921_v34  ;;  %v4933_v34 = vmul.f32 1.442695, %v4902_v8  ;;  %v5423_v23 = vsub.f32 %v15617_v52, %v13723_v0 }
 0x607   : > { %v13735_v56 = vpop.eup %10399  ;;  %10419 = vpow2.f32 %v4919_v44  ;;  %v4931_v44 = vmul.f32 1.442695, %v4901_v59  ;;  %v5422_v43 = vsub.f32 %v15618_v26, %v13728_v11  ;;  %v15624_v26 = vld [vmem:[#allocation78_spill] sm:$0xff] }
 0x608   : > { %v13743_v46 = vpop.eup %10401  ;;  %10421 = vpow2.f32 %v4925_v31  ;;  %v5440_v49 = vmul.f32 1.442695, %v5423_v23 }
 0x609   : > { %4414 = vadd.xlane.f32.xlu1 %v13681_v45  ;;  %v5397_v63 = vpop.xlane.xlu1 %5396  ;;  %v13747_v28 = vpop.eup %10403  ;;  %10423 = vpow2.f32 %v4923_v50  ;;  %v5438_v0 = vmul.f32 1.442695, %v5422_v43 }
 0x60a   : > { %4412 = vadd.xlane.f32.xlu0 %v13683_v21  ;;  %v13745_v54 = vpop.xlane.xlu0 %5394  ;;  %v13755_v41 = vpop.eup %10405  ;;  %10425 = vpow2.f32 %v4929_v22  ;;  %v15619_v22 = vld [vmem:[#allocation99_spill] sm:$0xff] }
 0x60b   : > { %v13757_v17 = vpop.eup %10407  ;;  %10427 = vpow2.f32 %v4927_v60  ;;  %v5425_v16 = vsub.f32 %v15619_v22, %v5397_v63  ;;  %v15620_v60 = vld [vmem:[#allocation51_spill] sm:$0xff] }
 0x60c   : > { %v13765_v61 = vpop.eup %10409  ;;  %10429 = vpow2.f32 %v4933_v34  ;;  %v5424_v42 = vsub.f32 %v15620_v60, %v13745_v54  ;;  %v15623_v34 = vld [vmem:[#allocation73_spill] sm:$0xff] }
 0x60d   : > { %4418 = vadd.xlane.f32.xlu1 %v13695_v13  ;;  %v5401_v62 = vpop.xlane.xlu1 %5400  ;;  %v13767_v2 = vpop.eup %10411  ;;  %10431 = vpow2.f32 %v4931_v44  ;;  %v5444_v52 = vmul.f32 1.442695, %v5425_v16 }
 0x60e   : > { %4416 = vadd.xlane.f32.xlu0 %v13697_v27  ;;  %v5399_v53 = vpop.xlane.xlu0 %5398  ;;  %v13775_v15 = vpop.eup %10413  ;;  %10433 = vpow2.f32 %v5440_v49  ;;  %v5427_v23 = vsub.f32 %v15623_v34, %v5401_v62  ;;  %v5442_v63 = vmul.f32 1.442695, %v5424_v42  ;;  %v15627_v49 = vld [vmem:[#allocation77_spill] sm:$0xff] }
 0x60f   : > { %v13777_v57 = vpop.eup %10415  ;;  %10435 = vpow2.f32 %v5438_v0  ;;  %v5426_v44 = vsub.f32 %v15624_v26, %v5399_v53  ;;  %v15628_v0 = vld [vmem:[#allocation82_spill] sm:$0xff] }
 0x610   : > { %v13785_v31 = vpop.eup %10417  ;;  %10437 = vpow2.f32 %v5444_v52  ;;  %v15631_v52 = vld [vmem:[#allocation102_spill] sm:$0xff] }
 0x611   : > { %4422 = vadd.xlane.f32.xlu1 %v13707_v9  ;;  %v5405_v32 = vpop.xlane.xlu1 %5404  ;;  %v13787_v35 = vpop.eup %10419  ;;  %10439 = vpow2.f32 %v5442_v63  ;;  %v5446_v62 = vmul.f32 1.442695, %v5426_v44  ;;  %v15632_v63 = vld [vmem:[#allocation103_spill] sm:$0xff] }
 0x612   : > { %4420 = vadd.xlane.f32.xlu0 %v13711_v4  ;;  %v5403_v37 = vpop.xlane.xlu0 %5402  ;;  %v13794_v11 = vpop.eup %10421  ;;  %v5429_v16 = vsub.f32 %v15627_v49, %v5405_v32 }
 0x613   : > { %15621 = vst [vmem:[#allocation80_spill] sm:$0xff] %v13794_v11  ;;  %v13796_v59 = vpop.eup %10423  ;;  %v5428_v42 = vsub.f32 %v15628_v0, %v5403_v37 }
 0x614   : > { %15622 = vst [vmem:[#allocation81_spill] sm:$0xff] %v13796_v59  ;;  %v13802_v22 = vpop.eup %10425 }
 0x615   : > { %4426 = vadd.xlane.f32.xlu1 %v13719_v12  ;;  %v5409_v50 = vpop.xlane.xlu1 %5408  ;;  %15625 = vst [vmem:[#allocation89_spill] sm:$0xff] %v13802_v22  ;;  %v13804_v60 = vpop.eup %10427  ;;  %v5450_v32 = vmul.f32 1.442695, %v5428_v42 }
 0x616   : > { %4424 = vadd.xlane.f32.xlu0 %v13721_v55  ;;  %v5407_v8 = vpop.xlane.xlu0 %5406  ;;  %15626 = vst [vmem:[#allocation68_spill] sm:$0xff] %v13804_v60  ;;  %v13810_v34 = vpop.eup %10429 }
 0x617   : > { %15629 = vst [vmem:[#allocation111_spill] sm:$0xff] %v13810_v34  ;;  %v13812_v53 = vpop.eup %10431  ;;  %v5430_v37 = vsub.f32 %v15632_v63, %v5407_v8 }
 0x618   : > { %15630 = vst [vmem:[#allocation112_spill] sm:$0xff] %v13812_v53  ;;  %v13822_v44 = vpop.eup %10433 }
 0x619   : > { %4430 = vadd.xlane.f32.xlu1 %v13733_v24  ;;  %v5413_v43 = vpop.xlane.xlu1 %5412  ;;  %15633 = vst [vmem:[#allocation91_spill] sm:$0xff] %v13822_v44  ;;  %v13824_v49 = vpop.eup %10435 }
 0x61a   : > { %4428 = vadd.xlane.f32.xlu0 %v13735_v56  ;;  %v5411_v54 = vpop.xlane.xlu0 %5410  ;;  %15634 = vst [vmem:[#allocation92_spill] sm:$0xff] %v13824_v49  ;;  %v13830_v42 = vpop.eup %10437 }
 0x61b   : > { %15637 = vst [vmem:[#allocation115_spill] sm:$0xff] %v13830_v42  ;;  %v13832_v63 = vpop.eup %10439 }
 0x61c   : > { %15638 = vst [vmem:[#allocation116_spill] sm:$0xff] %v13832_v63 }
 0x61d   : > { %4937 = vadd.xlane.f32.xlu1 %v13743_v46  ;;  %v13814_v26 = vpop.xlane.xlu1 %4402 }
 0x61e   : > { %4935 = vadd.xlane.f32.xlu0 %v13747_v28 }
 0x621   : > { %4941 = vadd.xlane.f32.xlu1 %v13755_v41 }
 0x622   : > { %4939 = vadd.xlane.f32.xlu0 %v13757_v17 }
 0x625   : > { %4945 = vadd.xlane.f32.xlu1 %v13765_v61 }
 0x626   : > { %4943 = vadd.xlane.f32.xlu0 %v13767_v2 }
 0x629   : > { %4949 = vadd.xlane.f32.xlu1 %v13775_v15 }
 0x62a   : > { %4947 = vadd.xlane.f32.xlu0 %v13777_v57 }
 0x62d   : > { %4953 = vadd.xlane.f32.xlu1 %v13785_v31 }
 0x62e   : > { %4951 = vadd.xlane.f32.xlu0 %v13787_v35 }
 0x631   : > { %4957 = vadd.xlane.f32.xlu1 %v13794_v11  ;;  %v5448_v11 = vmul.f32 1.442695, %v5427_v23  ;;  %v5431_v23 = vsub.f32 %v15631_v52, %v5409_v50  ;;  %v5454_v50 = vmul.f32 1.442695, %v5430_v37  ;;  %v15636_v52 = vld [vmem:[#allocation86_spill] sm:$0xff] }
 0x632   : > { %4955 = vadd.xlane.f32.xlu0 %v13796_v59  ;;  %v13818_v59 = vpop.xlane.xlu0 %4400 }
 0x633   : > { %10441 = vpow2.f32 %v5448_v11  ;;  %v5456_v0 = vmul.f32 1.442695, %v5431_v23  ;;  %v15635_v11 = vld [vmem:[#allocation67_spill] sm:$0xff] }
 0x634   : > { %10443 = vpow2.f32 %v5446_v62  ;;  %v5417_v62 = vpop.xlane.xlu1 %5416 }
 0x635   : > { %4961 = vadd.xlane.f32.xlu1 %v13802_v22  ;;  %v5452_v22 = vmul.f32 1.442695, %v5429_v16  ;;  %v5433_v16 = vsub.f32 %v15635_v11, %v5413_v43 }
 0x636   : > { %4959 = vadd.xlane.f32.xlu0 %v13804_v60  ;;  %v5415_v8 = vpop.xlane.xlu0 %5414 }
 0x637   : > { %10445 = vpow2.f32 %v5452_v22  ;;  %v15639_v22 = vld [vmem:[#allocation85_spill] sm:$0xff] }
 0x638   : > { %10447 = vpow2.f32 %v5450_v32  ;;  %v5435_v23 = vsub.f32 %v15639_v22, %v5417_v62  ;;  %v15640_v32 = vld [vmem:[#allocation90_spill] sm:$0xff] }
 0x639   : > { %4965 = vadd.xlane.f32.xlu1 %v13810_v34  ;;  %v5432_v34 = vsub.f32 %v15636_v52, %v5411_v54  ;;  %10449 = vpow2.f32 %v5456_v0  ;;  %v5434_v37 = vsub.f32 %v15640_v32, %v5415_v8 }
 0x63a   : > { %4963 = vadd.xlane.f32.xlu0 %v13812_v53  ;;  %10451 = vpow2.f32 %v5454_v50  ;;  %v5464_v52 = vmul.f32 1.442695, %v5435_v23 }
 0x63b   : > { %v5458_v43 = vmul.f32 1.442695, %v5432_v34  ;;  %v5462_v0 = vmul.f32 1.442695, %v5434_v37 }
 0x63d   : > { %5472 = vadd.xlane.f32.xlu1 %v13822_v44  ;;  %v5460_v44 = vmul.f32 1.442695, %v5433_v16  ;;  %v13838_v11 = vpop.eup %10441 }
 0x63e   : > { %5470 = vadd.xlane.f32.xlu0 %v13824_v49  ;;  %15641 = vst [vmem:[#allocation69_spill] sm:$0xff] %v13838_v11  ;;  %v13840_v54 = vpop.eup %10443  ;;  %v15655_v49 = vld [vmem:[#allocation26_spill] sm:$0xff] }
 0x63f   : > { %15642 = vst [vmem:[#allocation94_spill] sm:$0xff] %v13840_v54  ;;  %10453 = vpow2.f32 %v5460_v44 }
 0x640   : > { %10455 = vpow2.f32 %v5458_v43 }
 0x641   : > { %5476 = vadd.xlane.f32.xlu1 %v13830_v42  ;;  %v13844_v16 = vpop.eup %10445  ;;  %10457 = vpow2.f32 %v5464_v52  ;;  %v15654_v42 = vld [vmem:[#allocation27_spill] sm:$0xff] }
 0x642   : > { %5474 = vadd.xlane.f32.xlu0 %v13832_v63  ;;  %15643 = vst [vmem:[#allocation10_spill] sm:$0xff] %v13844_v16  ;;  %v13846_v62 = vpop.eup %10447  ;;  %10459 = vpow2.f32 %v5462_v0 }
 0x643   : > { %15644 = vst [vmem:[#allocation9_spill] sm:$0xff] %v13846_v62  ;;  %v13850_v34 = vpop.eup %10449 }
 0x644   : > { %15645 = vst [vmem:[#allocation119_spill] sm:$0xff] %v13850_v34  ;;  %v13852_v50 = vpop.eup %10451 }
 0x645   : > { %5480 = vadd.xlane.f32.xlu1 %v13838_v11  ;;  %15646 = vst [vmem:[#allocation120_spill] sm:$0xff] %v13852_v50  ;;  %v15653_v11 = vld [vmem:[#allocation22_spill] sm:$0xff] }
 0x646   : > { %5478 = vadd.xlane.f32.xlu0 %v13840_v54 }
 0x649   : > { %5484 = vadd.xlane.f32.xlu1 %v13844_v16  ;;  %v13856_v44 = vpop.eup %10453  ;;  %v15651_v16 = vld [vmem:[#allocation23_spill] sm:$0xff] }
 0x64a   : > { %5482 = vadd.xlane.f32.xlu0 %v13846_v62  ;;  %15647 = vst [vmem:[#allocation93_spill] sm:$0xff] %v13856_v44  ;;  %v13858_v8 = vpop.eup %10455  ;;  %v15652_v62 = vld [vmem:[#allocation5_spill] sm:$0xff] }
 0x64b   : > { %15648 = vst [vmem:[#allocation95_spill] sm:$0xff] %v13858_v8  ;;  %v13862_v22 = vpop.eup %10457  ;;  %v4115_v63 = vmul.f32 %v15652_v62, %v15654_v42  ;;  %v4116_v53 = vmul.f32 %v15652_v62, %v15655_v49 }
 0x64c   : > { %15649 = vst [vmem:[#allocation121_spill] sm:$0xff] %v13862_v22  ;;  %v13864_v23 = vpop.eup %10459 }
 0x64d   : > { %5488 = vadd.xlane.f32.xlu1 %v13850_v34  ;;  %15650 = vst [vmem:[#allocation122_spill] sm:$0xff] %v13864_v23 }
 0x64e   : > { %5486 = vadd.xlane.f32.xlu0 %v13852_v50 }
 0x651   : > { %5492 = vadd.xlane.f32.xlu1 %v13856_v44 }
 0x652   : > { %5490 = vadd.xlane.f32.xlu0 %v13858_v8 }
 0x655   : > { %5496 = vadd.xlane.f32.xlu1 %v13862_v22  ;;  %v4113_v22 = vmul.f32 %v15652_v62, %v15651_v16 }
 0x656   : > { %5494 = vadd.xlane.f32.xlu0 %v13864_v23  ;;  %v4114_v23 = vmul.f32 %v15652_v62, %v15653_v11 }
 0x658   : > { %v9748_v54 = vpack.c.bf16 %v4114_v23, %v4113_v22  ;;  %v9752_v23 = vpack.c.bf16 %v4116_v53, %v4115_v63  ;;  %v15659_v63 = vld [vmem:[#allocation37_spill] sm:$0xff] }
 0x66a   : > { %v3868_v43 = vpop.xlane.xlu1 %3867 }
 0x66b   : > { %10461 = vrcp.f32 %v3868_v43  ;;  %v3866_v32 = vpop.xlane.xlu0 %3865 }
 0x66c   : > { %10463 = vrcp.f32 %v3866_v32 }
 0x66e   : > { %v3872_v37 = vpop.xlane.xlu1 %3871 }
 0x66f   : > { %10465 = vrcp.f32 %v3872_v37  ;;  %v3870_v52 = vpop.xlane.xlu0 %3869 }
 0x670   : > { %10467 = vrcp.f32 %v3870_v52 }
 0x672   : > { %v3876_v0 = vpop.xlane.xlu1 %3875 }
 0x673   : > { %10469 = vrcp.f32 %v3876_v0  ;;  %v3874_v44 = vpop.xlane.xlu0 %3873 }
 0x674   : > { %10471 = vrcp.f32 %v3874_v44 }
 0x675   : > { %v10462_v8 = vpop.eup %10461 }
 0x676   : > { %v10464_v34 = vpop.eup %10463  ;;  %v3880_v50 = vpop.xlane.xlu1 %3879  ;;  %v3900_v37 = vmul.f32 %v10462_v8, %v13559_v14 }
 0x677   : > { %10473 = vrcp.f32 %v3880_v50  ;;  %v3878_v43 = vpop.xlane.xlu0 %3877  ;;  %v3898_v32 = vmul.f32 %v10464_v34, %v13561_v19  ;;  %v15656_v50 = vld [vmem:[#allocation53_spill] sm:$0xff] }
 0x678   : > { %10475 = vrcp.f32 %v3878_v43  ;;  %v15657_v43 = vld [vmem:[#allocation31_spill] sm:$0xff] }
 0x679   : > { %v10466_v52 = vpop.eup %10465  ;;  %8828 = vmatprep.mubr.f32.mxu1 %v3898_v32  ;;  %v4117_v32 = vmul.f32 %v15652_v62, %v15657_v43 }
 0x67a   : > { %v10468_v0 = vpop.eup %10467  ;;  %v3884_v44 = vpop.xlane.xlu1 %3883  ;;  %8829 = vmatmul.mubr.f32.vlgmr.msra.gmra.mrb[32].mxu1 %v3900_v37  ;;  %v3904_v14 = vmul.f32 %v10466_v52, %v13567_v20  ;;  %v15658_v37 = vld [vmem:[#allocation30_spill] sm:$0xff] }
 0x67b   : > { %10477 = vrcp.f32 %v3884_v44  ;;  %9747 = vmatpush3.bf16.msra.mxu1 %v15656_v50  ;;  %v3882_v60 = vpop.xlane.xlu0 %3881  ;;  %v3902_v19 = vmul.f32 %v10468_v0, %v13569_v18  ;;  %v4118_v44 = vmul.f32 %v15652_v62, %v15658_v37 }
 0x67c   : > { %9749 = vmatprep.subr.bf16.mxu1 %v9748_v54  ;;  %10479 = vrcp.f32 %v3882_v60 }
 0x67d   : > { %v10470_v34 = vpop.eup %10469  ;;  %8831 = vmatprep.mubr.f32.mxu1 %v3902_v19  ;;  %v9756_v53 = vpack.c.bf16 %v4118_v44, %v4117_v32  ;;  %v4119_v19 = vmul.f32 %v15652_v62, %v15659_v63 }
 0x67e   : > { %v10472_v8 = vpop.eup %10471  ;;  %v3888_v22 = vpop.xlane.xlu1 %3887  ;;  %8832 = vmatmul.mubr.f32.gmra.mrb[34].mxu1 %v3904_v14  ;;  %v3908_v20 = vmul.f32 %v10470_v34, %v13575_v1  ;;  %v15660_v14 = vld [vmem:[#allocation36_spill] sm:$0xff] }
 0x67f   : > { %10481 = vrcp.f32 %v3888_v22  ;;  %9751 = vmatpush3.bf16.msra.mxu1 %v9748_v54  ;;  %v3886_v50 = vpop.xlane.xlu0 %3885  ;;  %v3906_v18 = vmul.f32 %v10472_v8, %v13577_v47  ;;  %v4120_v22 = vmul.f32 %v15652_v62, %v15660_v14 }
 0x680   : > { %9753 = vmatprep.subr.bf16.mxu1 %v9752_v23  ;;  %10483 = vrcp.f32 %v3886_v50  ;;  %v15661_v50 = vld [vmem:[#allocation42_spill] sm:$0xff] }
 0x681   : > { %v10474_v60 = vpop.eup %10473  ;;  %8834 = vmatprep.mubr.f32.mxu1 %v3906_v18  ;;  %v9760_v44 = vpack.c.bf16 %v4120_v22, %v4119_v19  ;;  %v4121_v18 = vmul.f32 %v15652_v62, %v15661_v50  ;;  %v15663_v22 = vld [vmem:[#allocation44_spill] sm:$0xff] }
 0x682   : > { %v10476_v52 = vpop.eup %10475  ;;  %v3892_v0 = vpop.xlane.xlu1 %3891  ;;  %8835 = vmatmul.mubr.f32.gmra.mrb[36].mxu1 %v3908_v20  ;;  %v3912_v1 = vmul.f32 %v10474_v60, %v13583_v48  ;;  %v15662_v20 = vld [vmem:[#allocation41_spill] sm:$0xff] }
 0x683   : > { %10485 = vrcp.f32 %v3892_v0  ;;  %9755 = vmatpush3.bf16.msra.mxu1 %v9752_v23  ;;  %v3890_v54 = vpop.xlane.xlu0 %3889  ;;  %v3910_v47 = vmul.f32 %v10476_v52, %v13585_v5  ;;  %v4122_v23 = vmul.f32 %v15652_v62, %v15662_v20 }
 0x684   : > { %9757 = vmatprep.subr.bf16.mxu1 %v9756_v53  ;;  %10487 = vrcp.f32 %v3890_v54  ;;  %v4123_v54 = vmul.f32 %v15652_v62, %v15663_v22 }
 0x685   : > { %v10478_v34 = vpop.eup %10477  ;;  %8837 = vmatprep.mubr.f32.mxu1 %v3910_v47  ;;  %10489 = vrcp.f32 %v13818_v59  ;;  %v9764_v19 = vpack.c.bf16 %v4122_v23, %v4121_v18  ;;  %v15664_v47 = vld [vmem:[#allocation43_spill] sm:$0xff]  ;;  %v15665_v23 = vld [vmem:[#allocation48_spill] sm:$0xff] }
 0x686   : > { %v10480_v8 = vpop.eup %10479  ;;  %v3896_v32 = vpop.xlane.xlu1 %3895  ;;  %8838 = vmatmul.mubr.f32.gmra.mrb[38].mxu1 %v3912_v1  ;;  %v3916_v48 = vmul.f32 %v10478_v34, %v13595_v7  ;;  %v4124_v1 = vmul.f32 %v15652_v62, %v15664_v47 }
 0x687   : > { %10491 = vrcp.f32 %v3896_v32  ;;  %9759 = vmatpush3.bf16.msra.mxu1 %v9756_v53  ;;  %v3894_v5 = vpop.xlane.xlu0 %3893  ;;  %v3914_v52 = vmul.f32 %v10480_v8, %v13597_v40 }
 0x688   : > { %9761 = vmatprep.subr.bf16.mxu1 %v9760_v44  ;;  %10493 = vrcp.f32 %v3894_v5  ;;  %v9768_v18 = vpack.c.bf16 %v4124_v1, %v4123_v54  ;;  %v4125_v5 = vmul.f32 %v15652_v62, %v15665_v23 }
 0x689   : > { %v10482_v60 = vpop.eup %10481  ;;  %8840 = vmatprep.mubr.f32.mxu1 %v3914_v52  ;;  %10495 = vrcp.f32 %v13814_v26  ;;  %v15666_v52 = vld [vmem:[#allocation47_spill] sm:$0xff] }
 0x68a   : > { %v10484_v59 = vpop.eup %10483  ;;  %v4407_v0 = vpop.xlane.xlu1 %4406  ;;  %8841 = vmatmul.mubr.f32.gmra.mrb[40].mxu1 %v3916_v48  ;;  %v3920_v7 = vmul.f32 %v10482_v60, %v13601_v10  ;;  %v4126_v26 = vmul.f32 %v15652_v62, %v15666_v52 }
 0x68b   : > { %9763 = vmatpush3.bf16.msra.mxu1 %v9760_v44  ;;  %v4405_v40 = vpop.xlane.xlu0 %4404  ;;  %v3918_v53 = vmul.f32 %v10484_v59, %v13603_v58 }
 0x68c   : > { %9765 = vmatprep.subr.bf16.mxu1 %v9764_v19  ;;  %10497 = vrcp.f32 %v4405_v40  ;;  %v9772_v62 = vpack.c.bf16 %v4126_v26, %v4125_v5  ;;  %v15669_v26 = vld [vmem:[#allocation54_spill] sm:$0xff] }
 0x68d   : > { %v10486_v34 = vpop.eup %10485  ;;  %8843 = vmatprep.mubr.f32.mxu1 %v3918_v53  ;;  %10499 = vrcp.f32 %v4407_v0 }
 0x68e   : > { %v10488_v8 = vpop.eup %10487  ;;  %v5421_v32 = vpop.xlane.xlu1 %5420  ;;  %8844 = vmatmul.mubr.f32.gmra.mrb[42].mxu1 %v3920_v7  ;;  %v3924_v59 = vmul.f32 %v10486_v34, %v13615_v25  ;;  %v15667_v25 = vld [vmem:[#allocation106_spill] sm:$0xff] }
 0x68f   : > { %v5437_v44 = vsub.f32 %v13653_v33, %v5421_v32  ;;  %9767 = vmatpush3.bf16.msra.mxu1 %v9764_v19  ;;  %v5419_v58 = vpop.xlane.xlu0 %5418  ;;  %v3922_v48 = vmul.f32 %v10488_v8, %v13617_v51  ;;  %v10490_v10 = vpop.eup %10489  ;;  %v15668_v32 = vld [vmem:[#allocation6_spill] sm:$0xff] }
 0x690   : > { %9769 = vmatprep.subr.bf16.mxu1 %v9768_v18  ;;  %v5436_v60 = vsub.f32 %v13659_v29, %v5419_v58  ;;  %v4433_v19 = vmul.f32 %v10490_v10, %v15667_v25  ;;  %v4648_v5 = vmul.f32 %v15668_v32, %v15651_v16 }
 0x691   : > { %v10492_v54 = vpop.eup %10491  ;;  %v5468_v1 = vmul.f32 1.442695, %v5437_v44  ;;  %8846 = vmatprep.mubr.f32.mxu1 %v3922_v48 }
 0x692   : > { %v10494_v40 = vpop.eup %10493  ;;  %v5466_v53 = vmul.f32 1.442695, %v5436_v60  ;;  %v4411_v7 = vpop.xlane.xlu1 %4410  ;;  %8847 = vmatmul.mubr.f32.gmra.mrb[44].mxu1 %v3924_v59  ;;  %v3928_v51 = vmul.f32 %v10492_v54, %v13627_v6  ;;  %v15670_v6 = vld [vmem:[#allocation79_spill] sm:$0xff]  ;;  %v4650_v59 = vmul.f32 %v15668_v32, %v15654_v42  ;;  %v4651_v54 = vmul.f32 %v15668_v32, %v15655_v49 }
 0x693   : > { %10501 = vpow2.f32 %v5468_v1  ;;  %9771 = vmatpush3.bf16.msra.mxu1 %v9768_v18  ;;  %v4409_v33 = vpop.xlane.xlu0 %4408  ;;  %v3926_v0 = vmul.f32 %v10494_v40, %v13631_v38  ;;  %v10496_v29 = vpop.eup %10495  ;;  %v4649_v18 = vmul.f32 %v15668_v32, %v15653_v11 }
 0x694   : > { %10503 = vpow2.f32 %v5466_v53  ;;  %9773 = vmatprep.subr.bf16.mxu1 %v9772_v62  ;;  %v4435_v44 = vmul.f32 %v10496_v29, %v15670_v6 }
 0x695   : > { %10505 = vrcp.f32 %v4411_v7  ;;  %8849 = vmatprep.mubr.f32.mxu1 %v3926_v0  ;;  %v9828_v60 = vpack.c.bf16 %v4649_v18, %v4648_v5  ;;  %v4653_v0 = vmul.f32 %v15668_v32, %v15658_v37  ;;  %v4654_v18 = vmul.f32 %v15668_v32, %v15659_v63 }
 0x696   : > { %v10498_v34 = vpop.eup %10497  ;;  %10507 = vrcp.f32 %v4409_v33  ;;  %v4415_v8 = vpop.xlane.xlu1 %4414  ;;  %8850 = vmatmul.mubr.f32.gmra.mrb[46].mxu1 %v3928_v51  ;;  %v4652_v33 = vmul.f32 %v15668_v32, %v15657_v43 }
 0x697   : > { %9775 = vmatpush3.bf16.msra.mxu1 %v9772_v62  ;;  %8940 = vmatprep.mubr.f32.mxu1 %v4433_v19  ;;  %v4413_v38 = vpop.xlane.xlu0 %4412  ;;  %v10500_v58 = vpop.eup %10499  ;;  %v4437_v48 = vmul.f32 %v10498_v34, %v13641_v30  ;;  %v9832_v62 = vpack.c.bf16 %v4651_v54, %v4650_v59 }
 0x698   : > { %9825 = vmatprep.subr.bf16.mxu1 %v15669_v26  ;;  %10509 = vrcp.f32 %v4413_v38  ;;  %v4439_v40 = vmul.f32 %v10500_v58, %v13639_v3  ;;  %v9836_v5 = vpack.c.bf16 %v4653_v0, %v4652_v33  ;;  %v4655_v38 = vmul.f32 %v15668_v32, %v15660_v14 }
 0x699   : > { %10511 = vrcp.f32 %v4415_v8  ;;  %v4659_v33 = vmul.f32 %v15668_v32, %v15664_v47 }
 0x69a   : > { %v4419_v10 = vpop.xlane.xlu1 %4418  ;;  %8941 = vmatmul.mubr.f32.vlgmr.msra.gmra.mrb[32].mxu1 %v4435_v44 }
 0x69b   : > { %9827 = vmatpush3.bf16.msra.mxu1 %v15669_v26  ;;  %8943 = vmatprep.mubr.f32.mxu1 %v4437_v48  ;;  %v4417_v1 = vpop.xlane.xlu0 %4416  ;;  %v9840_v48 = vpack.c.bf16 %v4655_v38, %v4654_v18 }
 0x69c   : > { %9829 = vmatprep.subr.bf16.mxu1 %v9828_v60  ;;  %10513 = vrcp.f32 %v4417_v1 }
 0x69d   : > { %v13931_v53 = vpop.eup %10501  ;;  %10515 = vrcp.f32 %v4419_v10  ;;  %v4656_v10 = vmul.f32 %v15668_v32, %v15661_v50 }
 0x69e   : > { %v13933_v30 = vpop.eup %10503  ;;  %5500 = vadd.xlane.f32.xlu1 %v13931_v53  ;;  %v4423_v7 = vpop.xlane.xlu1 %4422  ;;  %8944 = vmatmul.mubr.f32.gmra.mrb[34].mxu1 %v4439_v40 }
 0x69f   : > { %v10506_v51 = vpop.eup %10505  ;;  %9831 = vmatpush3.bf16.msra.mxu1 %v9828_v60  ;;  %5498 = vadd.xlane.f32.xlu0 %v13933_v30  ;;  %v4421_v3 = vpop.xlane.xlu0 %4420  ;;  %v4657_v60 = vmul.f32 %v15668_v32, %v15662_v20 }
 0x6a0   : > { %v10508_v29 = vpop.eup %10507  ;;  %9833 = vmatprep.subr.bf16.mxu1 %v9832_v62  ;;  %10517 = vrcp.f32 %v4421_v3  ;;  %v4443_v8 = vmul.f32 %v10506_v51, %v13669_v36 }
 0x6a1   : > { %10519 = vrcp.f32 %v4423_v7  ;;  %v4441_v25 = vmul.f32 %v10508_v29, %v13673_v39  ;;  %v9844_v7 = vpack.c.bf16 %v4657_v60, %v4656_v10  ;;  %v15671_v10 = vld [vmem:[#allocation55_spill] sm:$0xff] }
 0x6a2   : > { %v10510_v19 = vpop.eup %10509  ;;  %v4427_v34 = vpop.xlane.xlu1 %4426 }
 0x6a3   : > { %v10512_v26 = vpop.eup %10511  ;;  %8946 = vmatprep.mubr.f32.mxu1 %v4441_v25  ;;  %9835 = vmatpush3.bf16.msra.mxu1 %v9832_v62  ;;  %v4425_v6 = vpop.xlane.xlu0 %4424  ;;  %v4445_v44 = vmul.f32 %v10510_v19, %v13683_v21  ;;  %v4658_v62 = vmul.f32 %v15668_v32, %v15663_v22  ;;  %v4660_v19 = vmul.f32 %v15668_v32, %v15665_v23 }
 0x6a4   : > { %8947 = vmatmul.mubr.f32.gmra.mrb[36].mxu1 %v4443_v8  ;;  %9837 = vmatprep.subr.bf16.mxu1 %v9836_v5  ;;  %10521 = vrcp.f32 %v4425_v6  ;;  %v4447_v58 = vmul.f32 %v10512_v26, %v13681_v45 }
 0x6a5   : > { %10523 = vrcp.f32 %v4427_v34  ;;  %8949 = vmatprep.mubr.f32.mxu1 %v4445_v44  ;;  %v9848_v25 = vpack.c.bf16 %v4659_v33, %v4658_v62  ;;  %v4661_v34 = vmul.f32 %v15668_v32, %v15666_v52 }
 0x6a6   : > { %v10514_v39 = vpop.eup %10513  ;;  %v4431_v36 = vpop.xlane.xlu1 %4430 }
 0x6a7   : > { %v10516_v59 = vpop.eup %10515  ;;  %9839 = vmatpush3.bf16.msra.mxu1 %v9836_v5  ;;  %v4429_v54 = vpop.xlane.xlu0 %4428  ;;  %v4449_v21 = vmul.f32 %v10514_v39, %v13697_v27  ;;  %v9852_v26 = vpack.c.bf16 %v4661_v34, %v4660_v19 }
 0x6a8   : > { %8950 = vmatmul.mubr.f32.gmra.mrb[38].mxu1 %v4447_v58  ;;  %9841 = vmatprep.subr.bf16.mxu1 %v9840_v48  ;;  %10525 = vrcp.f32 %v4429_v54  ;;  %v4451_v45 = vmul.f32 %v10516_v59, %v13695_v13 }
 0x6a9   : > { %10527 = vrcp.f32 %v4431_v36  ;;  %8952 = vmatprep.mubr.f32.mxu1 %v4449_v21 }
 0x6aa   : > { %v10518_v1 = vpop.eup %10517  ;;  %v4938_v40 = vpop.xlane.xlu1 %4937 }
 0x6ab   : > { %v10520_v0 = vpop.eup %10519  ;;  %9843 = vmatpush3.bf16.msra.mxu1 %v9840_v48  ;;  %v4936_v51 = vpop.xlane.xlu0 %4935  ;;  %v4453_v27 = vmul.f32 %v10518_v1, %v13711_v4 }
 0x6ac   : > { %8953 = vmatmul.mubr.f32.gmra.mrb[40].mxu1 %v4451_v45  ;;  %9845 = vmatprep.subr.bf16.mxu1 %v9844_v7  ;;  %10529 = vrcp.f32 %v4936_v51  ;;  %v4455_v13 = vmul.f32 %v10520_v0, %v13707_v9 }
 0x6ad   : > { %10531 = vrcp.f32 %v4938_v40  ;;  %8955 = vmatprep.mubr.f32.mxu1 %v4453_v27 }
 0x6ae   : > { %v10522_v3 = vpop.eup %10521  ;;  %v4942_v29 = vpop.xlane.xlu1 %4941 }
 0x6af   : > { %v10524_v8 = vpop.eup %10523  ;;  %9847 = vmatpush3.bf16.msra.mxu1 %v9844_v7  ;;  %v4940_v5 = vpop.xlane.xlu0 %4939  ;;  %v4457_v4 = vmul.f32 %v10522_v3, %v13721_v55 }
 0x6b0   : > { %8956 = vmatmul.mubr.f32.gmra.mrb[42].mxu1 %v4455_v13  ;;  %9849 = vmatprep.subr.bf16.mxu1 %v9848_v25  ;;  %10533 = vrcp.f32 %v4940_v5  ;;  %v4459_v9 = vmul.f32 %v10524_v8, %v13719_v12 }
 0x6b1   : > { %10535 = vrcp.f32 %v4942_v29  ;;  %8958 = vmatprep.mubr.f32.mxu1 %v4457_v4 }
 0x6b2   : > { %v10526_v18 = vpop.eup %10525  ;;  %v4946_v38 = vpop.xlane.xlu1 %4945 }
 0x6b3   : > { %v10528_v6 = vpop.eup %10527  ;;  %9851 = vmatpush3.bf16.msra.mxu1 %v9848_v25  ;;  %v4944_v44 = vpop.xlane.xlu0 %4943  ;;  %v4461_v32 = vmul.f32 %v10526_v18, %v13735_v56  ;;  %v15672_v56 = vld [vmem:[#allocation7_spill] sm:$0xff] }
 0x6b4   : > { %8959 = vmatmul.mubr.f32.gmra.mrb[44].mxu1 %v4459_v9  ;;  %9853 = vmatprep.subr.bf16.mxu1 %v9852_v26  ;;  %10537 = vrcp.f32 %v4944_v44  ;;  %v4463_v36 = vmul.f32 %v10528_v6, %v13733_v24  ;;  %v5183_v60 = vmul.f32 %v15672_v56, %v15651_v16  ;;  %v5184_v59 = vmul.f32 %v15672_v56, %v15653_v11 }
 0x6b5   : > { %10539 = vrcp.f32 %v4946_v38  ;;  %8961 = vmatprep.mubr.f32.mxu1 %v4461_v32  ;;  %v5185_v7 = vmul.f32 %v15672_v56, %v15654_v42  ;;  %v5186_v16 = vmul.f32 %v15672_v56, %v15655_v49  ;;  %v5187_v42 = vmul.f32 %v15672_v56, %v15657_v43 }
 0x6b6   : > { %v10530_v55 = vpop.eup %10529  ;;  %v4950_v39 = vpop.xlane.xlu1 %4949  ;;  %v9908_v45 = vpack.c.bf16 %v5184_v59, %v5183_v60  ;;  %v5188_v49 = vmul.f32 %v15672_v56, %v15658_v37  ;;  %v5189_v43 = vmul.f32 %v15672_v56, %v15659_v63  ;;  %v5190_v37 = vmul.f32 %v15672_v56, %v15660_v14 }
 0x6b7   : > { %v10532_v58 = vpop.eup %10531  ;;  %9855 = vmatpush3.bf16.msra.mxu1 %v9852_v26  ;;  %v4948_v48 = vpop.xlane.xlu0 %4947  ;;  %v4968_v12 = vmul.f32 %v10530_v55, %v13747_v28  ;;  %v9912_v51 = vpack.c.bf16 %v5186_v16, %v5185_v7  ;;  %v5191_v63 = vmul.f32 %v15672_v56, %v15661_v50  ;;  %v5192_v14 = vmul.f32 %v15672_v56, %v15662_v20  ;;  %v5696_v7 = vld [vmem:[%s10866_s3 + $0x8] sm:$0xff] }
 0x6b8   : > { %8962 = vmatmul.mubr.f32.gmra.mrb[46].mxu1 %v4463_v36  ;;  %9905 = vmatprep.subr.bf16.mxu1 %v15671_v10  ;;  %10541 = vrcp.f32 %v4948_v48  ;;  %v4970_v24 = vmul.f32 %v10532_v58, %v13743_v46  ;;  %v9916_v25 = vpack.c.bf16 %v5188_v49, %v5187_v42  ;;  %v9920_v4 = vpack.c.bf16 %v5190_v37, %v5189_v43  ;;  %v15675_v48 = vld [vmem:[#allocation68_spill] sm:$0xff]  ;;  %v15680_v42 = vld [vmem:[#allocation91_spill] sm:$0xff] }
 0x6b9   : > { %10543 = vrcp.f32 %v4950_v39  ;;  %9052 = vmatprep.mubr.f32.mxu1 %v4968_v12  ;;  %v9924_v44 = vpack.c.bf16 %v5192_v14, %v5191_v63  ;;  %v5193_v50 = vmul.f32 %v15672_v56, %v15663_v22  ;;  %v5194_v20 = vmul.f32 %v15672_v56, %v15664_v47  ;;  %v15682_v43 = vld [vmem:[#allocation115_spill] sm:$0xff] }
 0x6ba   : > { %v10534_v54 = vpop.eup %10533  ;;  %v4954_v21 = vpop.xlane.xlu1 %4953  ;;  %v5195_v22 = vmul.f32 %v15672_v56, %v15665_v23  ;;  %v5196_v47 = vmul.f32 %v15672_v56, %v15666_v52  ;;  %v15678_v56 = vld [vmem:[#allocation111_spill] sm:$0xff] }
 0x6bb   : > { %v10536_v1 = vpop.eup %10535  ;;  %v4952_v40 = vpop.xlane.xlu0 %4951  ;;  %v4972_v28 = vmul.f32 %v10534_v54, %v13757_v17  ;;  %v15676_v54 = vld [vmem:[#allocation89_spill] sm:$0xff] }
 0x6bc   : > { %9053 = vmatmul.mubr.f32.vlgmr.msra.gmra.mrb[32].mxu1 %v4970_v24  ;;  %10545 = vrcp.f32 %v4952_v40  ;;  %v4974_v62 = vmul.f32 %v10536_v1, %v13755_v41  ;;  %v15677_v40 = vld [vmem:[#allocation112_spill] sm:$0xff]  ;;  %v9932_v16 = vpack.c.bf16 %v5196_v47, %v5195_v22  ;;  %v15691_v22 = vld [vmem:[#allocation122_spill] sm:$0xff] }
 0x6bd   : > { %10547 = vrcp.f32 %v4954_v21  ;;  %9907 = vmatpush3.bf16.msra.mxu1 %v15671_v10  ;;  %9055 = vmatprep.mubr.f32.mxu1 %v4972_v28  ;;  %v9928_v10 = vpack.c.bf16 %v5194_v20, %v5193_v50 }
 0x6be   : > { %v10538_v11 = vpop.eup %10537  ;;  %9909 = vmatprep.subr.bf16.mxu1 %v9908_v45  ;;  %v4958_v46 = vpop.xlane.xlu1 %4957 }
 0x6bf   : > { %v10540_v33 = vpop.eup %10539  ;;  %v4956_v17 = vpop.xlane.xlu0 %4955  ;;  %v4976_v0 = vmul.f32 %v10538_v11, %v13767_v2 }
 0x6c0   : > { %9056 = vmatmul.mubr.f32.gmra.mrb[34].mxu1 %v4974_v62  ;;  %10549 = vrcp.f32 %v4956_v17  ;;  %v4978_v41 = vmul.f32 %v10540_v33, %v13765_v61  ;;  %v15679_v17 = vld [vmem:[#allocation92_spill] sm:$0xff] }
 0x6c1   : > { %10551 = vrcp.f32 %v4958_v46  ;;  %9911 = vmatpush3.bf16.msra.mxu1 %v9908_v45  ;;  %9058 = vmatprep.mubr.f32.mxu1 %v4976_v0  ;;  %v5695_v45 = vld [vmem:[%s10866_s3] sm:$0xff] }
 0x6c2   : > { %v10542_v27 = vpop.eup %10541  ;;  %9913 = vmatprep.subr.bf16.mxu1 %v9912_v51  ;;  %v4962_v3 = vpop.xlane.xlu1 %4961  ;;  %v9936_v46 = vpack.c.bf16 %v5696_v7, %v5695_v45 }
 0x6c3   : > { %v10544_v29 = vpop.eup %10543  ;;  %v4960_v13 = vpop.xlane.xlu0 %4959  ;;  %v4980_v2 = vmul.f32 %v10542_v27, %v13777_v57 }
 0x6c4   : > { %9059 = vmatmul.mubr.f32.gmra.mrb[36].mxu1 %v4978_v41  ;;  %10553 = vrcp.f32 %v4960_v13  ;;  %v4982_v61 = vmul.f32 %v10544_v29, %v13775_v15  ;;  %v15681_v29 = vld [vmem:[#allocation116_spill] sm:$0xff] }
 0x6c5   : > { %10555 = vrcp.f32 %v4962_v3  ;;  %9915 = vmatpush3.bf16.msra.mxu1 %v9912_v51  ;;  %9061 = vmatprep.mubr.f32.mxu1 %v4980_v2 }
 0x6c6   : > { %v10546_v19 = vpop.eup %10545  ;;  %9917 = vmatprep.subr.bf16.mxu1 %v9916_v25  ;;  %v4966_v34 = vpop.xlane.xlu1 %4965 }
 0x6c7   : > { %v10548_v8 = vpop.eup %10547  ;;  %v4964_v5 = vpop.xlane.xlu0 %4963  ;;  %v4984_v57 = vmul.f32 %v10546_v19, %v13787_v35  ;;  %v15673_v35 = vld [vmem:[#allocation81_spill] sm:$0xff] }
 0x6c8   : > { %9062 = vmatmul.mubr.f32.gmra.mrb[38].mxu1 %v4982_v61  ;;  %10557 = vrcp.f32 %v4964_v5  ;;  %v4986_v15 = vmul.f32 %v10548_v8, %v13785_v31  ;;  %v15674_v31 = vld [vmem:[#allocation80_spill] sm:$0xff]  ;;  %v15683_v61 = vld [vmem:[#allocation94_spill] sm:$0xff] }
 0x6c9   : > { %10559 = vrcp.f32 %v4966_v34  ;;  %9919 = vmatpush3.bf16.msra.mxu1 %v9916_v25  ;;  %9064 = vmatprep.mubr.f32.mxu1 %v4984_v57 }
 0x6ca   : > { %v10550_v18 = vpop.eup %10549  ;;  %9921 = vmatprep.subr.bf16.mxu1 %v9920_v4  ;;  %v5473_v38 = vpop.xlane.xlu1 %5472 }
 0x6cb   : > { %v10552_v9 = vpop.eup %10551  ;;  %v5471_v26 = vpop.xlane.xlu0 %5470  ;;  %v4988_v6 = vmul.f32 %v10550_v18, %v15673_v35 }
 0x6cc   : > { %9065 = vmatmul.mubr.f32.gmra.mrb[40].mxu1 %v4986_v15  ;;  %10561 = vrcp.f32 %v5471_v26  ;;  %v4990_v39 = vmul.f32 %v10552_v9, %v15674_v31  ;;  %v15686_v26 = vld [vmem:[#allocation10_spill] sm:$0xff] }
 0x6cd   : > { %10563 = vrcp.f32 %v5473_v38  ;;  %9923 = vmatpush3.bf16.msra.mxu1 %v9920_v4  ;;  %9067 = vmatprep.mubr.f32.mxu1 %v4988_v6  ;;  %v15684_v4 = vld [vmem:[#allocation69_spill] sm:$0xff] }
 0x6ce   : > { %v10554_v32 = vpop.eup %10553  ;;  %9925 = vmatprep.subr.bf16.mxu1 %v9924_v44  ;;  %v5477_v55 = vpop.xlane.xlu1 %5476  ;;  %v15685_v38 = vld [vmem:[#allocation9_spill] sm:$0xff] }
 0x6cf   : > { %v10556_v36 = vpop.eup %10555  ;;  %v5475_v58 = vpop.xlane.xlu0 %5474  ;;  %v4992_v12 = vmul.f32 %v10554_v32, %v15675_v48  ;;  %v15688_v32 = vld [vmem:[#allocation119_spill] sm:$0xff]  ;;  %v15690_v48 = vld [vmem:[#allocation93_spill] sm:$0xff] }
 0x6d0   : > { %9068 = vmatmul.mubr.f32.gmra.mrb[42].mxu1 %v4990_v39  ;;  %10565 = vrcp.f32 %v5475_v58  ;;  %v4994_v24 = vmul.f32 %v10556_v36, %v15676_v54  ;;  %v15689_v39 = vld [vmem:[#allocation95_spill] sm:$0xff] }
 0x6d1   : > { %10567 = vrcp.f32 %v5477_v55  ;;  %9927 = vmatpush3.bf16.msra.mxu1 %v9924_v44  ;;  %9070 = vmatprep.mubr.f32.mxu1 %v4992_v12  ;;  %v15687_v44 = vld [vmem:[#allocation120_spill] sm:$0xff] }
 0x6d2   : > { %v10558_v60 = vpop.eup %10557  ;;  %9929 = vmatprep.subr.bf16.mxu1 %v9928_v10  ;;  %v5481_v59 = vpop.xlane.xlu1 %5480 }
 0x6d3   : > { %v10560_v21 = vpop.eup %10559  ;;  %v5479_v1 = vpop.xlane.xlu0 %5478  ;;  %v4996_v28 = vmul.f32 %v10558_v60, %v15677_v40  ;;  %v15692_v60 = vld [vmem:[#allocation121_spill] sm:$0xff] }
 0x6d4   : > { %9071 = vmatmul.mubr.f32.gmra.mrb[44].mxu1 %v4994_v24  ;;  %10569 = vrcp.f32 %v5479_v1  ;;  %v4998_v11 = vmul.f32 %v10560_v21, %v15678_v56 }
 0x6d5   : > { %10571 = vrcp.f32 %v5481_v59  ;;  %9931 = vmatpush3.bf16.msra.mxu1 %v9928_v10  ;;  %9073 = vmatprep.mubr.f32.mxu1 %v4996_v28 }
 0x6d6   : > { %v10562_v23 = vpop.eup %10561  ;;  %9933 = vmatprep.subr.bf16.mxu1 %v9932_v16  ;;  %v5485_v52 = vpop.xlane.xlu1 %5484 }
 0x6d7   : > { %v10564_v62 = vpop.eup %10563  ;;  %v5483_v33 = vpop.xlane.xlu0 %5482  ;;  %v5503_v0 = vmul.f32 %v10562_v23, %v15679_v17 }
 0x6d8   : > { %9074 = vmatmul.mubr.f32.gmra.mrb[46].mxu1 %v4998_v11  ;;  %10573 = vrcp.f32 %v5483_v33  ;;  %v5505_v49 = vmul.f32 %v10564_v62, %v15680_v42 }
 0x6d9   : > { %10575 = vrcp.f32 %v5485_v52  ;;  %9935 = vmatpush3.bf16.msra.mxu1 %v9932_v16  ;;  %9164 = vmatprep.mubr.f32.mxu1 %v5503_v0 }
 0x6da   : > { %v10566_v51 = vpop.eup %10565  ;;  %v5489_v27 = vpop.xlane.xlu1 %5488  ;;  %9937 = vmatprep.subr.bf16.mxu1 %v9936_v46 }
 0x6db   : > { %v10568_v3 = vpop.eup %10567  ;;  %v5487_v41 = vpop.xlane.xlu0 %5486  ;;  %v5507_v13 = vmul.f32 %v10566_v51, %v15681_v29 }
 0x6dc   : > { %9165 = vmatmul.mubr.f32.vlgmr.msra.gmra.mrb[32].mxu1 %v5505_v49  ;;  %10577 = vrcp.f32 %v5487_v41  ;;  %v5509_v37 = vmul.f32 %v10568_v3, %v15682_v43  ;;  %v14054_v49 = vld [vmem:[%s15708_s21] ss:$0 sm:$0xff] }
 0x6dd   : > { %10579 = vrcp.f32 %v5489_v27  ;;  %9167 = vmatprep.mubr.f32.mxu1 %v5507_v13  ;;  %9939 = vmatpush3.bf16.msra.mxu1 %v9936_v46  ;;  %v10705_v13 = vld [vmem:[%s15121_s22 + $0x8] sm:$0xff] }
 0x6de   : > { %v10570_v2 = vpop.eup %10569  ;;  %v5493_v25 = vpop.xlane.xlu1 %5492 }
 0x6df   : > { %v10572_v19 = vpop.eup %10571  ;;  %v5491_v34 = vpop.xlane.xlu0 %5490  ;;  %v5511_v8 = vmul.f32 %v10570_v2, %v15683_v61 }
 0x6e0   : > { %9168 = vmatmul.mubr.f32.gmra.mrb[34].mxu1 %v5509_v37  ;;  %10581 = vrcp.f32 %v5491_v34  ;;  %v5513_v63 = vmul.f32 %v10572_v19, %v15684_v4 }
 0x6e1   : > { %10583 = vrcp.f32 %v5493_v25  ;;  %9170 = vmatprep.mubr.f32.mxu1 %v5511_v8  ;;  %v10706_v25 = vld [vmem:[%s15121_s22] sm:$0xff] }
 0x6e2   : > { %v10574_v5 = vpop.eup %10573  ;;  %v5497_v57 = vpop.xlane.xlu1 %5496 }
 0x6e3   : > { %v10576_v14 = vpop.eup %10575  ;;  %v5495_v18 = vpop.xlane.xlu0 %5494  ;;  %v5515_v15 = vmul.f32 %v10574_v5, %v15685_v38 }
 0x6e4   : > { %9171 = vmatmul.mubr.f32.gmra.mrb[36].mxu1 %v5513_v63  ;;  %10585 = vrcp.f32 %v5495_v18  ;;  %v5517_v35 = vmul.f32 %v10576_v14, %v15686_v26  ;;  %v10708_v63 = vld [vmem:[%s15121_s22 + $0x10] sm:$0xff] }
 0x6e5   : > { %10587 = vrcp.f32 %v5497_v57  ;;  %9173 = vmatprep.mubr.f32.mxu1 %v5515_v15  ;;  %v10707_v57 = vld [vmem:[%s15121_s22 + $0x18] sm:$0xff] }
 0x6e6   : > { %v10578_v9 = vpop.eup %10577 }
 0x6e7   : > { %v10580_v6 = vpop.eup %10579  ;;  %v5519_v50 = vmul.f32 %v10578_v9, %v15687_v44 }
 0x6e8   : > { %9174 = vmatmul.mubr.f32.gmra.mrb[38].mxu1 %v5517_v35  ;;  %v5521_v55 = vmul.f32 %v10580_v6, %v15688_v32  ;;  %v10709_v6 = vld [vmem:[%s15121_s22 + $0x28] sm:$0xff] }
 0x6e9   : > { %9176 = vmatprep.mubr.f32.mxu1 %v5519_v50  ;;  %v10710_v50 = vld [vmem:[%s15121_s22 + $0x20] sm:$0xff] }
 0x6ea   : > { %v10582_v20 = vpop.eup %10581 }
 0x6eb   : > { %v10584_v31 = vpop.eup %10583  ;;  %v5523_v36 = vmul.f32 %v10582_v20, %v15689_v39 }
 0x6ec   : > { %9177 = vmatmul.mubr.f32.gmra.mrb[40].mxu1 %v5521_v55  ;;  %v5525_v12 = vmul.f32 %v10584_v31, %v15690_v48  ;;  %v10711_v48 = vld [vmem:[%s15121_s22 + $0x38] sm:$0xff] }
 0x6ed   : > { %9179 = vmatprep.mubr.f32.mxu1 %v5523_v36 }
 0x6ee   : > { %v10586_v58 = vpop.eup %10585 }
 0x6ef   : > { %v10588_v10 = vpop.eup %10587  ;;  %v5527_v47 = vmul.f32 %v10586_v58, %v15691_v22 }
 0x6f0   : > { %9180 = vmatmul.mubr.f32.gmra.mrb[42].mxu1 %v5525_v12  ;;  %v5529_v59 = vmul.f32 %v10588_v10, %v15692_v60  ;;  %v10712_v10 = vld [vmem:[%s15121_s22 + $0x30] sm:$0xff] }
 0x6f1   : > { %9182 = vmatprep.mubr.f32.mxu1 %v5527_v47 }
 0x6f4   : > { %9183 = vmatmul.mubr.f32.gmra.mrb[44].mxu1 %v5529_v59 }
 0x72b   : > { %v5501_v54 = vpop.xlane.xlu1 %5500 }
 0x72c   : > { %10589 = vrcp.f32 %v5501_v54  ;;  %v5499_v24 = vpop.xlane.xlu0 %5498 }
 0x72d   : > { %10591 = vrcp.f32 %v5499_v24 }
 0x736   : > { %v10590_v21 = vpop.eup %10589 }
 0x737   : > { %v10592_v1 = vpop.eup %10591  ;;  %v5533_v28 = vmul.f32 %v10590_v21, %v13931_v53 }
 0x738   : > { %v5531_v40 = vmul.f32 %v10592_v1, %v13933_v30  ;;  %v10713_v1 = vld [vmem:[%s15121_s22 + $0x48] sm:$0xff] }
 0x73a   : > { %9185 = vmatprep.mubr.f32.mxu1 %v5531_v40 }
 0x73b   : > { %9186 = vmatmul.mubr.f32.gmra.mrb[46].mxu1 %v5533_v28  ;;  %v10714_v28 = vld [vmem:[%s15121_s22 + $0x40] sm:$0xff] }
 0x7af   : > { %v9166_v45 = vpop.f32.mrb[32].mxu1 }
 0x7b0   : > { %v5600_v7 = vpop.f32.mrb[33].mxu1 }
 0x7b1   : > { %9192 = vmatprep.mubr.msk.f32.mxu1 %vm15693_vm4, %v5600_v7  ;;  %vm15709_vm4 = vmmov %vm15167_vm0 }
 0x7b2   : > { %9193 = vmatmul.mubr.msk.f32.vlgmr.msra.gmra.mrb[64].mxu1 %vm15167_vm0, %v9166_v45 }
 0x7b3   : > { %v9169_v16 = vpop.f32.mrb[34].mxu1 }
 0x7b4   : > { %v5610_v23 = vpop.f32.mrb[35].mxu1 }
 0x7b5   : > { %9195 = vmatprep.mubr.msk.f32.mxu1 %vm15694_vm2, %v5610_v23  ;;  %vm15710_vm2 = vmmov %vm15167_vm0 }
 0x7b6   : > { %9196 = vmatmul.mubr.msk.f32.gmra.mrb[66].mxu1 %vm15695_vm3, %v9169_v16  ;;  %vm15711_vm3 = vmmov %vm15167_vm0 }
 0x7b7   : > { %v9172_v52 = vpop.f32.mrb[36].mxu1 }
 0x7b8   : > { %v5620_v56 = vpop.f32.mrb[37].mxu1 }
 0x7b9   : > { %9198 = vmatprep.mubr.msk.f32.mxu1 %vm15696_vm1, %v5620_v56  ;;  %vm15712_vm1 = vmmov %vm15167_vm0 }
 0x7ba   : > { %9199 = vmatmul.mubr.msk.f32.gmra.mrb[68].mxu1 %vm15697_vm5, %v9172_v52  ;;  %vm15713_vm5 = vmmov %vm15167_vm0 }
 0x7bb   : > { %v9175_v53 = vpop.f32.mrb[38].mxu1 }
 0x7bc   : > { %v5630_v30 = vpop.f32.mrb[39].mxu1 }
 0x7bd   : > { %9201 = vmatprep.mubr.msk.f32.mxu1 %vm15698_vm6, %v5630_v30  ;;  %vm15714_vm6 = vmmov %vm15167_vm0  ;;  %v10715_v30 = vld [vmem:[%s15121_s22 + $0x58] sm:$0xff] }
 0x7be   : > { %9202 = vmatmul.mubr.msk.f32.gmra.mrb[70].mxu1 %vm15699_vm7, %v9175_v53  ;;  %vm15715_vm7 = vmmov %vm15167_vm0 }
 0x7bf   : > { %v9178_v11 = vpop.f32.mrb[40].mxu1 }
 0x7c0   : > { %v5640_v46 = vpop.f32.mrb[41].mxu1 }
 0x7c1   : > { %9204 = vmatprep.mubr.msk.f32.mxu1 %vm15700_vm8, %v5640_v46  ;;  %vm15716_vm8 = vmmov %vm15167_vm0  ;;  %v10716_v46 = vld [vmem:[%s15121_s22 + $0x50] sm:$0xff] }
 0x7c2   : > { %9205 = vmatmul.mubr.msk.f32.gmra.mrb[72].mxu1 %vm15701_vm9, %v9178_v11  ;;  %vm15717_vm9 = vmmov %vm15167_vm0 }
 0x7c3   : > { %v9181_v62 = vpop.f32.mrb[42].mxu1 }
 0x7c4   : > { %v5650_v33 = vpop.f32.mrb[43].mxu1 }
 0x7c5   : > { %9207 = vmatprep.mubr.msk.f32.mxu1 %vm15702_vm10, %v5650_v33  ;;  %vm15718_vm10 = vmmov %vm15167_vm0 }
 0x7c6   : > { %9208 = vmatmul.mubr.msk.f32.gmra.mrb[74].mxu1 %vm15703_vm11, %v9181_v62  ;;  %vm15719_vm11 = vmmov %vm15167_vm0 }
 0x7c7   : > { %v9184_v17 = vpop.f32.mrb[44].mxu1 }
 0x7c8   : > { %v5660_v0 = vpop.f32.mrb[45].mxu1 }
 0x7c9   : > { %9210 = vmatprep.mubr.msk.f32.mxu1 %vm15704_vm12, %v5660_v0  ;;  %vm15720_vm12 = vmmov %vm15167_vm0 }
 0x7ca   : > { %9211 = vmatmul.mubr.msk.f32.gmra.mrb[76].mxu1 %vm15705_vm13, %v9184_v17  ;;  %vm15721_vm13 = vmmov %vm15167_vm0 }
 0x80e   : > { %v9187_v51 = vpop.f32.mrb[46].mxu1 }
 0x80f   : > { %v5670_v42 = vpop.f32.mrb[47].mxu1 }
 0x810   : > { %9213 = vmatprep.mubr.msk.f32.mxu1 %vm15706_vm14, %v5670_v42  ;;  %vm15722_vm14 = vmmov %vm15167_vm0 }
 0x811   : > { %9214 = vmatmul.mubr.msk.f32.gmra.mrb[78].mxu1 %vm15707_vm15, %v9187_v51  ;;  %vm15723_vm15 = vmmov %vm15167_vm0 }
 0x885   : > { %v9194_v27 = vpop.f32.mrb[64].mxu1 }
 0x886   : > { %v5824_v3 = vadd.f32 %v9194_v27, %v14054_v49  ;;  %v5818_v41 = vpop.f32.mrb[65].mxu1 }
 0x887   : > { %v5819_v29 = vadd.f32 %v14054_v49, %v5818_v41 }
 0x888   : > { %v14061_v2 = vadd.f32 %v10705_v13, %v5824_v3  ;;  %v10717_v3 = vld [vmem:[%s15121_s22 + $0x68] sm:$0xff] }
 0x889   : > { %v14066_v43 = vadd.f32 %v10706_v25, %v5819_v29  ;;  %v9197_v37 = vpop.f32.mrb[66].mxu1  ;;  %v10718_v29 = vld [vmem:[%s15121_s22 + $0x60] sm:$0xff] }
 0x88a   : > { %v5834_v19 = vadd.f32 %v9197_v37, %v14054_v49  ;;  %v5828_v34 = vpop.f32.mrb[67].mxu1  ;;  %v5918_v61 = vsel %vm15709_vm4, %v14061_v2, 0.0  ;;  %vm15724_vm4 = vmmov %vm15167_vm0 }
 0x88b   : > { %v5829_v8 = vadd.f32 %v14054_v49, %v5828_v34  ;;  %5919 = vadd.xlane.f32.xlu1 %v5918_v61  ;;  %v5915_v5 = vsel %vm15167_vm0, %v14066_v43, 0.0 }
 0x88c   : > { %v14077_v4 = vadd.f32 %v10707_v57, %v5834_v19  ;;  %5916 = vadd.xlane.f32.xlu0 %v5915_v5  ;;  %v10719_v5 = vld [vmem:[%s15121_s22 + $0x78] sm:$0xff] }
 0x88d   : > { %v14082_v14 = vadd.f32 %v10708_v63, %v5829_v8  ;;  %v9200_v18 = vpop.f32.mrb[68].mxu1  ;;  %v10720_v63 = vld [vmem:[%s15121_s22 + $0x70] sm:$0xff] }
 0x88e   : > { %v5844_v38 = vadd.f32 %v9200_v18, %v14054_v49  ;;  %v5838_v15 = vpop.f32.mrb[69].mxu1  ;;  %v5924_v9 = vsel %vm15710_vm2, %v14077_v4, 0.0  ;;  %vm15725_vm2 = vmmov %vm15167_vm0 }
 0x88f   : > { %v5839_v26 = vadd.f32 %v14054_v49, %v5838_v15  ;;  %5925 = vadd.xlane.f32.xlu1 %v5924_v9  ;;  %v5921_v35 = vsel %vm15711_vm3, %v14082_v14, 0.0  ;;  %vm15726_vm3 = vmmov %vm15167_vm0 }
 0x890   : > { %v14093_v44 = vadd.f32 %v10709_v6, %v5844_v38  ;;  %5922 = vadd.xlane.f32.xlu0 %v5921_v35 }
 0x891   : > { %v14098_v20 = vadd.f32 %v10710_v50, %v5839_v26  ;;  %v9203_v32 = vpop.f32.mrb[70].mxu1 }
 0x892   : > { %v5854_v55 = vadd.f32 %v9203_v32, %v14054_v49  ;;  %v5848_v31 = vpop.f32.mrb[71].mxu1  ;;  %v5930_v39 = vsel %vm15712_vm1, %v14093_v44, 0.0  ;;  %vm15727_vm1 = vmmov %vm15167_vm0 }
 0x893   : > { %v5849_v36 = vadd.f32 %v14054_v49, %v5848_v31  ;;  %5931 = vadd.xlane.f32.xlu1 %v5930_v39  ;;  %v5927_v58 = vsel %vm15713_vm5, %v14098_v20, 0.0  ;;  %vm15728_vm5 = vmmov %vm15167_vm0 }
 0x894   : > { %v14109_v12 = vadd.f32 %v10711_v48, %v5854_v55  ;;  %5928 = vadd.xlane.f32.xlu0 %v5927_v58 }
 0x895   : > { %v14114_v22 = vadd.f32 %v10712_v10, %v5849_v36  ;;  %v9206_v47 = vpop.f32.mrb[72].mxu1 }
 0x896   : > { %v5864_v60 = vadd.f32 %v9206_v47, %v14054_v49  ;;  %v5858_v59 = vpop.f32.mrb[73].mxu1  ;;  %v5936_v54 = vsel %vm15714_vm6, %v14109_v12, 0.0  ;;  %vm15729_vm6 = vmmov %vm15167_vm0 }
 0x897   : > { %v5859_v24 = vadd.f32 %v14054_v49, %v5858_v59  ;;  %5937 = vadd.xlane.f32.xlu1 %v5936_v54  ;;  %v5933_v21 = vsel %vm15715_vm7, %v14114_v22, 0.0  ;;  %vm15730_vm7 = vmmov %vm15167_vm0 }
 0x898   : > { %v14125_v40 = vadd.f32 %v10713_v1, %v5864_v60  ;;  %5934 = vadd.xlane.f32.xlu0 %v5933_v21 }
 0x899   : > { %v14130_v45 = vadd.f32 %v10714_v28, %v5859_v24  ;;  %v9209_v7 = vpop.f32.mrb[74].mxu1 }
 0x89a   : > { %v5874_v16 = vadd.f32 %v9209_v7, %v14054_v49  ;;  %v5868_v23 = vpop.f32.mrb[75].mxu1  ;;  %v5942_v52 = vsel %vm15716_vm8, %v14125_v40, 0.0  ;;  %vm15731_vm8 = vmmov %vm15167_vm0 }
 0x89b   : > { %v5869_v56 = vadd.f32 %v14054_v49, %v5868_v23  ;;  %5943 = vadd.xlane.f32.xlu1 %v5942_v52  ;;  %v5939_v53 = vsel %vm15717_vm9, %v14130_v45, 0.0  ;;  %vm15732_vm9 = vmmov %vm15167_vm0 }
 0x89c   : > { %v14141_v11 = vadd.f32 %v10715_v30, %v5874_v16  ;;  %5940 = vadd.xlane.f32.xlu0 %v5939_v53 }
 0x89d   : > { %v14146_v62 = vadd.f32 %v10716_v46, %v5869_v56  ;;  %v9212_v33 = vpop.f32.mrb[76].mxu1 }
 0x89e   : > { %v5884_v17 = vadd.f32 %v9212_v33, %v14054_v49  ;;  %v5878_v0 = vpop.f32.mrb[77].mxu1  ;;  %v5948_v51 = vsel %vm15718_vm10, %v14141_v11, 0.0  ;;  %vm15733_vm10 = vmmov %vm15167_vm0 }
 0x89f   : > { %v5879_v42 = vadd.f32 %v14054_v49, %v5878_v0  ;;  %5949 = vadd.xlane.f32.xlu1 %v5948_v51  ;;  %v5945_v27 = vsel %vm15719_vm11, %v14146_v62, 0.0  ;;  %vm15734_vm11 = vmmov %vm15167_vm0 }
 0x8a0   : > { %v14157_v41 = vadd.f32 %v10717_v3, %v5884_v17  ;;  %5946 = vadd.xlane.f32.xlu0 %v5945_v27 }
 0x8a1   : > { %v14162_v13 = vadd.f32 %v10718_v29, %v5879_v42 }
 0x8a2   : > { %v5954_v25 = vsel %vm15720_vm12, %v14157_v41, 0.0  ;;  %vm15735_vm12 = vmmov %vm15167_vm0 }
 0x8a3   : > { %5955 = vadd.xlane.f32.xlu1 %v5954_v25  ;;  %v5951_v37 = vsel %vm15721_vm13, %v14162_v13, 0.0  ;;  %vm15736_vm13 = vmmov %vm15167_vm0 }
 0x8a4   : > { %5952 = vadd.xlane.f32.xlu0 %v5951_v37 }
 0x8e4   : > { %v9215_v19 = vpop.f32.mrb[78].mxu1 }
 0x8e5   : > { %v5894_v34 = vadd.f32 %v9215_v19, %v14054_v49  ;;  %v5888_v61 = vpop.f32.mrb[79].mxu1 }
 0x8e6   : > { %v5889_v8 = vadd.f32 %v14054_v49, %v5888_v61 }
 0x8e7   : > { %v14173_v57 = vadd.f32 %v10719_v5, %v5894_v34 }
 0x8e8   : > { %v14178_v18 = vadd.f32 %v10720_v63, %v5889_v8 }
 0x8e9   : > { %v5960_v38 = vsel %vm15722_vm14, %v14173_v57, 0.0  ;;  %vm15737_vm14 = vmmov %vm15167_vm0 }
 0x8ea   : > { %5961 = vadd.xlane.f32.xlu1 %v5960_v38  ;;  %v5957_v15 = vsel %vm15723_vm15, %v14178_v18, 0.0  ;;  %vm15738_vm15 = vmmov %vm15167_vm0 }
 0x8eb   : > { %5958 = vadd.xlane.f32.xlu0 %v5957_v15 }
 0x918   : > { %v5920_v49 = vpop.xlane.xlu1 %5919 }
 0x919   : > { %v5965_v9 = vmul.f32 0.0625, %v5920_v49  ;;  %v5917_v26 = vpop.xlane.xlu0 %5916 }
 0x91a   : > { %v5964_v35 = vmul.f32 0.0625, %v5917_v26 }
 0x91b   : > { %v14185_v6 = vsub.f32 %v14061_v2, %v5965_v9 }
 0x91c   : > { %v14188_v50 = vsub.f32 %v14066_v43, %v5964_v35  ;;  %v5926_v32 = vpop.xlane.xlu1 %5925 }
 0x91d   : > { %v5967_v55 = vmul.f32 0.0625, %v5926_v32  ;;  %v5923_v31 = vpop.xlane.xlu0 %5922  ;;  %v5997_v39 = vmul.f32 %v14185_v6, %v14185_v6 }
 0x91e   : > { %v5966_v36 = vmul.f32 0.0625, %v5923_v31  ;;  %v5996_v58 = vmul.f32 %v14188_v50, %v14188_v50 }
 0x91f   : > { %v14195_v48 = vsub.f32 %v14077_v4, %v5967_v55  ;;  %v6015_v10 = vsel %vm15724_vm4, %v5997_v39, 0.0  ;;  %vm15742_vm4 = vmmov %vm15167_vm0 }
 0x920   : > { %v14199_v2 = vsub.f32 %v14082_v14, %v5966_v36  ;;  %v5932_v43 = vpop.xlane.xlu1 %5931  ;;  %6016 = vadd.xlane.f32.xlu1 %v6015_v10  ;;  %v6012_v47 = vsel %vm15167_vm0, %v5996_v58, 0.0  ;;  %v6168_v58 = vld [vmem:[%s10883_s19] sm:$0xff]  ;;  %v6169_v10 = vld [vmem:[%s10883_s19 + $0x8] sm:$0xff] }
 0x921   : > { %v5969_v60 = vmul.f32 0.0625, %v5932_v43  ;;  %6013 = vadd.xlane.f32.xlu0 %v6012_v47  ;;  %v5929_v59 = vpop.xlane.xlu0 %5928  ;;  %v5999_v54 = vmul.f32 %v14195_v48, %v14195_v48 }
 0x922   : > { %v5968_v24 = vmul.f32 0.0625, %v5929_v59  ;;  %v5998_v4 = vmul.f32 %v14199_v2, %v14199_v2 }
 0x923   : > { %v14207_v21 = vsub.f32 %v14093_v44, %v5969_v60  ;;  %v6021_v14 = vsel %vm15725_vm2, %v5999_v54, 0.0  ;;  %vm15743_vm2 = vmmov %vm15167_vm0 }
 0x924   : > { %v14211_v1 = vsub.f32 %v14098_v20, %v5968_v24  ;;  %v5938_v28 = vpop.xlane.xlu1 %5937  ;;  %6022 = vadd.xlane.f32.xlu1 %v6021_v14  ;;  %v6018_v7 = vsel %vm15726_vm3, %v5998_v4, 0.0  ;;  %vm15744_vm3 = vmmov %vm15167_vm0 }
 0x925   : > { %v5971_v16 = vmul.f32 0.0625, %v5938_v28  ;;  %6019 = vadd.xlane.f32.xlu0 %v6018_v7  ;;  %v5935_v23 = vpop.xlane.xlu0 %5934  ;;  %v6001_v52 = vmul.f32 %v14207_v21, %v14207_v21 }
 0x926   : > { %v5970_v56 = vmul.f32 0.0625, %v5935_v23  ;;  %v6000_v44 = vmul.f32 %v14211_v1, %v14211_v1 }
 0x927   : > { %v14219_v53 = vsub.f32 %v14109_v12, %v5971_v16  ;;  %v6027_v20 = vsel %vm15727_vm1, %v6001_v52, 0.0  ;;  %vm15745_vm1 = vmmov %vm15167_vm0 }
 0x928   : > { %v14223_v30 = vsub.f32 %v14114_v22, %v5970_v56  ;;  %v5944_v46 = vpop.xlane.xlu1 %5943  ;;  %6028 = vadd.xlane.f32.xlu1 %v6027_v20  ;;  %v6024_v33 = vsel %vm15728_vm5, %v6000_v44, 0.0  ;;  %vm15746_vm5 = vmmov %vm15167_vm0 }
 0x929   : > { %v5973_v17 = vmul.f32 0.0625, %v5944_v46  ;;  %6025 = vadd.xlane.f32.xlu0 %v6024_v33  ;;  %v5941_v0 = vpop.xlane.xlu0 %5940  ;;  %v6003_v51 = vmul.f32 %v14219_v53, %v14219_v53 }
 0x92a   : > { %v5972_v42 = vmul.f32 0.0625, %v5941_v0  ;;  %v6002_v12 = vmul.f32 %v14223_v30, %v14223_v30 }
 0x92b   : > { %v14231_v27 = vsub.f32 %v14125_v40, %v5973_v17  ;;  %v6033_v22 = vsel %vm15729_vm6, %v6003_v51, 0.0  ;;  %vm15747_vm6 = vmmov %vm15167_vm0 }
 0x92c   : > { %v14235_v3 = vsub.f32 %v14130_v45, %v5972_v42  ;;  %v5950_v29 = vpop.xlane.xlu1 %5949  ;;  %6034 = vadd.xlane.f32.xlu1 %v6033_v22  ;;  %v6030_v25 = vsel %vm15730_vm7, %v6002_v12, 0.0  ;;  %vm15748_vm7 = vmmov %vm15167_vm0 }
 0x92d   : > { %v5975_v37 = vmul.f32 0.0625, %v5950_v29  ;;  %6031 = vadd.xlane.f32.xlu0 %v6030_v25  ;;  %v5947_v19 = vpop.xlane.xlu0 %5946  ;;  %v6005_v34 = vmul.f32 %v14231_v27, %v14231_v27 }
 0x92e   : > { %v5974_v61 = vmul.f32 0.0625, %v5947_v19  ;;  %v6004_v40 = vmul.f32 %v14235_v3, %v14235_v3 }
 0x92f   : > { %v14243_v8 = vsub.f32 %v14141_v11, %v5975_v37  ;;  %v6039_v45 = vsel %vm15731_vm8, %v6005_v34, 0.0  ;;  %vm15749_vm8 = vmmov %vm15167_vm0 }
 0x930   : > { %v14247_v5 = vsub.f32 %v14146_v62, %v5974_v61  ;;  %v5956_v63 = vpop.xlane.xlu1 %5955  ;;  %6040 = vadd.xlane.f32.xlu1 %v6039_v45  ;;  %v6036_v38 = vsel %vm15732_vm9, %v6004_v40, 0.0  ;;  %v14287_v45 = vld [vmem:[%s15739_s8] ss:$0 sm:$0xff]  ;;  %vm15750_vm9 = vmmov %vm15167_vm0 }
 0x931   : > { %v5977_v15 = vmul.f32 0.0625, %v5956_v63  ;;  %6037 = vadd.xlane.f32.xlu0 %v6036_v38  ;;  %v5953_v49 = vpop.xlane.xlu0 %5952  ;;  %v6007_v9 = vmul.f32 %v14243_v8, %v14243_v8 }
 0x932   : > { %v5976_v26 = vmul.f32 0.0625, %v5953_v49  ;;  %v6006_v11 = vmul.f32 %v14247_v5, %v14247_v5 }
 0x933   : > { %v14255_v35 = vsub.f32 %v14157_v41, %v5977_v15  ;;  %v6045_v62 = vsel %vm15733_vm10, %v6007_v9, 0.0  ;;  %vm15751_vm10 = vmmov %vm15167_vm0 }
 0x934   : > { %v14259_v32 = vsub.f32 %v14162_v13, %v5976_v26  ;;  %6046 = vadd.xlane.f32.xlu1 %v6045_v62  ;;  %v6042_v55 = vsel %vm15734_vm11, %v6006_v11, 0.0  ;;  %v9940_v13 = vpack.c.bf16 %v6169_v10, %v6168_v58  ;;  %vm15752_vm11 = vmmov %vm15167_vm0 }
 0x935   : > { %6043 = vadd.xlane.f32.xlu0 %v6042_v55  ;;  %v6009_v31 = vmul.f32 %v14255_v35, %v14255_v35  ;;  %v14296_v55 = vld [vmem:[%s15741_s27] ss:$0 sm:$0xff] }
 0x936   : > { %v6008_v39 = vmul.f32 %v14259_v32, %v14259_v32  ;;  %9941 = vmatprep.subr.bf16.mxu0 %v9940_v13 }
 0x937   : > { %v6051_v36 = vsel %vm15735_vm12, %v6009_v31, 0.0  ;;  %9943 = vmatpush3.bf16.msra.mxu0 %v9940_v13  ;;  %vm15753_vm12 = vmmov %vm15167_vm0 }
 0x938   : > { %6052 = vadd.xlane.f32.xlu1 %v6051_v36  ;;  %v6048_v41 = vsel %vm15736_vm13, %v6008_v39, 0.0  ;;  %vm15754_vm13 = vmmov %vm15167_vm0 }
 0x939   : > { %6049 = vadd.xlane.f32.xlu0 %v6048_v41 }
 0x977   : > { %v5962_v43 = vpop.xlane.xlu1 %5961 }
 0x978   : > { %v5979_v47 = vmul.f32 0.0625, %v5962_v43  ;;  %v5959_v60 = vpop.xlane.xlu0 %5958 }
 0x979   : > { %v5978_v59 = vmul.f32 0.0625, %v5959_v60 }
 0x97a   : > { %v14271_v54 = vsub.f32 %v14173_v57, %v5979_v47 }
 0x97b   : > { %v14274_v24 = vsub.f32 %v14178_v18, %v5978_v59 }
 0x97c   : > { %v6011_v4 = vmul.f32 %v14271_v54, %v14271_v54 }
 0x97d   : > { %v6010_v14 = vmul.f32 %v14274_v24, %v14274_v24 }
 0x97e   : > { %v6057_v28 = vsel %vm15737_vm14, %v6011_v4, 0.0  ;;  %vm15755_vm14 = vmmov %vm15167_vm0 }
 0x97f   : > { %6058 = vadd.xlane.f32.xlu1 %v6057_v28  ;;  %v6054_v7 = vsel %vm15738_vm15, %v6010_v14, 0.0  ;;  %vm15756_vm15 = vmmov %vm15167_vm0 }
 0x980   : > { %6055 = vadd.xlane.f32.xlu0 %v6054_v7 }
 0x9ad   : > { %v6017_v16 = vpop.xlane.xlu1 %6016 }
 0x9ae   : > { %v6061_v23 = vmul.f32 0.0625, %v6017_v16  ;;  %v6014_v52 = vpop.xlane.xlu0 %6013 }
 0x9af   : > { %v6060_v57 = vmul.f32 0.0625, %v6014_v52 }
 0x9b0   : > { %v6077_v56 = vadd.f32 1e-05, %v6061_v23 }
 0x9b1   : > { %v6076_v44 = vadd.f32 1e-05, %v6060_v57  ;;  %v6023_v18 = vpop.xlane.xlu1 %6022 }
 0x9b2   : > { %10593 = vrsqrt.f32 %v6077_v56  ;;  %v6063_v20 = vmul.f32 0.0625, %v6023_v18  ;;  %v6020_v46 = vpop.xlane.xlu0 %6019 }
 0x9b3   : > { %10595 = vrsqrt.f32 %v6076_v44  ;;  %v6062_v33 = vmul.f32 0.0625, %v6020_v46 }
 0x9b4   : > { %v6079_v17 = vadd.f32 1e-05, %v6063_v20 }
 0x9b5   : > { %v6078_v0 = vadd.f32 1e-05, %v6062_v33  ;;  %v6029_v51 = vpop.xlane.xlu1 %6028 }
 0x9b6   : > { %10597 = vrsqrt.f32 %v6079_v17  ;;  %v6065_v42 = vmul.f32 0.0625, %v6029_v51  ;;  %v6026_v12 = vpop.xlane.xlu0 %6025 }
 0x9b7   : > { %10599 = vrsqrt.f32 %v6078_v0  ;;  %v6064_v22 = vmul.f32 0.0625, %v6026_v12 }
 0x9b8   : > { %v6081_v29 = vadd.f32 1e-05, %v6065_v42 }
 0x9b9   : > { %v6080_v25 = vadd.f32 1e-05, %v6064_v22  ;;  %v6035_v37 = vpop.xlane.xlu1 %6034 }
 0x9ba   : > { %10601 = vrsqrt.f32 %v6081_v29  ;;  %v6067_v19 = vmul.f32 0.0625, %v6035_v37  ;;  %v6032_v34 = vpop.xlane.xlu0 %6031 }
 0x9bb   : > { %10603 = vrsqrt.f32 %v6080_v25  ;;  %v6066_v61 = vmul.f32 0.0625, %v6032_v34 }
 0x9bc   : > { %v10594_v40 = vpop.eup %10593  ;;  %v6083_v63 = vadd.f32 1e-05, %v6067_v19 }
 0x9bd   : > { %v10596_v38 = vpop.eup %10595  ;;  %v6109_v15 = vmul.f32 %v10594_v40, %v14185_v6  ;;  %v6082_v49 = vadd.f32 1e-05, %v6066_v61  ;;  %v6041_v9 = vpop.xlane.xlu1 %6040 }
 0x9be   : > { %10605 = vrsqrt.f32 %v6083_v63  ;;  %v6069_v26 = vmul.f32 0.0625, %v6041_v9  ;;  %v6038_v11 = vpop.xlane.xlu0 %6037  ;;  %v6108_v62 = vmul.f32 %v10596_v38, %v14188_v50 }
 0x9bf   : > { %v6131_v31 = vmul.f32 %v14287_v45, %v6109_v15  ;;  %10607 = vrsqrt.f32 %v6082_v49  ;;  %v6068_v39 = vmul.f32 0.0625, %v6038_v11 }
 0x9c0   : > { %v10598_v36 = vpop.eup %10597  ;;  %v6085_v41 = vadd.f32 1e-05, %v6069_v26  ;;  %v6130_v6 = vmul.f32 %v14287_v45, %v6108_v62 }
 0x9c1   : > { %v10600_v58 = vpop.eup %10599  ;;  %v6084_v10 = vadd.f32 1e-05, %v6068_v39  ;;  %v6047_v13 = vpop.xlane.xlu1 %6046  ;;  %v6111_v43 = vmul.f32 %v10598_v36, %v14195_v48  ;;  %v14306_v4 = vadd.f32 %v14296_v55, %v6131_v31 }
 0x9c2   : > { %10609 = vrsqrt.f32 %v6085_v41  ;;  %v6071_v50 = vmul.f32 0.0625, %v6047_v13  ;;  %v6044_v47 = vpop.xlane.xlu0 %6043  ;;  %v14302_v60 = vadd.f32 %v14296_v55, %v6130_v6  ;;  %v6110_v59 = vmul.f32 %v10600_v58, %v14199_v2 }
 0x9c3   : > { %10611 = vrsqrt.f32 %v6084_v10  ;;  %v6070_v14 = vmul.f32 0.0625, %v6044_v47  ;;  %v6133_v28 = vmul.f32 %v14287_v45, %v6111_v43 }
 0x9c4   : > { %v10602_v7 = vpop.eup %10601  ;;  %v6087_v16 = vadd.f32 1e-05, %v6071_v50  ;;  %9220 = vmatprep.mubr.msk.f32.mxu0 %vm15742_vm4, %v14302_v60  ;;  %v6132_v48 = vmul.f32 %v14287_v45, %v6110_v59  ;;  %vm6529_vm4 = vcmask 523264  }
 0x9c5   : > { %v10604_v23 = vpop.eup %10603  ;;  %v6086_v52 = vadd.f32 1e-05, %v6070_v14  ;;  %v6053_v57 = vpop.xlane.xlu1 %6052  ;;  %9221 = vmatmul.mubr.msk.f32.vlgmr.msra.gmra.mrb[128].mxu0 %vm15167_vm0, %v14306_v4  ;;  %v6113_v2 = vmul.f32 %v10602_v7, %v14207_v21  ;;  %v14320_v33 = vadd.f32 %v14296_v55, %v6133_v28 }
 0x9c6   : > { %10613 = vrsqrt.f32 %v6087_v16  ;;  %v6073_v56 = vmul.f32 0.0625, %v6053_v57  ;;  %v6050_v44 = vpop.xlane.xlu0 %6049  ;;  %v14316_v18 = vadd.f32 %v14296_v55, %v6132_v48  ;;  %v6112_v20 = vmul.f32 %v10604_v23, %v14211_v1 }
 0x9c7   : > { %10615 = vrsqrt.f32 %v6086_v52  ;;  %v6072_v46 = vmul.f32 0.0625, %v6050_v44  ;;  %v6135_v17 = vmul.f32 %v14287_v45, %v6113_v2  ;;  %v6517_v44 = vld [vmem:[%s10893_s4 + $0x18] sm:$0xff] }
 0x9c8   : > { %v10606_v0 = vpop.eup %10605  ;;  %v6089_v51 = vadd.f32 1e-05, %v6073_v56  ;;  %9223 = vmatprep.mubr.msk.f32.mxu0 %vm15743_vm2, %v14316_v18  ;;  %v6134_v21 = vmul.f32 %v14287_v45, %v6112_v20  ;;  %vm15758_vm2 = vmmov %vm15167_vm0 }
 0x9c9   : > { %v10608_v42 = vpop.eup %10607  ;;  %v6088_v12 = vadd.f32 1e-05, %v6072_v46  ;;  %9224 = vmatmul.mubr.msk.f32.gmra.mrb[130].mxu0 %vm15744_vm3, %v14320_v33  ;;  %v6115_v1 = vmul.f32 %v10606_v0, %v14219_v53  ;;  %v14334_v25 = vadd.f32 %v14296_v55, %v6135_v17  ;;  %v6519_v46 = vld [vmem:[%s10893_s4 + $0x28] sm:$0xff]  ;;  %v6520_v0 = vld [vmem:[%s10893_s4 + $0x30] sm:$0xff]  ;;  %vm15759_vm3 = vmmov %vm15167_vm0 }
 0x9ca   : > { %10617 = vrsqrt.f32 %v6089_v51  ;;  %v14330_v22 = vadd.f32 %v14296_v55, %v6134_v21  ;;  %v6114_v29 = vmul.f32 %v10608_v42, %v14223_v30  ;;  %v6521_v51 = vld [vmem:[%s10893_s4 + $0x38] sm:$0xff]  ;;  %v14421_v42 = vld [vmem:[%s15757_s2] ss:$0 sm:$0xff] }
 0x9cb   : > { %10619 = vrsqrt.f32 %v6088_v12  ;;  %v6137_v37 = vmul.f32 %v14287_v45, %v6115_v1  ;;  %v9956_v21 = vpack.c.bf16 %v6521_v51, %v6520_v0 }
 0x9cc   : > { %v10610_v19 = vpop.eup %10609  ;;  %9226 = vmatprep.mubr.msk.f32.mxu0 %vm15745_vm1, %v14330_v22  ;;  %v6136_v34 = vmul.f32 %v14287_v45, %v6114_v29  ;;  %vm15760_vm1 = vmmov %vm15167_vm0 }
 0x9cd   : > { %v10612_v61 = vpop.eup %10611  ;;  %9227 = vmatmul.mubr.msk.f32.gmra.mrb[132].mxu0 %vm15746_vm5, %v14334_v25  ;;  %v6117_v53 = vmul.f32 %v10610_v19, %v14231_v27  ;;  %v14348_v63 = vadd.f32 %v14296_v55, %v6137_v37  ;;  %vm15761_vm5 = vmmov %vm15167_vm0 }
 0x9ce   : > { %v14344_v30 = vadd.f32 %v14296_v55, %v6136_v34  ;;  %v6116_v40 = vmul.f32 %v10612_v61, %v14235_v3 }
 0x9cf   : > { %v6139_v38 = vmul.f32 %v14287_v45, %v6117_v53 }
 0x9d0   : > { %v10614_v15 = vpop.eup %10613  ;;  %9229 = vmatprep.mubr.msk.f32.mxu0 %vm15747_vm6, %v14344_v30  ;;  %v6138_v49 = vmul.f32 %v14287_v45, %v6116_v40  ;;  %vm15762_vm6 = vmmov %vm15167_vm0 }
 0x9d1   : > { %v10616_v9 = vpop.eup %10615  ;;  %9230 = vmatmul.mubr.msk.f32.gmra.mrb[134].mxu0 %vm15748_vm7, %v14348_v63  ;;  %v6119_v27 = vmul.f32 %v10614_v15, %v14243_v8  ;;  %v14362_v11 = vadd.f32 %v14296_v55, %v6139_v38  ;;  %vm15763_vm7 = vmmov %vm15167_vm0 }
 0x9d2   : > { %v14358_v26 = vadd.f32 %v14296_v55, %v6138_v49  ;;  %v6118_v3 = vmul.f32 %v10616_v9, %v14247_v5 }
 0x9d3   : > { %v6141_v62 = vmul.f32 %v14287_v45, %v6119_v27 }
 0x9d4   : > { %v10618_v31 = vpop.eup %10617  ;;  %9232 = vmatprep.mubr.msk.f32.mxu0 %vm15749_vm8, %v14358_v26  ;;  %v6140_v39 = vmul.f32 %v14287_v45, %v6118_v3  ;;  %vm15764_vm8 = vmmov %vm15167_vm0 }
 0x9d5   : > { %v10620_v36 = vpop.eup %10619  ;;  %9233 = vmatmul.mubr.msk.f32.gmra.mrb[136].mxu0 %vm15750_vm9, %v14362_v11  ;;  %v6121_v8 = vmul.f32 %v10618_v31, %v14255_v35  ;;  %v14376_v6 = vadd.f32 %v14296_v55, %v6141_v62  ;;  %vm15765_vm9 = vmmov %vm15167_vm0 }
 0x9d6   : > { %v14372_v41 = vadd.f32 %v14296_v55, %v6140_v39  ;;  %v6120_v5 = vmul.f32 %v10620_v36, %v14259_v32 }
 0x9d7   : > { %v6143_v58 = vmul.f32 %v14287_v45, %v6121_v8 }
 0x9d8   : > { %9235 = vmatprep.mubr.msk.f32.mxu0 %vm15751_vm10, %v14372_v41  ;;  %v6142_v10 = vmul.f32 %v14287_v45, %v6120_v5  ;;  %vm15766_vm10 = vmmov %vm15167_vm0 }
 0x9d9   : > { %9236 = vmatmul.mubr.msk.f32.gmra.mrb[138].mxu0 %vm15752_vm11, %v14376_v6  ;;  %v14388_v13 = vadd.f32 %v14296_v55, %v6143_v58  ;;  %vm15767_vm11 = vmmov %vm15167_vm0 }
 0x9da   : > { %v14385_v35 = vadd.f32 %v14296_v55, %v6142_v10 }
 0x9dc   : > { %9238 = vmatprep.mubr.msk.f32.mxu0 %vm15753_vm12, %v14385_v35  ;;  %vm15768_vm12 = vmmov %vm15167_vm0 }
 0x9dd   : > { %9239 = vmatmul.mubr.msk.f32.gmra.mrb[140].mxu0 %vm15754_vm13, %v14388_v13  ;;  %vm15769_vm13 = vmmov %vm15167_vm0 }
 0xa0c   : > { %v6059_v32 = vpop.xlane.xlu1 %6058 }
 0xa0d   : > { %v6075_v43 = vmul.f32 0.0625, %v6059_v32  ;;  %v6056_v50 = vpop.xlane.xlu0 %6055 }
 0xa0e   : > { %v6074_v47 = vmul.f32 0.0625, %v6056_v50 }
 0xa0f   : > { %v6091_v59 = vadd.f32 1e-05, %v6075_v43 }
 0xa10   : > { %v6090_v14 = vadd.f32 1e-05, %v6074_v47 }
 0xa11   : > { %10621 = vrsqrt.f32 %v6091_v59 }
 0xa12   : > { %10623 = vrsqrt.f32 %v6090_v14 }
 0xa1b   : > { %v10622_v28 = vpop.eup %10621 }
 0xa1c   : > { %v10624_v7 = vpop.eup %10623  ;;  %v6123_v16 = vmul.f32 %v10622_v28, %v14271_v54  ;;  %v6514_v54 = vld [vmem:[%s10893_s4] sm:$0xff] }
 0xa1d   : > { %v6122_v48 = vmul.f32 %v10624_v7, %v14274_v24  ;;  %v6515_v24 = vld [vmem:[%s10893_s4 + $0x8] sm:$0xff] }
 0xa1e   : > { %v6145_v23 = vmul.f32 %v14287_v45, %v6123_v16  ;;  %v9944_v56 = vpack.c.bf16 %v6515_v24, %v6514_v54 }
 0xa1f   : > { %v6144_v52 = vmul.f32 %v14287_v45, %v6122_v48  ;;  %v6516_v45 = vld [vmem:[%s10893_s4 + $0x10] sm:$0xff] }
 0xa20   : > { %v14402_v2 = vadd.f32 %v14296_v55, %v6145_v23  ;;  %9945 = vmatprep.subr.bf16.mxu1 %v9944_v56  ;;  %v9948_v20 = vpack.c.bf16 %v6517_v44, %v6516_v45 }
 0xa21   : > { %v14399_v57 = vadd.f32 %v14296_v55, %v6144_v52  ;;  %9947 = vmatpush3.bf16.msra.mxu1 %v9944_v56  ;;  %v6518_v55 = vld [vmem:[%s10893_s4 + $0x20] sm:$0xff] }
 0xa22   : > { %9949 = vmatprep.subr.bf16.mxu1 %v9948_v20  ;;  %v9952_v17 = vpack.c.bf16 %v6519_v46, %v6518_v55 }
 0xa23   : > { %9241 = vmatprep.mubr.msk.f32.mxu0 %vm15755_vm14, %v14399_v57  ;;  %vm15770_vm14 = vmmov %vm15167_vm0 }
 0xa24   : > { %9242 = vmatmul.mubr.msk.f32.gmra.mrb[142].mxu0 %vm15756_vm15, %v14402_v2  ;;  %vm15771_vm15 = vmmov %vm15167_vm0 }
 0xa25   : > { %9951 = vmatpush3.bf16.msra.mxu1 %v9948_v20 }
 0xa26   : > { %9953 = vmatprep.subr.bf16.mxu1 %v9952_v17 }
 0xa29   : > { %9955 = vmatpush3.bf16.msra.mxu1 %v9952_v17 }
 0xa2a   : > { %9957 = vmatprep.subr.bf16.mxu1 %v9956_v21 }
 0xa2d   : > { %9959 = vmatpush3.bf16.msra.mxu1 %v9956_v21 }
 0xa98   : > { %v9222_v12 = vpop.f32.mrb[128].mxu0 }
 0xa99   : > { %v6297_v1 = vadd.f32 %v9222_v12, %v14421_v42  ;;  %v6291_v29 = vpop.f32.mrb[129].mxu0 }
 0xa9a   : > { %v6292_v37 = vadd.f32 %v14421_v42, %v6291_v29 }
 0xa9b   : > { %v6387_v19 = vmul.f32 0.044715, %v6297_v1  ;;  %v6371_v55 = vmul.f32 0.5, %v6297_v1 }
 0xa9c   : > { %v6386_v34 = vmul.f32 0.044715, %v6292_v37  ;;  %v9225_v61 = vpop.f32.mrb[130].mxu0 }
 0xa9d   : > { %v6403_v53 = vmul.f32 %v6387_v19, %v6297_v1  ;;  %v6307_v40 = vadd.f32 %v9225_v61, %v14421_v42  ;;  %v6301_v38 = vpop.f32.mrb[131].mxu0 }
 0xa9e   : > { %v6402_v15 = vmul.f32 %v6386_v34, %v6292_v37  ;;  %v14427_v49 = vadd.f32 %v14421_v42, %v6301_v38 }
 0xa9f   : > { %v6419_v9 = vmul.f32 %v6403_v53, %v6297_v1  ;;  %v6389_v27 = vmul.f32 0.044715, %v6307_v40 }
 0xaa0   : > { %v6418_v3 = vmul.f32 %v6402_v15, %v6292_v37  ;;  %v6388_v62 = vmul.f32 0.044715, %v14427_v49  ;;  %v9228_v31 = vpop.f32.mrb[132].mxu0  ;;  %v6370_v15 = vmul.f32 0.5, %v6292_v37 }
 0xaa1   : > { %v6435_v39 = vadd.f32 %v6419_v9, %v6297_v1  ;;  %v6405_v36 = vmul.f32 %v6389_v27, %v6307_v40  ;;  %v14431_v8 = vadd.f32 %v9228_v31, %v14421_v42  ;;  %v6311_v5 = vpop.f32.mrb[133].mxu0  ;;  %v6373_v31 = vmul.f32 0.5, %v6307_v40 }
 0xaa2   : > { %v6434_v58 = vadd.f32 %v6418_v3, %v6292_v37  ;;  %v6404_v10 = vmul.f32 %v6388_v62, %v14427_v49  ;;  %v14435_v32 = vadd.f32 %v14421_v42, %v6311_v5 }
 0xaa3   : > { %v6451_v43 = vmul.f32 0.7978846, %v6435_v39  ;;  %v6421_v50 = vmul.f32 %v6405_v36, %v6307_v40  ;;  %v6391_v47 = vmul.f32 0.044715, %v14431_v8 }
 0xaa4   : > { %v6420_v59 = vmul.f32 %v6404_v10, %v14427_v49  ;;  %v6390_v14 = vmul.f32 0.044715, %v14435_v32  ;;  %v9231_v28 = vpop.f32.mrb[134].mxu0  ;;  %v6450_v7 = vmul.f32 0.7978846, %v6434_v58 }
 0xaa5   : > { %10625 = vtanh.f32 %v6451_v43  ;;  %v6437_v16 = vadd.f32 %v6421_v50, %v6307_v40  ;;  %v6407_v48 = vmul.f32 %v6391_v47, %v14431_v8  ;;  %v14442_v23 = vadd.f32 %v9231_v28, %v14421_v42  ;;  %v6321_v52 = vpop.f32.mrb[135].mxu0 }
 0xaa6   : > { %v6436_v54 = vadd.f32 %v6420_v59, %v14427_v49  ;;  %v6406_v24 = vmul.f32 %v6390_v14, %v14435_v32  ;;  %v14447_v56 = vadd.f32 %v14421_v42, %v6321_v52  ;;  %10627 = vtanh.f32 %v6450_v7 }
 0xaa7   : > { %v6423_v45 = vmul.f32 %v6407_v48, %v14431_v8  ;;  %v6393_v44 = vmul.f32 0.044715, %v14442_v23  ;;  %v6453_v20 = vmul.f32 0.7978846, %v6437_v16  ;;  %v6372_v14 = vmul.f32 0.5, %v14427_v49 }
 0xaa8   : > { %v6422_v46 = vmul.f32 %v6406_v24, %v14435_v32  ;;  %v6392_v17 = vmul.f32 0.044715, %v14447_v56  ;;  %v9234_v0 = vpop.f32.mrb[136].mxu0  ;;  %v6452_v51 = vmul.f32 0.7978846, %v6436_v54 }
 0xaa9   : > { %v6439_v21 = vadd.f32 %v6423_v45, %v14431_v8  ;;  %v6409_v12 = vmul.f32 %v6393_v44, %v14442_v23  ;;  %v14456_v29 = vadd.f32 %v9234_v0, %v14421_v42  ;;  %v6331_v19 = vpop.f32.mrb[137].mxu0  ;;  %10629 = vtanh.f32 %v6453_v20 }
 0xaaa   : > { %v6438_v34 = vadd.f32 %v6422_v46, %v14435_v32  ;;  %v6408_v61 = vmul.f32 %v6392_v17, %v14447_v56  ;;  %v14461_v1 = vadd.f32 %v14421_v42, %v6331_v19  ;;  %10631 = vtanh.f32 %v6452_v51 }
 0xaab   : > { %v6425_v53 = vmul.f32 %v6409_v12, %v14442_v23  ;;  %v6395_v38 = vmul.f32 0.044715, %v14456_v29  ;;  %v6455_v9 = vmul.f32 0.7978846, %v6439_v21 }
 0xaac   : > { %v6424_v27 = vmul.f32 %v6408_v61, %v14447_v56  ;;  %v6394_v3 = vmul.f32 0.044715, %v14461_v1  ;;  %v9237_v62 = vpop.f32.mrb[138].mxu0  ;;  %v6454_v39 = vmul.f32 0.7978846, %v6438_v34 }
 0xaad   : > { %v6441_v36 = vadd.f32 %v6425_v53, %v14442_v23  ;;  %v6411_v5 = vmul.f32 %v6395_v38, %v14456_v29  ;;  %v14470_v58 = vadd.f32 %v9237_v62, %v14421_v42  ;;  %v6341_v10 = vpop.f32.mrb[139].mxu0  ;;  %10633 = vtanh.f32 %v6455_v9 }
 0xaae   : > { %v6440_v43 = vadd.f32 %v6424_v27, %v14447_v56  ;;  %v6410_v37 = vmul.f32 %v6394_v3, %v14461_v1  ;;  %v14475_v50 = vadd.f32 %v14421_v42, %v6341_v10  ;;  %10635 = vtanh.f32 %v6454_v39 }
 0xaaf   : > { %v10626_v47 = vpop.eup %10625  ;;  %v6427_v40 = vmul.f32 %v6411_v5, %v14456_v29  ;;  %v6397_v59 = vmul.f32 0.044715, %v14470_v58  ;;  %v6457_v28 = vmul.f32 0.7978846, %v6441_v36 }
 0xab0   : > { %v10628_v7 = vpop.eup %10627  ;;  %v6483_v16 = vadd.f32 1.0, %v10626_v47  ;;  %v6426_v48 = vmul.f32 %v6410_v37, %v14461_v1  ;;  %v6396_v52 = vmul.f32 0.044715, %v14475_v50  ;;  %v9240_v54 = vpop.f32.mrb[140].mxu0  ;;  %v6456_v24 = vmul.f32 0.7978846, %v6440_v43 }
 0xab1   : > { %v6443_v45 = vadd.f32 %v6427_v40, %v14456_v29  ;;  %v6413_v44 = vmul.f32 %v6397_v59, %v14470_v58  ;;  %v14485_v20 = vadd.f32 %v9240_v54, %v14421_v42  ;;  %v6351_v46 = vpop.f32.mrb[141].mxu0  ;;  %v6482_v17 = vadd.f32 1.0, %v10628_v7 }
 0xab2   : > { %v6499_v0 = vmul.f32 %v6483_v16, %v6371_v55  ;;  %v6442_v49 = vadd.f32 %v6426_v48, %v14461_v1  ;;  %v6412_v51 = vmul.f32 %v6396_v52, %v14475_v50  ;;  %v14490_v21 = vadd.f32 %v14421_v42, %v6351_v46 }
 0xab3   : > { %v10630_v12 = vpop.eup %10629  ;;  %v6429_v19 = vmul.f32 %v6413_v44, %v14470_v58  ;;  %v6399_v34 = vmul.f32 0.044715, %v14485_v20  ;;  %v6498_v61 = vmul.f32 %v6482_v17, %v6370_v15  ;;  %10637 = vtanh.f32 %v6456_v24 }
 0xab4   : > { %v10632_v53 = vpop.eup %10631  ;;  %v6428_v38 = vmul.f32 %v6412_v51, %v14475_v50  ;;  %v6398_v9 = vmul.f32 0.044715, %v14490_v21  ;;  %v6485_v55 = vadd.f32 1.0, %v10630_v12  ;;  %10639 = vtanh.f32 %v6457_v28 }
 0xab5   : > { %v6445_v27 = vadd.f32 %v6429_v19, %v14470_v58  ;;  %v6415_v3 = vmul.f32 %v6399_v34, %v14485_v20  ;;  %9260 = vmatprep.mubr.msk.f32.mxu1 %vm6529_vm4, %v6498_v61  ;;  %v6484_v62 = vadd.f32 1.0, %v10632_v53  ;;  %v6458_v39 = vmul.f32 0.7978846, %v6442_v49 }
 0xab6   : > { %v6444_v36 = vadd.f32 %v6428_v38, %v14475_v50  ;;  %v6414_v15 = vmul.f32 %v6398_v9, %v14490_v21  ;;  %9261 = vmatmul.mubr.msk.f32.vlgmr.msra.gmra.mrb[80].mxu1 %vm6529_vm4, %v6499_v0  ;;  %v6459_v5 = vmul.f32 0.7978846, %v6443_v45  ;;  %v6501_v47 = vmul.f32 %v6485_v55, %v6373_v31 }
 0xab7   : > { %v10634_v10 = vpop.eup %10633  ;;  %v6431_v43 = vmul.f32 %v6415_v3, %v14485_v20  ;;  %v6500_v37 = vmul.f32 %v6484_v62, %v6372_v14  ;;  %10641 = vtanh.f32 %v6458_v39  ;;  %v6374_v48 = vmul.f32 0.5, %v14435_v32 }
 0xab8   : > { %v10636_v40 = vpop.eup %10635  ;;  %v6430_v59 = vmul.f32 %v6414_v15, %v14490_v21  ;;  %v6487_v28 = vadd.f32 1.0, %v10634_v10  ;;  %10643 = vtanh.f32 %v6459_v5  ;;  %v6460_v7 = vmul.f32 0.7978846, %v6444_v36 }
 0xab9   : > { %v6447_v16 = vadd.f32 %v6431_v43, %v14485_v20  ;;  %9263 = vmatprep.mubr.msk.f32.mxu1 %vm6529_vm4, %v6500_v37  ;;  %v6486_v52 = vadd.f32 1.0, %v10636_v40  ;;  %v6461_v54 = vmul.f32 0.7978846, %v6445_v27  ;;  %v6375_v31 = vmul.f32 0.5, %v14431_v8 }
 0xaba   : > { %v6446_v24 = vadd.f32 %v6430_v59, %v14490_v21  ;;  %9264 = vmatmul.mubr.msk.f32.gmra.mrb[82].mxu1 %vm6529_vm4, %v6501_v47  ;;  %10645 = vtanh.f32 %v6460_v7  ;;  %v6376_v32 = vmul.f32 0.5, %v14447_v56  ;;  %v6377_v51 = vmul.f32 0.5, %v14442_v23 }
 0xabb   : > { %v6502_v14 = vmul.f32 %v6486_v52, %v6374_v48  ;;  %10647 = vtanh.f32 %v6461_v54  ;;  %v6463_v45 = vmul.f32 0.7978846, %v6447_v16  ;;  %v6503_v44 = vmul.f32 %v6487_v28, %v6375_v31 }
 0xabc   : > { %v6462_v46 = vmul.f32 0.7978846, %v6446_v24  ;;  %v6378_v53 = vmul.f32 0.5, %v14461_v1  ;;  %v6379_v9 = vmul.f32 0.5, %v14456_v29  ;;  %v6380_v23 = vmul.f32 0.5, %v14475_v50 }
 0xabd   : > { %v10638_v17 = vpop.eup %10637  ;;  %9266 = vmatprep.mubr.msk.f32.mxu1 %vm6529_vm4, %v6502_v14  ;;  %10649 = vtanh.f32 %v6463_v45  ;;  %v6381_v5 = vmul.f32 0.5, %v14470_v58  ;;  %v6382_v43 = vmul.f32 0.5, %v14490_v21  ;;  %v6383_v40 = vmul.f32 0.5, %v14485_v20 }
 0xabe   : > { %v10640_v0 = vpop.eup %10639  ;;  %9267 = vmatmul.mubr.msk.f32.gmra.mrb[84].mxu1 %vm6529_vm4, %v6503_v44  ;;  %v6488_v49 = vadd.f32 1.0, %v10638_v17  ;;  %10651 = vtanh.f32 %v6462_v46 }
 0xabf   : > { %v6489_v8 = vadd.f32 1.0, %v10640_v0 }
 0xac0   : > { %v6504_v12 = vmul.f32 %v6488_v49, %v6376_v32 }
 0xac1   : > { %v10642_v19 = vpop.eup %10641  ;;  %v6505_v34 = vmul.f32 %v6489_v8, %v6377_v51 }
 0xac2   : > { %v10644_v61 = vpop.eup %10643  ;;  %9269 = vmatprep.mubr.msk.f32.mxu1 %vm6529_vm4, %v6504_v12  ;;  %v6490_v38 = vadd.f32 1.0, %v10642_v19  ;;  %v14537_v12 = vld [vmem:[%s794_s16] ss:$0 sm:$0xff] }
 0xac3   : > { %9270 = vmatmul.mubr.msk.f32.gmra.mrb[86].mxu1 %vm6529_vm4, %v6505_v34  ;;  %v6491_v55 = vadd.f32 1.0, %v10644_v61 }
 0xac4   : > { %v10646_v56 = vpop.eup %10645  ;;  %v6506_v27 = vmul.f32 %v6490_v38, %v6378_v53 }
 0xac5   : > { %v10648_v3 = vpop.eup %10647  ;;  %v6507_v62 = vmul.f32 %v6491_v55, %v6379_v9  ;;  %v6492_v39 = vadd.f32 1.0, %v10646_v56 }
 0xac6   : > { %9272 = vmatprep.mubr.msk.f32.mxu1 %vm6529_vm4, %v6506_v27  ;;  %v6493_v36 = vadd.f32 1.0, %v10648_v3 }
 0xac7   : > { %v10650_v15 = vpop.eup %10649  ;;  %9273 = vmatmul.mubr.msk.f32.gmra.mrb[88].mxu1 %vm6529_vm4, %v6507_v62  ;;  %v6508_v1 = vmul.f32 %v6492_v39, %v6380_v23 }
 0xac8   : > { %v10652_v10 = vpop.eup %10651  ;;  %v6509_v29 = vmul.f32 %v6493_v36, %v6381_v5  ;;  %v6495_v47 = vadd.f32 1.0, %v10650_v15 }
 0xac9   : > { %9275 = vmatprep.mubr.msk.f32.mxu1 %vm6529_vm4, %v6508_v1  ;;  %v6494_v37 = vadd.f32 1.0, %v10652_v10 }
 0xaca   : > { %v6511_v59 = vmul.f32 %v6495_v47, %v6383_v40 }
 0xacb   : > { %9276 = vmatmul.mubr.msk.f32.gmra.mrb[90].mxu1 %vm6529_vm4, %v6509_v29  ;;  %v6510_v50 = vmul.f32 %v6494_v37, %v6382_v43 }
 0xacd   : > { %9278 = vmatprep.mubr.msk.f32.mxu1 %vm6529_vm4, %v6510_v50 }
 0xacf   : > { %9279 = vmatmul.mubr.msk.f32.gmra.mrb[92].mxu1 %vm6529_vm4, %v6511_v59 }
 0xaf7   : > { %v9243_v28 = vpop.f32.mrb[142].mxu0 }
 0xaf8   : > { %v6367_v58 = vadd.f32 %v9243_v28, %v14421_v42  ;;  %v6361_v7 = vpop.f32.mrb[143].mxu0 }
 0xaf9   : > { %v6362_v16 = vadd.f32 %v14421_v42, %v6361_v7 }
 0xafa   : > { %v6401_v48 = vmul.f32 0.044715, %v6367_v58  ;;  %v6385_v51 = vmul.f32 0.5, %v6367_v58 }
 0xafb   : > { %v6400_v21 = vmul.f32 0.044715, %v6362_v16  ;;  %v6384_v32 = vmul.f32 0.5, %v6362_v16 }
 0xafc   : > { %v6417_v52 = vmul.f32 %v6401_v48, %v6367_v58 }
 0xafd   : > { %v6416_v54 = vmul.f32 %v6400_v21, %v6362_v16 }
 0xafe   : > { %v6433_v24 = vmul.f32 %v6417_v52, %v6367_v58 }
 0xaff   : > { %v6432_v31 = vmul.f32 %v6416_v54, %v6362_v16 }
 0xb00   : > { %v6449_v14 = vadd.f32 %v6433_v24, %v6367_v58 }
 0xb01   : > { %v6448_v20 = vadd.f32 %v6432_v31, %v6362_v16 }
 0xb02   : > { %v6465_v45 = vmul.f32 0.7978846, %v6449_v14 }
 0xb03   : > { %v6464_v44 = vmul.f32 0.7978846, %v6448_v20 }
 0xb04   : > { %10653 = vtanh.f32 %v6465_v45 }
 0xb05   : > { %10655 = vtanh.f32 %v6464_v44 }
 0xb0e   : > { %v10654_v46 = vpop.eup %10653 }
 0xb0f   : > { %v10656_v17 = vpop.eup %10655  ;;  %v6497_v0 = vadd.f32 1.0, %v10654_v46 }
 0xb10   : > { %v6496_v49 = vadd.f32 1.0, %v10656_v17 }
 0xb11   : > { %v6513_v8 = vmul.f32 %v6497_v0, %v6385_v51 }
 0xb12   : > { %v6512_v42 = vmul.f32 %v6496_v49, %v6384_v32 }
 0xb14   : > { %9281 = vmatprep.mubr.msk.f32.mxu1 %vm6529_vm4, %v6512_v42 }
 0xb15   : > { %9282 = vmatmul.mubr.msk.f32.gmra.mrb[94].mxu1 %vm6529_vm4, %v6513_v8  ;;  %vm15772_vm4 = vmmov %vm15167_vm0 }
 0xb89   : > { %v9262_v19 = vpop.f32.mrb[80].mxu1 }
 0xb8a   : > { %v6650_v34 = vadd.f32 %v9262_v19, %v14537_v12  ;;  %v6644_v61 = vpop.f32.mrb[81].mxu1 }
 0xb8b   : > { %v6645_v53 = vadd.f32 %v14537_v12, %v6644_v61 }
 0xb8c   : > { %v14542_v38 = vadd.f32 %v6650_v34, %v14306_v4 }
 0xb8d   : > { %v14545_v9 = vadd.f32 %v6645_v53, %v14302_v60  ;;  %v9265_v55 = vpop.f32.mrb[82].mxu1 }
 0xb8e   : > { %v6660_v56 = vadd.f32 %v9265_v55, %v14537_v12  ;;  %v6654_v27 = vpop.f32.mrb[83].mxu1  ;;  %v6744_v3 = vsel %vm15167_vm0, %v14542_v38, 0.0 }
 0xb8f   : > { %v6655_v62 = vadd.f32 %v14537_v12, %v6654_v27  ;;  %6745 = vadd.xlane.f32.xlu1 %v6744_v3  ;;  %v6741_v23 = vsel %vm15758_vm2, %v14545_v9, 0.0  ;;  %vm15773_vm2 = vmmov %vm15167_vm0 }
 0xb90   : > { %v14554_v39 = vadd.f32 %v6660_v56, %v14320_v33  ;;  %6742 = vadd.xlane.f32.xlu0 %v6741_v23 }
 0xb91   : > { %v14557_v60 = vadd.f32 %v6655_v62, %v14316_v18  ;;  %v9268_v4 = vpop.f32.mrb[84].mxu1 }
 0xb92   : > { %v6670_v36 = vadd.f32 %v9268_v4, %v14537_v12  ;;  %v6664_v15 = vpop.f32.mrb[85].mxu1  ;;  %v6750_v1 = vsel %vm15759_vm3, %v14554_v39, 0.0  ;;  %vm15774_vm3 = vmmov %vm15167_vm0 }
 0xb93   : > { %v6665_v5 = vadd.f32 %v14537_v12, %v6664_v15  ;;  %6751 = vadd.xlane.f32.xlu1 %v6750_v1  ;;  %v6747_v10 = vsel %vm15760_vm1, %v14557_v60, 0.0  ;;  %vm15775_vm1 = vmmov %vm15167_vm0 }
 0xb94   : > { %v14566_v33 = vadd.f32 %v6670_v36, %v14334_v25  ;;  %6748 = vadd.xlane.f32.xlu0 %v6747_v10 }
 0xb95   : > { %v14569_v18 = vadd.f32 %v6665_v5, %v14330_v22 }
 0xb96   : > { %v9271_v29 = vpop.f32.mrb[86].mxu1  ;;  %v6756_v43 = vsel %vm15761_vm5, %v14566_v33, 0.0  ;;  %vm15776_vm5 = vmmov %vm15167_vm0 }
 0xb97   : > { %v6680_v37 = vadd.f32 %v9271_v29, %v14537_v12  ;;  %v6674_v47 = vpop.f32.mrb[87].mxu1  ;;  %6757 = vadd.xlane.f32.xlu1 %v6756_v43  ;;  %v6753_v50 = vsel %vm15762_vm6, %v14569_v18, 0.0  ;;  %vm15777_vm6 = vmmov %vm15167_vm0 }
 0xb98   : > { %v6675_v40 = vadd.f32 %v14537_v12, %v6674_v47  ;;  %6754 = vadd.xlane.f32.xlu0 %v6753_v50 }
 0xb99   : > { %v14578_v25 = vadd.f32 %v6680_v37, %v14348_v63 }
 0xb9a   : > { %v14581_v22 = vadd.f32 %v6675_v40, %v14344_v30  ;;  %v9274_v59 = vpop.f32.mrb[88].mxu1 }
 0xb9b   : > { %v6690_v28 = vadd.f32 %v9274_v59, %v14537_v12  ;;  %v6684_v58 = vpop.f32.mrb[89].mxu1  ;;  %v6762_v7 = vsel %vm15763_vm7, %v14578_v25, 0.0  ;;  %vm15778_vm7 = vmmov %vm15167_vm0 }
 0xb9c   : > { %v6685_v16 = vadd.f32 %v14537_v12, %v6684_v58  ;;  %6763 = vadd.xlane.f32.xlu1 %v6762_v7  ;;  %v6759_v48 = vsel %vm15764_vm8, %v14581_v22, 0.0  ;;  %vm15779_vm8 = vmmov %vm15167_vm0 }
 0xb9d   : > { %v14590_v21 = vadd.f32 %v6690_v28, %v14362_v11  ;;  %6760 = vadd.xlane.f32.xlu0 %v6759_v48 }
 0xb9e   : > { %v14593_v30 = vadd.f32 %v6685_v16, %v14358_v26  ;;  %v9277_v63 = vpop.f32.mrb[90].mxu1 }
 0xb9f   : > { %v6700_v52 = vadd.f32 %v9277_v63, %v14537_v12  ;;  %v6694_v54 = vpop.f32.mrb[91].mxu1  ;;  %v6768_v24 = vsel %vm15765_vm9, %v14590_v21, 0.0  ;;  %vm15780_vm9 = vmmov %vm15167_vm0 }
 0xba0   : > { %v6695_v31 = vadd.f32 %v14537_v12, %v6694_v54  ;;  %6769 = vadd.xlane.f32.xlu1 %v6768_v24  ;;  %v6765_v14 = vsel %vm15766_vm10, %v14593_v30, 0.0  ;;  %vm15781_vm10 = vmmov %vm15167_vm0 }
 0xba1   : > { %v14602_v11 = vadd.f32 %v6700_v52, %v14376_v6  ;;  %6766 = vadd.xlane.f32.xlu0 %v6765_v14 }
 0xba2   : > { %v14605_v26 = vadd.f32 %v6695_v31, %v14372_v41  ;;  %v9280_v20 = vpop.f32.mrb[92].mxu1 }
 0xba3   : > { %v6710_v45 = vadd.f32 %v9280_v20, %v14537_v12  ;;  %v6704_v44 = vpop.f32.mrb[93].mxu1  ;;  %v6774_v46 = vsel %vm15767_vm11, %v14602_v11, 0.0  ;;  %vm15782_vm11 = vmmov %vm15167_vm0 }
 0xba4   : > { %v6705_v17 = vadd.f32 %v14537_v12, %v6704_v44  ;;  %6775 = vadd.xlane.f32.xlu1 %v6774_v46  ;;  %v6771_v0 = vsel %vm15768_vm12, %v14605_v26, 0.0  ;;  %vm15783_vm12 = vmmov %vm15167_vm0 }
 0xba5   : > { %v14614_v6 = vadd.f32 %v6710_v45, %v14388_v13  ;;  %6772 = vadd.xlane.f32.xlu0 %v6771_v0 }
 0xba6   : > { %v14617_v41 = vadd.f32 %v6705_v17, %v14385_v35 }
 0xba7   : > { %v6780_v32 = vsel %vm15769_vm13, %v14614_v6, 0.0  ;;  %vm15784_vm13 = vmmov %vm15167_vm0 }
 0xba8   : > { %6781 = vadd.xlane.f32.xlu1 %v6780_v32  ;;  %v6777_v49 = vsel %vm15770_vm14, %v14617_v41, 0.0  ;;  %vm15785_vm14 = vmmov %vm15167_vm0 }
 0xba9   : > { %6778 = vadd.xlane.f32.xlu0 %v6777_v49 }
 0xbe8   : > { %v9283_v51 = vpop.f32.mrb[94].mxu1 }
 0xbe9   : > { %v6720_v42 = vadd.f32 %v9283_v51, %v14537_v12  ;;  %v6714_v8 = vpop.f32.mrb[95].mxu1 }
 0xbea   : > { %v6715_v19 = vadd.f32 %v14537_v12, %v6714_v8 }
 0xbeb   : > { %v14626_v13 = vadd.f32 %v6720_v42, %v14402_v2 }
 0xbec   : > { %v14629_v35 = vadd.f32 %v6715_v19, %v14399_v57 }
 0xbed   : > { %v6786_v34 = vsel %vm15771_vm15, %v14626_v13, 0.0  ;;  %vm15786_vm15 = vmmov %vm15167_vm0 }
 0xbee   : > { %6787 = vadd.xlane.f32.xlu1 %v6786_v34  ;;  %v6783_v61 = vsel %vm15772_vm4, %v14629_v35, 0.0  ;;  %vm15787_vm4 = vmmov %vm15167_vm0 }
 0xbef   : > { %6784 = vadd.xlane.f32.xlu0 %v6783_v61 }
 0xc1c   : > { %v6746_v53 = vpop.xlane.xlu1 %6745 }
 0xc1d   : > { %v6790_v55 = vmul.f32 0.0625, %v6746_v53  ;;  %v6743_v56 = vpop.xlane.xlu0 %6742 }
 0xc1e   : > { %v6789_v27 = vmul.f32 0.0625, %v6743_v56 }
 0xc1f   : > { %v14636_v12 = vsub.f32 %v14542_v38, %v6790_v55 }
 0xc20   : > { %v14639_v2 = vsub.f32 %v14545_v9, %v6789_v27  ;;  %v6752_v57 = vpop.xlane.xlu1 %6751 }
 0xc21   : > { %v6792_v3 = vmul.f32 0.0625, %v6752_v57  ;;  %v6749_v62 = vpop.xlane.xlu0 %6748  ;;  %v6822_v23 = vmul.f32 %v14636_v12, %v14636_v12 }
 0xc22   : > { %v6791_v4 = vmul.f32 0.0625, %v6749_v62  ;;  %v6821_v36 = vmul.f32 %v14639_v2, %v14639_v2 }
 0xc23   : > { %v14646_v15 = vsub.f32 %v14554_v39, %v6792_v3  ;;  %v6840_v1 = vsel %vm15167_vm0, %v6822_v23, 0.0 }
 0xc24   : > { %v14650_v38 = vsub.f32 %v14557_v60, %v6791_v4  ;;  %v6758_v9 = vpop.xlane.xlu1 %6757  ;;  %6841 = vadd.xlane.f32.xlu1 %v6840_v1  ;;  %v6837_v5 = vsel %vm15773_vm2, %v6821_v36, 0.0  ;;  %vm15790_vm2 = vmmov %vm15167_vm0 }
 0xc25   : > { %v6794_v10 = vmul.f32 0.0625, %v6758_v9  ;;  %6838 = vadd.xlane.f32.xlu0 %v6837_v5  ;;  %v6755_v29 = vpop.xlane.xlu0 %6754  ;;  %v6824_v43 = vmul.f32 %v14646_v15, %v14646_v15 }
 0xc26   : > { %v6793_v37 = vmul.f32 0.0625, %v6755_v29  ;;  %v6823_v39 = vmul.f32 %v14650_v38, %v14650_v38 }
 0xc27   : > { %v14658_v47 = vsub.f32 %v14566_v33, %v6794_v10  ;;  %v6846_v60 = vsel %vm15774_vm3, %v6824_v43, 0.0  ;;  %vm15791_vm3 = vmmov %vm15167_vm0 }
 0xc28   : > { %v14662_v50 = vsub.f32 %v14569_v18, %v6793_v37  ;;  %6847 = vadd.xlane.f32.xlu1 %v6846_v60  ;;  %v6843_v40 = vsel %vm15775_vm1, %v6823_v39, 0.0  ;;  %vm15792_vm1 = vmmov %vm15167_vm0 }
 0xc29   : > { %v6764_v59 = vpop.xlane.xlu1 %6763  ;;  %6844 = vadd.xlane.f32.xlu0 %v6843_v40  ;;  %v6826_v28 = vmul.f32 %v14658_v47, %v14658_v47 }
 0xc2a   : > { %v6796_v58 = vmul.f32 0.0625, %v6764_v59  ;;  %v6761_v7 = vpop.xlane.xlu0 %6760  ;;  %v6825_v16 = vmul.f32 %v14662_v50, %v14662_v50 }
 0xc2b   : > { %v6795_v33 = vmul.f32 0.0625, %v6761_v7  ;;  %v6852_v48 = vsel %vm15776_vm5, %v6826_v28, 0.0  ;;  %vm15793_vm5 = vmmov %vm15167_vm0 }
 0xc2c   : > { %v14671_v63 = vsub.f32 %v14578_v25, %v6796_v58  ;;  %6853 = vadd.xlane.f32.xlu1 %v6852_v48  ;;  %v6849_v18 = vsel %vm15777_vm6, %v6825_v16, 0.0  ;;  %vm15794_vm6 = vmmov %vm15167_vm0 }
 0xc2d   : > { %v14675_v52 = vsub.f32 %v14581_v22, %v6795_v33  ;;  %v6770_v54 = vpop.xlane.xlu1 %6769  ;;  %6850 = vadd.xlane.f32.xlu0 %v6849_v18 }
 0xc2e   : > { %v6798_v24 = vmul.f32 0.0625, %v6770_v54  ;;  %v6767_v31 = vpop.xlane.xlu0 %6766  ;;  %v6828_v14 = vmul.f32 %v14671_v63, %v14671_v63 }
 0xc2f   : > { %v6797_v20 = vmul.f32 0.0625, %v6767_v31  ;;  %v6827_v45 = vmul.f32 %v14675_v52, %v14675_v52 }
 0xc30   : > { %v14682_v25 = vsub.f32 %v14590_v21, %v6798_v24  ;;  %v6858_v44 = vsel %vm15778_vm7, %v6828_v14, 0.0  ;;  %vm15795_vm7 = vmmov %vm15167_vm0 }
 0xc31   : > { %v14686_v46 = vsub.f32 %v14593_v30, %v6797_v20  ;;  %v6776_v22 = vpop.xlane.xlu1 %6775  ;;  %6859 = vadd.xlane.f32.xlu1 %v6858_v44  ;;  %v6855_v17 = vsel %vm15779_vm8, %v6827_v45, 0.0  ;;  %vm15796_vm8 = vmmov %vm15167_vm0 }
 0xc32   : > { %v6800_v0 = vmul.f32 0.0625, %v6776_v22  ;;  %6856 = vadd.xlane.f32.xlu0 %v6855_v17  ;;  %v6773_v32 = vpop.xlane.xlu0 %6772  ;;  %v6830_v49 = vmul.f32 %v14682_v25, %v14682_v25 }
 0xc33   : > { %v6799_v51 = vmul.f32 0.0625, %v6773_v32  ;;  %v6829_v21 = vmul.f32 %v14686_v46, %v14686_v46  ;;  %v14736_v32 = vld [vmem:[%s797_s5] ss:$0 sm:$0xff] }
 0xc34   : > { %v14694_v42 = vsub.f32 %v14602_v11, %v6800_v0  ;;  %v6864_v30 = vsel %vm15780_vm9, %v6830_v49, 0.0  ;;  %vm15797_vm9 = vmmov %vm15167_vm0 }
 0xc35   : > { %v14698_v8 = vsub.f32 %v14605_v26, %v6799_v51  ;;  %v6782_v19 = vpop.xlane.xlu1 %6781  ;;  %6865 = vadd.xlane.f32.xlu1 %v6864_v30  ;;  %v6861_v34 = vsel %vm15781_vm10, %v6829_v21, 0.0  ;;  %vm15798_vm10 = vmmov %vm15167_vm0 }
 0xc36   : > { %v6802_v61 = vmul.f32 0.0625, %v6782_v19  ;;  %6862 = vadd.xlane.f32.xlu0 %v6861_v34  ;;  %v6779_v53 = vpop.xlane.xlu0 %6778  ;;  %v6832_v55 = vmul.f32 %v14694_v42, %v14694_v42  ;;  %v14744_v19 = vld [vmem:[%s800_s11] ss:$0 sm:$0xff] }
 0xc37   : > { %v6801_v56 = vmul.f32 0.0625, %v6779_v53  ;;  %v6831_v11 = vmul.f32 %v14698_v8, %v14698_v8 }
 0xc38   : > { %v14706_v27 = vsub.f32 %v14614_v6, %v6802_v61  ;;  %v6870_v26 = vsel %vm15782_vm11, %v6832_v55, 0.0  ;;  %vm15799_vm11 = vmmov %vm15167_vm0 }
 0xc39   : > { %v14710_v57 = vsub.f32 %v14617_v41, %v6801_v56  ;;  %6871 = vadd.xlane.f32.xlu1 %v6870_v26  ;;  %v6867_v3 = vsel %vm15783_vm12, %v6831_v11, 0.0  ;;  %vm15800_vm12 = vmmov %vm15167_vm0 }
 0xc3a   : > { %6868 = vadd.xlane.f32.xlu0 %v6867_v3  ;;  %v6834_v62 = vmul.f32 %v14706_v27, %v14706_v27 }
 0xc3b   : > { %v6833_v23 = vmul.f32 %v14710_v57, %v14710_v57 }
 0xc3c   : > { %v6876_v4 = vsel %vm15784_vm13, %v6834_v62, 0.0  ;;  %vm15801_vm13 = vmmov %vm15167_vm0 }
 0xc3d   : > { %6877 = vadd.xlane.f32.xlu1 %v6876_v4  ;;  %v6873_v6 = vsel %vm15785_vm14, %v6833_v23, 0.0  ;;  %vm15802_vm14 = vmmov %vm15167_vm0 }
 0xc3e   : > { %6874 = vadd.xlane.f32.xlu0 %v6873_v6 }
 0xc7b   : > { %v6788_v36 = vpop.xlane.xlu1 %6787 }
 0xc7c   : > { %v6804_v1 = vmul.f32 0.0625, %v6788_v36  ;;  %v6785_v41 = vpop.xlane.xlu0 %6784 }
 0xc7d   : > { %v6803_v9 = vmul.f32 0.0625, %v6785_v41 }
 0xc7e   : > { %v14720_v5 = vsub.f32 %v14626_v13, %v6804_v1 }
 0xc7f   : > { %v14723_v10 = vsub.f32 %v14629_v35, %v6803_v9 }
 0xc80   : > { %v6836_v29 = vmul.f32 %v14720_v5, %v14720_v5 }
 0xc81   : > { %v6835_v43 = vmul.f32 %v14723_v10, %v14723_v10 }
 0xc82   : > { %v6882_v37 = vsel %vm15786_vm15, %v6836_v29, 0.0  ;;  %vm15803_vm15 = vmmov %vm15167_vm0 }
 0xc83   : > { %6883 = vadd.xlane.f32.xlu1 %v6882_v37  ;;  %v6879_v39 = vsel %vm15787_vm4, %v6835_v43, 0.0  ;;  %vm15804_vm4 = vmmov %vm15167_vm0 }
 0xc84   : > { %6880 = vadd.xlane.f32.xlu0 %v6879_v39 }
 0xcb1   : > { %v6842_v60 = vpop.xlane.xlu1 %6841 }
 0xcb2   : > { %v6886_v40 = vmul.f32 0.0625, %v6842_v60  ;;  %v6839_v59 = vpop.xlane.xlu0 %6838 }
 0xcb3   : > { %v6885_v13 = vmul.f32 0.0625, %v6839_v59 }
 0xcb4   : > { %v6902_v28 = vadd.f32 1e-05, %v6886_v40 }
 0xcb5   : > { %v6901_v58 = vadd.f32 1e-05, %v6885_v13  ;;  %v6848_v35 = vpop.xlane.xlu1 %6847 }
 0xcb6   : > { %10657 = vrsqrt.f32 %v6902_v28  ;;  %v6888_v7 = vmul.f32 0.0625, %v6848_v35  ;;  %v6845_v16 = vpop.xlane.xlu0 %6844 }
 0xcb7   : > { %10659 = vrsqrt.f32 %v6901_v58  ;;  %v6887_v33 = vmul.f32 0.0625, %v6845_v16 }
 0xcb8   : > { %v6904_v48 = vadd.f32 1e-05, %v6888_v7 }
 0xcb9   : > { %v6903_v18 = vadd.f32 1e-05, %v6887_v33  ;;  %v6854_v54 = vpop.xlane.xlu1 %6853 }
 0xcba   : > { %10661 = vrsqrt.f32 %v6904_v48  ;;  %v6890_v24 = vmul.f32 0.0625, %v6854_v54  ;;  %v6851_v31 = vpop.xlane.xlu0 %6850 }
 0xcbb   : > { %10663 = vrsqrt.f32 %v6903_v18  ;;  %v6889_v14 = vmul.f32 0.0625, %v6851_v31 }
 0xcbc   : > { %v6906_v20 = vadd.f32 1e-05, %v6890_v24 }
 0xcbd   : > { %v6905_v45 = vadd.f32 1e-05, %v6889_v14 }
 0xcbe   : > { %10665 = vrsqrt.f32 %v6906_v20  ;;  %v6860_v44 = vpop.xlane.xlu1 %6859 }
 0xcbf   : > { %10667 = vrsqrt.f32 %v6905_v45  ;;  %v6892_v22 = vmul.f32 0.0625, %v6860_v44  ;;  %v6857_v17 = vpop.xlane.xlu0 %6856 }
 0xcc0   : > { %v10658_v0 = vpop.eup %10657  ;;  %v6891_v49 = vmul.f32 0.0625, %v6857_v17 }
 0xcc1   : > { %v10660_v51 = vpop.eup %10659  ;;  %v6934_v21 = vmul.f32 %v10658_v0, %v14636_v12  ;;  %v6908_v30 = vadd.f32 1e-05, %v6892_v22 }
 0xcc2   : > { %v6933_v34 = vmul.f32 %v10660_v51, %v14639_v2  ;;  %v6907_v61 = vadd.f32 1e-05, %v6891_v49  ;;  %v6866_v53 = vpop.xlane.xlu1 %6865 }
 0xcc3   : > { %v6956_v55 = vmul.f32 %v14736_v32, %v6934_v21  ;;  %10669 = vrsqrt.f32 %v6908_v30  ;;  %v6894_v56 = vmul.f32 0.0625, %v6866_v53  ;;  %v6863_v11 = vpop.xlane.xlu0 %6862 }
 0xcc4   : > { %v10662_v26 = vpop.eup %10661  ;;  %v6955_v3 = vmul.f32 %v14736_v32, %v6933_v34  ;;  %10671 = vrsqrt.f32 %v6907_v61  ;;  %v6893_v12 = vmul.f32 0.0625, %v6863_v11 }
 0xcc5   : > { %v10664_v62 = vpop.eup %10663  ;;  %v6978_v23 = vadd.f32 %v14744_v19, %v6956_v55  ;;  %v6936_v4 = vmul.f32 %v10662_v26, %v14646_v15  ;;  %v6910_v6 = vadd.f32 1e-05, %v6894_v56 }
 0xcc6   : > { %v6977_v2 = vadd.f32 %v14744_v19, %v6955_v3  ;;  %v6935_v36 = vmul.f32 %v10664_v62, %v14650_v38  ;;  %v6909_v1 = vadd.f32 1e-05, %v6893_v12  ;;  %v6872_v41 = vpop.xlane.xlu1 %6871 }
 0xcc7   : > { %6994 = vst.msk [vmem:[%s15121_s22 + $0x8] sm:$0xff] %vm15167_vm0, %v6978_v23  ;;  %v6958_v9 = vmul.f32 %v14736_v32, %v6936_v4  ;;  %10673 = vrsqrt.f32 %v6910_v6  ;;  %v6896_v29 = vmul.f32 0.0625, %v6872_v41  ;;  %v6869_v43 = vpop.xlane.xlu0 %6868 }
 0xcc8   : > { %v10666_v37 = vpop.eup %10665  ;;  %6993 = vst.msk [vmem:[%s15121_s22] sm:$0xff] %vm15790_vm2, %v6977_v2  ;;  %v6957_v15 = vmul.f32 %v14736_v32, %v6935_v36  ;;  %10675 = vrsqrt.f32 %v6909_v1  ;;  %v6895_v38 = vmul.f32 0.0625, %v6869_v43 }
 0xcc9   : > { %v10668_v39 = vpop.eup %10667  ;;  %v6980_v60 = vadd.f32 %v14744_v19, %v6958_v9  ;;  %v6938_v40 = vmul.f32 %v10666_v37, %v14658_v47  ;;  %v6912_v59 = vadd.f32 1e-05, %v6896_v29 }
 0xcca   : > { %v6979_v13 = vadd.f32 %v14744_v19, %v6957_v15  ;;  %v6937_v28 = vmul.f32 %v10668_v39, %v14662_v50  ;;  %v6911_v58 = vadd.f32 1e-05, %v6895_v38  ;;  %v6878_v35 = vpop.xlane.xlu1 %6877 }
 0xccb   : > { %6996 = vst.msk [vmem:[%s15121_s22 + $0x18] sm:$0xff] %vm15791_vm3, %v6980_v60  ;;  %v6960_v7 = vmul.f32 %v14736_v32, %v6938_v40  ;;  %10677 = vrsqrt.f32 %v6912_v59  ;;  %v6898_v16 = vmul.f32 0.0625, %v6878_v35  ;;  %v6875_v33 = vpop.xlane.xlu0 %6874 }
 0xccc   : > { %6995 = vst.msk [vmem:[%s15121_s22 + $0x10] sm:$0xff] %vm15792_vm1, %v6979_v13  ;;  %v6959_v47 = vmul.f32 %v14736_v32, %v6937_v28  ;;  %10679 = vrsqrt.f32 %v6911_v58  ;;  %v6897_v50 = vmul.f32 0.0625, %v6875_v33 }
 0xccd   : > { %v10670_v48 = vpop.eup %10669  ;;  %v6982_v18 = vadd.f32 %v14744_v19, %v6960_v7  ;;  %v6914_v54 = vadd.f32 1e-05, %v6898_v16 }
 0xcce   : > { %v10672_v24 = vpop.eup %10671  ;;  %v6981_v31 = vadd.f32 %v14744_v19, %v6959_v47  ;;  %v6940_v14 = vmul.f32 %v10670_v48, %v14671_v63  ;;  %v6913_v20 = vadd.f32 1e-05, %v6897_v50 }
 0xccf   : > { %6998 = vst.msk [vmem:[%s15121_s22 + $0x28] sm:$0xff] %vm15793_vm5, %v6982_v18  ;;  %v6939_v45 = vmul.f32 %v10672_v24, %v14675_v52  ;;  %10681 = vrsqrt.f32 %v6914_v54 }
 0xcd0   : > { %6997 = vst.msk [vmem:[%s15121_s22 + $0x20] sm:$0xff] %vm15794_vm6, %v6981_v31  ;;  %v6962_v44 = vmul.f32 %v14736_v32, %v6940_v14  ;;  %10683 = vrsqrt.f32 %v6913_v20 }
 0xcd1   : > { %v10674_v22 = vpop.eup %10673  ;;  %v6961_v63 = vmul.f32 %v14736_v32, %v6939_v45 }
 0xcd2   : > { %v10676_v17 = vpop.eup %10675  ;;  %v6984_v0 = vadd.f32 %v14744_v19, %v6962_v44  ;;  %v6942_v49 = vmul.f32 %v10674_v22, %v14682_v25 }
 0xcd3   : > { %v6983_v51 = vadd.f32 %v14744_v19, %v6961_v63  ;;  %v6941_v52 = vmul.f32 %v10676_v17, %v14686_v46 }
 0xcd4   : > { %7000 = vst.msk [vmem:[%s15121_s22 + $0x38] sm:$0xff] %vm15795_vm7, %v6984_v0  ;;  %v6964_v21 = vmul.f32 %v14736_v32, %v6942_v49 }
 0xcd5   : > { %v10678_v30 = vpop.eup %10677  ;;  %6999 = vst.msk [vmem:[%s15121_s22 + $0x30] sm:$0xff] %vm15796_vm8, %v6983_v51  ;;  %v6963_v34 = vmul.f32 %v14736_v32, %v6941_v52 }
 0xcd6   : > { %v10680_v25 = vpop.eup %10679  ;;  %v6986_v61 = vadd.f32 %v14744_v19, %v6964_v21  ;;  %v6944_v46 = vmul.f32 %v10678_v30, %v14694_v42 }
 0xcd7   : > { %v6985_v53 = vadd.f32 %v14744_v19, %v6963_v34  ;;  %v6943_v55 = vmul.f32 %v10680_v25, %v14698_v8 }
 0xcd8   : > { %7002 = vst.msk [vmem:[%s15121_s22 + $0x48] sm:$0xff] %vm15797_vm9, %v6986_v61  ;;  %v6966_v56 = vmul.f32 %v14736_v32, %v6944_v46 }
 0xcd9   : > { %v10682_v11 = vpop.eup %10681  ;;  %7001 = vst.msk [vmem:[%s15121_s22 + $0x40] sm:$0xff] %vm15798_vm10, %v6985_v53  ;;  %v6965_v26 = vmul.f32 %v14736_v32, %v6943_v55 }
 0xcda   : > { %v10684_v42 = vpop.eup %10683  ;;  %v6988_v3 = vadd.f32 %v14744_v19, %v6966_v56  ;;  %v6946_v8 = vmul.f32 %v10682_v11, %v14706_v27 }
 0xcdb   : > { %v6987_v12 = vadd.f32 %v14744_v19, %v6965_v26  ;;  %v6945_v62 = vmul.f32 %v10684_v42, %v14710_v57 }
 0xcdc   : > { %7004 = vst.msk [vmem:[%s15121_s22 + $0x58] sm:$0xff] %vm15799_vm11, %v6988_v3  ;;  %v6968_v23 = vmul.f32 %v14736_v32, %v6946_v8 }
 0xcdd   : > { %7003 = vst.msk [vmem:[%s15121_s22 + $0x50] sm:$0xff] %vm15800_vm12, %v6987_v12  ;;  %v6967_v4 = vmul.f32 %v14736_v32, %v6945_v62 }
 0xcde   : > { %v6990_v27 = vadd.f32 %v14744_v19, %v6968_v23 }
 0xcdf   : > { %v6989_v6 = vadd.f32 %v14744_v19, %v6967_v4 }
 0xce0   : > { %7006 = vst.msk [vmem:[%s15121_s22 + $0x68] sm:$0xff] %vm15801_vm13, %v6990_v27 }
 0xce1   : > { %7005 = vst.msk [vmem:[%s15121_s22 + $0x60] sm:$0xff] %vm15802_vm14, %v6989_v6 }
 0xd10   : > { %v6884_v57 = vpop.xlane.xlu1 %6883 }
 0xd11   : > { %v6900_v2 = vmul.f32 0.0625, %v6884_v57  ;;  %v6881_v36 = vpop.xlane.xlu0 %6880 }
 0xd12   : > { %v6899_v1 = vmul.f32 0.0625, %v6881_v36 }
 0xd13   : > { %v6916_v41 = vadd.f32 1e-05, %v6900_v2 }
 0xd14   : > { %v6915_v9 = vadd.f32 1e-05, %v6899_v1 }
 0xd15   : > { %10685 = vrsqrt.f32 %v6916_v41 }
 0xd16   : > { %10687 = vrsqrt.f32 %v6915_v9 }
 0xd1f   : > { %v10686_v29 = vpop.eup %10685 }
 0xd20   : > { %v10688_v43 = vpop.eup %10687  ;;  %v6948_v37 = vmul.f32 %v10686_v29, %v14720_v5 }
 0xd21   : > { %v6947_v15 = vmul.f32 %v10688_v43, %v14723_v10 }
 0xd22   : > { %v6970_v38 = vmul.f32 %v14736_v32, %v6948_v37 }
 0xd23   : > { %v6969_v39 = vmul.f32 %v14736_v32, %v6947_v15 }
 0xd24   : > { %v6992_v60 = vadd.f32 %v14744_v19, %v6970_v38 }
 0xd25   : > { %v6991_v40 = vadd.f32 %v14744_v19, %v6969_v39 }
 0xd26   : > { %7008 = vst.msk [vmem:[%s15121_s22 + $0x78] sm:$0xff] %vm15803_vm15, %v6992_v60 }
 0xd27   : > { %7007 = vst.msk [vmem:[%s15121_s22 + $0x70] sm:$0xff] %vm15804_vm4, %v6991_v40 }
 0xd28 PF: > { %s15805_s27 = sld [smem:[#allocation2_spill]] }
 0xd2e   : > { %s28_s27 = sadd.s32 1, %s15805_s27  }
 0xd2f   : > { %p25_p5 = scmp.ge.s32.totalorder %s28_s27, 8  }
 0xd31   :  { %27 = sbr.rel (!%p25_p5) target bundleno = 14 (0xe), region = 167 }

</bundles_post_ra>
